<compile_context>
chip_gen: v7x
topology: tpu7x:2x2x1
jax: 0.10.0
libtpu: 0.0.40
codegen_flags: <defaults>
</compile_context>

<pallas_src>
import functools

import jax
import jax.numpy as jnp
from jax import lax
from jax.experimental import pallas as pl
from jax.experimental.pallas import tpu as pltpu

_MIB = 1024 * 1024
_VMEM_CAP = 48 * _MIB       # v7x-safe scoped-VMEM cap (64 MiB physical per TC)
_FUSED_BUDGET = 40 * _MIB   # use the fused single-launch path below this estimate
_HIGH = lax.Precision.HIGHEST


def _round_up(x, m):
    return (x + m - 1) // m * m


def _cparams(est_bytes, n_grid_axes=0):
    limit = int(min(_VMEM_CAP, max(32 * _MIB, 2 * est_bytes)))
    if n_grid_axes:
        return pltpu.CompilerParams(
            dimension_semantics=("parallel",) * n_grid_axes,
            vmem_limit_bytes=limit)
    return pltpu.CompilerParams(vmem_limit_bytes=limit)


def _fused_vmem_estimate(nbp, nap, Fb, Fa, H, mnb, mna):
    return 4 * (nbp * Fb + 2 * nbp * H + nbp * nbp        # fbonds, h0+msg, bond adj
                + nap * nbp + nap * Fa + nap * (Fa + H)    # atom adj, fatoms, concat
                + 2 * nap * H                              # nei_atom, out
                + Fb * H + H * H + (Fa + H) * H + H        # weights + bias
                + nbp * mnb + nap * mna)                   # int32 graphs


def _pick_bond_tile(nbp, H, max_nei, budget=_FUSED_BUDGET):
    # Largest row tile whose per-grid-step working set (incl. the ~3x factor for the
    # one-hot compare temporaries and default double-buffering) fits the budget.
    for t in (512, 256, 128, 64, 32, 16, 8):
        if t > nbp:
            continue
        est = 4 * (2 * nbp * H + 2 * H * H + 2 * t * max_nei
                   + 4 * t * H + 3 * t * nbp)
        if est <= budget:
            return t
    return 8


def _split_for_megacore(n_rows, tile):
    # Ensure >=2 grid steps when possible so both v7x TensorCores get work.
    if n_rows // tile == 1 and tile >= 16:
        tile = max(8, (tile // 2) // 8 * 8)
    return _round_up(n_rows, tile), tile


def _one_hot_rows(idx, n_cols, max_nei):
    """adj[i, j] = #{k : idx[i, k] == j} — exact small-integer counts in f32."""
    col = lax.broadcasted_iota(jnp.int32, (1, n_cols), 1)
    adj = jnp.zeros((idx.shape[0], n_cols), jnp.float32)
    for k in range(max_nei):
        adj = adj + (idx[:, k:k + 1] == col).astype(jnp.float32)
    return adj


# --------------------------------------------------------------------------- #
# Fused single-launch kernel (graph fits in VMEM)
# --------------------------------------------------------------------------- #

def _fused_kernel(fbonds_ref, bgraph_ref, fatoms_ref, agraph_ref,
                  wi_ref, wh_ref, wo_ref, bo_ref, out_ref,
                  *, depth, max_nei_b, max_nei_a):
    f32 = jnp.float32
    nbp = fbonds_ref.shape[0]

    # nei_input_h = fbonds @ W_i ; message = relu(nei_input_h)
    h0 = jnp.dot(fbonds_ref[...], wi_ref[...],
                 preferred_element_type=f32, precision=_HIGH)
    msg = jnp.maximum(h0, 0.0)

    # bond->bond adjacency: built once, reused across all depth steps.
    adj_b = _one_hot_rows(bgraph_ref[...], nbp, max_nei_b)

    # depth recurrence, fully VMEM resident (depth is small & static -> unrolled).
    w_h = wh_ref[...]
    for _ in range(depth - 1):
        nei = jnp.dot(adj_b, msg, preferred_element_type=f32, precision=_HIGH)
        nei = jnp.dot(nei, w_h, preferred_element_type=f32, precision=_HIGH)
        msg = jnp.maximum(h0 + nei, 0.0)

    # atom readout: one K=(Fa+H) matmul of concat([fatoms, nei_atom]) @ W_o + b_o.
    adj_a = _one_hot_rows(agraph_ref[...], nbp, max_nei_a)
    nei_atom = jnp.dot(adj_a, msg, preferred_element_type=f32, precision=_HIGH)
    atom_in = jnp.concatenate([fatoms_ref[...], nei_atom], axis=1)
    out_ref[...] = jnp.maximum(
        jnp.dot(atom_in, wo_ref[...], preferred_element_type=f32, precision=_HIGH)
        + bo_ref[...], 0.0)


# --------------------------------------------------------------------------- #
# Tiled fallback kernels (large graphs)
# --------------------------------------------------------------------------- #

def _bond_init_kernel(fbonds_ref, wi_ref, h0_ref, msg_ref):
    h0 = jnp.dot(fbonds_ref[...], wi_ref[...],
                 preferred_element_type=jnp.float32, precision=_HIGH)
    h0_ref[...] = h0
    msg_ref[...] = jnp.maximum(h0, 0.0)


def _message_step_kernel(bgraph_ref, msg_in_ref, h0_ref, wh_ref, msg_out_ref,
                         *, max_nei):
    # TODO(synk): adjacency is rebuilt every depth step here; reuse / K-chunk /
    #             gather once the large-graph path becomes the hot one.
    adj = _one_hot_rows(bgraph_ref[...], msg_in_ref.shape[0], max_nei)
    nei = jnp.dot(adj, msg_in_ref[...],
                  preferred_element_type=jnp.float32, precision=_HIGH)
    nei = jnp.dot(nei, wh_ref[...],
                  preferred_element_type=jnp.float32, precision=_HIGH)
    msg_out_ref[...] = jnp.maximum(h0_ref[...] + nei, 0.0)


def _atom_readout_kernel(agraph_ref, fatoms_ref, msg_ref, wo_ref, bo_ref, out_ref,
                         *, max_nei):
    adj = _one_hot_rows(agraph_ref[...], msg_ref.shape[0], max_nei)
    nei_atom = jnp.dot(adj, msg_ref[...],
                       preferred_element_type=jnp.float32, precision=_HIGH)
    atom_in = jnp.concatenate([fatoms_ref[...], nei_atom], axis=1)
    out_ref[...] = jnp.maximum(
        jnp.dot(atom_in, wo_ref[...],
                preferred_element_type=jnp.float32, precision=_HIGH)
        + bo_ref[...], 0.0)


# --------------------------------------------------------------------------- #
# Parameter preparation (done once at model setup, hoisted out of the forward)
# --------------------------------------------------------------------------- #

def prepare_params(w_i, w_h, w_o, b_o, *, n_atom_feats):
    """Zero-pad weights to lane-dense shapes and stack W_o for the fused readout.

    w_i: [n_atom_feats+n_bond_feats, hidden]   (transposed vs torch Linear weight)
    w_h: [hidden, hidden]
    w_o: [n_atom_feats+hidden, hidden]
    b_o: [hidden]
    """
    f32 = jnp.float32
    f_bond_in, hidden = w_i.shape
    Fb = _round_up(f_bond_in, 128)
    Fa = _round_up(n_atom_feats, 128)
    H = _round_up(hidden, 128)

    wi_p = jnp.zeros((Fb, H), f32).at[:f_bond_in, :hidden].set(w_i)
    wh_p = jnp.zeros((H, H), f32).at[:hidden, :hidden].set(w_h)
    wo_p = jnp.zeros((Fa + H, H), f32)
    wo_p = wo_p.at[:n_atom_feats, :hidden].set(w_o[:n_atom_feats])
    wo_p = wo_p.at[Fa:Fa + hidden, :hidden].set(w_o[n_atom_feats:])
    bo_p = jnp.zeros((1, H), f32).at[0, :hidden].set(b_o)
    return wi_p, wh_p, wo_p, bo_p


# --------------------------------------------------------------------------- #
# Forward paths
# --------------------------------------------------------------------------- #

def _forward_fused(fatoms, fbonds, agraph, bgraph, wi_p, wh_p, wo_p, bo_p,
                   *, depth, hidden):
    f32 = jnp.float32
    n_atoms, n_atom_feats = fatoms.shape
    n_bonds, f_bond_in = fbonds.shape
    Fb, H = wi_p.shape
    Fa = wo_p.shape[0] - H
    mnb, mna = bgraph.shape[1], agraph.shape[1]

    nbp = _round_up(n_bonds, 128)   # lane-dense adjacency columns / matmul K dim
    nap = _round_up(n_atoms, 8)

    fbonds_p = jnp.zeros((nbp, Fb), f32).at[:n_bonds, :f_bond_in].set(fbonds)
    fatoms_p = jnp.zeros((nap, Fa), f32).at[:n_atoms, :n_atom_feats].set(fatoms)
    # -1 sentinel on padded rows never matches an adjacency column -> zero rows.
    bgraph_p = jnp.full((nbp, mnb), -1, jnp.int32).at[:n_bonds].set(
        bgraph.astype(jnp.int32))
    agraph_p = jnp.full((nap, mna), -1, jnp.int32).at[:n_atoms].set(
        agraph.astype(jnp.int32))

    est = _fused_vmem_estimate(nbp, nap, Fb, Fa, H, mnb, mna)
    out = pl.pallas_call(
        functools.partial(_fused_kernel, depth=depth,
                          max_nei_b=mnb, max_nei_a=mna),
        out_shape=jax.ShapeDtypeStruct((nap, H), f32),
        compiler_params=_cparams(est),
    )(fbonds_p, bgraph_p, fatoms_p, agraph_p, wi_p, wh_p, wo_p, bo_p)
    return out[:n_atoms, :hidden]


def _forward_tiled(fatoms, fbonds, agraph, bgraph, wi_p, wh_p, wo_p, bo_p,
                   *, depth, hidden):
    f32 = jnp.float32
    n_atoms, n_atom_feats = fatoms.shape
    n_bonds, f_bond_in = fbonds.shape
    Fb, H = wi_p.shape
    Fa = wo_p.shape[0] - H
    mnb, mna = bgraph.shape[1], agraph.shape[1]

    nbp = _round_up(n_bonds, 128)
    tile_b = _pick_bond_tile(nbp, H, mnb)
    nbp, tile_b = _split_for_megacore(nbp, tile_b)
    n_bt = nbp // tile_b

    nap = _round_up(n_atoms, 8)
    tile_a = min(tile_b, nap)
    nap, tile_a = _split_for_megacore(nap, tile_a)
    n_at = nap // tile_a

    fbonds_p = jnp.zeros((nbp, Fb), f32).at[:n_bonds, :f_bond_in].set(fbonds)
    fatoms_p = jnp.zeros((nap, Fa), f32).at[:n_atoms, :n_atom_feats].set(fatoms)
    bgraph_p = jnp.full((nbp, mnb), -1, jnp.int32).at[:n_bonds].set(
        bgraph.astype(jnp.int32))
    agraph_p = jnp.full((nap, mna), -1, jnp.int32).at[:n_atoms].set(
        agraph.astype(jnp.int32))

    # kernel 1: nei_input_h = fbonds @ W_i ; message = relu(.)
    est1 = 4 * (2 * tile_b * Fb + 2 * Fb * H + 4 * tile_b * H)
    h0, msg = pl.pallas_call(
        _bond_init_kernel,
        out_shape=(jax.ShapeDtypeStruct((nbp, H), f32),
                   jax.ShapeDtypeStruct((nbp, H), f32)),
        grid=(n_bt,),
        in_specs=[pl.BlockSpec((tile_b, Fb), lambda i: (i, 0)),
                  pl.BlockSpec((Fb, H), lambda i: (0, 0))],
        out_specs=(pl.BlockSpec((tile_b, H), lambda i: (i, 0)),
                   pl.BlockSpec((tile_b, H), lambda i: (i, 0))),
        compiler_params=_cparams(est1, 1),
    )(fbonds_p, wi_p)

    # kernel 2: one globally-synchronized message-passing depth step.
    # TODO(synk): pl.Buffered(1) on the grid-invariant (nbp, H) message / W_h blocks.
    est2 = 4 * (2 * nbp * H + 2 * H * H + 2 * tile_b * mnb
                + 4 * tile_b * H + 3 * tile_b * nbp)
    step_call = pl.pallas_call(
        functools.partial(_message_step_kernel, max_nei=mnb),
        out_shape=jax.ShapeDtypeStruct((nbp, H), f32),
        grid=(n_bt,),
        in_specs=[pl.BlockSpec((tile_b, mnb), lambda i: (i, 0)),   # bgraph tile
                  pl.BlockSpec((nbp, H), lambda i: (0, 0)),        # full message
                  pl.BlockSpec((tile_b, H), lambda i: (i, 0)),     # nei_input tile
                  pl.BlockSpec((H, H), lambda i: (0, 0))],         # W_h
        out_specs=pl.BlockSpec((tile_b, H), lambda i: (i, 0)),
        compiler_params=_cparams(est2, 1),
    )
    for _ in range(depth - 1):
        msg = step_call(bgraph_p, msg, h0, wh_p)

    # kernel 3: atom aggregation + fused K=(Fa+H) readout matmul + bias + relu.
    est3 = 4 * (2 * nbp * H + 2 * (Fa + H) * H + 2 * H
                + 2 * tile_a * (mna + Fa + 2 * H) + 3 * tile_a * nbp)
    out = pl.pallas_call(
        functools.partial(_atom_readout_kernel, max_nei=mna),
        out_shape=jax.ShapeDtypeStruct((nap, H), f32),
        grid=(n_at,),
        in_specs=[pl.BlockSpec((tile_a, mna), lambda i: (i, 0)),   # agraph tile
                  pl.BlockSpec((tile_a, Fa), lambda i: (i, 0)),    # fatoms tile
                  pl.BlockSpec((nbp, H), lambda i: (0, 0)),        # full message
                  pl.BlockSpec((Fa + H, H), lambda i: (0, 0)),     # stacked W_o
                  pl.BlockSpec((1, H), lambda i: (0, 0))],         # b_o
        out_specs=pl.BlockSpec((tile_a, H), lambda i: (i, 0)),
        compiler_params=_cparams(est3, 1),
    )(agraph_p, fatoms_p, msg, wo_p, bo_p)

    return out[:n_atoms, :hidden]


@functools.partial(jax.jit, static_argnames=("depth", "hidden", "impl"))
def graph_conv(fatoms, fbonds, agraph, bgraph, wi_p, wh_p, wo_p, bo_p,
               *, depth, hidden, impl="auto"):
    """Pallas GraphConv forward (eval mode).

    Weights must come from prepare_params (padded / stacked, (in, out) layout).
    agraph/bgraph entries must be valid bond indices in [0, n_bonds) (padding with
    bond 0 matches the torch gather+sum semantics); out-of-range sentinels would
    silently contribute zero in the one-hot path while the torch gather would error.
    """
    if impl == "auto":
        Fb, H = wi_p.shape
        Fa = wo_p.shape[0] - H
        nbp = _round_up(fbonds.shape[0], 128)
        nap = _round_up(fatoms.shape[0], 8)
        est = _fused_vmem_estimate(nbp, nap, Fb, Fa, H,
                                   bgraph.shape[1], agraph.shape[1])
        impl = "fused" if est <= _FUSED_BUDGET else "tiled"
    fwd = _forward_fused if impl == "fused" else _forward_tiled
    return fwd(fatoms, fbonds, agraph, bgraph, wi_p, wh_p, wo_p, bo_p,
               depth=depth, hidden=hidden)


# --------------------------------------------------------------------------- #
# Plain-JAX reference (mirrors the PyTorch forward exactly, eval mode, f32)
# --------------------------------------------------------------------------- #

def graph_conv_ref(fatoms, fbonds, agraph, bgraph, w_i, w_h, w_o, b_o, *, depth):
    hidden = w_i.shape[1]
    nei_input_h = fbonds @ w_i
    message_h = jnp.maximum(nei_input_h, 0.0)
    for _ in range(depth - 1):
        nei = message_h[bgraph.reshape(-1)].reshape(bgraph.shape + (hidden,)).sum(axis=1)
        nei = nei @ w_h
        message_h = jnp.maximum(nei_input_h + nei, 0.0)
    nei = message_h[agraph.reshape(-1)].reshape(agraph.shape + (hidden,)).sum(axis=1)
    atom_input = jnp.concatenate([fatoms, nei], axis=1)
    return jnp.maximum(atom_input @ w_o + b_o, 0.0)


if __name__ == "__main__":
    # Small synthetic shapes consistent with the module's forward.
    n_atoms = 16
    n_bonds = 32
    max_nei = 8
    n_atom_feats = 16
    n_bond_feats = 16
    hidden = 32
    depth = 3

    key = jax.random.PRNGKey(0)
    k1, k2, k3, k4, k5, k6, k7, k8 = jax.random.split(key, 8)

    fatoms = jax.random.normal(k1, (n_atoms, n_atom_feats), jnp.float32)
    fbonds = jax.random.normal(k2, (n_bonds, n_atom_feats + n_bond_feats), jnp.float32)
    agraph = jax.random.randint(k3, (n_atoms, max_nei), 0, n_bonds, dtype=jnp.int32)
    bgraph = jax.random.randint(k4, (n_bonds, max_nei), 0, n_bonds, dtype=jnp.int32)

    # Deterministic parameter init (synthetic; (in, out) layout, no checkpoint load).
    w_i = 0.1 * jax.random.normal(k5, (n_atom_feats + n_bond_feats, hidden), jnp.float32)
    w_h = 0.1 * jax.random.normal(k6, (hidden, hidden), jnp.float32)
    w_o = 0.1 * jax.random.normal(k7, (n_atom_feats + hidden, hidden), jnp.float32)
    b_o = 0.1 * jax.random.normal(k8, (hidden,), jnp.float32)

    params = prepare_params(w_i, w_h, w_o, b_o, n_atom_feats=n_atom_feats)

    # Primary path ("auto" -> fused single-launch kernel at this size).
    out = graph_conv(fatoms, fbonds, agraph, bgraph, *params,
                     depth=depth, hidden=hidden)
    out = jax.block_until_ready(out)

    # Also exercise the tiled large-graph fallback path.
    out_tiled = graph_conv(fatoms, fbonds, agraph, bgraph, *params,
                           depth=depth, hidden=hidden, impl="tiled")
    out_tiled = jax.block_until_ready(out_tiled)

    ref = graph_conv_ref(fatoms, fbonds, agraph, bgraph, w_i, w_h, w_o, b_o,
                         depth=depth)

    assert out.shape == (n_atoms, hidden)
    assert out_tiled.shape == (n_atoms, hidden)
    assert jnp.allclose(out, ref, rtol=2e-3, atol=2e-3), "fused path mismatch vs reference"
    assert jnp.allclose(out_tiled, ref, rtol=2e-3, atol=2e-3), "tiled path mismatch vs reference"

    print("KERNEL_OK")
</pallas_src>

<mosaic_0001>
module attributes {stable_mosaic.version = 11 : i64} {
  func.func @_fused_kernel(%arg0: memref<128x128xf32, #tpu.memory_space<vmem>>, %arg1: memref<128x8xi32, #tpu.memory_space<vmem>>, %arg2: memref<16x128xf32, #tpu.memory_space<vmem>>, %arg3: memref<16x8xi32, #tpu.memory_space<vmem>>, %arg4: memref<128x128xf32, #tpu.memory_space<vmem>>, %arg5: memref<128x128xf32, #tpu.memory_space<vmem>>, %arg6: memref<256x128xf32, #tpu.memory_space<vmem>>, %arg7: memref<1x128xf32, #tpu.memory_space<vmem>>, %arg8: memref<16x128xf32, #tpu.memory_space<vmem>>) attributes {dimension_semantics = [], scalar_prefetch = 0 : i64, scratch_operands = 0 : i64, tpu.core_type = #tpu.core_type<tc>} {
    %c0 = arith.constant 0 : index
    %c0_0 = arith.constant 0 : index
    %0 = vector.load %arg0[%c0, %c0_0] : memref<128x128xf32, #tpu.memory_space<vmem>>, vector<128x128xf32>
    %c0_1 = arith.constant 0 : index
    %c0_2 = arith.constant 0 : index
    %1 = vector.load %arg4[%c0_1, %c0_2] : memref<128x128xf32, #tpu.memory_space<vmem>>, vector<128x128xf32>
    %cst = arith.constant dense<0.000000e+00> : vector<128x128xf32>
    %2 = tpu.matmul %0, %1, %cst {dimension_numbers = #tpu.dot_dimension_numbers<[1], [0], [0], [1], [0, 0, 1, 1], [], []>, precision = #tpu.contract_precision<fp32>} : vector<128x128xf32>, vector<128x128xf32>, vector<128x128xf32> -> vector<128x128xf32>
    %cst_3 = arith.constant 0.000000e+00 : f32
    %3 = vector.broadcast %cst_3 : f32 to vector<128x128xf32>
    %4 = arith.maximumf %2, %3 : vector<128x128xf32>
    %c0_4 = arith.constant 0 : index
    %c0_5 = arith.constant 0 : index
    %5 = vector.load %arg1[%c0_4, %c0_5] : memref<128x8xi32, #tpu.memory_space<vmem>>, vector<128x8xi32>
    %6 = tpu.iota {dimensions = array<i32: 1>} : vector<1x128xi32>
    %cst_6 = arith.constant 0.000000e+00 : f32
    %7 = vector.broadcast %cst_6 : f32 to vector<128x128xf32>
    %8 = vector.extract_strided_slice %5 {offsets = [0, 0], sizes = [128, 1], strides = [1, 1]} : vector<128x8xi32> to vector<128x1xi32>
    %9 = vector.broadcast %8 : vector<128x1xi32> to vector<128x128xi32>
    %10 = vector.broadcast %6 : vector<1x128xi32> to vector<128x128xi32>
    %11 = arith.cmpi eq, %9, %10 : vector<128x128xi32>
    %12 = arith.extui %11 : vector<128x128xi1> to vector<128x128xi32>
    %13 = arith.sitofp %12 : vector<128x128xi32> to vector<128x128xf32>
    %14 = arith.addf %7, %13 : vector<128x128xf32>
    %15 = vector.extract_strided_slice %5 {offsets = [0, 1], sizes = [128, 1], strides = [1, 1]} : vector<128x8xi32> to vector<128x1xi32>
    %16 = vector.broadcast %15 : vector<128x1xi32> to vector<128x128xi32>
    %17 = vector.broadcast %6 : vector<1x128xi32> to vector<128x128xi32>
    %18 = arith.cmpi eq, %16, %17 : vector<128x128xi32>
    %19 = arith.extui %18 : vector<128x128xi1> to vector<128x128xi32>
    %20 = arith.sitofp %19 : vector<128x128xi32> to vector<128x128xf32>
    %21 = arith.addf %14, %20 : vector<128x128xf32>
    %22 = vector.extract_strided_slice %5 {offsets = [0, 2], sizes = [128, 1], strides = [1, 1]} : vector<128x8xi32> to vector<128x1xi32>
    %23 = vector.broadcast %22 : vector<128x1xi32> to vector<128x128xi32>
    %24 = vector.broadcast %6 : vector<1x128xi32> to vector<128x128xi32>
    %25 = arith.cmpi eq, %23, %24 : vector<128x128xi32>
    %26 = arith.extui %25 : vector<128x128xi1> to vector<128x128xi32>
    %27 = arith.sitofp %26 : vector<128x128xi32> to vector<128x128xf32>
    %28 = arith.addf %21, %27 : vector<128x128xf32>
    %29 = vector.extract_strided_slice %5 {offsets = [0, 3], sizes = [128, 1], strides = [1, 1]} : vector<128x8xi32> to vector<128x1xi32>
    %30 = vector.broadcast %29 : vector<128x1xi32> to vector<128x128xi32>
    %31 = vector.broadcast %6 : vector<1x128xi32> to vector<128x128xi32>
    %32 = arith.cmpi eq, %30, %31 : vector<128x128xi32>
    %33 = arith.extui %32 : vector<128x128xi1> to vector<128x128xi32>
    %34 = arith.sitofp %33 : vector<128x128xi32> to vector<128x128xf32>
    %35 = arith.addf %28, %34 : vector<128x128xf32>
    %36 = vector.extract_strided_slice %5 {offsets = [0, 4], sizes = [128, 1], strides = [1, 1]} : vector<128x8xi32> to vector<128x1xi32>
    %37 = vector.broadcast %36 : vector<128x1xi32> to vector<128x128xi32>
    %38 = vector.broadcast %6 : vector<1x128xi32> to vector<128x128xi32>
    %39 = arith.cmpi eq, %37, %38 : vector<128x128xi32>
    %40 = arith.extui %39 : vector<128x128xi1> to vector<128x128xi32>
    %41 = arith.sitofp %40 : vector<128x128xi32> to vector<128x128xf32>
    %42 = arith.addf %35, %41 : vector<128x128xf32>
    %43 = vector.extract_strided_slice %5 {offsets = [0, 5], sizes = [128, 1], strides = [1, 1]} : vector<128x8xi32> to vector<128x1xi32>
    %44 = vector.broadcast %43 : vector<128x1xi32> to vector<128x128xi32>
    %45 = vector.broadcast %6 : vector<1x128xi32> to vector<128x128xi32>
    %46 = arith.cmpi eq, %44, %45 : vector<128x128xi32>
    %47 = arith.extui %46 : vector<128x128xi1> to vector<128x128xi32>
    %48 = arith.sitofp %47 : vector<128x128xi32> to vector<128x128xf32>
    %49 = arith.addf %42, %48 : vector<128x128xf32>
    %50 = vector.extract_strided_slice %5 {offsets = [0, 6], sizes = [128, 1], strides = [1, 1]} : vector<128x8xi32> to vector<128x1xi32>
    %51 = vector.broadcast %50 : vector<128x1xi32> to vector<128x128xi32>
    %52 = vector.broadcast %6 : vector<1x128xi32> to vector<128x128xi32>
    %53 = arith.cmpi eq, %51, %52 : vector<128x128xi32>
    %54 = arith.extui %53 : vector<128x128xi1> to vector<128x128xi32>
    %55 = arith.sitofp %54 : vector<128x128xi32> to vector<128x128xf32>
    %56 = arith.addf %49, %55 : vector<128x128xf32>
    %57 = vector.extract_strided_slice %5 {offsets = [0, 7], sizes = [128, 1], strides = [1, 1]} : vector<128x8xi32> to vector<128x1xi32>
    %58 = vector.broadcast %57 : vector<128x1xi32> to vector<128x128xi32>
    %59 = vector.broadcast %6 : vector<1x128xi32> to vector<128x128xi32>
    %60 = arith.cmpi eq, %58, %59 : vector<128x128xi32>
    %61 = arith.extui %60 : vector<128x128xi1> to vector<128x128xi32>
    %62 = arith.sitofp %61 : vector<128x128xi32> to vector<128x128xf32>
    %63 = arith.addf %56, %62 : vector<128x128xf32>
    %c0_7 = arith.constant 0 : index
    %c0_8 = arith.constant 0 : index
    %64 = vector.load %arg5[%c0_7, %c0_8] : memref<128x128xf32, #tpu.memory_space<vmem>>, vector<128x128xf32>
    %cst_9 = arith.constant dense<0.000000e+00> : vector<128x128xf32>
    %65 = tpu.matmul %63, %4, %cst_9 {dimension_numbers = #tpu.dot_dimension_numbers<[1], [0], [0], [1], [0, 0, 1, 1], [], []>, precision = #tpu.contract_precision<fp32>} : vector<128x128xf32>, vector<128x128xf32>, vector<128x128xf32> -> vector<128x128xf32>
    %cst_10 = arith.constant dense<0.000000e+00> : vector<128x128xf32>
    %66 = tpu.matmul %65, %64, %cst_10 {dimension_numbers = #tpu.dot_dimension_numbers<[1], [0], [0], [1], [0, 0, 1, 1], [], []>, precision = #tpu.contract_precision<fp32>} : vector<128x128xf32>, vector<128x128xf32>, vector<128x128xf32> -> vector<128x128xf32>
    %67 = arith.addf %2, %66 : vector<128x128xf32>
    %cst_11 = arith.constant 0.000000e+00 : f32
    %68 = vector.broadcast %cst_11 : f32 to vector<128x128xf32>
    %69 = arith.maximumf %67, %68 : vector<128x128xf32>
    %cst_12 = arith.constant dense<0.000000e+00> : vector<128x128xf32>
    %70 = tpu.matmul %63, %69, %cst_12 {dimension_numbers = #tpu.dot_dimension_numbers<[1], [0], [0], [1], [0, 0, 1, 1], [], []>, precision = #tpu.contract_precision<fp32>} : vector<128x128xf32>, vector<128x128xf32>, vector<128x128xf32> -> vector<128x128xf32>
    %cst_13 = arith.constant dense<0.000000e+00> : vector<128x128xf32>
    %71 = tpu.matmul %70, %64, %cst_13 {dimension_numbers = #tpu.dot_dimension_numbers<[1], [0], [0], [1], [0, 0, 1, 1], [], []>, precision = #tpu.contract_precision<fp32>} : vector<128x128xf32>, vector<128x128xf32>, vector<128x128xf32> -> vector<128x128xf32>
    %72 = arith.addf %2, %71 : vector<128x128xf32>
    %cst_14 = arith.constant 0.000000e+00 : f32
    %73 = vector.broadcast %cst_14 : f32 to vector<128x128xf32>
    %74 = arith.maximumf %72, %73 : vector<128x128xf32>
    %c0_15 = arith.constant 0 : index
    %c0_16 = arith.constant 0 : index
    %75 = vector.load %arg3[%c0_15, %c0_16] : memref<16x8xi32, #tpu.memory_space<vmem>>, vector<16x8xi32>
    %76 = tpu.iota {dimensions = array<i32: 1>} : vector<1x128xi32>
    %cst_17 = arith.constant 0.000000e+00 : f32
    %77 = vector.broadcast %cst_17 : f32 to vector<16x128xf32>
    %78 = vector.extract_strided_slice %75 {offsets = [0, 0], sizes = [16, 1], strides = [1, 1]} : vector<16x8xi32> to vector<16x1xi32>
    %79 = vector.broadcast %78 : vector<16x1xi32> to vector<16x128xi32>
    %80 = vector.broadcast %76 : vector<1x128xi32> to vector<16x128xi32>
    %81 = arith.cmpi eq, %79, %80 : vector<16x128xi32>
    %82 = arith.extui %81 : vector<16x128xi1> to vector<16x128xi32>
    %83 = arith.sitofp %82 : vector<16x128xi32> to vector<16x128xf32>
    %84 = arith.addf %77, %83 : vector<16x128xf32>
    %85 = vector.extract_strided_slice %75 {offsets = [0, 1], sizes = [16, 1], strides = [1, 1]} : vector<16x8xi32> to vector<16x1xi32>
    %86 = vector.broadcast %85 : vector<16x1xi32> to vector<16x128xi32>
    %87 = vector.broadcast %76 : vector<1x128xi32> to vector<16x128xi32>
    %88 = arith.cmpi eq, %86, %87 : vector<16x128xi32>
    %89 = arith.extui %88 : vector<16x128xi1> to vector<16x128xi32>
    %90 = arith.sitofp %89 : vector<16x128xi32> to vector<16x128xf32>
    %91 = arith.addf %84, %90 : vector<16x128xf32>
    %92 = vector.extract_strided_slice %75 {offsets = [0, 2], sizes = [16, 1], strides = [1, 1]} : vector<16x8xi32> to vector<16x1xi32>
    %93 = vector.broadcast %92 : vector<16x1xi32> to vector<16x128xi32>
    %94 = vector.broadcast %76 : vector<1x128xi32> to vector<16x128xi32>
    %95 = arith.cmpi eq, %93, %94 : vector<16x128xi32>
    %96 = arith.extui %95 : vector<16x128xi1> to vector<16x128xi32>
    %97 = arith.sitofp %96 : vector<16x128xi32> to vector<16x128xf32>
    %98 = arith.addf %91, %97 : vector<16x128xf32>
    %99 = vector.extract_strided_slice %75 {offsets = [0, 3], sizes = [16, 1], strides = [1, 1]} : vector<16x8xi32> to vector<16x1xi32>
    %100 = vector.broadcast %99 : vector<16x1xi32> to vector<16x128xi32>
    %101 = vector.broadcast %76 : vector<1x128xi32> to vector<16x128xi32>
    %102 = arith.cmpi eq, %100, %101 : vector<16x128xi32>
    %103 = arith.extui %102 : vector<16x128xi1> to vector<16x128xi32>
    %104 = arith.sitofp %103 : vector<16x128xi32> to vector<16x128xf32>
    %105 = arith.addf %98, %104 : vector<16x128xf32>
    %106 = vector.extract_strided_slice %75 {offsets = [0, 4], sizes = [16, 1], strides = [1, 1]} : vector<16x8xi32> to vector<16x1xi32>
    %107 = vector.broadcast %106 : vector<16x1xi32> to vector<16x128xi32>
    %108 = vector.broadcast %76 : vector<1x128xi32> to vector<16x128xi32>
    %109 = arith.cmpi eq, %107, %108 : vector<16x128xi32>
    %110 = arith.extui %109 : vector<16x128xi1> to vector<16x128xi32>
    %111 = arith.sitofp %110 : vector<16x128xi32> to vector<16x128xf32>
    %112 = arith.addf %105, %111 : vector<16x128xf32>
    %113 = vector.extract_strided_slice %75 {offsets = [0, 5], sizes = [16, 1], strides = [1, 1]} : vector<16x8xi32> to vector<16x1xi32>
    %114 = vector.broadcast %113 : vector<16x1xi32> to vector<16x128xi32>
    %115 = vector.broadcast %76 : vector<1x128xi32> to vector<16x128xi32>
    %116 = arith.cmpi eq, %114, %115 : vector<16x128xi32>
    %117 = arith.extui %116 : vector<16x128xi1> to vector<16x128xi32>
    %118 = arith.sitofp %117 : vector<16x128xi32> to vector<16x128xf32>
    %119 = arith.addf %112, %118 : vector<16x128xf32>
    %120 = vector.extract_strided_slice %75 {offsets = [0, 6], sizes = [16, 1], strides = [1, 1]} : vector<16x8xi32> to vector<16x1xi32>
    %121 = vector.broadcast %120 : vector<16x1xi32> to vector<16x128xi32>
    %122 = vector.broadcast %76 : vector<1x128xi32> to vector<16x128xi32>
    %123 = arith.cmpi eq, %121, %122 : vector<16x128xi32>
    %124 = arith.extui %123 : vector<16x128xi1> to vector<16x128xi32>
    %125 = arith.sitofp %124 : vector<16x128xi32> to vector<16x128xf32>
    %126 = arith.addf %119, %125 : vector<16x128xf32>
    %127 = vector.extract_strided_slice %75 {offsets = [0, 7], sizes = [16, 1], strides = [1, 1]} : vector<16x8xi32> to vector<16x1xi32>
    %128 = vector.broadcast %127 : vector<16x1xi32> to vector<16x128xi32>
    %129 = vector.broadcast %76 : vector<1x128xi32> to vector<16x128xi32>
    %130 = arith.cmpi eq, %128, %129 : vector<16x128xi32>
    %131 = arith.extui %130 : vector<16x128xi1> to vector<16x128xi32>
    %132 = arith.sitofp %131 : vector<16x128xi32> to vector<16x128xf32>
    %133 = arith.addf %126, %132 : vector<16x128xf32>
    %cst_18 = arith.constant dense<0.000000e+00> : vector<16x128xf32>
    %134 = tpu.matmul %133, %74, %cst_18 {dimension_numbers = #tpu.dot_dimension_numbers<[1], [0], [0], [1], [0, 0, 1, 1], [], []>, precision = #tpu.contract_precision<fp32>} : vector<16x128xf32>, vector<128x128xf32>, vector<16x128xf32> -> vector<16x128xf32>
    %c0_19 = arith.constant 0 : index
    %c0_20 = arith.constant 0 : index
    %135 = vector.load %arg2[%c0_19, %c0_20] : memref<16x128xf32, #tpu.memory_space<vmem>>, vector<16x128xf32>
    %136 = tpu.concatenate %135, %134 in 1 : vector<16x128xf32>, vector<16x128xf32> -> vector<16x256xf32>
    %c0_21 = arith.constant 0 : index
    %c0_22 = arith.constant 0 : index
    %137 = vector.load %arg6[%c0_21, %c0_22] : memref<256x128xf32, #tpu.memory_space<vmem>>, vector<256x128xf32>
    %cst_23 = arith.constant dense<0.000000e+00> : vector<16x128xf32>
    %138 = tpu.matmul %136, %137, %cst_23 {dimension_numbers = #tpu.dot_dimension_numbers<[1], [0], [0], [1], [0, 0, 1, 1], [], []>, precision = #tpu.contract_precision<fp32>} : vector<16x256xf32>, vector<256x128xf32>, vector<16x128xf32> -> vector<16x128xf32>
    %c0_24 = arith.constant 0 : index
    %c0_25 = arith.constant 0 : index
    %139 = vector.load %arg7[%c0_24, %c0_25] : memref<1x128xf32, #tpu.memory_space<vmem>>, vector<1x128xf32>
    %140 = vector.broadcast %139 : vector<1x128xf32> to vector<16x128xf32>
    %141 = arith.addf %138, %140 : vector<16x128xf32>
    %cst_26 = arith.constant 0.000000e+00 : f32
    %142 = vector.broadcast %cst_26 : f32 to vector<16x128xf32>
    %143 = arith.maximumf %141, %142 : vector<16x128xf32>
    %c0_27 = arith.constant 0 : index
    %c0_28 = arith.constant 0 : index
    %144 = vector.load %arg8[%c0_27, %c0_28] : memref<16x128xf32, #tpu.memory_space<vmem>>, vector<16x128xf32>
    tpu.vector_store %arg8[%c0_27, %c0_28], %143 {strides = array<i32>} : memref<16x128xf32, #tpu.memory_space<vmem>>, vector<16x128xf32>,
    return
  }
}

</mosaic_0001>

<bundles_post_ra>
// kernel: graph_conv.1
= control target key start
LH: loop header
LB: loop body
LE: loop exit
PB: predicated region body
PF: predicated region fallthrough
CT: control target
= control target key end

     0   :  { %13 = vsyncpa [#allocation3], 0  ;;  %s19106_s0 = inlined_call_operand.vmem [shape: f32[128,128], index: 0, kind: input, shape index: {}]   ;;  %s19107_s1 = inlined_call_operand.vmem [shape: s32[128,8], index: 1, kind: input, shape index: {}]   ;;  %s19108_s2 = inlined_call_operand.vmem [shape: f32[16,128], index: 2, kind: input, shape index: {}]   ;;  %s19109_s3 = inlined_call_operand.vmem [shape: s32[16,8], index: 3, kind: input, shape index: {}]   ;;  %s19110_s4 = inlined_call_operand.vmem [shape: f32[128,128], index: 4, kind: input, shape index: {}]   ;;  %s19111_s5 = inlined_call_operand.hbm [shape: f32[128,128], index: 5, kind: input, shape index: {}]   ;;  %s19112_s6 = inlined_call_operand.vmem [shape: f32[256,128], index: 6, kind: input, shape index: {}]   ;;  %s19113_s7 = inlined_call_operand.vmem [shape: f32[1,128], index: 7, kind: input, shape index: {}]   ;;  %s19114_s8 = inlined_call_operand.hbm [shape: f32[16,128], index: 8, kind: output, shape index: {}]  }
   0x1   :  { %14 = vsyncpa [#allocation4], 0  ;;  %s14551_s27 = smov [#allocation2]   ;;  %s14503_s9 = scalar_lea.hbm %s19111_s5, 2048 }
   0x2   :  { %s30_s28 = sshll.u32 %s14551_s27, 4  ;;  %p14504_p0 = scmp.ne.s32.totalorder %s19111_s5, %s14503_s9  ;;  %s31_s28 = int_to_ptr.vmem [resolvable:$true] %s30_s28 }
   0x3   :  { %p14507_p1 = scmp.lt.u32.totalorder %s14503_s9, %s19111_s5 }
   0x5   :  { %p14509_p2 = pnand %p14507_p1, %p14504_p0 }
   0x7   :  { %14512 = shalt.err (!%p14509_p2)
}
   0x8   :  { %s14513_s14 = scalar_lea.vmem %s31_s28, 2048  ;;  %p14518_p4 = scmp.lt.s32.totalorder %s31_s28, %s31_s28 }
   0x9   :  { %p14514_p3 = scmp.ne.s32.totalorder %s31_s28, %s14513_s14  ;;  %p14519_p5 = scmp.lt.s32.totalorder %s14513_s14, %s14513_s14 }
   0xb   :  { %p14520_p6 = por %p14519_p5, %p14518_p4 }
   0xd   :  { %p14521_p7 = pnand %p14520_p6, %p14514_p3 }
   0xf   :  { %14524 = shalt.err (!%p14521_p7)
}
  0x10   :  { %s14552_s15 = smov 128   ;;  %s14553_s16 = smov 8  }
  0x11   :  { %36 = dma.hbm_to_vmem [thread:$0]  %s19111_s5, 2048, %s31_s28, [#allocation3], %s14552_s15, %s14552_s15, %s14553_s16  }
  0x12   :  { %14547 = dma.done.wait [#allocation3], 2048  }
  0x13   :  { %14548 = vsyncadd [#allocation3], 4294965248  ;;  %v19116_v0 = vmov 4   ;;  %v19132_v1 = vmov 0   ;;  %v14629_v2 = vld [vmem:[%s19107_s1 + $0x8] sm:$0xff]  ;;  %v14634_v3 = vld [vmem:[%s19107_s1] sm:$0xff] }
  0x14   :  { %14400 = vset.pattern.permute.xlu0 %v19116_v0  ;;  %14392 = vset.pattern.permute.xlu1 %v19132_v1  ;;  %v60_v4 = vld [vmem:[%s19110_s4] sm:$0xff]  ;;  %v61_v5 = vld [vmem:[%s19110_s4 + $0x8] sm:$0xff]  ;;  %v14647_v6 = vld [vmem:[%s19107_s1 + $0x10] sm:$0xff]  ;;  %v19137_v18 = vmov 1   ;;  %v19123_v31 = vmov 2  }
  0x15   :  { %1400 = vperm.xlu1 %14392, %v14629_v2   ;;  %1845 = vperm.xlu0 %14400, %v14634_v3   ;;  %v77_v7 = vand.u32 4294901760, %v60_v4  ;;  %v80_v8 = vand.u32 4294901760, %v61_v5  ;;  %v62_v9 = vld [vmem:[%s19110_s4 + $0x10] sm:$0xff]  ;;  %v63_v10 = vld [vmem:[%s19110_s4 + $0x18] sm:$0xff]  ;;  %v14658_v13 = vld [vmem:[%s19110_s4 + $0x20] sm:$0xff] }
  0x16   :  { %v83_v11 = vand.u32 4294901760, %v62_v9  ;;  %v86_v12 = vand.u32 4294901760, %v63_v10  ;;  %v14663_v14 = vld [vmem:[%s19110_s4 + $0x28] sm:$0xff]  ;;  %v89_v16 = vand.u32 4294901760, %v14658_v13  ;;  %v14676_v20 = vld [vmem:[%s19110_s4 + $0x30] sm:$0xff]  ;;  %v14681_v21 = vld [vmem:[%s19110_s4 + $0x38] sm:$0xff] }
  0x17   :  { %v14665_v15 = vpack.c.bf16 %v80_v8, %v77_v7  ;;  %v92_v17 = vand.u32 4294901760, %v14663_v14  ;;  %v14688_v22 = vld [vmem:[%s19107_s1 + $0x18] sm:$0xff]  ;;  %v95_v24 = vand.u32 4294901760, %v14676_v20  ;;  %v98_v25 = vand.u32 4294901760, %v14681_v21  ;;  %v44_v26 = vld [vmem:[%s19106_s0] sm:$0xff]  ;;  %v45_v27 = vld [vmem:[%s19106_s0 + $0x8] sm:$0xff] }
  0x18   :  { %v14671_v19 = vpack.c.bf16 %v86_v12, %v83_v11  ;;  %v14710_v28 = vld [vmem:[%s19110_s4 + $0x40] sm:$0xff]  ;;  %v14715_v29 = vld [vmem:[%s19110_s4 + $0x48] sm:$0xff]  ;;  %v14717_v30 = vand.u32 4294901760, %v44_v26  ;;  %v14725_v33 = vand.u32 4294901760, %v45_v27  ;;  %v46_v35 = vld [vmem:[%s19106_s0 + $0x10] sm:$0xff]  ;;  %v14759_v43 = vsub.f32 %v60_v4, %v77_v7 }
  0x19   :  { %19534 = vst [vmem:[#allocation8_spill] sm:$0xff] %v14665_v15  ;;  %14393 = vset.pattern.permute.xlu1 %v19137_v18  ;;  %1851 = vperm.xlu0 %14400, %v14647_v6   ;;  %v14696_v23 = vpack.c.bf16 %v92_v17, %v89_v16  ;;  %v14723_v32 = vld [vmem:[%s19107_s1 + $0x40] sm:$0xff]  ;;  %v47_v36 = vld [vmem:[%s19106_s0 + $0x18] sm:$0xff]  ;;  %v14743_v37 = vpack.c.bf16 %v98_v25, %v95_v24  ;;  %v19126_v38 = vand.u32 4294901760, %v14710_v28  ;;  %v19125_v39 = vand.u32 4294901760, %v14715_v29  ;;  %v14751_v40 = vld [vmem:[%s19110_s4 + $0x50] sm:$0xff] }
  0x1a   :  { %19535 = vst [vmem:[#allocation9_spill] sm:$0xff] %v14671_v19  ;;  %12626 = vmatprep.subr.bf16.mxu0 %v14665_v15  ;;  %1512 = vperm.xlu1 %14393, %v14629_v2   ;;  %v14730_v34 = vsub.f32 %v44_v26, %v14717_v30  ;;  %v14756_v41 = vld [vmem:[%s19110_s4 + $0x58] sm:$0xff]  ;;  %v14761_v44 = vsub.f32 %v61_v5, %v80_v8  ;;  %v14766_v45 = vld [vmem:[%s19107_s1 + $0x48] sm:$0xff]  ;;  %v14771_v47 = vand.u32 4294901760, %v46_v35  ;;  %v14773_v48 = vand.u32 4294901760, %v47_v36  ;;  %v14780_v49 = vld [vmem:[%s19110_s4 + $0x60] sm:$0xff] }
  0x1b   :  { %12628 = vmatpush3.bf16.msra.mxu0 %v14665_v15  ;;  %19536 = vst [vmem:[#allocation10_spill] sm:$0xff] %v14696_v23  ;;  %19538 = vst [vmem:[#allocation12_spill] sm:$0xff] %v14743_v37  ;;  %v14769_v46 = vsub.f32 %v45_v27, %v14725_v33  ;;  %v14785_v51 = vsub.f32 %v62_v9, %v83_v11  ;;  %v14787_v52 = vsub.f32 %v63_v10, %v86_v12  ;;  %v14802_v56 = vld [vmem:[%s19110_s4 + $0x68] sm:$0xff]  ;;  %v48_v57 = vld [vmem:[%s19106_s0 + $0x20] sm:$0xff] }
  0x1c   :  { %12630 = vmatprep.subr.bf16.mxu0 %v14671_v19  ;;  %19537 = vst [vmem:[#allocation11_spill] sm:$0xff] %v14730_v34  ;;  %v19115_v42 = vand.u32 4294901760, %v14730_v34  ;;  %19539 = vst [vmem:[#allocation13_spill] sm:$0xff] %v14766_v45  ;;  %v14795_v53 = vpack.c.bf16 %v19125_v39, %v19126_v38  ;;  %v19121_v54 = vand.u32 4294901760, %v14751_v40  ;;  %v19118_v55 = vand.u32 4294901760, %v14756_v41  ;;  %v14814_v62 = vld [vmem:[%s19110_s4 + $0x70] sm:$0xff] }
  0x1d   :  { %1854 = vperm.xlu0 %14400, %v14688_v22   ;;  %19540 = vst [vmem:[#allocation14_spill] sm:$0xff] %v14769_v46  ;;  %v19119_v59 = vand.u32 4294901760, %v14759_v43  ;;  %v19120_v60 = vand.u32 4294901760, %v14761_v44  ;;  %v19136_v61 = vand.u32 4294901760, %v14780_v49  ;;  %v14819_v63 = vld [vmem:[%s19110_s4 + $0x78] sm:$0xff]  ;;  %v19122_v4 = vand.u32 4294901760, %v14769_v46 }
  0x1e   :  { %14394 = vset.pattern.permute.xlu1 %v19123_v31  ;;  %v160_v50 = vsub.f32 %v14730_v34, %v19115_v42  ;;  %19541 = vst [vmem:[#allocation15_spill] sm:$0xff] %v14795_v53  ;;  %v14823_v5 = vsub.f32 %v46_v35, %v14771_v47  ;;  %v14826_v7 = vsub.f32 %v47_v36, %v14773_v48  ;;  %v19127_v8 = vand.u32 4294901760, %v14802_v56  ;;  %v49_v12 = vld [vmem:[%s19106_s0 + $0x28] sm:$0xff] }
  0x1f   :  { %12632 = vmatpush3.bf16.msra.mxu0 %v14671_v19  ;;  %1621 = vperm.xlu1 %14394, %v14634_v3   ;;  %v19128_v9 = vand.u32 4294901760, %v14785_v51  ;;  %v19129_v10 = vand.u32 4294901760, %v14787_v52  ;;  %v14832_v11 = vand.u32 4294901760, %v48_v57  ;;  %v14843_v26 = vpack.c.bf16 %v19118_v55, %v19121_v54 }
  0x20   :  { %12634 = vmatprep.subr.bf16.mxu0 %v14696_v23  ;;  %v161_v58 = vand.u32 4294901760, %v160_v50  ;;  %19542 = vst [vmem:[#allocation16_spill] sm:$0xff] %v14823_v5  ;;  %19543 = vst [vmem:[#allocation17_spill] sm:$0xff] %v14826_v7  ;;  %v19135_v27 = vand.u32 4294901760, %v14814_v62  ;;  %v19134_v35 = vand.u32 4294901760, %v14819_v63  ;;  %v321_v36 = vsub.f32 %v14759_v43, %v19119_v59 }
  0x21   :  { %1869 = vperm.xlu0 %14400, %v14723_v32   ;;  %19544 = vst [vmem:[#allocation18_spill] sm:$0xff] %v14843_v26  ;;  %v328_v50 = vsub.f32 %v14761_v44, %v19120_v60  ;;  %v14862_v42 = vsub.f32 %v14769_v46, %v19122_v4  ;;  %v19130_v0 = vand.u32 4294901760, %v14823_v5  ;;  %v19131_v55 = vand.u32 4294901760, %v14826_v7  ;;  %v14872_v60 = vld [vmem:[%s19107_s1 + $0x20] sm:$0xff] }
  0x22   :  { %10767 = vmatprep.mubr.f32.mxu0 %v161_v58  ;;  %v50_v58 = vld [vmem:[%s19106_s0 + $0x30] sm:$0xff]  ;;  %v14866_v59 = vand.u32 4294901760, %v49_v12  ;;  %v14878_v54 = vpack.c.bf16 %v19127_v8, %v19136_v61  ;;  %v335_v4 = vsub.f32 %v14785_v51, %v19128_v9  ;;  %v342_v31 = vsub.f32 %v14787_v52, %v19129_v10  ;;  %v51_v10 = vld [vmem:[%s19106_s0 + $0x38] sm:$0xff] }
  0x23   :  { %12636 = vmatpush3.bf16.msra.mxu0 %v14696_v23  ;;  %14395 = vset.pattern.permute.xlu1 %v19132_v1  ;;  %v14887_v39 = vsub.f32 %v48_v57, %v14832_v11  ;;  %v14893_v38 = vsub.f32 %v14658_v13, %v89_v16  ;;  %v14898_v8 = vsub.f32 %v14663_v14, %v92_v17  ;;  %v14900_v9 = vand.u32 4294901760, %v50_v58 }
  0x24   :  { %1403 = vperm.xlu1 %14395, %v14647_v6   ;;  %12638 = vmatprep.subr.bf16.mxu0 %v14743_v37  ;;  %19545 = vst [vmem:[#allocation19_spill] sm:$0xff] %v14878_v54  ;;  %v14908_v57 = vsub.f32 %v14676_v20, %v95_v24  ;;  %v14915_v13 = vpack.c.bf16 %v19134_v35, %v19135_v27  ;;  %v322_v14 = vand.u32 4294901760, %v321_v36  ;;  %v329_v16 = vand.u32 4294901760, %v328_v50 }
  0x25   :  { %1872 = vperm.xlu0 %14400, %v14766_v45   ;;  %19546 = vst [vmem:[#allocation20_spill] sm:$0xff] %v14887_v39  ;;  %v14920_v17 = vsub.f32 %v14681_v21, %v98_v25  ;;  %v14928_v24 = vsub.f32 %v14823_v5, %v19130_v0  ;;  %v14933_v36 = vsub.f32 %v14826_v7, %v19131_v55  ;;  %v52_v21 = vld [vmem:[%s19106_s0 + $0x40] sm:$0xff]  ;;  %v53_v25 = vld [vmem:[%s19106_s0 + $0x48] sm:$0xff]  ;;  %v14948_v0 = vld [vmem:[%s19107_s1 + $0x30] sm:$0xff]  ;;  %v336_v55 = vand.u32 4294901760, %v335_v4 }
  0x26   :  { %19547 = vst [vmem:[#allocation21_spill] sm:$0xff] %v14915_v13  ;;  %v14936_v50 = vsub.f32 %v49_v12, %v14866_v59  ;;  %19549 = vst [vmem:[#allocation23_spill] sm:$0xff] %v14948_v0  ;;  %v14951_v35 = vand.u32 4294901760, %v51_v10  ;;  %v14957_v20 = vsub.f32 %v50_v58, %v14900_v9  ;;  %v14961_v4 = vand.u32 4294901760, %v52_v21 }
  0x27   :  { %12640 = vmatpush3.bf16.msra.mxu0 %v14743_v37  ;;  %v19553_v12 = vmov 1   ;;  %v181_v27 = vand.u32 4294901760, %v14928_v24  ;;  %v19554_v58 = vand.u32 4294901760, %v14710_v28  ;;  %v14987_v24 = vld [vmem:[%s19107_s1 + $0x58] sm:$0xff]  ;;  %v19561_v23 = vand.u32 4294901760, %v14908_v57 }
  0x28   :  { %14396 = vset.pattern.permute.xlu1 %v19137_v18  ;;  %12642 = vmatprep.subr.bf16.mxu0 %v14795_v53  ;;  %19548 = vst [vmem:[#allocation22_spill] sm:$0xff] %v14936_v50  ;;  %19550 = vst [vmem:[#allocation24_spill] sm:$0xff] %v14957_v20  ;;  %v14998_v61 = vsub.f32 %v51_v10, %v14951_v35  ;;  %v55_v18 = vld [vmem:[%s19106_s0 + $0x58] sm:$0xff]  ;;  %v15018_v19 = vsub.f32 %v52_v21, %v14961_v4  ;;  %v19568_v21 = vmov 2   ;;  %v19571_v46 = vand.u32 4294901760, %v14756_v41 }
  0x29   :  { %14441 = vset.pattern.permute.xlu0 %v19132_v1  ;;  %1515 = vperm.xlu1 %14396, %v14647_v6   ;;  %19551 = vst [vmem:[#allocation25_spill] sm:$0xff] %v14961_v4  ;;  %v14972_v37 = vsub.f32 %v14710_v28, %v19554_v58  ;;  %19556 = vst [vmem:[#allocation27_spill] sm:$0xff] %v14987_v24  ;;  %v191_v28 = vand.u32 4294901760, %v14933_v36  ;;  %v363_v10 = vsub.f32 %v14908_v57, %v19561_v23 }
  0x2a   :  { %1397 = vperm.xlu0 %14441, %v14634_v3   ;;  %19558 = vst [vmem:[#allocation28_spill] sm:$0xff] %v14998_v61  ;;  %19563 = vst [vmem:[#allocation29_spill] sm:$0xff] %v15018_v19  ;;  %v19572_v45 = vand.u32 4294901760, %v14957_v20 }
  0x2b   :  { %12644 = vmatpush3.bf16.msra.mxu0 %v14795_v53  ;;  %v54_v53 = vld [vmem:[%s19106_s0 + $0x50] sm:$0xff] }
  0x2c   :  { %12646 = vmatprep.subr.bf16.mxu0 %v14843_v26 }
  0x2d   :  { %14397 = vset.pattern.permute.xlu1 %v19132_v1  ;;  %v343_v1 = vand.u32 4294901760, %v342_v31  ;;  %v14963_v31 = vand.u32 4294901760, %v53_v25 }
  0x2e   :  { %1409 = vperm.xlu0 %14441, %v14872_v60   ;;  %1406 = vperm.xlu1 %14397, %v14688_v22  }
  0x2f   :  { %12648 = vmatpush3.bf16.msra.mxu0 %v14843_v26  ;;  %v12657_v26 = vpack.c.bf16 %v329_v16, %v322_v14  ;;  %19552 = vst [vmem:[#allocation26_spill] sm:$0xff] %v14963_v31  ;;  %v19555_v14 = vand.u32 4294901760, %v14715_v29  ;;  %v14990_v58 = vpack.c.bf16 %v343_v1, %v336_v55  ;;  %v19560_v1 = vand.u32 4294901760, %v14898_v8 }
  0x30   :  { %12650 = vmatprep.subr.bf16.mxu0 %v14878_v54  ;;  %v15021_v5 = vsub.f32 %v53_v25, %v14963_v31  ;;  %v15040_v25 = vld [vmem:[%s19107_s1 + $0x60] sm:$0xff] }
  0x31   :  { %v14977_v16 = vsub.f32 %v14715_v29, %v19555_v14  ;;  %v19557_v29 = vand.u32 4294901760, %v14887_v39  ;;  %v356_v55 = vsub.f32 %v14898_v8, %v19560_v1  ;;  %v19566_v1 = vand.u32 4294901760, %v14936_v50  ;;  %19569 = vst [vmem:[#allocation33_spill] sm:$0xff] %v15040_v25 }
  0x32   :  { %1415 = vperm.xlu0 %14441, %v14948_v0   ;;  %14398 = vset.pattern.permute.xlu1 %v19553_v12  ;;  %19564 = vst [vmem:[#allocation30_spill] sm:$0xff] %v15021_v5 }
  0x33   :  { %12652 = vmatpush3.bf16.msra.mxu0 %v14878_v54  ;;  %1518 = vperm.xlu1 %14398, %v14688_v22   ;;  %v14995_v14 = vsub.f32 %v14887_v39, %v19557_v29  ;;  %v19559_v54 = vand.u32 4294901760, %v14893_v38  ;;  %v19562_v39 = vand.u32 4294901760, %v14920_v17  ;;  %v15029_v29 = vsub.f32 %v14936_v50, %v19566_v1 }
  0x34   :  { %12654 = vmatprep.subr.bf16.mxu0 %v14915_v13  ;;  %v19570_v50 = vand.u32 4294901760, %v14751_v40  ;;  %v357_v34 = vand.u32 4294901760, %v356_v55  ;;  %v364_v1 = vand.u32 4294901760, %v363_v10  ;;  %v19575_v55 = vand.u32 4294901760, %v14972_v37 }
  0x35   :  { %v349_v36 = vsub.f32 %v14893_v38, %v19559_v54  ;;  %v370_v7 = vsub.f32 %v14920_v17, %v19562_v39  ;;  %v15023_v54 = vand.u32 4294901760, %v54_v53  ;;  %v15033_v39 = vand.u32 4294901760, %v55_v18 }
  0x36   :  { %1430 = vperm.xlu0 %14441, %v14987_v24   ;;  %v201_v24 = vand.u32 4294901760, %v14995_v14  ;;  %v15047_v23 = vsub.f32 %v14751_v40, %v19570_v50  ;;  %v15058_v14 = vsub.f32 %v14957_v20, %v19572_v45  ;;  %v56_v40 = vld [vmem:[%s19106_s0 + $0x60] sm:$0xff]  ;;  %v211_v45 = vand.u32 4294901760, %v15029_v29  ;;  %v58_v29 = vld [vmem:[%s19106_s0 + $0x70] sm:$0xff] }
  0x37   :  { %19565 = vst [vmem:[#allocation31_spill] sm:$0xff] %v15023_v54  ;;  %19567 = vst [vmem:[#allocation32_spill] sm:$0xff] %v15033_v39  ;;  %12656 = vmatpush3.bf16.msra.mxu0 %v14915_v13  ;;  %14399 = vset.pattern.permute.xlu1 %v19568_v21  ;;  %v15052_v13 = vsub.f32 %v14756_v41, %v19571_v46  ;;  %v350_v15 = vand.u32 4294901760, %v349_v36  ;;  %v371_v50 = vand.u32 4294901760, %v370_v7  ;;  %v19574_v36 = vand.u32 4294901760, %v14862_v42 }
  0x38   :  { %1627 = vperm.xlu1 %14399, %v14647_v6   ;;  %12658 = vmatprep.subr.bf16.mxu0 %v12657_v26  ;;  %v15066_v46 = vsub.f32 %v54_v53, %v15023_v54  ;;  %v377_v10 = vsub.f32 %v14972_v37, %v19575_v55  ;;  %v19576_v7 = vand.u32 4294901760, %v14977_v16  ;;  %v15079_v41 = vsub.f32 %v55_v18, %v15033_v39  ;;  %v57_v55 = vld [vmem:[%s19106_s0 + $0x68] sm:$0xff] }
  0x39   :  { %v19578_v42 = vand.u32 4294901760, %v14998_v61  ;;  %v12665_v18 = vpack.c.bf16 %v357_v34, %v350_v15  ;;  %v19583_v20 = vand.u32 4294901760, %v15018_v19  ;;  %v19584_v34 = vand.u32 4294901760, %v15021_v5 }
  0x3a   :  { %19573 = vst [vmem:[#allocation34_spill] sm:$0xff] %v15066_v46  ;;  %10768 = vmatmul.mubr.f32.vlgmr.msra.gmra.mrb[0].mxu0 %v19574_v36  ;;  %1433 = vperm.xlu0 %14441, %v15040_v25   ;;  %v384_v0 = vsub.f32 %v14977_v16, %v19576_v7  ;;  %19577 = vst [vmem:[#allocation35_spill] sm:$0xff] %v15079_v41  ;;  %v15088_v25 = vand.u32 4294901760, %v56_v40  ;;  %v15120_v39 = vand.u32 4294901760, %v57_v55  ;;  %v19592_v54 = vand.u32 4294901760, %v15066_v46 }
  0x3b   :  { %12660 = vmatpush3.bf16.msra.mxu0 %v12657_v26  ;;  %10770 = vmatprep.mubr.f32.mxu0 %v181_v27  ;;  %v15084_v53 = vsub.f32 %v14998_v61, %v19578_v42  ;;  %v221_v26 = vand.u32 4294901760, %v15058_v14  ;;  %v19580_v27 = vand.u32 4294901760, %v14780_v49  ;;  %v19581_v42 = vand.u32 4294901760, %v14802_v56 }
  0x3c   :  { %19579 = vst [vmem:[#allocation36_spill] sm:$0xff] %v15088_v25  ;;  %1630 = vperm.xlu1 %14399, %v14688_v22   ;;  %12662 = vmatprep.subr.bf16.mxu0 %v14990_v58  ;;  %v12669_v61 = vpack.c.bf16 %v371_v50, %v364_v1  ;;  %v240_v15 = vsub.f32 %v15018_v19, %v19583_v20  ;;  %19585 = vst [vmem:[#allocation38_spill] sm:$0xff] %v15120_v39  ;;  %v19586_v20 = vand.u32 4294901760, %v15047_v23 }
  0x3d   :  { %v15099_v7 = vsub.f32 %v14780_v49, %v19580_v27  ;;  %v15104_v36 = vsub.f32 %v14802_v56, %v19581_v42  ;;  %v15115_v14 = vsub.f32 %v15021_v5, %v19584_v34  ;;  %v378_v56 = vand.u32 4294901760, %v377_v10  ;;  %v59_v10 = vld [vmem:[%s19106_s0 + $0x78] sm:$0xff] }
  0x3e   :  { %10771 = vmatmul.mubr.f32.gmra.mrb[2].mxu0 %v191_v28  ;;  %14443 = vset.pattern.permute.xlu0 %v19553_v12  ;;  %v385_v27 = vand.u32 4294901760, %v384_v0  ;;  %v391_v1 = vsub.f32 %v15047_v23, %v19586_v20  ;;  %v19587_v50 = vand.u32 4294901760, %v15052_v13  ;;  %v15131_v34 = vsub.f32 %v56_v40, %v15088_v25  ;;  %v15142_v20 = vld [vmem:[%s19107_s1 + $0x38] sm:$0xff] }
  0x3f   :  { %19582 = vst [vmem:[#allocation37_spill] sm:$0xff] %v15104_v36  ;;  %12664 = vmatpush3.bf16.msra.mxu0 %v14990_v58  ;;  %1509 = vperm.xlu0 %14443, %v14634_v3   ;;  %v15133_v0 = vand.u32 4294901760, %v58_v29  ;;  %v19589_v58 = vmov 4   ;;  %v404_v42 = vand.u32 4294901760, %v15099_v7  ;;  %v19590_v40 = vand.u32 4294901760, %v14814_v62 }
  0x40   :  { %v398_v28 = vsub.f32 %v15052_v13, %v19587_v50  ;;  %14401 = vset.pattern.permute.xlu1 %v19589_v58  ;;  %10773 = vmatprep.mubr.f32.mxu0 %v201_v24  ;;  %v411_v50 = vand.u32 4294901760, %v15104_v36  ;;  %v19591_v5 = vand.u32 4294901760, %v14819_v63  ;;  %v231_v24 = vand.u32 4294901760, %v15084_v53 }
  0x41   :  { %19588 = vst [vmem:[#allocation39_spill] sm:$0xff] %v15133_v0  ;;  %v15149_v49 = vsub.f32 %v14814_v62, %v19590_v40  ;;  %1848 = vperm.xlu1 %14401, %v14629_v2   ;;  %12666 = vmatprep.subr.bf16.mxu0 %v12665_v18  ;;  %v241_v58 = vand.u32 4294901760, %v240_v15  ;;  %v251_v25 = vand.u32 4294901760, %v15115_v14  ;;  %v260_v31 = vsub.f32 %v15066_v46, %v19592_v54 }
  0x42   :  { %v15154_v19 = vsub.f32 %v14819_v63, %v19591_v5  ;;  %10774 = vmatmul.mubr.f32.gmra.mrb[4].mxu0 %v211_v45  ;;  %v12673_v62 = vpack.c.bf16 %v385_v27, %v378_v56  ;;  %v19593_v40 = vand.u32 4294901760, %v15079_v41  ;;  %v15166_v63 = vsub.f32 %v57_v55, %v15120_v39 }
  0x43   :  { %v15168_v5 = vand.u32 4294901760, %v59_v10  ;;  %12668 = vmatpush3.bf16.msra.mxu0 %v12665_v18  ;;  %1530 = vperm.xlu0 %14443, %v15142_v20   ;;  %v392_v53 = vand.u32 4294901760, %v391_v1  ;;  %v399_v15 = vand.u32 4294901760, %v398_v28  ;;  %v15173_v54 = vsub.f32 %v58_v29, %v15133_v0 }
  0x44   :  { %v270_v4 = vsub.f32 %v15079_v41, %v19593_v40  ;;  %10776 = vmatprep.mubr.f32.mxu0 %v221_v26  ;;  %12670 = vmatprep.subr.bf16.mxu0 %v12669_v61  ;;  %v405_v45 = vsub.f32 %v15099_v7, %v404_v42  ;;  %v412_v56 = vsub.f32 %v15104_v36, %v411_v50  ;;  %v418_v55 = vand.u32 4294901760, %v15149_v49 }
  0x45   :  { %19594 = vst [vmem:[#allocation40_spill] sm:$0xff] %v15168_v5  ;;  %v425_v27 = vand.u32 4294901760, %v15154_v19  ;;  %14402 = vset.pattern.permute.xlu1 %v19553_v12  ;;  %v19595_v18 = vand.u32 4294901760, %v14759_v43  ;;  %v19596_v1 = vand.u32 4294901760, %v14761_v44  ;;  %v19597_v29 = vand.u32 4294901760, %v14785_v51 }
  0x46   :  { %v19598_v26 = vand.u32 4294901760, %v14787_v52  ;;  %v19599_v14 = vand.u32 4294901760, %v14893_v38  ;;  %v19600_v41 = vand.u32 4294901760, %v14898_v8  ;;  %v19602_v0 = vand.u32 4294901760, %v14908_v57  ;;  %10777 = vmatmul.mubr.f32.gmra.mrb[6].mxu0 %v231_v24  ;;  %1521 = vperm.xlu1 %14402, %v14872_v60  }
  0x47   :  { %v15184_v28 = vpack.c.bf16 %v19596_v1, %v19595_v18  ;;  %v19603_v39 = vand.u32 4294901760, %v14920_v17  ;;  %v15207_v1 = vsub.f32 %v59_v10, %v15168_v5  ;;  %12672 = vmatpush3.bf16.msra.mxu0 %v12669_v61  ;;  %1533 = vperm.xlu0 %14443, %v14723_v32   ;;  %v15224_v24 = vpack.c.bf16 %v425_v27, %v418_v55  ;;  %v15229_v10 = vld [vmem:[%s19107_s1 + $0x68] sm:$0xff] }
  0x48   :  { %v15190_v40 = vpack.c.bf16 %v19598_v26, %v19597_v29  ;;  %v15196_v46 = vpack.c.bf16 %v19600_v41, %v19599_v14  ;;  %v19604_v29 = vand.u32 4294901760, %v14972_v37  ;;  %v19605_v26 = vand.u32 4294901760, %v14977_v16  ;;  %10779 = vmatprep.mubr.f32.mxu0 %v241_v58  ;;  %12674 = vmatprep.subr.bf16.mxu0 %v12673_v62 }
  0x49   :  { %v15202_v36 = vpack.c.bf16 %v19603_v39, %v19602_v0  ;;  %v19606_v14 = vand.u32 4294901760, %v15047_v23  ;;  %v15222_v0 = vpack.c.bf16 %v411_v50, %v404_v42  ;;  %19609 = vst [vmem:[#allocation43_spill] sm:$0xff] %v15224_v24  ;;  %v19610_v18 = vand.u32 4294901760, %v15131_v34 }
  0x4a   :  { %19601 = vst [vmem:[#allocation41_spill] sm:$0xff] %v15196_v46  ;;  %v15213_v41 = vpack.c.bf16 %v19605_v26, %v19604_v29  ;;  %v19607_v46 = vand.u32 4294901760, %v15052_v13  ;;  %v261_v29 = vand.u32 4294901760, %v260_v31  ;;  %v12677_v26 = vpack.c.bf16 %v399_v15, %v392_v53  ;;  %10780 = vmatmul.mubr.f32.gmra.mrb[8].mxu0 %v251_v25  ;;  %v15247_v25 = vld [vmem:[%s19107_s1 + $0x70] sm:$0xff] }
  0x4b   :  { %19608 = vst [vmem:[#allocation42_spill] sm:$0xff] %v15222_v0  ;;  %v19209_v61 = vand.u32 4294901760, %v15173_v54  ;;  %v413_v42 = vand.u32 4294901760, %v412_v56  ;;  %v419_v50 = vsub.f32 %v15149_v49, %v418_v55  ;;  %v426_v58 = vsub.f32 %v15154_v19, %v425_v27  ;;  %12676 = vmatpush3.bf16.msra.mxu0 %v12673_v62  ;;  %1548 = vperm.xlu0 %14443, %v15229_v10   ;;  %v15255_v62 = vld [vmem:[%s19107_s1 + $0x28] sm:$0xff] }
  0x4c   :  { %v15219_v39 = vpack.c.bf16 %v19607_v46, %v19606_v14  ;;  %v280_v46 = vsub.f32 %v15131_v34, %v19610_v18  ;;  %v406_v14 = vand.u32 4294901760, %v405_v45  ;;  %v19210_v24 = vmov 3   ;;  %10782 = vmatprep.mubr.f32.mxu0 %v261_v29  ;;  %12678 = vmatprep.subr.bf16.mxu0 %v12677_v26 }
  0x4d   :  { %14403 = vset.pattern.permute.xlu1 %v19210_v24  ;;  %v271_v0 = vand.u32 4294901760, %v270_v4  ;;  %v19611_v31 = vand.u32 4294901760, %v15166_v63  ;;  %v19206_v15 = vand.u32 4294901760, %v15207_v1  ;;  %v300_v4 = vsub.f32 %v15173_v54, %v19209_v61  ;;  %v19645_v61 = vld [vmem:[#allocation21_spill] sm:$0xff] }
  0x4e   :  { %1739 = vperm.xlu1 %14403, %v14647_v6   ;;  %v281_v45 = vand.u32 4294901760, %v280_v46  ;;  %v12681_v56 = vpack.c.bf16 %v413_v42, %v406_v14  ;;  %v420_v55 = vand.u32 4294901760, %v419_v50  ;;  %v427_v27 = vand.u32 4294901760, %v426_v58 }
  0x4f   :  { %v290_v53 = vsub.f32 %v15166_v63, %v19611_v31  ;;  %10783 = vmatmul.mubr.f32.gmra.mrb[10].mxu0 %v271_v0  ;;  %v310_v29 = vsub.f32 %v15207_v1, %v19206_v15  ;;  %1551 = vperm.xlu0 %14443, %v15247_v25   ;;  %v19612_v46 = vmov 0   ;;  %v301_v14 = vand.u32 4294901760, %v300_v4  ;;  %v19622_v4 = vld [vmem:[#allocation13_spill] sm:$0xff]  ;;  %v19642_v15 = vld [vmem:[#allocation19_spill] sm:$0xff] }
  0x50   :  { %12680 = vmatpush3.bf16.msra.mxu0 %v12677_v26  ;;  %10785 = vmatprep.mubr.f32.mxu0 %v281_v45  ;;  %v12685_v0 = vpack.c.bf16 %v427_v27, %v420_v55  ;;  %v12689_v26 = vpack.c.bf16 %v14761_v44, %v14759_v43  ;;  %v12693_v50 = vpack.c.bf16 %v14787_v52, %v14785_v51  ;;  %v19212_v58 = vmov 5   ;;  %v19613_v52 = vld [vmem:[#allocation25_spill] sm:$0xff]  ;;  %v19621_v45 = vld [vmem:[#allocation39_spill] sm:$0xff]  ;;  %v19627_v27 = vld [vmem:[#allocation16_spill] sm:$0xff] }
  0x51   :  { %v291_v18 = vand.u32 4294901760, %v290_v53  ;;  %12682 = vmatprep.subr.bf16.mxu0 %v12681_v56  ;;  %v311_v42 = vand.u32 4294901760, %v310_v29  ;;  %v12697_v43 = vpack.c.bf16 %v14898_v8, %v14893_v38  ;;  %v12701_v44 = vpack.c.bf16 %v14920_v17, %v14908_v57  ;;  %v19614_v57 = vld [vmem:[#allocation26_spill] sm:$0xff]  ;;  %v19616_v17 = vld [vmem:[#allocation37_spill] sm:$0xff] }
  0x52   :  { %14404 = vset.pattern.permute.xlu1 %v19612_v46  ;;  %v19204_v38 = vmov 6   ;;  %v12705_v51 = vpack.c.bf16 %v14977_v16, %v14972_v37  ;;  %v12709_v8 = vpack.c.bf16 %v15052_v13, %v15047_v23  ;;  %v19615_v37 = vld [vmem:[#allocation31_spill] sm:$0xff]  ;;  %v12713_v16 = vpack.c.bf16 %v19616_v17, %v15099_v7  ;;  %v19617_v13 = vld [vmem:[#allocation32_spill] sm:$0xff]  ;;  %v19619_v53 = vld [vmem:[#allocation38_spill] sm:$0xff] }
  0x53   :  { %1412 = vperm.xlu1 %14404, %v15255_v62   ;;  %10786 = vmatmul.mubr.f32.gmra.mrb[12].mxu0 %v291_v18  ;;  %v19618_v23 = vld [vmem:[#allocation36_spill] sm:$0xff]  ;;  %v12717_v31 = vpack.c.bf16 %v15154_v19, %v15149_v49  ;;  %v19620_v7 = vld [vmem:[#allocation23_spill] sm:$0xff]  ;;  %v19625_v49 = vld [vmem:[#allocation14_spill] sm:$0xff]  ;;  %v19207_v29 = vmov 7  }
  0x54   :  { %12684 = vmatpush3.bf16.msra.mxu0 %v12681_v56  ;;  %14455 = vset.pattern.permute.xlu0 %v19210_v24  ;;  %v19623_v56 = vld [vmem:[#allocation11_spill] sm:$0xff]  ;;  %v19624_v19 = vld [vmem:[#allocation8_spill] sm:$0xff]  ;;  %v15329_v55 = vld [vmem:[%s19107_s1 + $0x78] sm:$0xff] }
  0x55   :  { %1733 = vperm.xlu0 %14455, %v14634_v3   ;;  %10788 = vmatprep.mubr.f32.mxu0 %v301_v14  ;;  %19626 = vst [vmem:[#allocation25_spill] sm:$0xff] %v15329_v55  ;;  %v19628_v18 = vld [vmem:[#allocation9_spill] sm:$0xff]  ;;  %v19638_v17 = vld [vmem:[#allocation30_spill] sm:$0xff] }
  0x56   :  { %12686 = vmatprep.subr.bf16.mxu0 %v12685_v0  ;;  %v19629_v14 = vld [vmem:[#allocation17_spill] sm:$0xff] }
  0x57   :  { %14405 = vset.pattern.permute.xlu1 %v19553_v12  ;;  %10789 = vmatmul.mubr.f32.gmra.mrb[14].mxu0 %v311_v42  ;;  %v19631_v42 = vld [vmem:[#allocation10_spill] sm:$0xff] }
  0x58   :  { %1524 = vperm.xlu1 %14405, %v15255_v62   ;;  %12688 = vmatpush3.bf16.msra.mxu0 %v12685_v0  ;;  %v19630_v0 = vld [vmem:[#allocation20_spill] sm:$0xff] }
  0x59   :  { %10823 = vmatprep.mubr.f32.mxu0 %v14717_v30  ;;  %1736 = vperm.xlu0 %14455, %v14629_v2  }
  0x5a   :  { %12690 = vmatprep.subr.bf16.mxu0 %v12689_v26 }
  0x5b   :  { %10824 = vmatmul.mubr.f32.vlgmr.msra.gmra.mrb[0].mxu0 %v14725_v33 }
  0x5c   :  { %14406 = vset.pattern.permute.xlu1 %v19212_v58  ;;  %12692 = vmatpush3.bf16.msra.mxu0 %v12689_v26  ;;  %v19632_v26 = vld [vmem:[#allocation22_spill] sm:$0xff] }
  0x5d   :  { %1960 = vperm.xlu1 %14406, %v14629_v2   ;;  %1742 = vperm.xlu0 %14455, %v14688_v22  }
  0x5e   :  { %10826 = vmatprep.mubr.f32.mxu0 %v14771_v47  ;;  %12694 = vmatprep.subr.bf16.mxu0 %v12693_v50 }
  0x5f   :  { %10827 = vmatmul.mubr.f32.gmra.mrb[2].mxu0 %v14773_v48 }
  0x60   :  { %12696 = vmatpush3.bf16.msra.mxu0 %v12693_v50  ;;  %10829 = vmatprep.mubr.f32.mxu0 %v14832_v11  ;;  %v19633_v50 = vld [vmem:[#allocation24_spill] sm:$0xff] }
  0x61   :  { %14407 = vset.pattern.permute.xlu1 %v19568_v21  ;;  %1754 = vperm.xlu0 %14455, %v15142_v20  }
  0x62   :  { %1633 = vperm.xlu1 %14407, %v14872_v60   ;;  %12698 = vmatprep.subr.bf16.mxu0 %v12697_v43 }
  0x63   :  { %10830 = vmatmul.mubr.f32.gmra.mrb[4].mxu0 %v14866_v59 }
  0x64   :  { %12700 = vmatpush3.bf16.msra.mxu0 %v12697_v43  ;;  %10832 = vmatprep.mubr.f32.mxu0 %v14900_v9  ;;  %v19634_v43 = vld [vmem:[#allocation12_spill] sm:$0xff] }
  0x65   :  { %1757 = vperm.xlu0 %14455, %v14723_v32   ;;  %12702 = vmatprep.subr.bf16.mxu0 %v12701_v44 }
  0x66   :  { %14408 = vset.pattern.permute.xlu1 %v19204_v38 }
  0x67   :  { %2069 = vperm.xlu1 %14408, %v14634_v3   ;;  %10833 = vmatmul.mubr.f32.gmra.mrb[6].mxu0 %v14951_v35 }
  0x68   :  { %12704 = vmatpush3.bf16.msra.mxu0 %v12701_v44  ;;  %10835 = vmatprep.mubr.f32.mxu0 %v19613_v52  ;;  %v19635_v44 = vld [vmem:[#allocation28_spill] sm:$0xff] }
  0x69   :  { %1772 = vperm.xlu0 %14455, %v15229_v10   ;;  %12706 = vmatprep.subr.bf16.mxu0 %v12705_v51 }
  0x6b   :  { %14409 = vset.pattern.permute.xlu1 %v19568_v21  ;;  %10836 = vmatmul.mubr.f32.gmra.mrb[8].mxu0 %v19614_v57 }
  0x6c   :  { %1636 = vperm.xlu1 %14409, %v15255_v62   ;;  %12708 = vmatpush3.bf16.msra.mxu0 %v12705_v51  ;;  %v19636_v51 = vld [vmem:[#allocation29_spill] sm:$0xff] }
  0x6d   :  { %10838 = vmatprep.mubr.f32.mxu0 %v19615_v37  ;;  %14460 = vset.pattern.permute.xlu0 %v19568_v21 }
  0x6e   :  { %12710 = vmatprep.subr.bf16.mxu0 %v12709_v8  ;;  %1624 = vperm.xlu0 %14460, %v14629_v2  }
  0x6f   :  { %10839 = vmatmul.mubr.f32.gmra.mrb[10].mxu0 %v19617_v13 }
  0x70   :  { %14410 = vset.pattern.permute.xlu1 %v19204_v38  ;;  %12712 = vmatpush3.bf16.msra.mxu0 %v12709_v8  ;;  %v19637_v8 = vld [vmem:[#allocation15_spill] sm:$0xff] }
  0x71   :  { %2072 = vperm.xlu1 %14410, %v14629_v2   ;;  %10841 = vmatprep.mubr.f32.mxu0 %v19618_v23 }
  0x72   :  { %12714 = vmatprep.subr.bf16.mxu0 %v12713_v16  ;;  %1645 = vperm.xlu0 %14460, %v14723_v32  }
  0x73   :  { %10842 = vmatmul.mubr.f32.gmra.mrb[12].mxu0 %v19619_v53 }
  0x74   :  { %12716 = vmatpush3.bf16.msra.mxu0 %v12713_v16  ;;  %10844 = vmatprep.mubr.f32.mxu0 %v19621_v45  ;;  %v19639_v16 = vld [vmem:[#allocation34_spill] sm:$0xff]  ;;  %v19650_v45 = vld [vmem:[#allocation33_spill] sm:$0xff] }
  0x75   :  { %14411 = vset.pattern.permute.xlu1 %v19553_v12  ;;  %12718 = vmatprep.subr.bf16.mxu0 %v12717_v31 }
  0x76   :  { %1527 = vperm.xlu1 %14411, %v19620_v7   ;;  %1648 = vperm.xlu0 %14460, %v19622_v4  }
  0x77   :  { %10845 = vmatmul.mubr.f32.gmra.mrb[14].mxu0 %v15168_v5 }
  0x78   :  { %12720 = vmatpush3.bf16.msra.mxu0 %v12717_v31  ;;  %10879 = vmatprep.mubr.f32.mxu0 %v19623_v56  ;;  %v19640_v31 = vld [vmem:[#allocation18_spill] sm:$0xff] }
  0x79   :  { %12722 = vmatprep.subr.bf16.mxu0 %v19624_v19 }
  0x7a   :  { %14412 = vset.pattern.permute.xlu1 %v19210_v24  ;;  %1663 = vperm.xlu0 %14460, %v15247_v25  }
  0x7b   :  { %1745 = vperm.xlu1 %14412, %v14872_v60   ;;  %10880 = vmatmul.mubr.f32.vlgmr.msra.gmra.mrb[0].mxu0 %v19625_v49 }
  0x7c   :  { %12724 = vmatpush3.bf16.msra.mxu0 %v19624_v19  ;;  %10882 = vmatprep.mubr.f32.mxu0 %v19627_v27 }
  0x7d   :  { %12726 = vmatprep.subr.bf16.mxu0 %v19628_v18 }
  0x7e   :  { %1666 = vperm.xlu0 %14460, %v15329_v55   ;;  %v19648_v55 = vand.u32 4294901760, %v19623_v56  ;;  %v19651_v56 = vand.u32 4294901760, %v19627_v27  ;;  %v19655_v27 = vld [vmem:[#allocation41_spill] sm:$0xff] }
  0x7f   :  { %14413 = vset.pattern.permute.xlu1 %v19207_v29  ;;  %10883 = vmatmul.mubr.f32.gmra.mrb[2].mxu0 %v19629_v14 }
  0x80   :  { %2181 = vperm.xlu1 %14413, %v14634_v3   ;;  %12728 = vmatpush3.bf16.msra.mxu0 %v19628_v18 }
  0x81   :  { %10885 = vmatprep.mubr.f32.mxu0 %v19630_v0  ;;  %12730 = vmatprep.subr.bf16.mxu0 %v19631_v42 }
  0x82   :  { %14465 = vset.pattern.permute.xlu0 %v19204_v38  ;;  %v19641_v38 = vld [vmem:[#allocation35_spill] sm:$0xff] }
  0x83   :  { %10886 = vmatmul.mubr.f32.gmra.mrb[4].mxu0 %v19632_v26  ;;  %2075 = vperm.xlu0 %14465, %v14647_v6  }
  0x84   :  { %14414 = vset.pattern.permute.xlu1 %v19612_v46  ;;  %12732 = vmatpush3.bf16.msra.mxu0 %v19631_v42 }
  0x85   :  { %1418 = vperm.xlu1 %14414, %v15142_v20   ;;  %10888 = vmatprep.mubr.f32.mxu0 %v19633_v50 }
  0x86   :  { %12734 = vmatprep.subr.bf16.mxu0 %v19634_v43 }
  0x87   :  { %10889 = vmatmul.mubr.f32.gmra.mrb[6].mxu0 %v19635_v44  ;;  %2078 = vperm.xlu0 %14465, %v14688_v22  }
  0x88   :  { %12736 = vmatpush3.bf16.msra.mxu0 %v19634_v43  ;;  %10891 = vmatprep.mubr.f32.mxu0 %v19636_v51 }
  0x89   :  { %14415 = vset.pattern.permute.xlu1 %v19210_v24  ;;  %12738 = vmatprep.subr.bf16.mxu0 %v19637_v8  ;;  %v19646_v24 = vmov 4  }
  0x8a   :  { %1748 = vperm.xlu1 %14415, %v15255_v62  }
  0x8b   :  { %10892 = vmatmul.mubr.f32.gmra.mrb[8].mxu0 %v19638_v17  ;;  %2084 = vperm.xlu0 %14465, %v15255_v62  }
  0x8c   :  { %10894 = vmatprep.mubr.f32.mxu0 %v19639_v16  ;;  %12740 = vmatpush3.bf16.msra.mxu0 %v19637_v8 }
  0x8d   :  { %12742 = vmatprep.subr.bf16.mxu0 %v19640_v31 }
  0x8e   :  { %14416 = vset.pattern.permute.xlu1 %v19212_v58  ;;  %v19647_v58 = vld [vmem:[#allocation27_spill] sm:$0xff] }
  0x8f   :  { %1966 = vperm.xlu1 %14416, %v14688_v22   ;;  %10895 = vmatmul.mubr.f32.gmra.mrb[10].mxu0 %v19641_v38 }
  0x90   :  { %2093 = vperm.xlu0 %14465, %v14723_v32   ;;  %10897 = vmatprep.mubr.f32.mxu0 %v15131_v34 }
  0x91   :  { %12744 = vmatpush3.bf16.msra.mxu0 %v19640_v31 }
  0x92   :  { %12746 = vmatprep.subr.bf16.mxu0 %v19642_v15 }
  0x93   :  { %14417 = vset.pattern.permute.xlu1 %v19568_v21  ;;  %10898 = vmatmul.mubr.f32.gmra.mrb[12].mxu0 %v15166_v63 }
  0x94   :  { %1639 = vperm.xlu1 %14417, %v19620_v7   ;;  %2096 = vperm.xlu0 %14465, %v19622_v4   ;;  %v15374_v22 = vpop.permute.xlu1 %1400  ;;  %v15376_v29 = vpop.permute.xlu0 %1845 }
  0x95   :  { %10900 = vmatprep.mubr.f32.mxu0 %v15173_v54  ;;  %12748 = vmatpush3.bf16.msra.mxu0 %v19642_v15  ;;  %19643 = vst [vmem:[#allocation26_spill] sm:$0xff] %v15374_v22  ;;  %19644 = vst [vmem:[#allocation31_spill] sm:$0xff] %v15376_v29  ;;  %v19649_v29 = vand.u32 4294901760, %v19625_v49  ;;  %v19652_v49 = vand.u32 4294901760, %v19629_v14  ;;  %v19656_v14 = vand.u32 4294901760, %v19632_v26 }
  0x96   :  { %12750 = vmatprep.subr.bf16.mxu0 %v19645_v61 }
  0x97   :  { %10901 = vmatmul.mubr.f32.gmra.mrb[14].mxu0 %v15207_v1 }
  0x98   :  { %14418 = vset.pattern.permute.xlu1 %v19646_v24  ;;  %2102 = vperm.xlu0 %14465, %v19647_v58   ;;  %v15386_v5 = vpop.permute.xlu0 %1851 }
  0x99   :  { %1857 = vperm.xlu1 %14418, %v14872_v60   ;;  %12752 = vmatpush3.bf16.msra.mxu0 %v19645_v61  ;;  %v15388_v22 = vpop.permute.xlu1 %1512 }
  0x9a   :  { %10935 = vmatprep.mubr.f32.mxu0 %v19648_v55  ;;  %12754 = vmatprep.subr.bf16.mxu0 %v15184_v28 }
  0x9c   :  { %10936 = vmatmul.mubr.f32.vlgmr.msra.gmra.mrb[0].mxu0 %v19649_v29  ;;  %2105 = vperm.xlu0 %14465, %v19650_v45   ;;  %v15396_v53 = vpop.permute.xlu0 %1854  ;;  %v19653_v29 = vmov 5   ;;  %v19654_v45 = vand.u32 4294901760, %v19630_v0  ;;  %v19658_v0 = vand.u32 4294901760, %v19635_v44 }
  0x9d   :  { %14419 = vset.pattern.permute.xlu1 %v19568_v21  ;;  %12756 = vmatpush3.bf16.msra.mxu0 %v15184_v28 }
  0x9e   :  { %1642 = vperm.xlu1 %14419, %v15142_v20   ;;  %10938 = vmatprep.mubr.f32.mxu0 %v19651_v56  ;;  %v15402_v55 = vpop.permute.xlu1 %1621 }
  0x9f   :  { %12758 = vmatprep.subr.bf16.mxu0 %v15190_v40 }
  0xa0   :  { %10939 = vmatmul.mubr.f32.gmra.mrb[2].mxu0 %v19652_v49  ;;  %14472 = vset.pattern.permute.xlu0 %v19653_v29  ;;  %v15409_v28 = vpop.permute.xlu0 %1869  ;;  %v19660_v49 = vmov 3  }
  0xa1   :  { %12760 = vmatpush3.bf16.msra.mxu0 %v15190_v40  ;;  %1957 = vperm.xlu0 %14472, %v14634_v3   ;;  %v19657_v40 = vand.u32 4294901760, %v19633_v50 }
  0xa2   :  { %14420 = vset.pattern.permute.xlu1 %v19646_v24  ;;  %10941 = vmatprep.mubr.f32.mxu0 %v19654_v45  ;;  %v19661_v45 = vand.u32 4294901760, %v19638_v17  ;;  %v19664_v17 = vand.u32 4294901760, %v15131_v34  ;;  %v19669_v34 = vand.u32 4294901760, %v15207_v1 }
  0xa3   :  { %1860 = vperm.xlu1 %14420, %v15255_v62   ;;  %12762 = vmatprep.subr.bf16.mxu0 %v19655_v27  ;;  %v15418_v56 = vpop.permute.xlu1 %1403 }
  0xa4   :  { %10942 = vmatmul.mubr.f32.gmra.mrb[4].mxu0 %v19656_v14  ;;  %v15422_v3 = vpop.permute.xlu0 %1872 }
  0xa5   :  { %12764 = vmatpush3.bf16.msra.mxu0 %v19655_v27  ;;  %1963 = vperm.xlu0 %14472, %v14647_v6   ;;  %v19659_v6 = vand.u32 4294901760, %v19636_v51  ;;  %v19663_v27 = vand.u32 4294901760, %v19641_v38  ;;  %v19666_v38 = vand.u32 4294901760, %v15166_v63  ;;  %v19670_v63 = vld [vmem:[#allocation43_spill] sm:$0xff] }
  0xa6   :  { %10944 = vmatprep.mubr.f32.mxu0 %v19657_v40  ;;  %12766 = vmatprep.subr.bf16.mxu0 %v15202_v36  ;;  %v1394_v40 = vlaneseq }
  0xa7   :  { %14421 = vset.pattern.permute.xlu1 %v19612_v46 }
  0xa8   :  { %1421 = vperm.xlu1 %14421, %v14723_v32   ;;  %10945 = vmatmul.mubr.f32.gmra.mrb[6].mxu0 %v19658_v0  ;;  %v15433_v26 = vpop.permute.xlu1 %1515  ;;  %v19668_v0 = vmov 7  }
  0xa9   :  { %12768 = vmatpush3.bf16.msra.mxu0 %v15202_v36  ;;  %1978 = vperm.xlu0 %14472, %v15142_v20   ;;  %v1398_v50 = vpop.permute.xlu0 %1397  ;;  %v19662_v36 = vand.u32 4294901760, %v19639_v16  ;;  %v19665_v16 = vld [vmem:[#allocation42_spill] sm:$0xff] }
  0xaa   :  { %10947 = vmatprep.mubr.f32.mxu0 %v19659_v6  ;;  %12770 = vmatprep.subr.bf16.mxu0 %v15213_v41 }
  0xac   :  { %14422 = vset.pattern.permute.xlu1 %v19660_v49  ;;  %10948 = vmatmul.mubr.f32.gmra.mrb[8].mxu0 %v19661_v45 }
  0xad   :  { %1751 = vperm.xlu1 %14422, %v19620_v7   ;;  %12772 = vmatpush3.bf16.msra.mxu0 %v15213_v41  ;;  %v15446_v44 = vpop.permute.xlu1 %1406  ;;  %v15448_v51 = vpop.permute.xlu0 %1409 }
  0xae   :  { %1981 = vperm.xlu0 %14472, %v14723_v32   ;;  %10950 = vmatprep.mubr.f32.mxu0 %v19662_v36 }
  0xaf   :  { %12774 = vmatprep.subr.bf16.mxu0 %v15219_v39 }
  0xb0   :  { %10951 = vmatmul.mubr.f32.gmra.mrb[10].mxu0 %v19663_v27  ;;  %v19228_v27 = vmov 0.0  }
  0xb1   :  { %14423 = vset.pattern.permute.xlu1 %v19653_v29  ;;  %12776 = vmatpush3.bf16.msra.mxu0 %v15219_v39  ;;  %v15457_v41 = vpop.permute.xlu0 %1415  ;;  %v19667_v39 = vand.u32 4294901760, %v15173_v54  ;;  %v15482_v54 = vand.u32 127, %v1394_v40 }
  0xb2   :  { %1999 = vperm.xlu0 %14472, %v15247_v25   ;;  %1969 = vperm.xlu1 %14423, %v14872_v60   ;;  %v15462_v14 = vpop.permute.xlu1 %1518 }
  0xb3   :  { %10953 = vmatprep.mubr.f32.mxu0 %v19664_v17  ;;  %12778 = vmatprep.subr.bf16.mxu0 %v19665_v16  ;;  %19671 = vst [vmem:[#allocation37_spill] sm:$0xff] %v15482_v54  ;;  %vm1444_vm0 = vcmp.eq.s32.totalorder %v1398_v50, %v15482_v54  ;;  %vm1668_vm1 = vcmp.eq.s32.totalorder %v15402_v55, %v15482_v54 }
  0xb4   :  { %10954 = vmatmul.mubr.f32.gmra.mrb[12].mxu0 %v19666_v38  ;;  %v9294_v17 = vsel %vm1444_vm0, 1.0, %v19228_v27  ;;  %v9326_v55 = vsel %vm1668_vm1, 1.0, %v19228_v27  ;;  %vm1557_vm4 = vcmp.eq.s32.totalorder %v15388_v22, %v15482_v54  ;;  %vm1559_vm8 = vcmp.eq.s32.totalorder %v15462_v14, %v15482_v54 }
  0xb5   :  { %12780 = vmatpush3.bf16.msra.mxu0 %v19665_v16  ;;  %10956 = vmatprep.mubr.f32.mxu0 %v19667_v39  ;;  %v15471_v6 = vpop.permute.xlu0 %1430  ;;  %vm1447_vm9 = vcmp.eq.s32.totalorder %v15446_v44, %v15482_v54  ;;  %vm1895_vm12 = vcmp.eq.s32.totalorder %v15396_v53, %v15482_v54 }
  0xb6   :  { %14474 = vset.pattern.permute.xlu0 %v19668_v0  ;;  %14424 = vset.pattern.permute.xlu1 %v19612_v46  ;;  %v9297_v14 = vsel %vm1447_vm9, 1.0, %v19228_v27 }
  0xb7   :  { %2184 = vperm.xlu0 %14474, %v14629_v2   ;;  %1424 = vperm.xlu1 %14424, %v19622_v4   ;;  %v15478_v45 = vpop.permute.xlu1 %1627  ;;  %v14493_v2 = vld [vmem:[%s19107_s1 + $0x10] sm:$0xff] }
  0xb8   :  { %10957 = vmatmul.mubr.f32.gmra.mrb[14].mxu0 %v19669_v34  ;;  %12782 = vmatprep.subr.bf16.mxu0 %v19670_v63 }
  0xb9   :  { %12784 = vmatpush3.bf16.msra.mxu0 %v19670_v63  ;;  %10991 = vmatprep.mubr.f32.mxu0 %v14717_v30  ;;  %v15485_v36 = vpop.permute.xlu0 %1433 }
  0xba   :  { %12786 = vmatprep.subr.bf16.mxu0 %v19624_v19 }
  0xbb   :  { %2187 = vperm.xlu0 %14474, %v14493_v2   ;;  %14425 = vset.pattern.permute.xlu1 %v19553_v12  ;;  %v15494_v1 = vpop.permute.xlu1 %1630 }
  0xbc   :  { %1536 = vperm.xlu1 %14425, %v19622_v4   ;;  %10992 = vmatmul.mubr.f32.vlgmr.msra.gmra.mrb[0].mxu0 %v14725_v33  ;;  %vm1671_vm10 = vcmp.eq.s32.totalorder %v15494_v1, %v15482_v54 }
  0xbd   :  { %12788 = vmatpush3.bf16.msra.mxu0 %v19624_v19  ;;  %10994 = vmatprep.mubr.f32.mxu0 %v14771_v47  ;;  %v9329_v44 = vsel %vm1671_vm10, 1.0, %v19228_v27 }
  0xbe   :  { %12790 = vmatprep.subr.bf16.mxu0 %v19628_v18  ;;  %v1510_v16 = vpop.permute.xlu0 %1509 }
  0xbf   :  { %2202 = vperm.xlu0 %14474, %v15142_v20   ;;  %vm1556_vm2 = vcmp.eq.s32.totalorder %v1510_v16, %v15482_v54 }
  0xc0   :  { %14426 = vset.pattern.permute.xlu1 %v19653_v29  ;;  %10995 = vmatmul.mubr.f32.gmra.mrb[2].mxu0 %v14773_v48  ;;  %v9310_v4 = vsel %vm1556_vm2, 1.0, %v19228_v27  ;;  %v15509_v19 = vpop.permute.xlu1 %1848 }
  0xc1   :  { %1972 = vperm.xlu1 %14426, %v15255_v62   ;;  %12792 = vmatpush3.bf16.msra.mxu0 %v19628_v18  ;;  %v1604_v50 = vadd.f32 %v9310_v4, %v9294_v17  ;;  %v14494_v18 = vld [vmem:[%s19107_s1 + $0x18] sm:$0xff]  ;;  %v19674_v4 = vld [vmem:[#allocation39_spill] sm:$0xff] }
  0xc2   :  { %10997 = vmatprep.mubr.f32.mxu0 %v14832_v11  ;;  %12794 = vmatprep.subr.bf16.mxu0 %v19631_v42  ;;  %v15515_v38 = vpop.permute.xlu0 %1530 }
  0xc3   :  { %2205 = vperm.xlu0 %14474, %v14723_v32   ;;  %v1716_v39 = vadd.f32 %v9326_v55, %v1604_v50  ;;  %v15529_v32 = vld [vmem:[%s19107_s1 + $0x50] sm:$0xff]  ;;  %vm1563_vm15 = vcmp.eq.s32.totalorder %v15515_v38, %v15482_v54 }
  0xc4   :  { %10998 = vmatmul.mubr.f32.gmra.mrb[4].mxu0 %v14866_v59  ;;  %v19675_v55 = vld [vmem:[#allocation40_spill] sm:$0xff] }
  0xc5   :  { %14427 = vset.pattern.permute.xlu1 %v19668_v0  ;;  %12796 = vmatpush3.bf16.msra.mxu0 %v19631_v42  ;;  %v15524_v40 = vpop.permute.xlu1 %1521 }
  0xc6   :  { %2190 = vperm.xlu1 %14427, %v14494_v18   ;;  %11000 = vmatprep.mubr.f32.mxu0 %v14900_v9  ;;  %v15532_v34 = vpop.permute.xlu0 %1533 }
  0xc7   :  { %12798 = vmatprep.subr.bf16.mxu0 %v19634_v43  ;;  %2211 = vperm.xlu0 %14474, %v15529_v32  }
  0xc8   :  { %11001 = vmatmul.mubr.f32.gmra.mrb[6].mxu0 %v14951_v35 }
  0xc9   :  { %12800 = vmatpush3.bf16.msra.mxu0 %v19634_v43  ;;  %11003 = vmatprep.mubr.f32.mxu0 %v19613_v52  ;;  %v19672_v43 = vmov 6  }
  0xca   :  { %14428 = vset.pattern.permute.xlu1 %v19646_v24  ;;  %12802 = vmatprep.subr.bf16.mxu0 %v19637_v8  ;;  %v15541_v42 = vpop.permute.xlu0 %1548 }
  0xcb   :  { %1863 = vperm.xlu1 %14428, %v19620_v7   ;;  %2214 = vperm.xlu0 %14474, %v19647_v58  }
  0xcc   :  { %11004 = vmatmul.mubr.f32.gmra.mrb[8].mxu0 %v19614_v57 }
  0xcd   :  { %v15545_v63 = vpop.permute.xlu1 %1739  ;;  %12804 = vmatpush3.bf16.msra.mxu0 %v19637_v8  ;;  %11006 = vmatprep.mubr.f32.mxu0 %v19615_v37  ;;  %v19673_v8 = vld [vmem:[#allocation38_spill] sm:$0xff] }
  0xce   :  { %12806 = vmatprep.subr.bf16.mxu0 %v19640_v31  ;;  %v15551_v2 = vpop.permute.xlu0 %1551 }
  0xcf   :  { %14429 = vset.pattern.permute.xlu1 %v19672_v43  ;;  %2220 = vperm.xlu0 %14474, %v15229_v10  }
  0xd0   :  { %2081 = vperm.xlu1 %14429, %v14872_v60   ;;  %11007 = vmatmul.mubr.f32.gmra.mrb[10].mxu0 %v19617_v13 }
  0xd1   :  { %12808 = vmatpush3.bf16.msra.mxu0 %v19640_v31  ;;  %11009 = vmatprep.mubr.f32.mxu0 %v19618_v23 }
  0xd2   :  { %v15557_v17 = vpop.permute.xlu1 %1412  ;;  %12810 = vmatprep.subr.bf16.mxu0 %v19642_v15 }
  0xd3   :  { %2223 = vperm.xlu0 %14474, %v15247_v25  }
  0xd4   :  { %14430 = vset.pattern.permute.xlu1 %v19646_v24  ;;  %11010 = vmatmul.mubr.f32.gmra.mrb[12].mxu0 %v19673_v8  ;;  %v1734_v16 = vpop.permute.xlu0 %1733 }
  0xd5   :  { %1866 = vperm.xlu1 %14430, %v15142_v20   ;;  %12812 = vmatpush3.bf16.msra.mxu0 %v19642_v15  ;;  %vm1780_vm3 = vcmp.eq.s32.totalorder %v1734_v16, %v15482_v54 }
  0xd6   :  { %v9342_v60 = vsel %vm1780_vm3, 1.0, %v19228_v27  ;;  %11012 = vmatprep.mubr.f32.mxu0 %v19674_v4  ;;  %12814 = vmatprep.subr.bf16.mxu0 %v19645_v61 }
  0xd7   :  { %v15568_v31 = vpop.permute.xlu1 %1524  ;;  %v15572_v50 = vadd.f32 %v9342_v60, %v1716_v39  ;;  %14479 = vset.pattern.permute.xlu0 %v19612_v46 }
  0xd8   :  { %11013 = vmatmul.mubr.f32.gmra.mrb[14].mxu0 %v19675_v55  ;;  %v1737_v18 = vpop.permute.xlu0 %1736 }
  0xd9   :  { %14431 = vset.pattern.permute.xlu1 %v19612_v46  ;;  %12816 = vmatpush3.bf16.msra.mxu0 %v19645_v61  ;;  %vm1781_vm6 = vcmp.eq.s32.totalorder %v1737_v18, %v15482_v54 }
  0xda   :  { %1427 = vperm.xlu1 %14431, %v15529_v32   ;;  %11047 = vmatprep.mubr.f32.mxu0 %v14717_v30 }
  0xdc   :  { %v15580_v15 = vpop.permute.xlu1 %1960  ;;  %11048 = vmatmul.mubr.f32.vlgmr.msra.gmra.mrb[0].mxu0 %v14725_v33  ;;  %v15583_v16 = vpop.permute.xlu0 %1742 }
  0xdd   :  { %11050 = vmatprep.mubr.f32.mxu0 %v14771_v47  ;;  %vm1783_vm11 = vcmp.eq.s32.totalorder %v15583_v16, %v15482_v54 }
  0xde   :  { %14432 = vset.pattern.permute.xlu1 %v19553_v12  ;;  %v9345_v1 = vsel %vm1783_vm11, 1.0, %v19228_v27  ;;  %vm1900_vm11 = vcmp.eq.s32.totalorder %v15409_v28, %v15482_v54 }
  0xdf   :  { %1539 = vperm.xlu1 %14432, %v15529_v32  }
  0xe0   :  { %11051 = vmatmul.mubr.f32.gmra.mrb[2].mxu0 %v14773_v48  ;;  %v15591_v61 = vpop.permute.xlu0 %1754  ;;  %v14495_v48 = vld [vmem:[%s19107_s1 + $0x20] sm:$0xff] }
  0xe1   :  { %v15589_v39 = vpop.permute.xlu1 %1633  ;;  %11053 = vmatprep.mubr.f32.mxu0 %v14832_v11  ;;  %v9311_v11 = vsel %vm1557_vm4, 1.0, %v19228_v27  ;;  %vm1787_vm2 = vcmp.eq.s32.totalorder %v15591_v61, %v15482_v54 }
  0xe3   :  { %14433 = vset.pattern.permute.xlu1 %v19653_v29 }
  0xe4   :  { %1975 = vperm.xlu1 %14433, %v19620_v7   ;;  %11054 = vmatmul.mubr.f32.gmra.mrb[4].mxu0 %v14866_v59  ;;  %v15597_v30 = vpop.permute.xlu0 %1757  ;;  %v19677_v59 = vld [vmem:[#allocation26_spill] sm:$0xff] }
  0xe5   :  { %11056 = vmatprep.mubr.f32.mxu0 %v14900_v9  ;;  %vm1445_vm5 = vcmp.eq.s32.totalorder %v19677_v59, %v15482_v54  ;;  %vm1788_vm9 = vcmp.eq.s32.totalorder %v15597_v30, %v15482_v54 }
  0xe6   :  { %v15599_v33 = vpop.permute.xlu1 %2069  ;;  %v9350_v30 = vsel %vm1788_vm9, 1.0, %v19228_v27 }
  0xe7   :  { %vm2116_vm4 = vcmp.eq.s32.totalorder %v15599_v33, %v15482_v54 }
  0xe8   :  { %14434 = vset.pattern.permute.xlu1 %v19668_v0  ;;  %11057 = vmatmul.mubr.f32.gmra.mrb[6].mxu0 %v14951_v35  ;;  %v15606_v47 = vpop.permute.xlu0 %1772  ;;  %v9295_v35 = vsel %vm1445_vm5, 1.0, %v19228_v27 }
  0xe9   :  { %19676 = vst [vmem:[#allocation32_spill] sm:$0xff] %v15606_v47  ;;  %2193 = vperm.xlu1 %14434, %v14495_v48   ;;  %11059 = vmatprep.mubr.f32.mxu0 %v19613_v52  ;;  %v1605_v22 = vadd.f32 %v9311_v11, %v9295_v35  ;;  %v9343_v52 = vsel %vm1781_vm6, 1.0, %v19228_v27 }
  0xeb   :  { %v15614_v9 = vpop.permute.xlu1 %1636 }
  0xec   :  { %11060 = vmatmul.mubr.f32.gmra.mrb[8].mxu0 %v19614_v57 }
  0xed   :  { %14435 = vset.pattern.permute.xlu1 %v19553_v12  ;;  %v1625_v7 = vpop.permute.xlu0 %1624  ;;  %11062 = vmatprep.mubr.f32.mxu0 %v19615_v37 }
  0xee   :  { %1542 = vperm.xlu1 %14435, %v19647_v58   ;;  %vm1669_vm7 = vcmp.eq.s32.totalorder %v1625_v7, %v15482_v54  ;;  %v15638_v58 = vld [vmem:[%s19107_s1 + $0x48] sm:$0xff] }
  0xef   :  { %v9327_v60 = vsel %vm1669_vm7, 1.0, %v19228_v27  ;;  %vm1564_vm7 = vcmp.eq.s32.totalorder %v15532_v34, %v15482_v54 }
  0xf0   :  { %v15626_v48 = vpop.permute.xlu1 %2072  ;;  %v1717_v18 = vadd.f32 %v9327_v60, %v1605_v22  ;;  %11063 = vmatmul.mubr.f32.gmra.mrb[10].mxu0 %v19617_v13 }
  0xf1   :  { %11065 = vmatprep.mubr.f32.mxu0 %v19618_v23  ;;  %v15630_v57 = vpop.permute.xlu0 %1645 }
  0xf2   :  { %v15632_v59 = vadd.f32 %v9343_v52, %v1717_v18  ;;  %14436 = vset.pattern.permute.xlu1 %v19660_v49  ;;  %v15682_v52 = vld [vmem:[%s19107_s1 + $0x58] sm:$0xff] }
  0xf3   :  { %1760 = vperm.xlu1 %14436, %v15638_v58  }
  0xf4   :  { %11066 = vmatmul.mubr.f32.gmra.mrb[12].mxu0 %v19673_v8 }
  0xf5   :  { %v15642_v37 = vpop.permute.xlu1 %1527  ;;  %11068 = vmatprep.mubr.f32.mxu0 %v19674_v4  ;;  %v15645_v13 = vpop.permute.xlu0 %1648  ;;  %v9313_v4 = vsel %vm1559_vm8, 1.0, %v19228_v27  ;;  %vm1676_vm8 = vcmp.eq.s32.totalorder %v15630_v57, %v15482_v54 }
  0xf6   :  { %v1607_v22 = vadd.f32 %v9313_v4, %v9297_v14  ;;  %v9361_v4 = vsel %vm1895_vm12, 1.0, %v19228_v27 }
  0xf7   :  { %14437 = vset.pattern.permute.xlu1 %v19668_v0 }
  0xf8   :  { %2196 = vperm.xlu1 %14437, %v15255_v62   ;;  %11069 = vmatmul.mubr.f32.gmra.mrb[14].mxu0 %v19675_v55  ;;  %v14497_v62 = vld [vmem:[%s19107_s1 + $0x30] sm:$0xff]  ;;  %v1719_v16 = vadd.f32 %v9329_v44, %v1607_v22 }
  0xf9   :  { %v15652_v11 = vpop.permute.xlu0 %1663 }
  0xfa   :  { %v15650_v23 = vpop.permute.xlu1 %1745  ;;  %19678 = vst [vmem:[#allocation36_spill] sm:$0xff] %v15652_v11 }
  0xfc   :  { %14438 = vset.pattern.permute.xlu1 %v19568_v21 }
  0xfd   :  { %1651 = vperm.xlu1 %14438, %v15529_v32   ;;  %v15656_v8 = vpop.permute.xlu0 %1666 }
  0xfe   :  { %19679 = vst [vmem:[#allocation23_spill] sm:$0xff] %v15656_v8  ;;  %v1831_v8 = vadd.f32 %v9345_v1, %v1719_v16  ;;  %v15704_v16 = vld [vmem:[%s19107_s1 + $0x60] sm:$0xff] }
  0xff   :  { %v15658_v35 = vpop.permute.xlu1 %2181 }
 0x100   :  { %v1943_v47 = vadd.f32 %v9361_v4, %v1831_v8  ;;  %v19683_v4 = vld [vmem:[#allocation31_spill] sm:$0xff]  ;;  %vm2228_vm6 = vcmp.eq.s32.totalorder %v15658_v35, %v15482_v54  ;;  %v9318_v35 = vsel %vm1564_vm7, 1.0, %v19228_v27 }
 0x101   :  { %14439 = vset.pattern.permute.xlu1 %v19672_v43  ;;  %vm1892_vm1 = vcmp.eq.s32.totalorder %v19683_v4, %v15482_v54 }
 0x102   :  { %2087 = vperm.xlu1 %14439, %v14497_v62   ;;  %v15671_v7 = vpop.permute.xlu0 %2075  ;;  %v9358_v38 = vsel %vm1892_vm1, 1.0, %v19228_v27 }
 0x103   :  { %v1940_v61 = vadd.f32 %v9358_v38, %v15572_v50 }
 0x104   :  { %v1419_v55 = vpop.permute.xlu1 %1418 }
 0x105   :  { %vm1451_vm0 = vcmp.eq.s32.totalorder %v1419_v55, %v15482_v54  ;;  %v9349_v55 = vsel %vm1787_vm2, 1.0, %v19228_v27  ;;  %vm1455_vm2 = vcmp.eq.s32.totalorder %v15471_v6, %v15482_v54 }
 0x106   :  { %14440 = vset.pattern.permute.xlu1 %v19568_v21  ;;  %v2079_v60 = vpop.permute.xlu0 %2078  ;;  %v9305_v6 = vsel %vm1455_vm2, 1.0, %v19228_v27  ;;  %vm1894_vm2 = vcmp.eq.s32.totalorder %v15386_v5, %v15482_v54 }
 0x107   :  { %1654 = vperm.xlu1 %14440, %v15682_v52   ;;  %vm2119_vm13 = vcmp.eq.s32.totalorder %v2079_v60, %v15482_v54 }
 0x108   :  { %v9393_v53 = vsel %vm2119_vm13, 1.0, %v19228_v27 }
 0x109   :  { %v15687_v18 = vpop.permute.xlu1 %1748 }
 0x10a   :  { %v15691_v14 = vpop.permute.xlu0 %2084 }
 0x10b   :  { %14442 = vset.pattern.permute.xlu1 %v19672_v43  ;;  %vm2121_vm9 = vcmp.eq.s32.totalorder %v15691_v14, %v15482_v54  ;;  %v15885_v14 = vld [vmem:[%s19107_s1 + $0x70] sm:$0xff] }
 0x10c   :  { %2090 = vperm.xlu1 %14442, %v15142_v20  }
 0x10e   :  { %v1967_v11 = vpop.permute.xlu1 %1966 }
 0x10f   :  { %vm2007_vm14 = vcmp.eq.s32.totalorder %v1967_v11, %v15482_v54  ;;  %v15698_v22 = vpop.permute.xlu0 %2093 }
 0x110   :  { %v9377_v44 = vsel %vm2007_vm14, 1.0, %v19228_v27  ;;  %14444 = vset.pattern.permute.xlu1 %v19553_v12  ;;  %vm2124_vm12 = vcmp.eq.s32.totalorder %v15698_v22, %v15482_v54  ;;  %vm1561_vm14 = vcmp.eq.s32.totalorder %v15568_v31, %v15482_v54 }
 0x111   :  { %v2055_v1 = vadd.f32 %v9377_v44, %v1943_v47  ;;  %1545 = vperm.xlu1 %14444, %v15704_v16   ;;  %v9301_v44 = vsel %vm1451_vm0, 1.0, %v19228_v27  ;;  %vm1673_vm0 = vcmp.eq.s32.totalorder %v15614_v9, %v15482_v54 }
 0x113   :  { %v15707_v20 = vpop.permute.xlu1 %1639  ;;  %v15709_v8 = vadd.f32 %v9393_v53, %v2055_v1  ;;  %v15711_v11 = vpop.permute.xlu0 %2096  ;;  %v9317_v53 = vsel %vm1563_vm15, 1.0, %v19228_v27  ;;  %vm1449_vm15 = vcmp.eq.s32.totalorder %v15557_v17, %v15482_v54  ;;  %v9331_v17 = vsel %vm1673_vm0, 1.0, %v19228_v27 }
 0x114   :  { %19680 = vst [vmem:[#allocation13_spill] sm:$0xff] %v15707_v20  ;;  %19681 = vst [vmem:[#allocation11_spill] sm:$0xff] %v15711_v11  ;;  %v1611_v11 = vadd.f32 %v9317_v53, %v9301_v44  ;;  %v9299_v31 = vsel %vm1449_vm15, 1.0, %v19228_v27  ;;  %vm1670_vm15 = vcmp.eq.s32.totalorder %v15478_v45, %v15482_v54  ;;  %vm1782_vm0 = vcmp.eq.s32.totalorder %v15545_v63, %v15482_v54 }
 0x115   :  { %14445 = vset.pattern.permute.xlu1 %v19660_v49  ;;  %v9344_v45 = vsel %vm1782_vm0, 1.0, %v19228_v27 }
 0x116   :  { %1763 = vperm.xlu1 %14445, %v15529_v32  }
 0x117   :  { %v15717_v60 = vpop.permute.xlu0 %2102 }
 0x118   :  { %v15715_v47 = vpop.permute.xlu1 %1857  ;;  %19682 = vst [vmem:[#allocation8_spill] sm:$0xff] %v15717_v60 }
 0x11a   :  { %14446 = vset.pattern.permute.xlu1 %v19668_v0 }
 0x11b   :  { %2199 = vperm.xlu1 %14446, %v14497_v62   ;;  %v15727_v1 = vpop.permute.xlu0 %2105 }
 0x11c   :  { %19684 = vst [vmem:[#allocation14_spill] sm:$0xff] %v15727_v1 }
 0x11d   :  { %v1643_v60 = vpop.permute.xlu1 %1642 }
 0x11e   :  { %vm1675_vm3 = vcmp.eq.s32.totalorder %v1643_v60, %v15482_v54 }
 0x11f   :  { %v9333_v4 = vsel %vm1675_vm3, 1.0, %v19228_v27  ;;  %14447 = vset.pattern.permute.xlu1 %v19612_v46  ;;  %vm1785_vm3 = vcmp.eq.s32.totalorder %v15687_v18, %v15482_v54 }
 0x120   :  { %v1723_v20 = vadd.f32 %v9333_v4, %v1611_v11  ;;  %1436 = vperm.xlu1 %14447, %v15229_v10   ;;  %v1958_v62 = vpop.permute.xlu0 %1957  ;;  %v9390_v4 = vsel %vm2116_vm4, 1.0, %v19228_v27  ;;  %v9347_v18 = vsel %vm1785_vm3, 1.0, %v19228_v27  ;;  %vm1893_vm3 = vcmp.eq.s32.totalorder %v15509_v19, %v15482_v54 }
 0x121   :  { %vm2004_vm5 = vcmp.eq.s32.totalorder %v1958_v62, %v15482_v54  ;;  %v9334_v62 = vsel %vm1676_vm8, 1.0, %v19228_v27 }
 0x122   :  { %v9374_v53 = vsel %vm2004_vm5, 1.0, %v19228_v27  ;;  %v15742_v60 = vpop.permute.xlu1 %1860  ;;  %v15744_v44 = vadd.f32 %v9349_v55, %v1723_v20  ;;  %v9406_v20 = vsel %vm2228_vm6, 1.0, %v19228_v27  ;;  %vm1677_vm6 = vcmp.eq.s32.totalorder %v15645_v13, %v15482_v54 }
 0x123   :  { %v2052_v11 = vadd.f32 %v9374_v53, %v1940_v61  ;;  %vm1897_vm5 = vcmp.eq.s32.totalorder %v15742_v60, %v15482_v54 }
 0x124   :  { %14448 = vset.pattern.permute.xlu1 %v19660_v49  ;;  %v15752_v50 = vpop.permute.xlu0 %1963 }
 0x125   :  { %v2164_v33 = vadd.f32 %v9390_v4, %v2052_v11  ;;  %1766 = vperm.xlu1 %14448, %v15682_v52  }
 0x127   :  { %v2276_v38 = vadd.f32 %v9406_v20, %v2164_v33  ;;  %v1422_v55 = vpop.permute.xlu1 %1421  ;;  %v9366_v20 = vsel %vm1900_vm11, 1.0, %v19228_v27 }
 0x128   :  { %vm1452_vm10 = vcmp.eq.s32.totalorder %v1422_v55, %v15482_v54  ;;  %v15762_v34 = vpop.permute.xlu0 %1978 }
 0x129   :  { %v15765_v61 = vand.u32 4294901760, %v2276_v38  ;;  %v9302_v53 = vsel %vm1452_vm10, 1.0, %v19228_v27  ;;  %14449 = vset.pattern.permute.xlu1 %v19653_v29  ;;  %vm1901_vm10 = vcmp.eq.s32.totalorder %v15422_v3, %v15482_v54 }
 0x12a   :  { %v1612_v57 = vadd.f32 %v9318_v35, %v9302_v53  ;;  %1984 = vperm.xlu1 %14449, %v15638_v58   ;;  %v9398_v53 = vsel %vm2124_vm12, 1.0, %v19228_v27  ;;  %v9367_v3 = vsel %vm1901_vm10, 1.0, %v19228_v27 }
 0x12b   :  { %19685 = vst [vmem:[#allocation16_spill] sm:$0xff] %v15765_v61  ;;  %v15774_v11 = vsub.f32 %v2276_v38, %v15765_v61 }
 0x12c   :  { %v1724_v4 = vadd.f32 %v9334_v62, %v1612_v57  ;;  %v15776_v33 = vpop.permute.xlu1 %1751 }
 0x12d   :  { %19686 = vst [vmem:[#allocation9_spill] sm:$0xff] %v15774_v11  ;;  %v1982_v55 = vpop.permute.xlu0 %1981  ;;  %v15780_v1 = vand.u32 4294901760, %v15774_v11 }
 0x12e   :  { %v1836_v28 = vadd.f32 %v9350_v30, %v1724_v4  ;;  %vm2012_vm13 = vcmp.eq.s32.totalorder %v1982_v55, %v15482_v54  ;;  %14450 = vset.pattern.permute.xlu1 %v19568_v21 }
 0x12f   :  { %19687 = vst [vmem:[#allocation17_spill] sm:$0xff] %v15780_v1  ;;  %v9382_v35 = vsel %vm2012_vm13, 1.0, %v19228_v27  ;;  %1657 = vperm.xlu1 %14450, %v15704_v16   ;;  %v2392_v38 = vsub.f32 %v15774_v11, %v15780_v1  ;;  %vm1558_vm13 = vcmp.eq.s32.totalorder %v15433_v26, %v15482_v54 }
 0x130   :  { %v1948_v62 = vadd.f32 %v9366_v20, %v1836_v28 }
 0x131   :  { %v15791_v57 = vpop.permute.xlu1 %1969  ;;  %v15793_v61 = vand.u32 4294901760, %v2392_v38  ;;  %v19689_v38 = vld [vmem:[#allocation25_spill] sm:$0xff] }
 0x132   :  { %v2060_v22 = vadd.f32 %v9382_v35, %v1948_v62 }
 0x133   :  { %19688 = vst [vmem:[#allocation20_spill] sm:$0xff] %v15793_v61  ;;  %14451 = vset.pattern.permute.xlu1 %v19646_v24  ;;  %11103 = vmatprep.mubr.f32.mxu1 %v15793_v61 }
 0x134   :  { %1875 = vperm.xlu1 %14451, %v15529_v32   ;;  %v15798_v30 = vadd.f32 %v9398_v53, %v2060_v22 }
 0x136   :  { %v1425_v4 = vpop.permute.xlu1 %1424 }
 0x137   :  { %vm1453_vm4 = vcmp.eq.s32.totalorder %v1425_v4, %v15482_v54  ;;  %v9335_v4 = vsel %vm1677_vm6, 1.0, %v19228_v27  ;;  %vm2005_vm6 = vcmp.eq.s32.totalorder %v15580_v15, %v15482_v54 }
 0x138   :  { %14452 = vset.pattern.permute.xlu1 %v19568_v21  ;;  %v9315_v21 = vsel %vm1561_vm14, 1.0, %v19228_v27  ;;  %v9303_v61 = vsel %vm1453_vm4, 1.0, %v19228_v27  ;;  %vm1446_vm14 = vcmp.eq.s32.totalorder %v15418_v56, %v15482_v54  ;;  %vm1456_vm4 = vcmp.eq.s32.totalorder %v15485_v36, %v15482_v54 }
 0x139   :  { %1660 = vperm.xlu1 %14452, %v15229_v10   ;;  %v1609_v9 = vadd.f32 %v9315_v21, %v9299_v31  ;;  %v9363_v21 = vsel %vm1897_vm5, 1.0, %v19228_v27  ;;  %v9296_v26 = vsel %vm1446_vm14, 1.0, %v19228_v27  ;;  %vm2006_vm5 = vcmp.eq.s32.totalorder %v15752_v50, %v15482_v54 }
 0x13a   :  { %v9306_v36 = vsel %vm1456_vm4, 1.0, %v19228_v27  ;;  %v9376_v19 = vsel %vm2006_vm5, 1.0, %v19228_v27  ;;  %v9375_v50 = vsel %vm2005_vm6, 1.0, %v19228_v27  ;;  %vm1896_vm4 = vcmp.eq.s32.totalorder %v15715_v47, %v15482_v54 }
 0x13b   :  { %v1537_v20 = vpop.permute.xlu1 %1536  ;;  %vm1450_vm6 = vcmp.eq.s32.totalorder %v15457_v41, %v15482_v54  ;;  %v16018_v41 = vld [vmem:[%s19107_s1 + $0x78] sm:$0xff] }
 0x13c   :  { %vm1565_vm1 = vcmp.eq.s32.totalorder %v1537_v20, %v15482_v54 }
 0x13d   :  { %14453 = vset.pattern.permute.xlu1 %v19646_v24 }
 0x13e   :  { %1878 = vperm.xlu1 %14453, %v15682_v52  }
 0x140   :  { %v1973_v55 = vpop.permute.xlu1 %1972 }
 0x141   :  { %vm2009_vm7 = vcmp.eq.s32.totalorder %v1973_v55, %v15482_v54 }
 0x142   :  { %14454 = vset.pattern.permute.xlu1 %v19612_v46  ;;  %v9379_v55 = vsel %vm2009_vm7, 1.0, %v19228_v27 }
 0x143   :  { %1439 = vperm.xlu1 %14454, %v15247_v25  }
 0x145   :  { %v15806_v28 = vpop.permute.xlu1 %2190 }
 0x146   :  { %vm2231_vm5 = vcmp.eq.s32.totalorder %v15806_v28, %v15482_v54 }
 0x147   :  { %14456 = vset.pattern.permute.xlu1 %v19660_v49  ;;  %v9409_v28 = vsel %vm2231_vm5, 1.0, %v19228_v27 }
 0x148   :  { %1769 = vperm.xlu1 %14456, %v15704_v16  }
 0x14a   :  { %v15810_v35 = vpop.permute.xlu1 %1863 }
 0x14c   :  { %14457 = vset.pattern.permute.xlu1 %v19653_v29 }
 0x14d   :  { %1987 = vperm.xlu1 %14457, %v15529_v32  }
 0x14f   :  { %v15814_v10 = vpop.permute.xlu1 %2081 }
 0x151   :  { %14458 = vset.pattern.permute.xlu1 %v19612_v46  ;;  %v1721_v46 = vadd.f32 %v9331_v17, %v1609_v9  ;;  %v15870_v17 = vld [vmem:[%s19107_s1 + $0x68] sm:$0xff] }
 0x152   :  { %1442 = vperm.xlu1 %14458, %v19689_v38  }
 0x153   :  { %v1833_v13 = vadd.f32 %v9347_v18, %v1721_v46  ;;  %v9395_v18 = vsel %vm2121_vm9, 1.0, %v19228_v27  ;;  %vm1560_vm9 = vcmp.eq.s32.totalorder %v15524_v40, %v15482_v54 }
 0x154   :  { %v15818_v62 = vpop.permute.xlu1 %1866 }
 0x156   :  { %14459 = vset.pattern.permute.xlu1 %v19553_v12 }
 0x157   :  { %1554 = vperm.xlu1 %14459, %v19689_v38  }
 0x159   :  { %v15822_v25 = vpop.permute.xlu1 %1427 }
 0x15a   :  { %vm1454_vm10 = vcmp.eq.s32.totalorder %v15822_v25, %v15482_v54 }
 0x15b   :  { %14461 = vset.pattern.permute.xlu1 %v19653_v29 }
 0x15c   :  { %1990 = vperm.xlu1 %14461, %v15682_v52  }
 0x15e   :  { %v15826_v53 = vpop.permute.xlu1 %1539 }
 0x15f   :  { %vm1566_vm7 = vcmp.eq.s32.totalorder %v15826_v53, %v15482_v54 }
 0x160   :  { %14462 = vset.pattern.permute.xlu1 %v19668_v0 }
 0x161   :  { %2208 = vperm.xlu1 %14462, %v15638_v58   ;;  %v9319_v58 = vsel %vm1565_vm1, 1.0, %v19228_v27 }
 0x163   :  { %v15830_v22 = vpop.permute.xlu1 %1975 }
 0x165   :  { %14463 = vset.pattern.permute.xlu1 %v19646_v24 }
 0x166   :  { %1881 = vperm.xlu1 %14463, %v15704_v16  }
 0x168   :  { %v15840_v52 = vpop.permute.xlu1 %2193 }
 0x16a   :  { %14464 = vset.pattern.permute.xlu1 %v19672_v43 }
 0x16b   :  { %2099 = vperm.xlu1 %14464, %v15529_v32   ;;  %v1613_v32 = vadd.f32 %v9319_v58, %v9303_v61  ;;  %v1945_v61 = vadd.f32 %v9363_v21, %v1833_v13 }
 0x16d   :  { %v1543_v20 = vpop.permute.xlu1 %1542  ;;  %v1725_v58 = vadd.f32 %v9335_v4, %v1613_v32  ;;  %v2057_v46 = vadd.f32 %v9379_v55, %v1945_v61 }
 0x16e   :  { %vm1567_vm8 = vcmp.eq.s32.totalorder %v1543_v20, %v15482_v54 }
 0x16f   :  { %v9321_v60 = vsel %vm1567_vm8, 1.0, %v19228_v27  ;;  %14466 = vset.pattern.permute.xlu1 %v19646_v24  ;;  %vm1448_vm8 = vcmp.eq.s32.totalorder %v15448_v51, %v15482_v54 }
 0x170   :  { %v1615_v31 = vadd.f32 %v9321_v60, %v9305_v6  ;;  %1884 = vperm.xlu1 %14466, %v15870_v17   ;;  %v2169_v60 = vadd.f32 %v9395_v18, %v2057_v46 }
 0x172   :  { %v1761_v9 = vpop.permute.xlu1 %1760 }
 0x173   :  { %vm1789_vm11 = vcmp.eq.s32.totalorder %v1761_v9, %v15482_v54  ;;  %v15908_v9 = vpop.permute.xlu0 %1999 }
 0x174   :  { %v9351_v6 = vsel %vm1789_vm11, 1.0, %v19228_v27  ;;  %14467 = vset.pattern.permute.xlu1 %v19660_v49  ;;  %19690 = vst [vmem:[#allocation10_spill] sm:$0xff] %v15908_v9 }
 0x175   :  { %v1837_v20 = vadd.f32 %v9351_v6, %v1725_v58  ;;  %1775 = vperm.xlu1 %14467, %v15885_v14   ;;  %v9312_v58 = vsel %vm1558_vm13, 1.0, %v19228_v27  ;;  %v9328_v6 = vsel %vm1670_vm15, 1.0, %v19228_v27  ;;  %vm2118_vm13 = vcmp.eq.s32.totalorder %v15671_v7, %v15482_v54 }
 0x176   :  { %v1606_v56 = vadd.f32 %v9312_v58, %v9296_v26 }
 0x177   :  { %v2197_v21 = vpop.permute.xlu1 %2196  ;;  %v15889_v32 = vadd.f32 %v9367_v3, %v1837_v20  ;;  %v2185_v3 = vpop.permute.xlu0 %2184 }
 0x178   :  { %vm2233_vm12 = vcmp.eq.s32.totalorder %v2197_v21, %v15482_v54  ;;  %v1718_v63 = vadd.f32 %v9328_v6, %v1606_v56  ;;  %vm2229_vm15 = vcmp.eq.s32.totalorder %v2185_v3, %v15482_v54  ;;  %v9392_v6 = vsel %vm2118_vm13, 1.0, %v19228_v27 }
 0x179   :  { %v9411_v4 = vsel %vm2233_vm12, 1.0, %v19228_v27  ;;  %14468 = vset.pattern.permute.xlu1 %v19653_v29  ;;  %vm2117_vm12 = vcmp.eq.s32.totalorder %v15626_v48, %v15482_v54  ;;  %vm1899_vm13 = vcmp.eq.s32.totalorder %v15818_v62, %v15482_v54 }
 0x17a   :  { %v15894_v13 = vadd.f32 %v9411_v4, %v2169_v60  ;;  %1993 = vperm.xlu1 %14468, %v15704_v16   ;;  %v1830_v60 = vadd.f32 %v9344_v45, %v1718_v63  ;;  %v9359_v4 = vsel %vm1893_vm3, 1.0, %v19228_v27  ;;  %v9391_v45 = vsel %vm2117_vm12, 1.0, %v19228_v27 }
 0x17b   :  { %v1941_v5 = vadd.f32 %v9359_v4, %v15632_v59  ;;  %v2188_v58 = vpop.permute.xlu0 %2187  ;;  %v9407_v63 = vsel %vm2229_vm15, 1.0, %v19228_v27 }
 0x17c   :  { %v1652_v55 = vpop.permute.xlu1 %1651  ;;  %vm2230_vm0 = vcmp.eq.s32.totalorder %v2188_v58, %v15482_v54 }
 0x17d   :  { %vm1678_vm11 = vcmp.eq.s32.totalorder %v1652_v55, %v15482_v54  ;;  %v2053_v53 = vadd.f32 %v9375_v50, %v1941_v5  ;;  %v9304_v55 = vsel %vm1454_vm10, 1.0, %v19228_v27  ;;  %v9408_v3 = vsel %vm2230_vm0, 1.0, %v19228_v27 }
 0x17e   :  { %14469 = vset.pattern.permute.xlu1 %v19660_v49  ;;  %v9336_v7 = vsel %vm1678_vm11, 1.0, %v19228_v27  ;;  %vm1570_vm10 = vcmp.eq.s32.totalorder %v15551_v2, %v15482_v54  ;;  %vm2232_vm11 = vcmp.eq.s32.totalorder %v15840_v52, %v15482_v54 }
 0x17f   :  { %1778 = vperm.xlu1 %14469, %v19689_v38   ;;  %v15985_v51 = vpop.permute.xlu0 %2202  ;;  %v9410_v62 = vsel %vm2232_vm11, 1.0, %v19228_v27  ;;  %vm2010_vm11 = vcmp.eq.s32.totalorder %v15830_v22, %v15482_v54 }
 0x181   :  { %v15899_v61 = vpop.permute.xlu1 %2087 }
 0x183   :  { %14470 = vset.pattern.permute.xlu1 %v19653_v29 }
 0x184   :  { %1996 = vperm.xlu1 %14470, %v15870_v17  }
 0x186   :  { %v1655_v46 = vpop.permute.xlu1 %1654 }
 0x187   :  { %vm1679_vm1 = vcmp.eq.s32.totalorder %v1655_v46, %v15482_v54 }
 0x188   :  { %v9337_v18 = vsel %vm1679_vm1, 1.0, %v19228_v27  ;;  %14471 = vset.pattern.permute.xlu1 %v19646_v24  ;;  %vm1672_vm1 = vcmp.eq.s32.totalorder %v15589_v39, %v15482_v54 }
 0x189   :  { %v15920_v20 = vadd.f32 %v9337_v18, %v1615_v31  ;;  %1887 = vperm.xlu1 %14471, %v15885_v14   ;;  %v9360_v31 = vsel %vm1894_vm2, 1.0, %v19228_v27  ;;  %v9298_v18 = vsel %vm1448_vm8, 1.0, %v19228_v27  ;;  %vm1784_vm2 = vcmp.eq.s32.totalorder %v15650_v23, %v15482_v54 }
 0x18a   :  { %v1942_v15 = vadd.f32 %v9360_v31, %v1830_v60  ;;  %v9330_v40 = vsel %vm1672_vm1, 1.0, %v19228_v27  ;;  %v2165_v31 = vadd.f32 %v9391_v45, %v2053_v53  ;;  %vm1569_vm8 = vcmp.eq.s32.totalorder %v15541_v42, %v15482_v54 }
 0x18b   :  { %v15927_v21 = vpop.permute.xlu1 %2090  ;;  %v9362_v23 = vsel %vm1896_vm4, 1.0, %v19228_v27  ;;  %v9300_v42 = vsel %vm1450_vm6, 1.0, %v19228_v27  ;;  %v9365_v45 = vsel %vm1899_vm13, 1.0, %v19228_v27  ;;  %vm1786_vm6 = vcmp.eq.s32.totalorder %v15776_v33, %v15482_v54 }
 0x18c   :  { %v2054_v46 = vadd.f32 %v9376_v19, %v1942_v15  ;;  %v9346_v19 = vsel %vm1784_vm2, 1.0, %v19228_v27  ;;  %v2277_v50 = vadd.f32 %v9407_v63, %v2165_v31  ;;  %v19696_v63 = vld [vmem:[#allocation32_spill] sm:$0xff]  ;;  %vm2011_vm2 = vcmp.eq.s32.totalorder %v15762_v34, %v15482_v54 }
 0x18d   :  { %1890 = vperm.xlu1 %14471, %v19689_v38   ;;  %v9320_v38 = vsel %vm1566_vm7, 1.0, %v19228_v27  ;;  %vm2008_vm7 = vcmp.eq.s32.totalorder %v15791_v57, %v15482_v54  ;;  %vm1793_vm1 = vcmp.eq.s32.totalorder %v19696_v63, %v15482_v54  ;;  %vm2123_vm4 = vcmp.eq.s32.totalorder %v15927_v21, %v15482_v54 }
 0x18e   :  { %v1614_v56 = vadd.f32 %v9320_v38, %v9304_v55  ;;  %v2166_v48 = vadd.f32 %v9392_v6, %v2054_v46  ;;  %v9378_v57 = vsel %vm2008_vm7, 1.0, %v19228_v27  ;;  %v16023_v38 = vand.u32 4294901760, %v2277_v50  ;;  %v19693_v6 = vld [vmem:[#allocation13_spill] sm:$0xff] }
 0x18f   :  { %v9323_v46 = vsel %vm1569_vm8, 1.0, %v19228_v27  ;;  %vm1674_vm15 = vcmp.eq.s32.totalorder %v19693_v6, %v15482_v54  ;;  %vm2235_vm8 = vcmp.eq.s32.totalorder %v15985_v51, %v15482_v54  ;;  %vm2122_vm13 = vcmp.eq.s32.totalorder %v15899_v61, %v15482_v54 }
 0x190   :  { %v1546_v59 = vpop.permute.xlu1 %1545  ;;  %v1726_v60 = vadd.f32 %v9336_v7, %v1614_v56  ;;  %v2278_v15 = vadd.f32 %v9408_v3, %v2166_v48  ;;  %19691 = vst [vmem:[#allocation22_spill] sm:$0xff] %v16023_v38  ;;  %v16044_v52 = vsub.f32 %v2277_v50, %v16023_v38  ;;  %v9332_v31 = vsel %vm1674_vm15, 1.0, %v19228_v27 }
 0x191   :  { %vm1568_vm14 = vcmp.eq.s32.totalorder %v1546_v59, %v15482_v54  ;;  %14473 = vset.pattern.permute.xlu1 %v19672_v43  ;;  %v2206_v59 = vpop.permute.xlu0 %2205 }
 0x192   :  { %v9322_v25 = vsel %vm1568_vm14, 1.0, %v19228_v27  ;;  %2108 = vperm.xlu1 %14473, %v15870_v17   ;;  %v9314_v17 = vsel %vm1560_vm9, 1.0, %v19228_v27  ;;  %vm2120_vm9 = vcmp.eq.s32.totalorder %v15814_v10, %v15482_v54  ;;  %v16025_v53 = vand.u32 4294901760, %v2278_v15  ;;  %19694 = vst [vmem:[#allocation12_spill] sm:$0xff] %v16044_v52 }
 0x193   :  { %v15964_v26 = vadd.f32 %v9322_v25, %v9306_v36  ;;  %v1608_v5 = vadd.f32 %v9314_v17, %v9298_v18  ;;  %vm2236_vm12 = vcmp.eq.s32.totalorder %v2206_v59, %v15482_v54  ;;  %v2279_v25 = vadd.f32 %v9409_v28, %v15709_v8 }
 0x194   :  { %19692 = vst [vmem:[#allocation24_spill] sm:$0xff] %v16025_v53  ;;  %v9394_v55 = vsel %vm2120_vm9, 1.0, %v19228_v27  ;;  %vm1562_vm14 = vcmp.eq.s32.totalorder %v15642_v37, %v15482_v54  ;;  %v16047_v8 = vsub.f32 %v2278_v15, %v16025_v53  ;;  %v9414_v37 = vsel %vm2236_vm12, 1.0, %v19228_v27 }
 0x195   :  { %v1764_v39 = vpop.permute.xlu1 %1763  ;;  %v9316_v3 = vsel %vm1562_vm14, 1.0, %v19228_v27  ;;  %v2284_v34 = vadd.f32 %v9414_v37, %v15798_v30  ;;  %v16083_v2 = vand.u32 4294901760, %v16044_v52  ;;  %v9381_v15 = vsel %vm2011_vm2, 1.0, %v19228_v27 }
 0x196   :  { %vm1790_vm3 = vcmp.eq.s32.totalorder %v1764_v39, %v15482_v54  ;;  %14475 = vset.pattern.permute.xlu1 %v19668_v0  ;;  %19695 = vst [vmem:[#allocation28_spill] sm:$0xff] %v16047_v8  ;;  %v1610_v50 = vadd.f32 %v9316_v3, %v9300_v42  ;;  %v9397_v28 = vsel %vm2123_vm4, 1.0, %v19228_v27 }
 0x197   :  { %v9352_v4 = vsel %vm1790_vm3, 1.0, %v19228_v27  ;;  %2217 = vperm.xlu1 %14475, %v15704_v16   ;;  %v1720_v16 = vadd.f32 %v9330_v40, %v1608_v5  ;;  %v19698_v40 = vld [vmem:[#allocation36_spill] sm:$0xff]  ;;  %v1947_v5 = vadd.f32 %v9365_v45, %v15744_v44  ;;  %19699 = vst [vmem:[#allocation15_spill] sm:$0xff] %v16083_v2  ;;  %v19701_v44 = vld [vmem:[#allocation23_spill] sm:$0xff]  ;;  %v16109_v42 = vand.u32 4294901760, %v2284_v34 }
 0x198   :  { %v15994_v36 = vadd.f32 %v9352_v4, %v1726_v60  ;;  %v16061_v60 = vand.u32 4294901760, %v2279_v25  ;;  %vm1682_vm3 = vcmp.eq.s32.totalorder %v19698_v40, %v15482_v54  ;;  %vm1683_vm5 = vcmp.eq.s32.totalorder %v19701_v44, %v15482_v54 }
 0x199   :  { %v1832_v58 = vadd.f32 %v9346_v19, %v1720_v16  ;;  %v16086_v19 = vsel %vm1793_vm1, 1.0, %v19228_v27  ;;  %v16090_v16 = vand.u32 4294901760, %v16047_v8  ;;  %v16093_v30 = vsel %vm1682_vm3, 1.0, %v19228_v27  ;;  %19705 = vst [vmem:[#allocation35_spill] sm:$0xff] %v16109_v42 }
 0x19a   :  { %v16006_v47 = vpop.permute.xlu1 %2199  ;;  %19697 = vst [vmem:[#allocation29_spill] sm:$0xff] %v16061_v60  ;;  %v16100_v21 = vsub.f32 %v2279_v25, %v16061_v60  ;;  %v16116_v25 = vand.u32 4294901760, %v15894_v13  ;;  %v16138_v37 = vsel %vm1683_vm5, 1.0, %v19228_v27  ;;  %v16141_v45 = vsub.f32 %v2284_v34, %v16109_v42 }
 0x19b   :  { %14476 = vset.pattern.permute.xlu1 %v19653_v29  ;;  %v1944_v10 = vadd.f32 %v9362_v23, %v1832_v58  ;;  %19700 = vst [vmem:[#allocation30_spill] sm:$0xff] %v16090_v16  ;;  %v1722_v23 = vadd.f32 %v9332_v31, %v1610_v50  ;;  %v19703_v58 = vld [vmem:[#allocation11_spill] sm:$0xff]  ;;  %v2412_v51 = vsub.f32 %v16047_v8, %v16090_v16 }
 0x19c   :  { %2002 = vperm.xlu1 %14476, %v16018_v41   ;;  %19702 = vst [vmem:[#allocation34_spill] sm:$0xff] %v16100_v21  ;;  %vm2125_vm7 = vcmp.eq.s32.totalorder %v19703_v58, %v15482_v54  ;;  %19706 = vst [vmem:[#allocation19_spill] sm:$0xff] %v16116_v25  ;;  %v16180_v61 = vand.u32 4294901760, %v16141_v45  ;;  %vm2234_vm14 = vcmp.eq.s32.totalorder %v16006_v47, %v15482_v54 }
 0x19d   :  { %v2056_v56 = vadd.f32 %v9378_v57, %v1944_v10  ;;  %v2059_v57 = vadd.f32 %v9381_v15, %v1947_v5  ;;  %v9348_v10 = vsel %vm1786_vm6, 1.0, %v19228_v27  ;;  %19709 = vst [vmem:[#allocation33_spill] sm:$0xff] %v16141_v45  ;;  %v16151_v3 = vand.u32 4294901760, %v2412_v51 }
 0x19e   :  { %19716 = vst [vmem:[#allocation26_spill] sm:$0xff] %v16180_v61 }
 0x19f   :  { %v1437_v7 = vpop.permute.xlu1 %1436  ;;  %v2168_v17 = vadd.f32 %v9394_v55, %v2056_v56  ;;  %v9399_v55 = vsel %vm2125_vm7, 1.0, %v19228_v27  ;;  %v16125_v56 = vand.u32 4294901760, %v16100_v21  ;;  %19712 = vst [vmem:[#allocation43_spill] sm:$0xff] %v16151_v3 }
 0x1a0   :  { %vm1457_vm0 = vcmp.eq.s32.totalorder %v1437_v7, %v15482_v54  ;;  %14477 = vset.pattern.permute.xlu1 %v19672_v43  ;;  %v2171_v7 = vadd.f32 %v9397_v28, %v2059_v57 }
 0x1a1   :  { %v9307_v18 = vsel %vm1457_vm0, 1.0, %v19228_v27  ;;  %2111 = vperm.xlu1 %14477, %v15885_v14   ;;  %v16067_v14 = vsel %vm1570_vm10, 1.0, %v19228_v27  ;;  %v2280_v48 = vadd.f32 %v9410_v62, %v2168_v17  ;;  %19707 = vst [vmem:[#allocation21_spill] sm:$0xff] %v16125_v56  ;;  %v9413_v62 = vsel %vm2235_vm8, 1.0, %v19228_v27 }
 0x1a2   :  { %v16054_v39 = vadd.f32 %v9323_v46, %v9307_v18  ;;  %v2402_v46 = vsub.f32 %v16044_v52, %v16083_v2  ;;  %vm1898_vm10 = vcmp.eq.s32.totalorder %v15810_v35, %v15482_v54  ;;  %v1834_v17 = vadd.f32 %v9348_v10, %v1722_v23 }
 0x1a3   :  { %v16104_v59 = vand.u32 4294901760, %v2280_v48  ;;  %v16149_v35 = vsub.f32 %v15894_v13, %v16116_v25  ;;  %v9364_v31 = vsel %vm1898_vm10, 1.0, %v19228_v27  ;;  %v2422_v5 = vsub.f32 %v16100_v21, %v16125_v56 }
 0x1a4   :  { %v16075_v4 = vpop.permute.xlu1 %1766  ;;  %v16143_v63 = vand.u32 4294901760, %v2402_v46  ;;  %v9380_v23 = vsel %vm2010_vm11, 1.0, %v19228_v27  ;;  %v1946_v57 = vadd.f32 %v9364_v31, %v1834_v17  ;;  %v9396_v10 = vsel %vm2122_vm13, 1.0, %v19228_v27 }
 0x1a5   :  { %2114 = vperm.xlu1 %14477, %v16018_v41   ;;  %19704 = vst [vmem:[#allocation18_spill] sm:$0xff] %v16104_v59  ;;  %v16131_v18 = vsub.f32 %v2280_v48, %v16104_v59  ;;  %19711 = vst [vmem:[#allocation42_spill] sm:$0xff] %v16149_v35  ;;  %v2283_v48 = vadd.f32 %v9413_v62, %v2171_v7  ;;  %v16185_v46 = vand.u32 4294901760, %v16149_v35  ;;  %v16194_v7 = vand.u32 4294901760, %v2422_v5 }
 0x1a6   :  { %19710 = vst [vmem:[#allocation41_spill] sm:$0xff] %v16143_v63  ;;  %vm1791_vm0 = vcmp.eq.s32.totalorder %v16075_v4, %v15482_v54 }
 0x1a7   :  { %19708 = vst [vmem:[#allocation27_spill] sm:$0xff] %v16131_v18  ;;  %v16169_v44 = vand.u32 4294901760, %v16131_v18  ;;  %19717 = vst [vmem:[#allocation31_spill] sm:$0xff] %v16185_v46  ;;  %v16188_v22 = vand.u32 4294901760, %v2283_v48 }
 0x1a8   :  { %19720 = vst [vmem:[#allocation32_spill] sm:$0xff] %v16194_v7 }
 0x1a9   :  { %14478 = vset.pattern.permute.xlu1 %v19668_v0  ;;  %v1985_v33 = vpop.permute.xlu1 %1984  ;;  %19715 = vst [vmem:[#allocation40_spill] sm:$0xff] %v16169_v44  ;;  %19718 = vst [vmem:[#allocation25_spill] sm:$0xff] %v16188_v22 }
 0x1aa   :  { %vm2013_vm9 = vcmp.eq.s32.totalorder %v1985_v33, %v15482_v54  ;;  %2226 = vperm.xlu1 %14478, %v16018_v41  }
 0x1ab   :  { %v9383_v6 = vsel %vm2013_vm9, 1.0, %v19228_v27 }
 0x1ac   :  { %v2061_v41 = vadd.f32 %v9383_v6, %v15889_v32  ;;  %v2058_v6 = vadd.f32 %v9380_v23, %v1946_v57  ;;  %v16213_v57 = vsub.f32 %v2283_v48, %v16188_v22 }
 0x1ae   :  { %v1658_v32 = vpop.permute.xlu1 %1657  ;;  %v16153_v40 = vadd.f32 %v9399_v55, %v2061_v41  ;;  %14480 = vset.pattern.permute.xlu1 %v19553_v12  ;;  %v2170_v5 = vadd.f32 %v9396_v10, %v2058_v6  ;;  %19723 = vst [vmem:[#allocation11_spill] sm:$0xff] %v16213_v57 }
 0x1af   :  { %vm1680_vm12 = vcmp.eq.s32.totalorder %v1658_v32, %v15482_v54  ;;  %v16158_v34 = vpop.f32.mrb[0].mxu0  ;;  %v9412_v32 = vsel %vm2234_vm14, 1.0, %v19228_v27 }
 0x1b0   :  { %19713 = vst [vmem:[#allocation38_spill] sm:$0xff] %v16158_v34  ;;  %v9338_v13 = vsel %vm1680_vm12, 1.0, %v19228_v27  ;;  %v1363_v50 = vmax.f32 %v16158_v34, 0.0  ;;  %v16166_v15 = vpop.f32.mrb[1].mxu0  ;;  %v2282_v10 = vadd.f32 %v9412_v32, %v2170_v5  ;;  %v19727_v5 = vmov 0.0  }
 0x1b1   :  { %19714 = vst [vmem:[#allocation39_spill] sm:$0xff] %v16166_v15  ;;  %v16176_v58 = vadd.f32 %v9338_v13, %v15964_v26  ;;  %v1362_v28 = vmax.f32 %v16166_v15, 0.0 }
 0x1b2   :  { %v2312_v33 = vand.u32 4294901760, %v1363_v50 }
 0x1b3   :  { %v2309_v51 = vand.u32 4294901760, %v1362_v28  ;;  %v16190_v26 = vpop.permute.xlu1 %1875  ;;  %v16192_v55 = vpop.f32.mrb[2].mxu0 }
 0x1b4   :  { %19719 = vst [vmem:[#allocation13_spill] sm:$0xff] %v16192_v55  ;;  %v16196_v62 = vsub.f32 %v1363_v50, %v2312_v33  ;;  %v1365_v47 = vmax.f32 %v16192_v55, 0.0  ;;  %v16199_v41 = vpop.f32.mrb[3].mxu0  ;;  %vm1902_vm10 = vcmp.eq.s32.totalorder %v16190_v26, %v15482_v54 }
 0x1b5   :  { %19721 = vst [vmem:[#allocation36_spill] sm:$0xff] %v16199_v41  ;;  %v16204_v31 = vpack.c.bf16 %v2312_v33, %v2309_v51  ;;  %v16206_v13 = vsub.f32 %v1362_v28, %v2309_v51  ;;  %v1364_v0 = vmax.f32 %v16199_v41, 0.0  ;;  %v9368_v26 = vsel %vm1902_vm10, 1.0, %v19727_v5 }
 0x1b6   :  { %v2318_v29 = vand.u32 4294901760, %v1365_v47  ;;  %v19239_v50 = vand.u32 4294901760, %v16196_v62 }
 0x1b7   :  { %19722 = vst [vmem:[#allocation23_spill] sm:$0xff] %v16204_v31  ;;  %v2315_v43 = vand.u32 4294901760, %v1364_v0  ;;  %v16215_v17 = vpop.f32.mrb[4].mxu0  ;;  %12818 = vmatprep.subr.bf16.mxu1 %v16204_v31  ;;  %v16221_v33 = vpack.c.bf16 %v16196_v62, %v16206_v13  ;;  %v19728_v12 = vand.u32 4294901760, %v16206_v13 }
 0x1b8   :  { %19724 = vst [vmem:[#allocation44_spill] sm:$0xff] %v16215_v17  ;;  %v16223_v51 = vsub.f32 %v1365_v47, %v2318_v29  ;;  %v1367_v6 = vmax.f32 %v16215_v17, 0.0  ;;  %v1661_v23 = vpop.permute.xlu1 %1660  ;;  %v16226_v27 = vpop.f32.mrb[5].mxu0  ;;  %12820 = vmatpush3.bf16.msra.mxu1 %v16204_v31  ;;  %v2560_v48 = vsub.f32 %v16196_v62, %v19239_v50 }
 0x1b9   :  { %19725 = vst [vmem:[#allocation45_spill] sm:$0xff] %v16226_v27  ;;  %v16232_v24 = vpack.c.bf16 %v2318_v29, %v2315_v43  ;;  %v16234_v28 = vsub.f32 %v1364_v0, %v2315_v43  ;;  %vm1681_vm15 = vcmp.eq.s32.totalorder %v1661_v23, %v15482_v54  ;;  %v1366_v47 = vmax.f32 %v16226_v27, 0.0 }
 0x1ba   :  { %v2324_v32 = vand.u32 4294901760, %v1367_v6  ;;  %v9339_v49 = vsel %vm1681_vm15, 1.0, %v19727_v5  ;;  %v2553_v17 = vsub.f32 %v16206_v13, %v19728_v12  ;;  %v2561_v41 = vand.u32 4294901760, %v2560_v48 }
 0x1bb   :  { %19726 = vst [vmem:[#allocation46_spill] sm:$0xff] %v16232_v24  ;;  %v16243_v55 = vadd.f32 %v9339_v49, %v16054_v39  ;;  %v2321_v50 = vand.u32 4294901760, %v1366_v47  ;;  %v16245_v29 = vpop.f32.mrb[6].mxu0  ;;  %12822 = vmatprep.subr.bf16.mxu1 %v16232_v24  ;;  %v16250_v23 = vand.u32 4294901760, %v2282_v10  ;;  %v16258_v49 = vpack.c.bf16 %v16223_v51, %v16234_v28 }
 0x1bc   :  { %19729 = vst [vmem:[#allocation47_spill] sm:$0xff] %v16245_v29  ;;  %v1369_v27 = vmax.f32 %v16245_v29, 0.0  ;;  %v16253_v15 = vpop.f32.mrb[7].mxu0  ;;  %12824 = vmatpush3.bf16.msra.mxu1 %v16232_v24  ;;  %v2554_v12 = vand.u32 4294901760, %v2553_v17  ;;  %v19734_v34 = vand.u32 4294901760, %v16234_v28  ;;  %v16270_v56 = vsub.f32 %v1367_v6, %v2324_v32 }
 0x1bd   :  { %19730 = vst [vmem:[#allocation48_spill] sm:$0xff] %v16250_v23  ;;  %19731 = vst [vmem:[#allocation49_spill] sm:$0xff] %v16253_v15  ;;  %v16260_v39 = vpack.c.bf16 %v2324_v32, %v2321_v50  ;;  %v16262_v48 = vsub.f32 %v1366_v47, %v2321_v50  ;;  %v1368_v0 = vmax.f32 %v16253_v15, 0.0  ;;  %v16265_v43 = vpop.permute.xlu1 %1878  ;;  %v19735_v2 = vand.u32 4294901760, %v16223_v51 }
 0x1be   :  { %19732 = vst [vmem:[#allocation50_spill] sm:$0xff] %v16258_v49  ;;  %v2567_v29 = vsub.f32 %v16234_v28, %v19734_v34  ;;  %v2330_v16 = vand.u32 4294901760, %v1369_v27  ;;  %v16272_v17 = vpack.c.bf16 %v2561_v41, %v2554_v12  ;;  %v16282_v24 = vand.u32 4294901760, %v16213_v57 }
 0x1bf   :  { %19733 = vst [vmem:[#allocation51_spill] sm:$0xff] %v16260_v39  ;;  %v2574_v1 = vsub.f32 %v16223_v51, %v19735_v2  ;;  %v2327_v21 = vand.u32 4294901760, %v1368_v0  ;;  %v16277_v50 = vpop.f32.mrb[8].mxu0  ;;  %12826 = vmatprep.subr.bf16.mxu1 %v16260_v39  ;;  %v16285_v34 = vsub.f32 %v2282_v10, %v16250_v23  ;;  %v19741_v8 = vand.u32 4294901760, %v16262_v48 }
 0x1c0   :  { %19736 = vst [vmem:[#allocation52_spill] sm:$0xff] %v16277_v50  ;;  %v2568_v47 = vand.u32 4294901760, %v2567_v29  ;;  %19737 = vst [vmem:[#allocation53_spill] sm:$0xff] %v16282_v24  ;;  %v16287_v41 = vsub.f32 %v1369_v27, %v2330_v16  ;;  %v1371_v6 = vmax.f32 %v16277_v50, 0.0  ;;  %v16290_v32 = vpop.f32.mrb[9].mxu0  ;;  %12828 = vmatpush3.bf16.msra.mxu1 %v16260_v39  ;;  %v19286_v50 = vand.u32 4294901760, %v16270_v56 }
 0x1c1   :  { %19738 = vst [vmem:[#allocation54_spill] sm:$0xff] %v16285_v34  ;;  %19739 = vst [vmem:[#allocation55_spill] sm:$0xff] %v16290_v32  ;;  %v2575_v2 = vand.u32 4294901760, %v2574_v1  ;;  %v16293_v12 = vpack.c.bf16 %v2330_v16, %v2327_v21  ;;  %v16295_v29 = vsub.f32 %v1368_v0, %v2327_v21  ;;  %v1370_v15 = vmax.f32 %v16290_v32, 0.0 }
 0x1c2   :  { %v2581_v10 = vsub.f32 %v16262_v48, %v19741_v8  ;;  %v2336_v52 = vand.u32 4294901760, %v1371_v6  ;;  %v1440_v27 = vpop.permute.xlu1 %1439  ;;  %vm1903_vm2 = vcmp.eq.s32.totalorder %v16265_v43, %v15482_v54 }
 0x1c3   :  { %19740 = vst [vmem:[#allocation56_spill] sm:$0xff] %v16293_v12  ;;  %v16301_v31 = vpack.c.bf16 %v2575_v2, %v2568_v47  ;;  %v2333_v1 = vand.u32 4294901760, %v1370_v15  ;;  %vm1458_vm1 = vcmp.eq.s32.totalorder %v1440_v27, %v15482_v54  ;;  %v16308_v16 = vpop.f32.mrb[10].mxu0  ;;  %12830 = vmatprep.subr.bf16.mxu1 %v16293_v12  ;;  %v2588_v27 = vsub.f32 %v16270_v56, %v19286_v50 }
 0x1c4   :  { %19742 = vst [vmem:[#allocation57_spill] sm:$0xff] %v16308_v16  ;;  %v2582_v21 = vand.u32 4294901760, %v2581_v10  ;;  %v16314_v0 = vsub.f32 %v1371_v6, %v2336_v52  ;;  %v9308_v47 = vsel %vm1458_vm1, 1.0, %v19727_v5  ;;  %v1373_v2 = vmax.f32 %v16308_v16, 0.0  ;;  %v16318_v11 = vpop.f32.mrb[11].mxu0  ;;  %12832 = vmatpush3.bf16.msra.mxu1 %v16293_v12 }
 0x1c5   :  { %19743 = vst [vmem:[#allocation58_spill] sm:$0xff] %v16318_v11  ;;  %v16324_v10 = vpack.c.bf16 %v2336_v52, %v2333_v1  ;;  %v16326_v8 = vsub.f32 %v1370_v15, %v2333_v1  ;;  %v16329_v32 = vadd.f32 %v16067_v14, %v9308_v47  ;;  %v1372_v6 = vmax.f32 %v16318_v11, 0.0 }
 0x1c6   :  { %v2342_v39 = vand.u32 4294901760, %v1373_v2  ;;  %v2589_v42 = vand.u32 4294901760, %v2588_v27  ;;  %v19745_v16 = vand.u32 4294901760, %v16295_v29  ;;  %v19746_v12 = vand.u32 4294901760, %v16287_v41 }
 0x1c7   :  { %19744 = vst [vmem:[#allocation59_spill] sm:$0xff] %v16324_v10  ;;  %v2339_v50 = vand.u32 4294901760, %v1372_v6  ;;  %v1770_v52 = vpop.permute.xlu1 %1769  ;;  %v16338_v25 = vpop.f32.mrb[12].mxu0  ;;  %12834 = vmatprep.subr.bf16.mxu1 %v16324_v10  ;;  %v16345_v1 = vadd.f32 %v16086_v19, %v16243_v55 }
 0x1c8   :  { %v2595_v22 = vsub.f32 %v16295_v29, %v19745_v16  ;;  %v2602_v23 = vsub.f32 %v16287_v41, %v19746_v12  ;;  %19747 = vst [vmem:[#allocation60_spill] sm:$0xff] %v16338_v25  ;;  %v16347_v47 = vsub.f32 %v1373_v2, %v2342_v39  ;;  %vm1792_vm3 = vcmp.eq.s32.totalorder %v1770_v52, %v15482_v54  ;;  %v16351_v16 = vpop.f32.mrb[13].mxu0 }
 0x1c9   :  { %19748 = vst [vmem:[#allocation61_spill] sm:$0xff] %v16345_v1  ;;  %v1375_v12 = vmax.f32 %v16338_v25, 0.0  ;;  %19749 = vst [vmem:[#allocation62_spill] sm:$0xff] %v16351_v16  ;;  %12836 = vmatpush3.bf16.msra.mxu1 %v16324_v10  ;;  %v16354_v27 = vpack.c.bf16 %v2589_v42, %v2582_v21  ;;  %v16356_v11 = vpack.c.bf16 %v2342_v39, %v2339_v50  ;;  %v9354_v15 = vsel %vm1792_vm3, 1.0, %v19727_v5 }
 0x1ca   :  { %v16358_v14 = vsub.f32 %v1372_v6, %v2339_v50  ;;  %v1374_v19 = vmax.f32 %v16351_v16, 0.0  ;;  %v16363_v55 = vadd.f32 %v9354_v15, %v16176_v58  ;;  %v2596_v52 = vand.u32 4294901760, %v2595_v22 }
 0x1cb   :  { %19750 = vst [vmem:[#allocation63_spill] sm:$0xff] %v16356_v11  ;;  %v2348_v2 = vand.u32 4294901760, %v1375_v12  ;;  %v2603_v25 = vand.u32 4294901760, %v2602_v23  ;;  %v16365_v60 = vpop.f32.mrb[14].mxu0  ;;  %12838 = vmatprep.subr.bf16.mxu1 %v16356_v11  ;;  %v19753_v42 = vand.u32 4294901760, %v16326_v8  ;;  %v19754_v50 = vand.u32 4294901760, %v16314_v0 }
 0x1cc   :  { %19751 = vst [vmem:[#allocation64_spill] sm:$0xff] %v16363_v55  ;;  %v2345_v59 = vand.u32 4294901760, %v1374_v19  ;;  %19752 = vst [vmem:[#allocation65_spill] sm:$0xff] %v16365_v60  ;;  %v1377_v22 = vmax.f32 %v16365_v60, 0.0  ;;  %v16378_v23 = vpop.permute.xlu1 %1987  ;;  %v16380_v15 = vpop.f32.mrb[15].mxu0  ;;  %v9353_v6 = vsel %vm1791_vm0, 1.0, %v19727_v5 }
 0x1cd   :  { %v2609_v39 = vsub.f32 %v16326_v8, %v19753_v42  ;;  %v2616_v21 = vsub.f32 %v16314_v0, %v19754_v50  ;;  %v16375_v58 = vsub.f32 %v1375_v12, %v2348_v2  ;;  %19755 = vst [vmem:[#allocation66_spill] sm:$0xff] %v16380_v15  ;;  %12840 = vmatpush3.bf16.msra.mxu1 %v16356_v11  ;;  %v19312_v42 = vand.u32 4294901760, %v16347_v47 }
 0x1ce   :  { %v16383_v16 = vpack.c.bf16 %v2603_v25, %v2596_v52  ;;  %v16386_v10 = vpack.c.bf16 %v2348_v2, %v2345_v59  ;;  %v16388_v49 = vsub.f32 %v1374_v19, %v2345_v59  ;;  %v1376_v50 = vmax.f32 %v16380_v15, 0.0 }
 0x1cf   :  { %v16392_v12 = vand.u32 4294901760, %v16285_v34  ;;  %v2354_v60 = vand.u32 4294901760, %v1377_v22  ;;  %v2610_v11 = vand.u32 4294901760, %v2609_v39  ;;  %v2617_v25 = vand.u32 4294901760, %v2616_v21 }
 0x1d0   :  { %19756 = vst [vmem:[#allocation67_spill] sm:$0xff] %v16386_v10  ;;  %v16402_v2 = vsel %vm1903_vm2, 1.0, %v19727_v5  ;;  %v2351_v59 = vand.u32 4294901760, %v1376_v50  ;;  %12842 = vmatprep.subr.bf16.mxu1 %v16386_v10  ;;  %v19758_v19 = vand.u32 4294901760, %v16358_v14  ;;  %v2630_v4 = vsub.f32 %v16347_v47, %v19312_v42 }
 0x1d1   :  { %19757 = vst [vmem:[#allocation68_spill] sm:$0xff] %v16392_v12  ;;  %v2656_v15 = vsub.f32 %v1377_v22, %v2354_v60  ;;  %12844 = vmatpush3.bf16.msra.mxu1 %v16386_v10  ;;  %v16412_v39 = vpack.c.bf16 %v2617_v25, %v2610_v11  ;;  %v2636_v43 = vand.u32 4294901760, %v16388_v49  ;;  %v2643_v21 = vand.u32 4294901760, %v16375_v58  ;;  %v1443_v1 = vpop.permute.xlu1 %1442 }
 0x1d2   :  { %v2623_v52 = vsub.f32 %v16358_v14, %v19758_v19  ;;  %v16416_v53 = vpack.c.bf16 %v2354_v60, %v2351_v59  ;;  %v2649_v38 = vsub.f32 %v1376_v50, %v2351_v59  ;;  %v2631_v55 = vand.u32 4294901760, %v2630_v4 }
 0x1d3   :  { %vm1459_vm4 = vcmp.eq.s32.totalorder %v1443_v1, %v15482_v54  ;;  %v2637_v19 = vsub.f32 %v16388_v49, %v2636_v43  ;;  %v2644_v22 = vsub.f32 %v16375_v58, %v2643_v21  ;;  %v2657_v42 = vand.u32 4294901760, %v2656_v15 }
 0x1d4   :  { %19759 = vst [vmem:[#allocation69_spill] sm:$0xff] %v16416_v53  ;;  %v2624_v9 = vand.u32 4294901760, %v2623_v52  ;;  %v9309_v11 = vsel %vm1459_vm4, 1.0, %v19727_v5  ;;  %12846 = vmatprep.subr.bf16.mxu1 %v16416_v53  ;;  %v2650_v10 = vand.u32 4294901760, %v2649_v38  ;;  %v16427_v60 = vadd.f32 %v16093_v30, %v16329_v32 }
 0x1d5   :  { %12848 = vmatpush3.bf16.msra.mxu1 %v16416_v53  ;;  %v2638_v50 = vand.u32 4294901760, %v2637_v19  ;;  %v2645_v1 = vand.u32 4294901760, %v2644_v22  ;;  %v2658_v59 = vsub.f32 %v2656_v15, %v2657_v42  ;;  %v16432_v52 = vpack.c.bf16 %v16270_v56, %v16262_v48 }
 0x1d6   :  { %v16423_v25 = vpack.c.bf16 %v2631_v55, %v2624_v9  ;;  %19760 = vst [vmem:[#allocation70_spill] sm:$0xff] %v16427_v60  ;;  %12850 = vmatprep.subr.bf16.mxu1 %v16272_v17  ;;  %v2651_v4 = vsub.f32 %v2649_v38, %v2650_v10  ;;  %v16437_v9 = vpack.c.bf16 %v16287_v41, %v16295_v29  ;;  %v1555_v55 = vpop.permute.xlu1 %1554  ;;  %v19765_v60 = vand.u32 4294901760, %v16206_v13 }
 0x1d7   :  { %19761 = vst [vmem:[#allocation71_spill] sm:$0xff] %v16432_v52  ;;  %v16441_v30 = vpack.c.bf16 %v16314_v0, %v16326_v8  ;;  %v16445_v32 = vpack.c.bf16 %v16347_v47, %v16358_v14  ;;  %v16447_v19 = vpack.c.bf16 %v2645_v1, %v2638_v50  ;;  %v2659_v22 = vand.u32 4294901760, %v2658_v59 }
 0x1d8   :  { %19762 = vst [vmem:[#allocation72_spill] sm:$0xff] %v16437_v9  ;;  %v16451_v53 = vpack.c.bf16 %v16375_v58, %v16388_v49  ;;  %v16453_v52 = vpack.c.bf16 %v2656_v15, %v2649_v38  ;;  %vm1571_vm5 = vcmp.eq.s32.totalorder %v1555_v55, %v15482_v54  ;;  %11104 = vmatmul.mubr.f32.vlgmr.msra.gmra.mrb[0].mxu1 %v16143_v63  ;;  %v16457_v9 = vpop.permute.xlu0 %2211  ;;  %v19767_v1 = vand.u32 4294901760, %v16234_v28 }
 0x1d9   :  { %19763 = vst [vmem:[#allocation73_spill] sm:$0xff] %v16441_v30  ;;  %19764 = vst [vmem:[#allocation74_spill] sm:$0xff] %v16445_v32  ;;  %v2652_v30 = vand.u32 4294901760, %v2651_v4  ;;  %v19766_v32 = vand.u32 4294901760, %v16196_v62  ;;  %v19768_v49 = vand.u32 4294901760, %v16223_v51  ;;  %v9325_v38 = vsel %vm1571_vm5, 1.0, %v19727_v5  ;;  %11106 = vmatprep.mubr.f32.mxu1 %v16151_v3  ;;  %12852 = vmatpush3.bf16.msra.mxu1 %v16272_v17 }
 0x1da   :  { %v19769_v15 = vand.u32 4294901760, %v16262_v48  ;;  %v19770_v13 = vand.u32 4294901760, %v16270_v56  ;;  %v19771_v62 = vand.u32 4294901760, %v16295_v29  ;;  %v19772_v28 = vand.u32 4294901760, %v16287_v41  ;;  %12854 = vmatprep.subr.bf16.mxu1 %v16301_v31 }
 0x1db   :  { %v16463_v50 = vpack.c.bf16 %v19766_v32, %v19765_v60  ;;  %v16469_v58 = vpack.c.bf16 %v19768_v49, %v19767_v1  ;;  %v19773_v51 = vand.u32 4294901760, %v16326_v8  ;;  %v19774_v4 = vand.u32 4294901760, %v16314_v0 }
 0x1dc   :  { %v16478_v59 = vpack.c.bf16 %v19770_v13, %v19769_v15  ;;  %v16484_v60 = vpack.c.bf16 %v19772_v28, %v19771_v62  ;;  %v1619_v55 = vadd.f32 %v9325_v38, %v9309_v11  ;;  %v16493_v48 = vpack.c.bf16 %v2659_v22, %v2652_v30  ;;  %v1991_v22 = vpop.permute.xlu1 %1990  ;;  %11107 = vmatmul.mubr.f32.gmra.mrb[2].mxu1 %v16194_v7 }
 0x1dd   :  { %v16490_v32 = vpack.c.bf16 %v19774_v4, %v19773_v51  ;;  %v19775_v56 = vand.u32 4294901760, %v16358_v14  ;;  %v19776_v17 = vand.u32 4294901760, %v16347_v47  ;;  %v16501_v41 = vpack.c.bf16 %v2643_v21, %v2636_v43  ;;  %v19779_v47 = vld [vmem:[#allocation8_spill] sm:$0xff]  ;;  %12856 = vmatpush3.bf16.msra.mxu1 %v16301_v31 }
 0x1de   :  { %v1839_v1 = vadd.f32 %v9353_v6, %v15920_v20  ;;  %v19777_v8 = vsub.f32 %v16131_v18, %v16169_v44  ;;  %v2452_v11 = vsub.f32 %v16285_v34, %v16392_v12  ;;  %v16511_v30 = vpack.c.bf16 %v2657_v42, %v2650_v10  ;;  %12858 = vmatprep.subr.bf16.mxu1 %v16354_v27  ;;  %v2215_v6 = vpop.permute.xlu0 %2214 }
 0x1df   :  { %v16499_v29 = vpack.c.bf16 %v19776_v17, %v19775_v56  ;;  %v16515_v14 = vadd.f32 %v16138_v37, %v1619_v55  ;;  %vm2127_vm6 = vcmp.eq.s32.totalorder %v19779_v47, %v15482_v54  ;;  %vm2015_vm7 = vcmp.eq.s32.totalorder %v1991_v22, %v15482_v54 }
 0x1e0   :  { %v16507_v0 = vand.u32 4294901760, %v19777_v8  ;;  %v1951_v20 = vadd.f32 %v16402_v2, %v1839_v1  ;;  %v9385_v10 = vsel %vm2015_vm7, 1.0, %v19727_v5  ;;  %v19780_v37 = vsub.f32 %v16149_v35, %v16185_v46  ;;  %v2209_v15 = vpop.permute.xlu1 %2208 }
 0x1e1   :  { %v2462_v43 = vsub.f32 %v16213_v57, %v16282_v24  ;;  %v16532_v21 = vand.u32 4294901760, %v2452_v11  ;;  %v2472_v49 = vsub.f32 %v16141_v45, %v16180_v61  ;;  %v9401_v31 = vsel %vm2127_vm6, 1.0, %v19727_v5  ;;  %12860 = vmatpush3.bf16.msra.mxu1 %v16354_v27 }
 0x1e2   :  { %19778 = vst [vmem:[#allocation75_spill] sm:$0xff] %v16507_v0  ;;  %11109 = vmatprep.mubr.f32.mxu1 %v16507_v0  ;;  %v16528_v42 = vand.u32 4294901760, %v19780_v37  ;;  %v2063_v2 = vadd.f32 %v9385_v10, %v1951_v20  ;;  %vm2239_vm8 = vcmp.eq.s32.totalorder %v2215_v6, %v15482_v54  ;;  %vm2237_vm9 = vcmp.eq.s32.totalorder %v2209_v15, %v15482_v54 }
 0x1e3   :  { %19782 = vst [vmem:[#allocation76_spill] sm:$0xff] %v16532_v21  ;;  %12862 = vmatprep.subr.bf16.mxu1 %v16383_v16  ;;  %v16543_v13 = vand.u32 4294901760, %v2462_v43  ;;  %v9415_v62 = vsel %vm2237_vm9, 1.0, %v19727_v5  ;;  %v16546_v28 = vand.u32 4294901760, %v2472_v49  ;;  %v9417_v51 = vsel %vm2239_vm8, 1.0, %v19727_v5 }
 0x1e4   :  { %19781 = vst [vmem:[#allocation8_spill] sm:$0xff] %v16528_v42  ;;  %11110 = vmatmul.mubr.f32.gmra.mrb[4].mxu1 %v16528_v42  ;;  %v2175_v38 = vadd.f32 %v9401_v31, %v2063_v2  ;;  %v2285_v4 = vadd.f32 %v9415_v62, %v16153_v40  ;;  %vm2014_vm11 = vcmp.eq.s32.totalorder %v16378_v23, %v15482_v54  ;;  %v19837_v42 = vld [vmem:[#allocation12_spill] sm:$0xff] }
 0x1e5   :  { %11112 = vmatprep.mubr.f32.mxu1 %v16532_v21  ;;  %19783 = vst [vmem:[#allocation77_spill] sm:$0xff] %v16543_v13  ;;  %19784 = vst [vmem:[#allocation78_spill] sm:$0xff] %v16546_v28  ;;  %12864 = vmatpush3.bf16.msra.mxu1 %v16383_v16  ;;  %v1882_v55 = vpop.permute.xlu1 %1881  ;;  %v9384_v40 = vsel %vm2014_vm11, 1.0, %v19727_v5  ;;  %v1950_v16 = vadd.f32 %v9368_v26, %v15994_v36  ;;  %vm2238_vm12 = vcmp.eq.s32.totalorder %v16457_v9, %v15482_v54  ;;  %v16751_v21 = vld [vmem:[#allocation2 + $0x20] sm:$0xff] }
 0x1e6   :  { %v16557_v27 = vand.u32 4294901760, %v2285_v4  ;;  %12866 = vmatprep.subr.bf16.mxu1 %v16412_v39  ;;  %v2287_v56 = vadd.f32 %v9417_v51, %v2175_v38  ;;  %vm1904_vm14 = vcmp.eq.s32.totalorder %v1882_v55, %v15482_v54  ;;  %v19796_v51 = vld [vmem:[#allocation14_spill] sm:$0xff]  ;;  %v19351_v7 = vand.u32 4294901760, %v16751_v21 }
 0x1e7   :  { %v2062_v11 = vadd.f32 %v9384_v40, %v1950_v16  ;;  %v9370_v31 = vsel %vm1904_vm14, 1.0, %v19727_v5  ;;  %vm2128_vm15 = vcmp.eq.s32.totalorder %v19796_v51, %v15482_v54 }
 0x1e8   :  { %11113 = vmatmul.mubr.f32.gmra.mrb[6].mxu1 %v16543_v13  ;;  %19785 = vst [vmem:[#allocation79_spill] sm:$0xff] %v16557_v27  ;;  %v16562_v17 = vsub.f32 %v2285_v4, %v16557_v27  ;;  %v16573_v1 = vand.u32 4294901760, %v2287_v56  ;;  %v9402_v40 = vsel %vm2128_vm15, 1.0, %v19727_v5  ;;  %v19839_v13 = vld [vmem:[#allocation28_spill] sm:$0xff] }
 0x1e9   :  { %11115 = vmatprep.mubr.f32.mxu1 %v16546_v28  ;;  %12868 = vmatpush3.bf16.msra.mxu1 %v16412_v39  ;;  %v9416_v39 = vsel %vm2238_vm12, 1.0, %v19727_v5  ;;  %v16748_v28 = vld [vmem:[#allocation2 + $0x18] sm:$0xff] }
 0x1ea   :  { %19786 = vst [vmem:[#allocation80_spill] sm:$0xff] %v16562_v17  ;;  %12870 = vmatprep.subr.bf16.mxu1 %v16423_v25  ;;  %v16571_v23 = vand.u32 4294901760, %v16562_v17  ;;  %19788 = vst [vmem:[#allocation82_spill] sm:$0xff] %v16573_v1  ;;  %v2100_v8 = vpop.permute.xlu1 %2099  ;;  %v16585_v20 = vsub.f32 %v2287_v56, %v16573_v1 }
 0x1eb   :  { %vm2126_vm13 = vcmp.eq.s32.totalorder %v2100_v8, %v15482_v54 }
 0x1ec   :  { %19787 = vst [vmem:[#allocation81_spill] sm:$0xff] %v16571_v23  ;;  %v2482_v22 = vsub.f32 %v16562_v17, %v16571_v23  ;;  %v9400_v36 = vsel %vm2126_vm13, 1.0, %v19727_v5  ;;  %19790 = vst [vmem:[#allocation84_spill] sm:$0xff] %v16585_v20 }
 0x1ed   :  { %12872 = vmatpush3.bf16.msra.mxu1 %v16423_v25  ;;  %v2174_v9 = vadd.f32 %v9400_v36, %v2062_v11  ;;  %v16593_v25 = vand.u32 4294901760, %v16585_v20  ;;  %v19799_v36 = vld [vmem:[#allocation10_spill] sm:$0xff] }
 0x1ee   :  { %12874 = vmatprep.subr.bf16.mxu1 %v16447_v19  ;;  %v16582_v47 = vand.u32 4294901760, %v2482_v22  ;;  %vm2018_vm2 = vcmp.eq.s32.totalorder %v19799_v36, %v15482_v54 }
 0x1ef   :  { %v2286_v10 = vadd.f32 %v9416_v39, %v2174_v9  ;;  %v1885_v6 = vpop.permute.xlu1 %1884  ;;  %19792 = vst [vmem:[#allocation86_spill] sm:$0xff] %v16593_v25  ;;  %v19800_v9 = vld [vmem:[#allocation70_spill] sm:$0xff] }
 0x1f0   :  { %19789 = vst [vmem:[#allocation83_spill] sm:$0xff] %v16582_v47  ;;  %11116 = vmatmul.mubr.f32.gmra.mrb[8].mxu1 %v16582_v47  ;;  %vm1905_vm4 = vcmp.eq.s32.totalorder %v1885_v6, %v15482_v54 }
 0x1f1   :  { %12876 = vmatpush3.bf16.msra.mxu1 %v16447_v19  ;;  %v16589_v37 = vand.u32 4294901760, %v2286_v10  ;;  %v2502_v19 = vsub.f32 %v16585_v20, %v16593_v25 }
 0x1f2   :  { %12878 = vmatprep.subr.bf16.mxu1 %v16493_v48 }
 0x1f3   :  { %19791 = vst [vmem:[#allocation85_spill] sm:$0xff] %v16589_v37  ;;  %v16596_v43 = vsub.f32 %v2286_v10, %v16589_v37  ;;  %v16615_v55 = vand.u32 4294901760, %v2502_v19 }
 0x1f4   :  { %v1776_v2 = vpop.permute.xlu1 %1775 }
 0x1f5   :  { %19793 = vst [vmem:[#allocation87_spill] sm:$0xff] %v16596_v43  ;;  %12880 = vmatpush3.bf16.msra.mxu1 %v16493_v48  ;;  %v16602_v49 = vand.u32 4294901760, %v16596_v43  ;;  %v19797_v48 = vld [vmem:[#allocation64_spill] sm:$0xff]  ;;  %19798 = vst [vmem:[#allocation14_spill] sm:$0xff] %v16615_v55  ;;  %vm1794_vm1 = vcmp.eq.s32.totalorder %v1776_v2, %v15482_v54 }
 0x1f6   :  { %12882 = vmatprep.subr.bf16.mxu1 %v16221_v33  ;;  %v1952_v4 = vadd.f32 %v9370_v31, %v19797_v48  ;;  %v9356_v22 = vsel %vm1794_vm1, 1.0, %v19727_v5 }
 0x1f7   :  { %19794 = vst [vmem:[#allocation88_spill] sm:$0xff] %v16602_v49  ;;  %v2492_v38 = vsub.f32 %v16596_v43, %v16602_v49  ;;  %v1842_v10 = vadd.f32 %v9356_v22, %v19800_v9 }
 0x1f9   :  { %v1994_v15 = vpop.permute.xlu1 %1993  ;;  %v16609_v62 = vand.u32 4294901760, %v2492_v38  ;;  %v9388_v38 = vsel %vm2018_vm2, 1.0, %v19727_v5 }
 0x1fa   :  { %vm2016_vm0 = vcmp.eq.s32.totalorder %v1994_v15, %v15482_v54  ;;  %v9371_v15 = vsel %vm1905_vm4, 1.0, %v19727_v5 }
 0x1fb   :  { %19795 = vst [vmem:[#allocation89_spill] sm:$0xff] %v16609_v62  ;;  %v9386_v26 = vsel %vm2016_vm0, 1.0, %v19727_v5  ;;  %11118 = vmatprep.mubr.f32.mxu1 %v16609_v62  ;;  %v19834_v62 = vld [vmem:[#allocation23_spill] sm:$0xff] }
 0x1fc   :  { %v2064_v56 = vadd.f32 %v9386_v26, %v1952_v4  ;;  %11119 = vmatmul.mubr.f32.gmra.mrb[10].mxu1 %v16615_v55  ;;  %v19801_v4 = vld [vmem:[#allocation61_spill] sm:$0xff] }
 0x1fd   :  { %v1953_v26 = vadd.f32 %v9371_v15, %v19801_v4 }
 0x1fe   :  { %v1779_v16 = vpop.permute.xlu1 %1778  ;;  %v2176_v8 = vadd.f32 %v9402_v40, %v2064_v56  ;;  %v2221_v56 = vpop.permute.xlu0 %2220 }
 0x1ff   :  { %vm2241_vm6 = vcmp.eq.s32.totalorder %v2221_v56, %v15482_v54  ;;  %vm1795_vm9 = vcmp.eq.s32.totalorder %v1779_v16, %v15482_v54 }
 0x202   :  { %v2224_v56 = vpop.permute.xlu0 %2223 }
 0x203   :  { %v1997_v11 = vpop.permute.xlu1 %1996  ;;  %vm2242_vm11 = vcmp.eq.s32.totalorder %v2224_v56, %v15482_v54 }
 0x204   :  { %vm2017_vm5 = vcmp.eq.s32.totalorder %v1997_v11, %v15482_v54  ;;  %v9419_v11 = vsel %vm2241_vm6, 1.0, %v19727_v5 }
 0x205   :  { %v9387_v48 = vsel %vm2017_vm5, 1.0, %v19727_v5 }
 0x206   :  { %v2065_v22 = vadd.f32 %v9387_v48, %v1953_v26 }
 0x208   :  { %v1888_v39 = vpop.permute.xlu1 %1887 }
 0x209   :  { %vm1906_vm3 = vcmp.eq.s32.totalorder %v1888_v39, %v15482_v54 }
 0x20a   :  { %v9372_v19 = vsel %vm1906_vm3, 1.0, %v19727_v5 }
 0x20b   :  { %v1954_v31 = vadd.f32 %v9372_v19, %v1842_v10 }
 0x20c   :  { %v1891_v2 = vpop.permute.xlu1 %1890 }
 0x20d   :  { %v2066_v51 = vadd.f32 %v9388_v38, %v1954_v31  ;;  %vm1907_vm10 = vcmp.eq.s32.totalorder %v1891_v2, %v15482_v54 }
 0x211   :  { %v2109_v40 = vpop.permute.xlu1 %2108 }
 0x212   :  { %vm2129_vm7 = vcmp.eq.s32.totalorder %v2109_v40, %v15482_v54 }
 0x213   :  { %v9403_v6 = vsel %vm2129_vm7, 1.0, %v19727_v5 }
 0x214   :  { %v2177_v39 = vadd.f32 %v9403_v6, %v2065_v22  ;;  %v9357_v6 = vsel %vm1795_vm9, 1.0, %v19727_v5 }
 0x216   :  { %v2289_v36 = vadd.f32 %v9419_v11, %v2177_v39  ;;  %v2218_v9 = vpop.permute.xlu1 %2217  ;;  %v9373_v11 = vsel %vm1907_vm10, 1.0, %v19727_v5 }
 0x217   :  { %vm2240_vm8 = vcmp.eq.s32.totalorder %v2218_v9, %v15482_v54  ;;  %v1843_v9 = vadd.f32 %v9357_v6, %v16515_v14 }
 0x218   :  { %v16639_v10 = vand.u32 4294901760, %v2289_v36  ;;  %v9418_v19 = vsel %vm2240_vm8, 1.0, %v19727_v5 }
 0x219   :  { %v2288_v31 = vadd.f32 %v9418_v19, %v2176_v8  ;;  %v9420_v19 = vsel %vm2242_vm11, 1.0, %v19727_v5 }
 0x21a   :  { %19802 = vst [vmem:[#allocation64_spill] sm:$0xff] %v16639_v10  ;;  %v16643_v38 = vsub.f32 %v2289_v36, %v16639_v10 }
 0x21b   :  { %v16645_v15 = vand.u32 4294901760, %v2288_v31  ;;  %v2003_v48 = vpop.permute.xlu1 %2002 }
 0x21c   :  { %19803 = vst [vmem:[#allocation10_spill] sm:$0xff] %v16643_v38  ;;  %v16648_v4 = vand.u32 4294901760, %v16643_v38  ;;  %vm2019_vm13 = vcmp.eq.s32.totalorder %v2003_v48, %v15482_v54  ;;  %v1955_v48 = vadd.f32 %v9373_v11, %v1843_v9 }
 0x21d   :  { %19804 = vst [vmem:[#allocation70_spill] sm:$0xff] %v16645_v15  ;;  %v16651_v26 = vsub.f32 %v2288_v31, %v16645_v15 }
 0x21e   :  { %19805 = vst [vmem:[#allocation61_spill] sm:$0xff] %v16648_v4  ;;  %v2522_v22 = vsub.f32 %v16643_v38, %v16648_v4 }
 0x21f   :  { %19806 = vst [vmem:[#allocation90_spill] sm:$0xff] %v16651_v26  ;;  %v16655_v40 = vand.u32 4294901760, %v16651_v26 }
 0x220   :  { %v2112_v8 = vpop.permute.xlu1 %2111  ;;  %v16672_v56 = vand.u32 4294901760, %v2522_v22 }
 0x221   :  { %19807 = vst [vmem:[#allocation91_spill] sm:$0xff] %v16655_v40  ;;  %vm2130_vm12 = vcmp.eq.s32.totalorder %v2112_v8, %v15482_v54  ;;  %v2512_v39 = vsub.f32 %v16651_v26, %v16655_v40  ;;  %v9389_v8 = vsel %vm2019_vm13, 1.0, %v19727_v5 }
 0x222   :  { %v9404_v16 = vsel %vm2130_vm12, 1.0, %v19727_v5  ;;  %19809 = vst [vmem:[#allocation93_spill] sm:$0xff] %v16672_v56  ;;  %v2067_v14 = vadd.f32 %v9389_v8, %v1955_v48 }
 0x223   :  { %v2178_v2 = vadd.f32 %v9404_v16, %v2066_v51  ;;  %v16668_v36 = vand.u32 4294901760, %v2512_v39 }
 0x224   :  { %v2115_v31 = vpop.permute.xlu1 %2114 }
 0x225   :  { %19808 = vst [vmem:[#allocation92_spill] sm:$0xff] %v16668_v36  ;;  %v2290_v55 = vadd.f32 %v9420_v19, %v2178_v2  ;;  %vm2131_vm14 = vcmp.eq.s32.totalorder %v2115_v31, %v15482_v54  ;;  %11121 = vmatprep.mubr.f32.mxu1 %v16668_v36  ;;  %v19830_v36 = vld [vmem:[#allocation73_spill] sm:$0xff] }
 0x226   :  { %11122 = vmatmul.mubr.f32.gmra.mrb[12].mxu1 %v16672_v56  ;;  %v9405_v39 = vsel %vm2131_vm14, 1.0, %v19727_v5 }
 0x227   :  { %v16678_v51 = vand.u32 4294901760, %v2290_v55  ;;  %v2179_v16 = vadd.f32 %v9405_v39, %v2067_v14  ;;  %v19818_v14 = vld [vmem:[#allocation16_spill] sm:$0xff] }
 0x229   :  { %19810 = vst [vmem:[#allocation94_spill] sm:$0xff] %v16678_v51  ;;  %v16682_v6 = vsub.f32 %v2290_v55, %v16678_v51  ;;  %v2227_v22 = vpop.permute.xlu1 %2226 }
 0x22a   :  { %vm2243_vm15 = vcmp.eq.s32.totalorder %v2227_v22, %v15482_v54  ;;  %v19819_v22 = vld [vmem:[#allocation22_spill] sm:$0xff]  ;;  %v19826_v54 = vld [vmem:[#allocation48_spill] sm:$0xff] }
 0x22b   :  { %19811 = vst [vmem:[#allocation95_spill] sm:$0xff] %v16682_v6  ;;  %v9421_v2 = vsel %vm2243_vm15, 1.0, %v19727_v5  ;;  %v16687_v19 = vand.u32 4294901760, %v16682_v6  ;;  %v19825_v5 = vld [vmem:[#allocation19_spill] sm:$0xff] }
 0x22c   :  { %v2291_v11 = vadd.f32 %v9421_v2, %v2179_v16  ;;  %v19820_v16 = vld [vmem:[#allocation24_spill] sm:$0xff]  ;;  %v19821_v2 = vld [vmem:[#allocation50_spill] sm:$0xff] }
 0x22d   :  { %19812 = vst [vmem:[#allocation96_spill] sm:$0xff] %v16687_v19  ;;  %v2532_v9 = vsub.f32 %v16682_v6, %v16687_v19 }
 0x22e   :  { %v16691_v31 = vand.u32 4294901760, %v2291_v11 }
 0x22f   :  { %v16693_v56 = vand.u32 4294901760, %v2532_v9  ;;  %v19823_v9 = vld [vmem:[#allocation18_spill] sm:$0xff] }
 0x230   :  { %19813 = vst [vmem:[#allocation97_spill] sm:$0xff] %v16691_v31  ;;  %v16696_v55 = vsub.f32 %v2291_v11, %v16691_v31  ;;  %v19822_v11 = vld [vmem:[#allocation29_spill] sm:$0xff] }
 0x231   :  { %19814 = vst [vmem:[#allocation98_spill] sm:$0xff] %v16693_v56  ;;  %11124 = vmatprep.mubr.f32.mxu1 %v16693_v56  ;;  %v19829_v56 = vld [vmem:[#allocation35_spill] sm:$0xff] }
 0x232   :  { %19815 = vst [vmem:[#allocation99_spill] sm:$0xff] %v16696_v55  ;;  %v16700_v8 = vand.u32 4294901760, %v16696_v55 }
 0x234   :  { %19816 = vst [vmem:[#allocation100_spill] sm:$0xff] %v16700_v8  ;;  %v2542_v48 = vsub.f32 %v16696_v55, %v16700_v8 }
 0x236   :  { %v16704_v39 = vand.u32 4294901760, %v2542_v48  ;;  %v19824_v48 = vld [vmem:[#allocation71_spill] sm:$0xff] }
 0x237   :  { %19835 = vst [vmem:[#allocation71_spill] sm:$0xff] %v16748_v28 }
 0x238   :  { %19817 = vst [vmem:[#allocation101_spill] sm:$0xff] %v16704_v39  ;;  %11125 = vmatmul.mubr.f32.gmra.mrb[14].mxu1 %v16704_v39  ;;  %v19827_v39 = vld [vmem:[#allocation72_spill] sm:$0xff] }
 0x239   :  { %11159 = vmatprep.mubr.f32.mxu1 %v19818_v14 }
 0x23c   :  { %11160 = vmatmul.mubr.f32.vlgmr.msra.gmra.mrb[0].mxu1 %v19819_v22 }
 0x23d   :  { %12884 = vmatpush3.bf16.msra.mxu1 %v16221_v33  ;;  %11162 = vmatprep.mubr.f32.mxu1 %v19820_v16  ;;  %v19828_v33 = vld [vmem:[#allocation25_spill] sm:$0xff] }
 0x23e   :  { %12886 = vmatprep.subr.bf16.mxu1 %v19821_v2 }
 0x240   :  { %11163 = vmatmul.mubr.f32.gmra.mrb[2].mxu1 %v19822_v11 }
 0x241   :  { %12888 = vmatpush3.bf16.msra.mxu1 %v19821_v2  ;;  %11165 = vmatprep.mubr.f32.mxu1 %v19823_v9  ;;  %v19831_v2 = vld [vmem:[#allocation74_spill] sm:$0xff] }
 0x242   :  { %12890 = vmatprep.subr.bf16.mxu1 %v19824_v48 }
 0x244   :  { %11166 = vmatmul.mubr.f32.gmra.mrb[4].mxu1 %v19825_v5 }
 0x245   :  { %12892 = vmatpush3.bf16.msra.mxu1 %v19824_v48  ;;  %11168 = vmatprep.mubr.f32.mxu1 %v19826_v54  ;;  %v16741_v48 = vld [vmem:[#allocation2 + $0x8] sm:$0xff] }
 0x246   :  { %12894 = vmatprep.subr.bf16.mxu1 %v19827_v39  ;;  %v19343_v47 = vand.u32 4294901760, %v16741_v48 }
 0x248   :  { %11169 = vmatmul.mubr.f32.gmra.mrb[6].mxu1 %v19828_v33 }
 0x249   :  { %12896 = vmatpush3.bf16.msra.mxu1 %v19827_v39  ;;  %11171 = vmatprep.mubr.f32.mxu1 %v19829_v56  ;;  %v16739_v39 = vld [vmem:[#allocation2] sm:$0xff] }
 0x24a   :  { %12898 = vmatprep.subr.bf16.mxu1 %v19830_v36  ;;  %19833 = vst [vmem:[#allocation50_spill] sm:$0xff] %v16739_v39 }
 0x24c   :  { %11172 = vmatmul.mubr.f32.gmra.mrb[8].mxu1 %v16557_v27 }
 0x24d   :  { %12900 = vmatpush3.bf16.msra.mxu1 %v19830_v36  ;;  %11174 = vmatprep.mubr.f32.mxu1 %v16589_v37  ;;  %v19832_v36 = vld [vmem:[#allocation9_spill] sm:$0xff] }
 0x24e   :  { %12902 = vmatprep.subr.bf16.mxu1 %v19831_v2 }
 0x250   :  { %11175 = vmatmul.mubr.f32.gmra.mrb[10].mxu1 %v16573_v1 }
 0x251   :  { %12904 = vmatpush3.bf16.msra.mxu1 %v19831_v2  ;;  %11177 = vmatprep.mubr.f32.mxu1 %v16645_v15  ;;  %v16743_v2 = vld [vmem:[#allocation2 + $0x10] sm:$0xff] }
 0x252   :  { %12906 = vmatprep.subr.bf16.mxu1 %v16451_v53  ;;  %v19840_v63 = vand.u32 4294901760, %v16743_v2 }
 0x254   :  { %11178 = vmatmul.mubr.f32.gmra.mrb[12].mxu1 %v16639_v10 }
 0x255   :  { %12908 = vmatpush3.bf16.msra.mxu1 %v16451_v53  ;;  %11180 = vmatprep.mubr.f32.mxu1 %v16678_v51  ;;  %v19344_v53 = vand.u32 4294901760, %v16739_v39  ;;  %v16775_v39 = vld [vmem:[#allocation2 + $0x38] sm:$0xff] }
 0x256   :  { %12910 = vmatprep.subr.bf16.mxu1 %v16453_v52 }
 0x257   :  { %v16761_v0 = vpack.c.bf16 %v19343_v47, %v19344_v53  ;;  %v19841_v47 = vld [vmem:[#allocation46_spill] sm:$0xff] }
 0x258   :  { %11181 = vmatmul.mubr.f32.gmra.mrb[14].mxu1 %v16691_v31  ;;  %v19842_v53 = vld [vmem:[#allocation34_spill] sm:$0xff] }
 0x259   :  { %12912 = vmatpush3.bf16.msra.mxu1 %v16453_v52  ;;  %11215 = vmatprep.mubr.f32.mxu1 %v19832_v36  ;;  %v16753_v52 = vld [vmem:[#allocation2 + $0x28] sm:$0xff]  ;;  %v19345_v36 = vand.u32 4294901760, %v16748_v28  ;;  %19838 = vst [vmem:[#allocation73_spill] sm:$0xff] %v16761_v0  ;;  %v16792_v28 = vld [vmem:[#allocation2 + $0x40] sm:$0xff] }
 0x25a   :  { %12914 = vmatprep.subr.bf16.mxu1 %v19834_v62  ;;  %19836 = vst [vmem:[#allocation72_spill] sm:$0xff] %v16753_v52  ;;  %v19350_v3 = vand.u32 4294901760, %v16753_v52  ;;  %13010 = vmatprep.subr.bf16.mxu0 %v16761_v0  ;;  %v19846_v52 = vld [vmem:[#allocation56_spill] sm:$0xff] }
 0x25b   :  { %v16771_v31 = vpack.c.bf16 %v19345_v36, %v19840_v63  ;;  %13012 = vmatpush3.bf16.msra.mxu0 %v16761_v0  ;;  %v16794_v0 = vld [vmem:[#allocation2 + $0x48] sm:$0xff] }
 0x25c   :  { %11216 = vmatmul.mubr.f32.vlgmr.msra.gmra.mrb[0].mxu1 %v19837_v42  ;;  %v16773_v42 = vld [vmem:[#allocation2 + $0x30] sm:$0xff]  ;;  %v16786_v63 = vpack.c.bf16 %v19350_v3, %v19351_v7  ;;  %v19359_v7 = vand.u32 4294901760, %v16792_v28 }
 0x25d   :  { %12916 = vmatpush3.bf16.msra.mxu1 %v19834_v62  ;;  %11218 = vmatprep.mubr.f32.mxu1 %v19839_v13  ;;  %v19356_v36 = vand.u32 4294901760, %v16773_v42  ;;  %v19355_v13 = vand.u32 4294901760, %v16775_v39 }
 0x25e   :  { %12918 = vmatprep.subr.bf16.mxu1 %v19841_v47  ;;  %13014 = vmatprep.subr.bf16.mxu0 %v16771_v31  ;;  %19843 = vst [vmem:[#allocation74_spill] sm:$0xff] %v16786_v63 }
 0x25f   :  { %13016 = vmatpush3.bf16.msra.mxu0 %v16771_v31  ;;  %v16804_v3 = vpack.c.bf16 %v19355_v13, %v19356_v36  ;;  %v19848_v36 = vld [vmem:[#allocation59_spill] sm:$0xff] }
 0x260   :  { %11219 = vmatmul.mubr.f32.gmra.mrb[2].mxu1 %v19842_v53  ;;  %v19844_v53 = vld [vmem:[#allocation51_spill] sm:$0xff]  ;;  %13018 = vmatprep.subr.bf16.mxu0 %v16786_v63 }
 0x261   :  { %12920 = vmatpush3.bf16.msra.mxu1 %v19841_v47  ;;  %11221 = vmatprep.mubr.f32.mxu1 %v16131_v18  ;;  %19845 = vst [vmem:[#allocation23_spill] sm:$0xff] %v16804_v3  ;;  %v19358_v18 = vand.u32 4294901760, %v16794_v0 }
 0x262   :  { %12922 = vmatprep.subr.bf16.mxu1 %v19844_v53 }
 0x263   :  { %13020 = vmatpush3.bf16.msra.mxu0 %v16786_v63  ;;  %v16818_v13 = vpack.c.bf16 %v19358_v18, %v19359_v7  ;;  %v19850_v18 = vld [vmem:[#allocation67_spill] sm:$0xff]  ;;  %v19851_v7 = vld [vmem:[#allocation69_spill] sm:$0xff] }
 0x264   :  { %11222 = vmatmul.mubr.f32.gmra.mrb[4].mxu1 %v16149_v35  ;;  %13022 = vmatprep.subr.bf16.mxu0 %v16804_v3 }
 0x265   :  { %12924 = vmatpush3.bf16.msra.mxu1 %v19844_v53  ;;  %11224 = vmatprep.mubr.f32.mxu1 %v16285_v34  ;;  %19847 = vst [vmem:[#allocation46_spill] sm:$0xff] %v16818_v13 }
 0x266   :  { %12926 = vmatprep.subr.bf16.mxu1 %v19846_v52 }
 0x267   :  { %13024 = vmatpush3.bf16.msra.mxu0 %v16804_v3 }
 0x268   :  { %11225 = vmatmul.mubr.f32.gmra.mrb[6].mxu1 %v16213_v57  ;;  %13026 = vmatprep.subr.bf16.mxu0 %v16818_v13  ;;  %v19849_v57 = vld [vmem:[#allocation63_spill] sm:$0xff] }
 0x269   :  { %12928 = vmatpush3.bf16.msra.mxu1 %v19846_v52  ;;  %11227 = vmatprep.mubr.f32.mxu1 %v16141_v45 }
 0x26a   :  { %12930 = vmatprep.subr.bf16.mxu1 %v19848_v36 }
 0x26b   :  { %13028 = vmatpush3.bf16.msra.mxu0 %v16818_v13 }
 0x26c   :  { %11228 = vmatmul.mubr.f32.gmra.mrb[8].mxu1 %v16562_v17 }
 0x26d   :  { %12932 = vmatpush3.bf16.msra.mxu1 %v19848_v36  ;;  %11230 = vmatprep.mubr.f32.mxu1 %v16596_v43  ;;  %v19852_v43 = vld [vmem:[#allocation17_spill] sm:$0xff] }
 0x26e   :  { %12934 = vmatprep.subr.bf16.mxu1 %v19849_v57 }
 0x270   :  { %11231 = vmatmul.mubr.f32.gmra.mrb[10].mxu1 %v16585_v20  ;;  %v19853_v20 = vld [vmem:[#allocation15_spill] sm:$0xff] }
 0x271   :  { %12936 = vmatpush3.bf16.msra.mxu1 %v19849_v57  ;;  %11233 = vmatprep.mubr.f32.mxu1 %v16651_v26  ;;  %v19854_v26 = vld [vmem:[#allocation30_spill] sm:$0xff] }
 0x272   :  { %12938 = vmatprep.subr.bf16.mxu1 %v19850_v18 }
 0x274   :  { %11234 = vmatmul.mubr.f32.gmra.mrb[12].mxu1 %v16643_v38  ;;  %v19855_v38 = vld [vmem:[#allocation21_spill] sm:$0xff] }
 0x275   :  { %12940 = vmatpush3.bf16.msra.mxu1 %v19850_v18  ;;  %11236 = vmatprep.mubr.f32.mxu1 %v16682_v6 }
 0x276   :  { %12942 = vmatprep.subr.bf16.mxu1 %v19851_v7 }
 0x278   :  { %11237 = vmatmul.mubr.f32.gmra.mrb[14].mxu1 %v16696_v55  ;;  %v19882_v55 = vand.u32 4294901760, %v16773_v42 }
 0x279   :  { %12944 = vmatpush3.bf16.msra.mxu1 %v19851_v7  ;;  %11271 = vmatprep.mubr.f32.mxu1 %v19852_v43 }
 0x27a   :  { %12946 = vmatprep.subr.bf16.mxu1 %v16463_v50 }
 0x27c   :  { %11272 = vmatmul.mubr.f32.vlgmr.msra.gmra.mrb[0].mxu1 %v19853_v20 }
 0x27d   :  { %12948 = vmatpush3.bf16.msra.mxu1 %v16463_v50  ;;  %11274 = vmatprep.mubr.f32.mxu1 %v19854_v26  ;;  %v19856_v50 = vld [vmem:[#allocation97_spill] sm:$0xff] }
 0x27e   :  { %12950 = vmatprep.subr.bf16.mxu1 %v16469_v58 }
 0x280   :  { %11275 = vmatmul.mubr.f32.gmra.mrb[2].mxu1 %v19855_v38 }
 0x281   :  { %12952 = vmatpush3.bf16.msra.mxu1 %v16469_v58  ;;  %11277 = vmatprep.mubr.f32.mxu1 %v16169_v44 }
 0x282   :  { %12954 = vmatprep.subr.bf16.mxu1 %v16478_v59 }
 0x284   :  { %11278 = vmatmul.mubr.f32.gmra.mrb[4].mxu1 %v16185_v46 }
 0x285   :  { %12956 = vmatpush3.bf16.msra.mxu1 %v16478_v59  ;;  %11280 = vmatprep.mubr.f32.mxu1 %v16392_v12 }
 0x286   :  { %12958 = vmatprep.subr.bf16.mxu1 %v16484_v60 }
 0x288   :  { %11281 = vmatmul.mubr.f32.gmra.mrb[6].mxu1 %v16282_v24 }
 0x289   :  { %12960 = vmatpush3.bf16.msra.mxu1 %v16484_v60  ;;  %11283 = vmatprep.mubr.f32.mxu1 %v16180_v61  ;;  %v2304_v60 = vld [vmem:[#allocation2 + $0x60] sm:$0xff] }
 0x28a   :  { %12962 = vmatprep.subr.bf16.mxu1 %v16490_v32 }
 0x28c   :  { %11284 = vmatmul.mubr.f32.gmra.mrb[8].mxu1 %v16571_v23 }
 0x28d   :  { %12964 = vmatpush3.bf16.msra.mxu1 %v16490_v32  ;;  %11286 = vmatprep.mubr.f32.mxu1 %v16602_v49  ;;  %v2305_v32 = vld [vmem:[#allocation2 + $0x68] sm:$0xff] }
 0x28e   :  { %12966 = vmatprep.subr.bf16.mxu1 %v16499_v29 }
 0x290   :  { %11287 = vmatmul.mubr.f32.gmra.mrb[10].mxu1 %v16593_v25 }
 0x291   :  { %12968 = vmatpush3.bf16.msra.mxu1 %v16499_v29  ;;  %11289 = vmatprep.mubr.f32.mxu1 %v16655_v40  ;;  %v3631_v29 = vand.u32 4294901760, %v2304_v60  ;;  %v19864_v40 = vand.u32 4294901760, %v16741_v48 }
 0x292   :  { %12970 = vmatprep.subr.bf16.mxu1 %v16501_v41 }
 0x293   :  { %v16938_v25 = vsub.f32 %v16741_v48, %v19864_v40  ;;  %v16960_v44 = vsub.f32 %v2304_v60, %v3631_v29 }
 0x294   :  { %11290 = vmatmul.mubr.f32.gmra.mrb[12].mxu1 %v16648_v4 }
 0x295   :  { %12972 = vmatpush3.bf16.msra.mxu1 %v16501_v41  ;;  %11292 = vmatprep.mubr.f32.mxu1 %v16687_v19  ;;  %v3634_v41 = vand.u32 4294901760, %v2305_v32  ;;  %19865 = vst [vmem:[#allocation67_spill] sm:$0xff] %v16938_v25  ;;  %v19383_v23 = vand.u32 4294901760, %v16938_v25  ;;  %19869 = vst [vmem:[#allocation102_spill] sm:$0xff] %v16960_v44 }
 0x296   :  { %12974 = vmatprep.subr.bf16.mxu1 %v16511_v30 }
 0x297   :  { %v16962_v38 = vsub.f32 %v2305_v32, %v3634_v41 }
 0x298   :  { %11293 = vmatmul.mubr.f32.gmra.mrb[14].mxu1 %v16700_v8  ;;  %v19861_v8 = vld [vmem:[#allocation50_spill] sm:$0xff] }
 0x299   :  { %12976 = vmatpush3.bf16.msra.mxu1 %v16511_v30  ;;  %11327 = vmatprep.mubr.f32.mxu1 %v19818_v14  ;;  %v19862_v19 = vand.u32 4294901760, %v19861_v8  ;;  %19870 = vst [vmem:[#allocation103_spill] sm:$0xff] %v16962_v38 }
 0x29a   :  { %12978 = vmatprep.subr.bf16.mxu1 %v19834_v62 }
 0x29b   :  { %v16933_v4 = vsub.f32 %v19861_v8, %v19862_v19  ;;  %v3846_v19 = vsub.f32 %v16938_v25, %v19383_v23  ;;  %v19880_v23 = vld [vmem:[#allocation72_spill] sm:$0xff] }
 0x29c   :  { %11328 = vmatmul.mubr.f32.vlgmr.msra.gmra.mrb[0].mxu1 %v19819_v22  ;;  %v19881_v26 = vand.u32 4294901760, %v19880_v23 }
 0x29d   :  { %12980 = vmatpush3.bf16.msra.mxu1 %v19834_v62  ;;  %11330 = vmatprep.mubr.f32.mxu1 %v19820_v16  ;;  %v2306_v62 = vld [vmem:[#allocation2 + $0x70] sm:$0xff]  ;;  %19863 = vst [vmem:[#allocation63_spill] sm:$0xff] %v16933_v4  ;;  %v19375_v49 = vand.u32 4294901760, %v16933_v4  ;;  %v3847_v8 = vand.u32 4294901760, %v3846_v19 }
 0x29e   :  { %12982 = vmatprep.subr.bf16.mxu1 %v19841_v47  ;;  %v17032_v20 = vsub.f32 %v19880_v23, %v19881_v26  ;;  %v17047_v23 = vsub.f32 %v16773_v42, %v19882_v55  ;;  %v19883_v26 = vand.u32 4294901760, %v16775_v39 }
 0x29f   :  { %v3839_v61 = vsub.f32 %v16933_v4, %v19375_v49 }
 0x2a0   :  { %11331 = vmatmul.mubr.f32.gmra.mrb[2].mxu1 %v19822_v11  ;;  %v19885_v55 = vand.u32 4294901760, %v17032_v20 }
 0x2a1   :  { %12984 = vmatpush3.bf16.msra.mxu1 %v19841_v47  ;;  %11333 = vmatprep.mubr.f32.mxu1 %v19823_v9  ;;  %v16923_v47 = vpack.c.bf16 %v3634_v41, %v3631_v29  ;;  %v3840_v40 = vand.u32 4294901760, %v3839_v61 }
 0x2a2   :  { %12986 = vmatprep.subr.bf16.mxu1 %v19844_v53 }
 0x2a3   :  { %19859 = vst [vmem:[#allocation56_spill] sm:$0xff] %v16923_v47  ;;  %v16951_v48 = vpack.c.bf16 %v3847_v8, %v3840_v40 }
 0x2a4   :  { %11334 = vmatmul.mubr.f32.gmra.mrb[4].mxu1 %v19825_v5 }
 0x2a5   :  { %12988 = vmatpush3.bf16.msra.mxu1 %v19844_v53  ;;  %11336 = vmatprep.mubr.f32.mxu1 %v19826_v54  ;;  %v3637_v53 = vand.u32 4294901760, %v2306_v62  ;;  %19866 = vst [vmem:[#allocation69_spill] sm:$0xff] %v16951_v48 }
 0x2a6   :  { %12990 = vmatprep.subr.bf16.mxu1 %v19846_v52 }
 0x2a7   :  { %v16978_v29 = vsub.f32 %v2306_v62, %v3637_v53 }
 0x2a8   :  { %11337 = vmatmul.mubr.f32.gmra.mrb[6].mxu1 %v19828_v33 }
 0x2a9   :  { %12992 = vmatpush3.bf16.msra.mxu1 %v19846_v52  ;;  %11339 = vmatprep.mubr.f32.mxu1 %v19829_v56  ;;  %19871 = vst [vmem:[#allocation104_spill] sm:$0xff] %v16978_v29 }
 0x2aa   :  { %12994 = vmatprep.subr.bf16.mxu1 %v19848_v36 }
 0x2ac   :  { %11340 = vmatmul.mubr.f32.gmra.mrb[8].mxu1 %v16557_v27 }
 0x2ad   :  { %12996 = vmatpush3.bf16.msra.mxu1 %v19848_v36  ;;  %11342 = vmatprep.mubr.f32.mxu1 %v16589_v37  ;;  %v2307_v36 = vld [vmem:[#allocation2 + $0x78] sm:$0xff] }
 0x2ae   :  { %12998 = vmatprep.subr.bf16.mxu1 %v19849_v57  ;;  %v3640_v52 = vand.u32 4294901760, %v2307_v36 }
 0x2b0   :  { %11343 = vmatmul.mubr.f32.gmra.mrb[10].mxu1 %v16573_v1  ;;  %v16980_v41 = vsub.f32 %v2307_v36, %v3640_v52 }
 0x2b1   :  { %13000 = vmatpush3.bf16.msra.mxu1 %v19849_v57  ;;  %11345 = vmatprep.mubr.f32.mxu1 %v16645_v15  ;;  %v2303_v57 = vld [vmem:[#allocation2 + $0x58] sm:$0xff] }
 0x2b2   :  { %13002 = vmatprep.subr.bf16.mxu1 %v19850_v18  ;;  %v3628_v59 = vand.u32 4294901760, %v2303_v57  ;;  %19872 = vst [vmem:[#allocation105_spill] sm:$0xff] %v16980_v41 }
 0x2b4   :  { %11346 = vmatmul.mubr.f32.gmra.mrb[12].mxu1 %v16639_v10  ;;  %v16956_v12 = vsub.f32 %v2303_v57, %v3628_v59  ;;  %v19382_v57 = vand.u32 4294901760, %v16962_v38 }
 0x2b5   :  { %13004 = vmatpush3.bf16.msra.mxu1 %v19850_v18  ;;  %11348 = vmatprep.mubr.f32.mxu1 %v16678_v51  ;;  %v19857_v18 = vld [vmem:[#allocation20_spill] sm:$0xff] }
 0x2b6   :  { %13006 = vmatprep.subr.bf16.mxu1 %v19851_v7  ;;  %19868 = vst [vmem:[#allocation50_spill] sm:$0xff] %v16956_v12  ;;  %v19377_v49 = vand.u32 4294901760, %v16956_v12  ;;  %v3930_v32 = vsub.f32 %v16962_v38, %v19382_v57 }
 0x2b8   :  { %11349 = vmatmul.mubr.f32.gmra.mrb[14].mxu1 %v19856_v50  ;;  %v3916_v19 = vsub.f32 %v16956_v12, %v19377_v49  ;;  %v3931_v49 = vand.u32 4294901760, %v3930_v32  ;;  %v19876_v32 = vand.u32 4294901760, %v16743_v2 }
 0x2b9   :  { %13008 = vmatpush3.bf16.msra.mxu1 %v19851_v7  ;;  %11383 = vmatprep.mubr.f32.mxu1 %v19818_v14  ;;  %v2302_v7 = vld [vmem:[#allocation2 + $0x50] sm:$0xff] }
 0x2ba   :  { %v3625_v58 = vand.u32 4294901760, %v2302_v7 }
 0x2bc   :  { %11384 = vmatmul.mubr.f32.vlgmr.msra.gmra.mrb[0].mxu1 %v19819_v22  ;;  %v16921_v30 = vpack.c.bf16 %v3628_v59, %v3625_v58  ;;  %v16954_v24 = vsub.f32 %v2302_v7, %v3625_v58  ;;  %v19379_v7 = vand.u32 4294901760, %v16960_v44  ;;  %v3917_v59 = vand.u32 4294901760, %v3916_v19 }
 0x2bd   :  { %11386 = vmatprep.mubr.f32.mxu1 %v19820_v16 }
 0x2be   :  { %19858 = vst [vmem:[#allocation51_spill] sm:$0xff] %v16921_v30  ;;  %13030 = vmatprep.subr.bf16.mxu0 %v16921_v30  ;;  %19867 = vst [vmem:[#allocation20_spill] sm:$0xff] %v16954_v24  ;;  %v19378_v46 = vand.u32 4294901760, %v16954_v24  ;;  %v3923_v60 = vsub.f32 %v16960_v44, %v19379_v7  ;;  %v16990_v7 = vpack.c.bf16 %v16938_v25, %v16933_v4 }
 0x2bf   :  { %13032 = vmatpush3.bf16.msra.mxu0 %v16921_v30 }
 0x2c0   :  { %11387 = vmatmul.mubr.f32.gmra.mrb[2].mxu1 %v19822_v11  ;;  %13034 = vmatprep.subr.bf16.mxu0 %v16923_v47  ;;  %v3909_v61 = vsub.f32 %v16954_v24, %v19378_v46  ;;  %v3924_v8 = vand.u32 4294901760, %v3923_v60  ;;  %v19381_v46 = vand.u32 4294901760, %v16978_v29  ;;  %v17010_v60 = vpack.c.bf16 %v16980_v41, %v16978_v29 }
 0x2c1   :  { %11389 = vmatprep.mubr.f32.mxu1 %v19823_v9 }
 0x2c2   :  { %v3910_v58 = vand.u32 4294901760, %v3909_v61  ;;  %v19380_v61 = vand.u32 4294901760, %v16980_v41  ;;  %v16986_v19 = vpack.c.bf16 %v3931_v49, %v3924_v8  ;;  %v3937_v62 = vsub.f32 %v16978_v29, %v19381_v46  ;;  %19875 = vst [vmem:[#allocation108_spill] sm:$0xff] %v17010_v60 }
 0x2c3   :  { %13036 = vmatpush3.bf16.msra.mxu0 %v16923_v47  ;;  %v17002_v49 = vpack.c.bf16 %v16956_v12, %v16954_v24  ;;  %v17015_v8 = vsub.f32 %v16743_v2, %v19876_v32  ;;  %v19879_v46 = vand.u32 4294901760, %v16751_v21 }
 0x2c4   :  { %11390 = vmatmul.mubr.f32.gmra.mrb[4].mxu1 %v19825_v5  ;;  %v16982_v40 = vpack.c.bf16 %v3917_v59, %v3910_v58  ;;  %v3944_v36 = vsub.f32 %v16980_v41, %v19380_v61  ;;  %v17006_v59 = vpack.c.bf16 %v16962_v38, %v16960_v44 }
 0x2c5   :  { %11392 = vmatprep.mubr.f32.mxu1 %v19826_v54  ;;  %19873 = vst [vmem:[#allocation106_spill] sm:$0xff] %v17002_v49  ;;  %v17027_v57 = vsub.f32 %v16751_v21, %v19879_v46 }
 0x2c6   :  { %19874 = vst [vmem:[#allocation107_spill] sm:$0xff] %v17006_v59 }
 0x2c7   :  { %v19884_v34 = vand.u32 4294901760, %v17027_v57 }
 0x2c8   :  { %11393 = vmatmul.mubr.f32.gmra.mrb[6].mxu1 %v19828_v33 }
 0x2c9   :  { %11395 = vmatprep.mubr.f32.mxu1 %v19829_v56  ;;  %v3867_v42 = vsub.f32 %v17027_v57, %v19884_v34 }
 0x2cc   :  { %11396 = vmatmul.mubr.f32.gmra.mrb[8].mxu1 %v16557_v27 }
 0x2cd   :  { %11398 = vmatprep.mubr.f32.mxu1 %v16589_v37  ;;  %v3868_v37 = vand.u32 4294901760, %v3867_v42 }
 0x2d0   :  { %11399 = vmatmul.mubr.f32.gmra.mrb[10].mxu1 %v16573_v1 }
 0x2d1   :  { %11401 = vmatprep.mubr.f32.mxu1 %v16645_v15 }
 0x2d4   :  { %11402 = vmatmul.mubr.f32.gmra.mrb[12].mxu1 %v16639_v10 }
 0x2d5   :  { %11404 = vmatprep.mubr.f32.mxu1 %v16678_v51  ;;  %v19886_v51 = vand.u32 4294901760, %v16792_v28 }
 0x2d7   :  { %v17079_v34 = vsub.f32 %v16792_v28, %v19886_v51 }
 0x2d8   :  { %11405 = vmatmul.mubr.f32.gmra.mrb[14].mxu1 %v19856_v50 }
 0x2d9   :  { %11775 = vmatprep.mubr.f32.mxu1 %v19857_v18  ;;  %v16928_v18 = vpack.c.bf16 %v3640_v52, %v3637_v53  ;;  %v3938_v53 = vand.u32 4294901760, %v3937_v62  ;;  %v3945_v52 = vand.u32 4294901760, %v3944_v36  ;;  %v19877_v62 = vld [vmem:[#allocation71_spill] sm:$0xff]  ;;  %v19894_v22 = vand.u32 4294901760, %v17079_v34 }
 0x2da   :  { %v19878_v36 = vand.u32 4294901760, %v19877_v62 }
 0x2db   :  { %19860 = vst [vmem:[#allocation59_spill] sm:$0xff] %v16928_v18  ;;  %13038 = vmatprep.subr.bf16.mxu0 %v16928_v18  ;;  %v16998_v58 = vpack.c.bf16 %v3945_v52, %v3938_v53  ;;  %v19385_v52 = vand.u32 4294901760, %v17015_v8 }
 0x2dc   :  { %13040 = vmatpush3.bf16.msra.mxu0 %v16928_v18  ;;  %v17020_v53 = vsub.f32 %v19877_v62, %v19878_v36 }
 0x2dd   :  { %13042 = vmatprep.subr.bf16.mxu0 %v16951_v48  ;;  %v3853_v2 = vsub.f32 %v17015_v8, %v19385_v52  ;;  %v17052_v52 = vsub.f32 %v16775_v39, %v19883_v26  ;;  %v3874_v39 = vsub.f32 %v17032_v20, %v19885_v55 }
 0x2de   :  { %v19387_v61 = vand.u32 4294901760, %v17020_v53 }
 0x2df   :  { %v3854_v36 = vand.u32 4294901760, %v3853_v2 }
 0x2e0   :  { %v3860_v32 = vsub.f32 %v17020_v53, %v19387_v61 }
 0x2e2   :  { %v3861_v43 = vand.u32 4294901760, %v3860_v32  ;;  %v19888_v32 = vand.u32 4294901760, %v16794_v0 }
 0x2e4   :  { %v17087_v15 = vpack.c.bf16 %v3861_v43, %v3854_v36  ;;  %v17092_v2 = vsub.f32 %v16794_v0, %v19888_v32  ;;  %v19890_v36 = vand.u32 4294901760, %v17047_v23  ;;  %v19891_v32 = vand.u32 4294901760, %v17052_v52 }
 0x2e6   :  { %19887 = vst [vmem:[#allocation71_spill] sm:$0xff] %v17087_v15  ;;  %v3881_v0 = vsub.f32 %v17047_v23, %v19890_v36 }
 0x38f   :  { %v11385_v62 = vpop.f32.mrb[0].mxu1 }
 0x390   :  { %v17042_v46 = vand.u32 4294901760, %v11385_v62  ;;  %v3500_v21 = vpop.f32.mrb[1].mxu1 }
 0x391   :  { %v17054_v6 = vand.u32 4294901760, %v3500_v21 }
 0x392   :  { %v17057_v61 = vsub.f32 %v11385_v62, %v17042_v46 }
 0x393   :  { %v17060_v17 = vsub.f32 %v3500_v21, %v17054_v6  ;;  %v11388_v45 = vpop.f32.mrb[2].mxu1 }
 0x394   :  { %v19403_v26 = vand.u32 4294901760, %v17057_v61  ;;  %v17069_v35 = vand.u32 4294901760, %v11388_v45  ;;  %v3512_v62 = vpop.f32.mrb[3].mxu1 }
 0x395   :  { %v17074_v50 = vand.u32 4294901760, %v3512_v62  ;;  %v19889_v28 = vand.u32 4294901760, %v17060_v17 }
 0x396   :  { %v3688_v55 = vsub.f32 %v17057_v61, %v19403_v26  ;;  %v17085_v10 = vsub.f32 %v11388_v45, %v17069_v35  ;;  %v3875_v26 = vand.u32 4294901760, %v3874_v39 }
 0x397   :  { %v17095_v21 = vsub.f32 %v3512_v62, %v17074_v50  ;;  %v11391_v1 = vpop.f32.mrb[4].mxu1  ;;  %v3678_v51 = vsub.f32 %v17060_v17, %v19889_v28  ;;  %v3888_v62 = vsub.f32 %v17052_v52, %v19891_v32 }
 0x398   :  { %v17101_v27 = vand.u32 4294901760, %v11391_v1  ;;  %v3524_v43 = vpop.f32.mrb[5].mxu1  ;;  %v3689_v39 = vand.u32 4294901760, %v3688_v55  ;;  %v19892_v54 = vand.u32 4294901760, %v17085_v10  ;;  %v17126_v42 = vpack.c.bf16 %v3875_v26, %v3868_v37 }
 0x399   :  { %v19414_v56 = vand.u32 4294901760, %v17095_v21  ;;  %v17110_v33 = vand.u32 4294901760, %v3524_v43  ;;  %v3679_v28 = vand.u32 4294901760, %v3678_v51  ;;  %v3889_v16 = vand.u32 4294901760, %v3888_v62 }
 0x39a   :  { %v17114_v45 = vsub.f32 %v11391_v1, %v17101_v27  ;;  %v3708_v5 = vsub.f32 %v17085_v10, %v19892_v54  ;;  %19893 = vst [vmem:[#allocation72_spill] sm:$0xff] %v17126_v42  ;;  %v3882_v54 = vand.u32 4294901760, %v3881_v0  ;;  %v3895_v37 = vsub.f32 %v17079_v34, %v19894_v22 }
 0x39b   :  { %v17121_v9 = vsub.f32 %v3524_v43, %v17110_v33  ;;  %v11394_v32 = vpop.f32.mrb[6].mxu1  ;;  %11439 = vmatprep.mubr.f32.mxu0 %v3679_v28  ;;  %v3698_v51 = vsub.f32 %v17095_v21, %v19414_v56  ;;  %v19895_v62 = vand.u32 4294901760, %v17092_v2 }
 0x39c   :  { %v19418_v1 = vand.u32 4294901760, %v17114_v45  ;;  %v17129_v55 = vand.u32 4294901760, %v11394_v32  ;;  %v3536_v11 = vpop.f32.mrb[7].mxu1  ;;  %11440 = vmatmul.mubr.f32.vlgmr.msra.gmra.mrb[16].mxu0 %v3689_v39  ;;  %v3709_v56 = vand.u32 4294901760, %v3708_v5 }
 0x39d   :  { %v17132_v43 = vand.u32 4294901760, %v3536_v11  ;;  %13044 = vmatpush3.bf16.msra.mxu0 %v16951_v48  ;;  %v3699_v28 = vand.u32 4294901760, %v3698_v51  ;;  %v3902_v39 = vsub.f32 %v17092_v2, %v19895_v62  ;;  %v19896_v22 = vand.u32 4294901760, %v17121_v9 }
 0x39e   :  { %v17139_v26 = vsub.f32 %v11394_v32, %v17129_v55  ;;  %13046 = vmatprep.subr.bf16.mxu0 %v17087_v15  ;;  %v3728_v0 = vsub.f32 %v17114_v45, %v19418_v1  ;;  %v17157_v1 = vpack.c.bf16 %v3889_v16, %v3882_v54 }
 0x39f   :  { %v17149_v51 = vsub.f32 %v3536_v11, %v17132_v43  ;;  %v11397_v36 = vpop.f32.mrb[8].mxu1  ;;  %11442 = vmatprep.mubr.f32.mxu0 %v3699_v28  ;;  %v3718_v32 = vsub.f32 %v17121_v9, %v19896_v22  ;;  %v3896_v28 = vand.u32 4294901760, %v3895_v37  ;;  %v3903_v16 = vand.u32 4294901760, %v3902_v39 }
 0x3a0   :  { %v19425_v5 = vand.u32 4294901760, %v17139_v26  ;;  %v17155_v14 = vand.u32 4294901760, %v11397_v36  ;;  %v3548_v48 = vpop.f32.mrb[9].mxu1  ;;  %11443 = vmatmul.mubr.f32.gmra.mrb[18].mxu0 %v3709_v56  ;;  %19897 = vst [vmem:[#allocation109_spill] sm:$0xff] %v17157_v1  ;;  %v3729_v22 = vand.u32 4294901760, %v3728_v0 }
 0x3a1   :  { %v17160_v62 = vand.u32 4294901760, %v3548_v48  ;;  %13048 = vmatpush3.bf16.msra.mxu0 %v17087_v15  ;;  %v3719_v11 = vand.u32 4294901760, %v3718_v32  ;;  %v19898_v15 = vand.u32 4294901760, %v17149_v51 }
 0x3a2   :  { %v17164_v29 = vsub.f32 %v11397_v36, %v17155_v14  ;;  %13050 = vmatprep.subr.bf16.mxu0 %v17126_v42  ;;  %v3748_v56 = vsub.f32 %v17139_v26, %v19425_v5  ;;  %v17190_v5 = vpack.c.bf16 %v3903_v16, %v3896_v28 }
 0x3a3   :  { %v17171_v54 = vsub.f32 %v3548_v48, %v17160_v62  ;;  %v11400_v41 = vpop.f32.mrb[10].mxu1  ;;  %11445 = vmatprep.mubr.f32.mxu0 %v3719_v11  ;;  %v3738_v37 = vsub.f32 %v17149_v51, %v19898_v15 }
 0x3a4   :  { %v19430_v36 = vand.u32 4294901760, %v17164_v29  ;;  %v17177_v32 = vand.u32 4294901760, %v11400_v41  ;;  %v3560_v0 = vpop.f32.mrb[11].mxu1  ;;  %11446 = vmatmul.mubr.f32.gmra.mrb[20].mxu0 %v3729_v22  ;;  %v3749_v11 = vand.u32 4294901760, %v3748_v56  ;;  %19899 = vst [vmem:[#allocation110_spill] sm:$0xff] %v17190_v5 }
 0x3a5   :  { %v17180_v44 = vand.u32 4294901760, %v3560_v0  ;;  %13052 = vmatpush3.bf16.msra.mxu0 %v17126_v42  ;;  %v3739_v48 = vand.u32 4294901760, %v3738_v37  ;;  %v19900_v42 = vand.u32 4294901760, %v17171_v54 }
 0x3a6   :  { %v17184_v39 = vsub.f32 %v11400_v41, %v17177_v32  ;;  %13054 = vmatprep.subr.bf16.mxu0 %v17157_v1  ;;  %v3768_v15 = vsub.f32 %v17164_v29, %v19430_v36 }
 0x3a7   :  { %v17193_v22 = vsub.f32 %v3560_v0, %v17180_v44  ;;  %v11403_v38 = vpop.f32.mrb[12].mxu1  ;;  %11448 = vmatprep.mubr.f32.mxu0 %v3739_v48  ;;  %v3758_v37 = vsub.f32 %v17171_v54, %v19900_v42 }
 0x3a8   :  { %v19435_v41 = vand.u32 4294901760, %v17184_v39  ;;  %v17199_v56 = vand.u32 4294901760, %v11403_v38  ;;  %v3572_v12 = vpop.f32.mrb[13].mxu1  ;;  %11449 = vmatmul.mubr.f32.gmra.mrb[22].mxu0 %v3749_v11  ;;  %v3769_v0 = vand.u32 4294901760, %v3768_v15 }
 0x3a9   :  { %v19436_v24 = vand.u32 4294901760, %v17193_v22  ;;  %v17202_v36 = vand.u32 4294901760, %v3572_v12  ;;  %13056 = vmatpush3.bf16.msra.mxu0 %v17157_v1  ;;  %v3759_v28 = vand.u32 4294901760, %v3758_v37 }
 0x3aa   :  { %v17206_v16 = vsub.f32 %v11403_v38, %v17199_v56  ;;  %13058 = vmatprep.subr.bf16.mxu0 %v17190_v5  ;;  %v3788_v42 = vsub.f32 %v17184_v39, %v19435_v41 }
 0x3ab   :  { %v17213_v48 = vsub.f32 %v3572_v12, %v17202_v36  ;;  %v11406_v11 = vpop.f32.mrb[14].mxu1  ;;  %11451 = vmatprep.mubr.f32.mxu0 %v3759_v28  ;;  %v3778_v1 = vsub.f32 %v17193_v22, %v19436_v24 }
 0x3ac   :  { %v19441_v37 = vand.u32 4294901760, %v17206_v16  ;;  %v17219_v38 = vand.u32 4294901760, %v11406_v11  ;;  %v3584_v15 = vpop.f32.mrb[15].mxu1  ;;  %11452 = vmatmul.mubr.f32.gmra.mrb[24].mxu0 %v3769_v0  ;;  %v3789_v28 = vand.u32 4294901760, %v3788_v42 }
 0x3ad   :  { %v19444_v25 = vand.u32 4294901760, %v17213_v48  ;;  %v17222_v4 = vand.u32 4294901760, %v3584_v15  ;;  %13060 = vmatpush3.bf16.msra.mxu0 %v17190_v5  ;;  %v3779_v12 = vand.u32 4294901760, %v3778_v1 }
 0x3ae   :  { %v17226_v41 = vsub.f32 %v11406_v11, %v17219_v38  ;;  %13062 = vmatprep.subr.bf16.mxu0 %v16982_v40  ;;  %v3808_v24 = vsub.f32 %v17206_v16, %v19441_v37 }
 0x3af   :  { %v17233_v18 = vsub.f32 %v3584_v15, %v17222_v4  ;;  %11454 = vmatprep.mubr.f32.mxu0 %v3779_v12  ;;  %v3798_v0 = vsub.f32 %v17213_v48, %v19444_v25 }
 0x3b0   :  { %v19442_v1 = vand.u32 4294901760, %v17226_v41  ;;  %11455 = vmatmul.mubr.f32.gmra.mrb[26].mxu0 %v3789_v28  ;;  %v3809_v5 = vand.u32 4294901760, %v3808_v24  ;;  %v17255_v24 = vpack.c.bf16 %v17020_v53, %v17015_v8 }
 0x3b1   :  { %v19443_v11 = vand.u32 4294901760, %v17233_v18  ;;  %13064 = vmatpush3.bf16.msra.mxu0 %v16982_v40  ;;  %v3799_v42 = vand.u32 4294901760, %v3798_v0  ;;  %v17279_v0 = vpack.c.bf16 %v17092_v2, %v17079_v34 }
 0x3b2   :  { %13066 = vmatprep.subr.bf16.mxu0 %v16986_v19  ;;  %v3828_v15 = vsub.f32 %v17226_v41, %v19442_v1  ;;  %v19906_v1 = vld [vmem:[#allocation67_spill] sm:$0xff] }
 0x3b3   :  { %11457 = vmatprep.mubr.f32.mxu0 %v3799_v42  ;;  %v3818_v12 = vsub.f32 %v17233_v18, %v19443_v11  ;;  %19901 = vst [vmem:[#allocation111_spill] sm:$0xff] %v17279_v0  ;;  %v19902_v42 = vld [vmem:[#allocation73_spill] sm:$0xff]  ;;  %v19907_v11 = vand.u32 4294901760, %v19906_v1  ;;  %v19914_v1 = vand.u32 4294901760, %v17095_v21 }
 0x3b4   :  { %11458 = vmatmul.mubr.f32.gmra.mrb[28].mxu0 %v3809_v5  ;;  %v3829_v37 = vand.u32 4294901760, %v3828_v15  ;;  %v17263_v5 = vpack.c.bf16 %v17032_v20, %v17027_v57  ;;  %v19903_v15 = vld [vmem:[#allocation59_spill] sm:$0xff] }
 0x3b5   :  { %13068 = vmatpush3.bf16.msra.mxu0 %v16986_v19  ;;  %v3819_v28 = vand.u32 4294901760, %v3818_v12  ;;  %v19904_v12 = vld [vmem:[#allocation63_spill] sm:$0xff] }
 0x3b6   :  { %13070 = vmatprep.subr.bf16.mxu0 %v16998_v58 }
 0x3b7   :  { %11460 = vmatprep.mubr.f32.mxu0 %v3819_v28  ;;  %v19905_v28 = vand.u32 4294901760, %v19904_v12  ;;  %v19913_v12 = vand.u32 4294901760, %v17057_v61 }
 0x3b8   :  { %11461 = vmatmul.mubr.f32.gmra.mrb[30].mxu0 %v3829_v37  ;;  %v17271_v37 = vpack.c.bf16 %v17052_v52, %v17047_v23 }
 0x3b9   :  { %13072 = vmatpush3.bf16.msra.mxu0 %v16998_v58  ;;  %11495 = vmatprep.mubr.f32.mxu0 %v17054_v6  ;;  %v17333_v25 = vpack.c.bf16 %v19907_v11, %v19905_v28  ;;  %v19932_v28 = vld [vmem:[#allocation50_spill] sm:$0xff] }
 0x3ba   :  { %13074 = vmatprep.subr.bf16.mxu0 %v16990_v7 }
 0x3bb   :  { %19908 = vst [vmem:[#allocation73_spill] sm:$0xff] %v17333_v25 }
 0x3bc   :  { %11496 = vmatmul.mubr.f32.vlgmr.msra.gmra.mrb[16].mxu0 %v17042_v46 }
 0x3bd   :  { %11498 = vmatprep.mubr.f32.mxu0 %v17074_v50  ;;  %13076 = vmatpush3.bf16.msra.mxu0 %v16990_v7 }
 0x3be   :  { %13078 = vmatprep.subr.bf16.mxu0 %v17255_v24 }
 0x3c0   :  { %11499 = vmatmul.mubr.f32.gmra.mrb[18].mxu0 %v17069_v35 }
 0x3c1   :  { %11501 = vmatprep.mubr.f32.mxu0 %v17110_v33  ;;  %13080 = vmatpush3.bf16.msra.mxu0 %v17255_v24 }
 0x3c2   :  { %13082 = vmatprep.subr.bf16.mxu0 %v17263_v5 }
 0x3c4   :  { %11502 = vmatmul.mubr.f32.gmra.mrb[20].mxu0 %v17101_v27 }
 0x3c5   :  { %11504 = vmatprep.mubr.f32.mxu0 %v17132_v43  ;;  %13084 = vmatpush3.bf16.msra.mxu0 %v17263_v5 }
 0x3c6   :  { %13086 = vmatprep.subr.bf16.mxu0 %v17271_v37 }
 0x3c8   :  { %11505 = vmatmul.mubr.f32.gmra.mrb[22].mxu0 %v17129_v55 }
 0x3c9   :  { %11507 = vmatprep.mubr.f32.mxu0 %v17160_v62  ;;  %13088 = vmatpush3.bf16.msra.mxu0 %v17271_v37 }
 0x3ca   :  { %13090 = vmatprep.subr.bf16.mxu0 %v17279_v0 }
 0x3cc   :  { %11508 = vmatmul.mubr.f32.gmra.mrb[24].mxu0 %v17155_v14 }
 0x3cd   :  { %11510 = vmatprep.mubr.f32.mxu0 %v17180_v44  ;;  %13092 = vmatpush3.bf16.msra.mxu0 %v17279_v0 }
 0x3ce   :  { %13094 = vmatprep.subr.bf16.mxu0 %v17002_v49 }
 0x3d0   :  { %11511 = vmatmul.mubr.f32.gmra.mrb[26].mxu0 %v17177_v32 }
 0x3d1   :  { %11513 = vmatprep.mubr.f32.mxu0 %v17202_v36  ;;  %13096 = vmatpush3.bf16.msra.mxu0 %v17002_v49  ;;  %v19911_v49 = vand.u32 4294901760, %v17020_v53 }
 0x3d2   :  { %13098 = vmatprep.subr.bf16.mxu0 %v17006_v59 }
 0x3d4   :  { %11514 = vmatmul.mubr.f32.gmra.mrb[28].mxu0 %v17199_v56 }
 0x3d5   :  { %11516 = vmatprep.mubr.f32.mxu0 %v17222_v4  ;;  %13100 = vmatpush3.bf16.msra.mxu0 %v17006_v59  ;;  %v19910_v59 = vand.u32 4294901760, %v17015_v8  ;;  %v19918_v8 = vand.u32 4294901760, %v17085_v10 }
 0x3d6   :  { %13102 = vmatprep.subr.bf16.mxu0 %v17010_v60 }
 0x3d7   :  { %v17344_v0 = vpack.c.bf16 %v19911_v49, %v19910_v59  ;;  %v19919_v49 = vand.u32 4294901760, %v17121_v9  ;;  %v19921_v59 = vand.u32 4294901760, %v17052_v52  ;;  %v19928_v52 = vand.u32 4294901760, %v17139_v26 }
 0x3d8   :  { %11517 = vmatmul.mubr.f32.gmra.mrb[30].mxu0 %v17219_v38 }
 0x3d9   :  { %13104 = vmatpush3.bf16.msra.mxu0 %v17010_v60  ;;  %11551 = vmatprep.mubr.f32.mxu0 %v17060_v17  ;;  %v19909_v60 = vand.u32 4294901760, %v17060_v17  ;;  %19912 = vst [vmem:[#allocation63_spill] sm:$0xff] %v17344_v0  ;;  %v19915_v17 = vand.u32 4294901760, %v17027_v57  ;;  %v19924_v57 = vand.u32 4294901760, %v17149_v51 }
 0x3da   :  { %13106 = vmatprep.subr.bf16.mxu0 %v19902_v42 }
 0x3dc   :  { %11552 = vmatmul.mubr.f32.vlgmr.msra.gmra.mrb[16].mxu0 %v17057_v61  ;;  %v19920_v61 = vand.u32 4294901760, %v17047_v23  ;;  %v19929_v23 = vand.u32 4294901760, %v17171_v54 }
 0x3dd   :  { %11554 = vmatprep.mubr.f32.mxu0 %v17095_v21  ;;  %13108 = vmatpush3.bf16.msra.mxu0 %v19902_v42 }
 0x3de   :  { %13110 = vmatprep.subr.bf16.mxu0 %v16771_v31  ;;  %v17368_v53 = vpack.c.bf16 %v19921_v59, %v19920_v61  ;;  %v19943_v61 = vand.u32 4294901760, %v17213_v48  ;;  %v19946_v59 = vld [vmem:[#allocation105_spill] sm:$0xff] }
 0x3e0   :  { %11555 = vmatmul.mubr.f32.gmra.mrb[18].mxu0 %v17085_v10  ;;  %19922 = vst [vmem:[#allocation112_spill] sm:$0xff] %v17368_v53  ;;  %v19925_v10 = vand.u32 4294901760, %v17079_v34  ;;  %v19936_v34 = vand.u32 4294901760, %v17193_v22 }
 0x3e1   :  { %11557 = vmatprep.mubr.f32.mxu0 %v17121_v9  ;;  %13112 = vmatpush3.bf16.msra.mxu0 %v16771_v31  ;;  %v19926_v9 = vand.u32 4294901760, %v17092_v2  ;;  %v19935_v2 = vand.u32 4294901760, %v17164_v29 }
 0x3e2   :  { %13114 = vmatprep.subr.bf16.mxu0 %v16786_v63 }
 0x3e3   :  { %v17380_v21 = vpack.c.bf16 %v19926_v9, %v19925_v10  ;;  %v19949_v10 = vand.u32 4294901760, %v17206_v16  ;;  %v19950_v9 = vand.u32 4294901760, %v17233_v18 }
 0x3e4   :  { %11558 = vmatmul.mubr.f32.gmra.mrb[20].mxu0 %v17114_v45 }
 0x3e5   :  { %11560 = vmatprep.mubr.f32.mxu0 %v17149_v51  ;;  %13116 = vmatpush3.bf16.msra.mxu0 %v16786_v63  ;;  %19927 = vst [vmem:[#allocation113_spill] sm:$0xff] %v17380_v21 }
 0x3e6   :  { %13118 = vmatprep.subr.bf16.mxu0 %v16804_v3 }
 0x3e8   :  { %11561 = vmatmul.mubr.f32.gmra.mrb[22].mxu0 %v17139_v26  ;;  %v19937_v26 = vld [vmem:[#allocation102_spill] sm:$0xff] }
 0x3e9   :  { %11563 = vmatprep.mubr.f32.mxu0 %v17171_v54  ;;  %13120 = vmatpush3.bf16.msra.mxu0 %v16804_v3  ;;  %v19938_v54 = vand.u32 4294901760, %v19937_v26 }
 0x3ea   :  { %13122 = vmatprep.subr.bf16.mxu0 %v16818_v13 }
 0x3ec   :  { %11564 = vmatmul.mubr.f32.gmra.mrb[24].mxu0 %v17164_v29  ;;  %v19944_v29 = vld [vmem:[#allocation104_spill] sm:$0xff] }
 0x3ed   :  { %11566 = vmatprep.mubr.f32.mxu0 %v17193_v22  ;;  %13124 = vmatpush3.bf16.msra.mxu0 %v16818_v13  ;;  %v19945_v22 = vand.u32 4294901760, %v19944_v29 }
 0x3ee   :  { %13126 = vmatprep.subr.bf16.mxu0 %v16921_v30 }
 0x3f0   :  { %11567 = vmatmul.mubr.f32.gmra.mrb[26].mxu0 %v17184_v39 }
 0x3f1   :  { %11569 = vmatprep.mubr.f32.mxu0 %v17213_v48  ;;  %13128 = vmatpush3.bf16.msra.mxu0 %v16921_v30 }
 0x3f2   :  { %13130 = vmatprep.subr.bf16.mxu0 %v16923_v47 }
 0x3f4   :  { %11570 = vmatmul.mubr.f32.gmra.mrb[28].mxu0 %v17206_v16 }
 0x3f5   :  { %11572 = vmatprep.mubr.f32.mxu0 %v17233_v18  ;;  %13132 = vmatpush3.bf16.msra.mxu0 %v16923_v47 }
 0x3f6   :  { %13134 = vmatprep.subr.bf16.mxu0 %v19903_v15 }
 0x3f8   :  { %11573 = vmatmul.mubr.f32.gmra.mrb[30].mxu0 %v17226_v41 }
 0x3f9   :  { %13136 = vmatpush3.bf16.msra.mxu0 %v19903_v15  ;;  %11607 = vmatprep.mubr.f32.mxu0 %v19909_v60  ;;  %v19916_v60 = vand.u32 4294901760, %v17032_v20  ;;  %v19923_v20 = vand.u32 4294901760, %v17114_v45  ;;  %v19930_v45 = vld [vmem:[#allocation20_spill] sm:$0xff] }
 0x3fa   :  { %13138 = vmatprep.subr.bf16.mxu0 %v17333_v25  ;;  %v19931_v51 = vand.u32 4294901760, %v19930_v45 }
 0x3fb   :  { %v17356_v11 = vpack.c.bf16 %v19916_v60, %v19915_v17  ;;  %v19939_v17 = vld [vmem:[#allocation103_spill] sm:$0xff] }
 0x3fc   :  { %11608 = vmatmul.mubr.f32.vlgmr.msra.gmra.mrb[16].mxu0 %v19913_v12  ;;  %v19933_v12 = vand.u32 4294901760, %v19932_v28  ;;  %v19940_v60 = vand.u32 4294901760, %v19939_v17  ;;  %v19958_v17 = vld [vmem:[#allocation45_spill] sm:$0xff] }
 0x3fd   :  { %11610 = vmatprep.mubr.f32.mxu0 %v19914_v1  ;;  %13140 = vmatpush3.bf16.msra.mxu0 %v17333_v25  ;;  %19917 = vst [vmem:[#allocation67_spill] sm:$0xff] %v17356_v11 }
 0x3fe   :  { %13142 = vmatprep.subr.bf16.mxu0 %v17344_v0  ;;  %v17392_v1 = vpack.c.bf16 %v19933_v12, %v19931_v51  ;;  %v19957_v12 = vld [vmem:[#allocation44_spill] sm:$0xff] }
 0x400   :  { %11611 = vmatmul.mubr.f32.gmra.mrb[18].mxu0 %v19918_v8  ;;  %19934 = vst [vmem:[#allocation20_spill] sm:$0xff] %v17392_v1  ;;  %v17404_v8 = vpack.c.bf16 %v19940_v60, %v19938_v54 }
 0x401   :  { %11613 = vmatprep.mubr.f32.mxu0 %v19919_v49  ;;  %13144 = vmatpush3.bf16.msra.mxu0 %v17344_v0  ;;  %v19942_v49 = vand.u32 4294901760, %v17184_v39  ;;  %v19951_v39 = vand.u32 4294901760, %v17226_v41  ;;  %v19956_v41 = vld [vmem:[#allocation36_spill] sm:$0xff] }
 0x402   :  { %13146 = vmatprep.subr.bf16.mxu0 %v17356_v11  ;;  %19941 = vst [vmem:[#allocation50_spill] sm:$0xff] %v17404_v8 }
 0x404   :  { %11614 = vmatmul.mubr.f32.gmra.mrb[20].mxu0 %v19923_v20  ;;  %v19947_v20 = vand.u32 4294901760, %v19946_v59 }
 0x405   :  { %11616 = vmatprep.mubr.f32.mxu0 %v19924_v57  ;;  %13148 = vmatpush3.bf16.msra.mxu0 %v17356_v11 }
 0x406   :  { %13150 = vmatprep.subr.bf16.mxu0 %v17368_v53  ;;  %v17416_v57 = vpack.c.bf16 %v19947_v20, %v19945_v22 }
 0x408   :  { %11617 = vmatmul.mubr.f32.gmra.mrb[22].mxu0 %v19928_v52  ;;  %19948 = vst [vmem:[#allocation102_spill] sm:$0xff] %v17416_v57 }
 0x409   :  { %11619 = vmatprep.mubr.f32.mxu0 %v19929_v23  ;;  %13152 = vmatpush3.bf16.msra.mxu0 %v17368_v53 }
 0x40a   :  { %13154 = vmatprep.subr.bf16.mxu0 %v17380_v21 }
 0x40c   :  { %11620 = vmatmul.mubr.f32.gmra.mrb[24].mxu0 %v19935_v2 }
 0x40d   :  { %11622 = vmatprep.mubr.f32.mxu0 %v19936_v34  ;;  %13156 = vmatpush3.bf16.msra.mxu0 %v17380_v21 }
 0x40e   :  { %13158 = vmatprep.subr.bf16.mxu0 %v17392_v1 }
 0x410   :  { %11623 = vmatmul.mubr.f32.gmra.mrb[26].mxu0 %v19942_v49 }
 0x411   :  { %11625 = vmatprep.mubr.f32.mxu0 %v19943_v61  ;;  %13160 = vmatpush3.bf16.msra.mxu0 %v17392_v1 }
 0x412   :  { %13162 = vmatprep.subr.bf16.mxu0 %v17404_v8 }
 0x414   :  { %11626 = vmatmul.mubr.f32.gmra.mrb[28].mxu0 %v19949_v10 }
 0x415   :  { %11628 = vmatprep.mubr.f32.mxu0 %v19950_v9  ;;  %13164 = vmatpush3.bf16.msra.mxu0 %v17404_v8 }
 0x416   :  { %13166 = vmatprep.subr.bf16.mxu0 %v17416_v57 }
 0x418   :  { %11629 = vmatmul.mubr.f32.gmra.mrb[30].mxu0 %v19951_v39 }
 0x419   :  { %13168 = vmatpush3.bf16.msra.mxu0 %v17416_v57  ;;  %11663 = vmatprep.mubr.f32.mxu0 %v17054_v6 }
 0x41a   :  { %13170 = vmatprep.subr.bf16.mxu0 %v19902_v42 }
 0x41c   :  { %11664 = vmatmul.mubr.f32.vlgmr.msra.gmra.mrb[16].mxu0 %v17042_v46 }
 0x41d   :  { %11666 = vmatprep.mubr.f32.mxu0 %v17074_v50  ;;  %13172 = vmatpush3.bf16.msra.mxu0 %v19902_v42 }
 0x41e   :  { %13174 = vmatprep.subr.bf16.mxu0 %v16771_v31 }
 0x420   :  { %11667 = vmatmul.mubr.f32.gmra.mrb[18].mxu0 %v17069_v35 }
 0x421   :  { %11669 = vmatprep.mubr.f32.mxu0 %v17110_v33  ;;  %13176 = vmatpush3.bf16.msra.mxu0 %v16771_v31 }
 0x422   :  { %13178 = vmatprep.subr.bf16.mxu0 %v16786_v63 }
 0x424   :  { %11670 = vmatmul.mubr.f32.gmra.mrb[20].mxu0 %v17101_v27 }
 0x425   :  { %11672 = vmatprep.mubr.f32.mxu0 %v17132_v43  ;;  %13180 = vmatpush3.bf16.msra.mxu0 %v16786_v63 }
 0x426   :  { %13182 = vmatprep.subr.bf16.mxu0 %v16804_v3 }
 0x428   :  { %11673 = vmatmul.mubr.f32.gmra.mrb[22].mxu0 %v17129_v55 }
 0x429   :  { %11675 = vmatprep.mubr.f32.mxu0 %v17160_v62  ;;  %13184 = vmatpush3.bf16.msra.mxu0 %v16804_v3 }
 0x42a   :  { %13186 = vmatprep.subr.bf16.mxu0 %v16818_v13 }
 0x42c   :  { %11676 = vmatmul.mubr.f32.gmra.mrb[24].mxu0 %v17155_v14 }
 0x42d   :  { %11678 = vmatprep.mubr.f32.mxu0 %v17180_v44  ;;  %13188 = vmatpush3.bf16.msra.mxu0 %v16818_v13 }
 0x42e   :  { %13190 = vmatprep.subr.bf16.mxu0 %v16921_v30 }
 0x430   :  { %11679 = vmatmul.mubr.f32.gmra.mrb[26].mxu0 %v17177_v32 }
 0x431   :  { %11681 = vmatprep.mubr.f32.mxu0 %v17202_v36  ;;  %13192 = vmatpush3.bf16.msra.mxu0 %v16921_v30 }
 0x432   :  { %13194 = vmatprep.subr.bf16.mxu0 %v16923_v47 }
 0x434   :  { %11682 = vmatmul.mubr.f32.gmra.mrb[28].mxu0 %v17199_v56 }
 0x435   :  { %11684 = vmatprep.mubr.f32.mxu0 %v17222_v4  ;;  %13196 = vmatpush3.bf16.msra.mxu0 %v16923_v47 }
 0x436   :  { %13198 = vmatprep.subr.bf16.mxu0 %v19903_v15 }
 0x438   :  { %11685 = vmatmul.mubr.f32.gmra.mrb[30].mxu0 %v17219_v38 }
 0x439   :  { %13200 = vmatpush3.bf16.msra.mxu0 %v19903_v15  ;;  %11719 = vmatprep.mubr.f32.mxu0 %v17054_v6 }
 0x43a   :  { %13394 = vmatprep.subr.bf16.mxu0 %v19902_v42 }
 0x43c   :  { %11720 = vmatmul.mubr.f32.vlgmr.msra.gmra.mrb[16].mxu0 %v17042_v46 }
 0x43d   :  { %11722 = vmatprep.mubr.f32.mxu0 %v17074_v50  ;;  %13396 = vmatpush3.bf16.msra.mxu0 %v19902_v42 }
 0x43e   :  { %13398 = vmatprep.subr.bf16.mxu0 %v16771_v31 }
 0x440   :  { %11723 = vmatmul.mubr.f32.gmra.mrb[18].mxu0 %v17069_v35  ;;  %v19952_v35 = vld [vmem:[#allocation69_spill] sm:$0xff] }
 0x441   :  { %11725 = vmatprep.mubr.f32.mxu0 %v17110_v33  ;;  %13400 = vmatpush3.bf16.msra.mxu0 %v16771_v31  ;;  %v19954_v33 = vld [vmem:[#allocation39_spill] sm:$0xff] }
 0x442   :  { %13402 = vmatprep.subr.bf16.mxu0 %v16786_v63 }
 0x444   :  { %11726 = vmatmul.mubr.f32.gmra.mrb[20].mxu0 %v17101_v27  ;;  %v19953_v27 = vld [vmem:[#allocation38_spill] sm:$0xff] }
 0x445   :  { %11728 = vmatprep.mubr.f32.mxu0 %v17132_v43  ;;  %13404 = vmatpush3.bf16.msra.mxu0 %v16786_v63  ;;  %v19955_v43 = vld [vmem:[#allocation13_spill] sm:$0xff] }
 0x446   :  { %13406 = vmatprep.subr.bf16.mxu0 %v16804_v3 }
 0x448   :  { %11729 = vmatmul.mubr.f32.gmra.mrb[22].mxu0 %v17129_v55 }
 0x449   :  { %11731 = vmatprep.mubr.f32.mxu0 %v17160_v62  ;;  %13408 = vmatpush3.bf16.msra.mxu0 %v16804_v3 }
 0x44a   :  { %13410 = vmatprep.subr.bf16.mxu0 %v16818_v13 }
 0x44c   :  { %11732 = vmatmul.mubr.f32.gmra.mrb[24].mxu0 %v17155_v14 }
 0x44d   :  { %11734 = vmatprep.mubr.f32.mxu0 %v17180_v44  ;;  %13412 = vmatpush3.bf16.msra.mxu0 %v16818_v13 }
 0x44e   :  { %13414 = vmatprep.subr.bf16.mxu0 %v16921_v30 }
 0x450   :  { %11735 = vmatmul.mubr.f32.gmra.mrb[26].mxu0 %v17177_v32 }
 0x451   :  { %11737 = vmatprep.mubr.f32.mxu0 %v17202_v36  ;;  %13416 = vmatpush3.bf16.msra.mxu0 %v16921_v30 }
 0x452   :  { %13418 = vmatprep.subr.bf16.mxu0 %v16923_v47 }
 0x454   :  { %11738 = vmatmul.mubr.f32.gmra.mrb[28].mxu0 %v17199_v56 }
 0x455   :  { %11740 = vmatprep.mubr.f32.mxu0 %v17222_v4  ;;  %13420 = vmatpush3.bf16.msra.mxu0 %v16923_v47 }
 0x456   :  { %13422 = vmatprep.subr.bf16.mxu0 %v19903_v15 }
 0x458   :  { %11741 = vmatmul.mubr.f32.gmra.mrb[30].mxu0 %v17219_v38 }
 0x459   :  { %13424 = vmatpush3.bf16.msra.mxu0 %v19903_v15 }
 0x45a   :  { %13426 = vmatprep.subr.bf16.mxu0 %v19952_v35 }
 0x50f   :  { %v11721_v44 = vpop.f32.mrb[16].mxu0 }
 0x510   :  { %v4881_v6 = vadd.f32 %v11721_v44, %v19953_v27  ;;  %v4786_v14 = vpop.f32.mrb[17].mxu0 }
 0x511   :  { %v4880_v50 = vadd.f32 %v4786_v14, %v19954_v33  ;;  %v19959_v14 = vld [vmem:[#allocation47_spill] sm:$0xff]  ;;  %v19968_v33 = vld [vmem:[#allocation62_spill] sm:$0xff] }
 0x512   :  { %v4897_v18 = vmax.f32 %v4881_v6, 0.0 }
 0x513   :  { %v4896_v46 = vmax.f32 %v4880_v50, 0.0  ;;  %v11724_v55 = vpop.f32.mrb[18].mxu0 }
 0x514   :  { %v4916_v4 = vand.u32 4294901760, %v4897_v18  ;;  %v4883_v62 = vadd.f32 %v11724_v55, %v19955_v43  ;;  %v4798_v36 = vpop.f32.mrb[19].mxu0 }
 0x515   :  { %v4913_v32 = vand.u32 4294901760, %v4896_v46  ;;  %v4882_v56 = vadd.f32 %v4798_v36, %v19956_v41 }
 0x516   :  { %v17496_v16 = vsub.f32 %v4897_v18, %v4916_v4  ;;  %v4899_v48 = vmax.f32 %v4883_v62, 0.0  ;;  %v19960_v62 = vld [vmem:[#allocation49_spill] sm:$0xff] }
 0x517   :  { %v17498_v38 = vpack.c.bf16 %v4916_v4, %v4913_v32  ;;  %v17500_v52 = vsub.f32 %v4896_v46, %v4913_v32  ;;  %v4898_v23 = vmax.f32 %v4882_v56, 0.0  ;;  %v11727_v45 = vpop.f32.mrb[20].mxu0 }
 0x518   :  { %v19454_v51 = vand.u32 4294901760, %v17496_v16  ;;  %v4922_v28 = vand.u32 4294901760, %v4899_v48  ;;  %v4885_v2 = vadd.f32 %v11727_v45, %v19957_v12  ;;  %v4810_v34 = vpop.f32.mrb[21].mxu0 }
 0x519   :  { %v19455_v26 = vand.u32 4294901760, %v17500_v52  ;;  %v4919_v54 = vand.u32 4294901760, %v4898_v23  ;;  %v4884_v60 = vadd.f32 %v4810_v34, %v19958_v17  ;;  %13202 = vmatprep.subr.bf16.mxu1 %v17498_v38  ;;  %v17509_v49 = vpack.c.bf16 %v17496_v16, %v17500_v52  ;;  %v19965_v17 = vld [vmem:[#allocation58_spill] sm:$0xff] }
 0x51a   :  { %v17511_v61 = vsub.f32 %v4899_v48, %v4922_v28  ;;  %v4901_v29 = vmax.f32 %v4885_v2, 0.0  ;;  %13204 = vmatpush3.bf16.msra.mxu1 %v17498_v38  ;;  %v5164_v22 = vsub.f32 %v17496_v16, %v19454_v51  ;;  %v19962_v51 = vld [vmem:[#allocation55_spill] sm:$0xff]  ;;  %v19972_v63 = vand.u32 4294901760, %v17500_v52 }
 0x51b   :  { %v17517_v59 = vpack.c.bf16 %v4922_v28, %v4919_v54  ;;  %v17519_v20 = vsub.f32 %v4898_v23, %v4919_v54  ;;  %v4900_v10 = vmax.f32 %v4884_v60, 0.0  ;;  %v11730_v9 = vpop.f32.mrb[22].mxu0  ;;  %v5157_v39 = vsub.f32 %v17500_v52, %v19455_v26 }
 0x51c   :  { %v19453_v44 = vand.u32 4294901760, %v17511_v61  ;;  %v4928_v6 = vand.u32 4294901760, %v4901_v29  ;;  %v4887_v50 = vadd.f32 %v11730_v9, %v19959_v14  ;;  %v4822_v18 = vpop.f32.mrb[23].mxu0  ;;  %v5165_v46 = vand.u32 4294901760, %v5164_v22  ;;  %v19961_v9 = vld [vmem:[#allocation52_spill] sm:$0xff] }
 0x51d   :  { %v19456_v55 = vand.u32 4294901760, %v17519_v20  ;;  %v4925_v4 = vand.u32 4294901760, %v4900_v10  ;;  %v4886_v36 = vadd.f32 %v4822_v18, %v19960_v62  ;;  %13206 = vmatprep.subr.bf16.mxu1 %v17517_v59  ;;  %v5158_v32 = vand.u32 4294901760, %v5157_v39 }
 0x51e   :  { %v17529_v56 = vsub.f32 %v4901_v29, %v4928_v6  ;;  %v4903_v48 = vmax.f32 %v4887_v50, 0.0  ;;  %13208 = vmatpush3.bf16.msra.mxu1 %v17517_v59  ;;  %v5178_v23 = vsub.f32 %v17511_v61, %v19453_v44  ;;  %v17537_v45 = vpack.c.bf16 %v17511_v61, %v17519_v20 }
 0x51f   :  { %v17539_v28 = vpack.c.bf16 %v4928_v6, %v4925_v4  ;;  %v17541_v2 = vsub.f32 %v4900_v10, %v4925_v4  ;;  %v4902_v34 = vmax.f32 %v4886_v36, 0.0  ;;  %v11733_v54 = vpop.f32.mrb[24].mxu0  ;;  %v17543_v60 = vpack.c.bf16 %v5165_v46, %v5158_v32 }
 0x520   :  { %v19457_v29 = vand.u32 4294901760, %v17529_v56  ;;  %v4934_v22 = vand.u32 4294901760, %v4903_v48  ;;  %v4889_v39 = vadd.f32 %v11733_v54, %v19961_v9  ;;  %v4834_v50 = vpop.f32.mrb[25].mxu0  ;;  %v5171_v18 = vsub.f32 %v17519_v20, %v19456_v55 }
 0x521   :  { %v4931_v6 = vand.u32 4294901760, %v4902_v34  ;;  %v4888_v10 = vadd.f32 %v4834_v50, %v19962_v51  ;;  %13210 = vmatprep.subr.bf16.mxu1 %v17539_v28  ;;  %v5179_v4 = vand.u32 4294901760, %v5178_v23  ;;  %v19963_v50 = vand.u32 4294901760, %v17541_v2  ;;  %v19964_v51 = vld [vmem:[#allocation57_spill] sm:$0xff] }
 0x522   :  { %v17553_v46 = vsub.f32 %v4903_v48, %v4934_v22  ;;  %v4905_v36 = vmax.f32 %v4889_v39, 0.0  ;;  %13212 = vmatpush3.bf16.msra.mxu1 %v17539_v28  ;;  %v5172_v32 = vand.u32 4294901760, %v5171_v18  ;;  %v5192_v54 = vsub.f32 %v17529_v56, %v19457_v29 }
 0x523   :  { %v17559_v26 = vpack.c.bf16 %v4934_v22, %v4931_v6  ;;  %v17561_v55 = vsub.f32 %v4902_v34, %v4931_v6  ;;  %v4904_v44 = vmax.f32 %v4888_v10, 0.0  ;;  %v11736_v9 = vpop.f32.mrb[26].mxu0  ;;  %v5185_v23 = vsub.f32 %v17541_v2, %v19963_v50 }
 0x524   :  { %v19458_v48 = vand.u32 4294901760, %v17553_v46  ;;  %v4940_v39 = vand.u32 4294901760, %v4905_v36  ;;  %v4891_v62 = vadd.f32 %v11736_v9, %v19964_v51  ;;  %v4846_v18 = vpop.f32.mrb[27].mxu0  ;;  %v17568_v14 = vpack.c.bf16 %v5179_v4, %v5172_v32 }
 0x525   :  { %v4937_v22 = vand.u32 4294901760, %v4904_v44  ;;  %v4890_v34 = vadd.f32 %v4846_v18, %v19965_v17  ;;  %13214 = vmatprep.subr.bf16.mxu1 %v17559_v26  ;;  %v5186_v6 = vand.u32 4294901760, %v5185_v23  ;;  %v5193_v50 = vand.u32 4294901760, %v5192_v54  ;;  %v19967_v17 = vld [vmem:[#allocation60_spill] sm:$0xff] }
 0x526   :  { %v17573_v10 = vsub.f32 %v4905_v36, %v4940_v39  ;;  %v4907_v12 = vmax.f32 %v4891_v62, 0.0  ;;  %13216 = vmatpush3.bf16.msra.mxu1 %v17559_v26  ;;  %v5206_v9 = vsub.f32 %v17553_v46, %v19458_v48  ;;  %v19966_v18 = vand.u32 4294901760, %v17561_v55 }
 0x527   :  { %v17579_v4 = vpack.c.bf16 %v4940_v39, %v4937_v22  ;;  %v17581_v32 = vsub.f32 %v4904_v44, %v4937_v22  ;;  %v4906_v29 = vmax.f32 %v4890_v34, 0.0  ;;  %v11739_v51 = vpop.f32.mrb[28].mxu0  ;;  %v17588_v43 = vpack.c.bf16 %v5193_v50, %v5186_v6 }
 0x528   :  { %v5199_v23 = vsub.f32 %v17561_v55, %v19966_v18  ;;  %v19467_v36 = vand.u32 4294901760, %v17573_v10  ;;  %v4946_v62 = vand.u32 4294901760, %v4907_v12  ;;  %v4893_v41 = vadd.f32 %v11739_v51, %v19967_v17  ;;  %v4858_v54 = vpop.f32.mrb[29].mxu0 }
 0x529   :  { %v4943_v39 = vand.u32 4294901760, %v4906_v29  ;;  %v4892_v44 = vadd.f32 %v4858_v54, %v19968_v33  ;;  %13218 = vmatprep.subr.bf16.mxu1 %v17579_v4  ;;  %v5207_v18 = vand.u32 4294901760, %v5206_v9  ;;  %v19969_v54 = vand.u32 4294901760, %v17581_v32 }
 0x52a   :  { %v5200_v22 = vand.u32 4294901760, %v5199_v23  ;;  %v17593_v34 = vsub.f32 %v4907_v12, %v4946_v62  ;;  %v4909_v27 = vmax.f32 %v4893_v41, 0.0  ;;  %13220 = vmatpush3.bf16.msra.mxu1 %v17579_v4  ;;  %v5220_v51 = vsub.f32 %v17573_v10, %v19467_v36  ;;  %v19970_v41 = vld [vmem:[#allocation65_spill] sm:$0xff]  ;;  %v19971_v36 = vld [vmem:[#allocation66_spill] sm:$0xff] }
 0x52b   :  { %v17599_v6 = vpack.c.bf16 %v4946_v62, %v4943_v39  ;;  %v5225_v50 = vsub.f32 %v4906_v29, %v4943_v39  ;;  %v4908_v48 = vmax.f32 %v4892_v44, 0.0  ;;  %v11742_v17 = vpop.f32.mrb[30].mxu0  ;;  %v5213_v33 = vsub.f32 %v17581_v32, %v19969_v54 }
 0x52c   :  { %v5233_v12 = vand.u32 4294901760, %v17593_v34  ;;  %v4952_v23 = vand.u32 4294901760, %v4909_v27  ;;  %v4895_v57 = vadd.f32 %v11742_v17, %v19970_v41  ;;  %v4870_v8 = vpop.f32.mrb[31].mxu0  ;;  %v17606_v9 = vpack.c.bf16 %v5207_v18, %v5200_v22 }
 0x52d   :  { %v5226_v1 = vand.u32 4294901760, %v5225_v50  ;;  %v4949_v21 = vand.u32 4294901760, %v4908_v48  ;;  %v4894_v62 = vadd.f32 %v4870_v8, %v19971_v36  ;;  %13222 = vmatprep.subr.bf16.mxu1 %v17599_v6  ;;  %v5214_v29 = vand.u32 4294901760, %v5213_v33 }
 0x52e   :  { %v5246_v39 = vsub.f32 %v4909_v27, %v4952_v23  ;;  %v4911_v44 = vmax.f32 %v4895_v57, 0.0  ;;  %13224 = vmatpush3.bf16.msra.mxu1 %v17599_v6  ;;  %v5221_v54 = vand.u32 4294901760, %v5220_v51  ;;  %v5234_v53 = vsub.f32 %v17593_v34, %v5233_v12 }
 0x52f   :  { %v17612_v11 = vpack.c.bf16 %v4952_v23, %v4949_v21  ;;  %v5239_v17 = vsub.f32 %v4908_v48, %v4949_v21  ;;  %v4910_v41 = vmax.f32 %v4894_v62, 0.0  ;;  %v5227_v22 = vsub.f32 %v5225_v50, %v5226_v1 }
 0x530   :  { %v5247_v18 = vand.u32 4294901760, %v5246_v39  ;;  %v4958_v0 = vand.u32 4294901760, %v4911_v44  ;;  %v13249_v25 = vpack.c.bf16 %v5221_v54, %v5214_v29  ;;  %v5235_v15 = vand.u32 4294901760, %v5234_v53 }
 0x531   :  { %v5240_v8 = vand.u32 4294901760, %v5239_v17  ;;  %v4955_v36 = vand.u32 4294901760, %v4910_v41  ;;  %13226 = vmatprep.subr.bf16.mxu1 %v17612_v11  ;;  %v5228_v27 = vand.u32 4294901760, %v5227_v22  ;;  %v17617_v57 = vpack.c.bf16 %v17529_v56, %v17541_v2 }
 0x532   :  { %v5260_v33 = vsub.f32 %v4911_v44, %v4958_v0  ;;  %13228 = vmatpush3.bf16.msra.mxu1 %v17612_v11  ;;  %v5248_v51 = vsub.f32 %v5246_v39, %v5247_v18  ;;  %v17622_v21 = vpack.c.bf16 %v17553_v46, %v17561_v55  ;;  %v17626_v53 = vpack.c.bf16 %v17573_v10, %v17581_v32 }
 0x533   :  { %v17628_v48 = vpack.c.bf16 %v4958_v0, %v4955_v36  ;;  %v5253_v23 = vsub.f32 %v4910_v41, %v4955_v36  ;;  %v13253_v62 = vpack.c.bf16 %v5235_v15, %v5228_v27  ;;  %v5241_v29 = vsub.f32 %v5239_v17, %v5240_v8 }
 0x534   :  { %v5261_v54 = vand.u32 4294901760, %v5260_v33  ;;  %v5249_v22 = vand.u32 4294901760, %v5248_v51  ;;  %v17631_v44 = vpack.c.bf16 %v17593_v34, %v5225_v50  ;;  %v17633_v47 = vpack.c.bf16 %v5246_v39, %v5239_v17 }
 0x535   :  { %v5254_v30 = vand.u32 4294901760, %v5253_v23  ;;  %13230 = vmatprep.subr.bf16.mxu1 %v17628_v48  ;;  %v5242_v13 = vand.u32 4294901760, %v5241_v29  ;;  %v17636_v3 = vpack.c.bf16 %v5260_v33, %v5253_v23  ;;  %v19973_v0 = vand.u32 4294901760, %v17496_v16 }
 0x536   :  { %13232 = vmatpush3.bf16.msra.mxu1 %v17628_v48  ;;  %v5262_v15 = vsub.f32 %v5260_v33, %v5261_v54  ;;  %v19974_v34 = vand.u32 4294901760, %v17519_v20  ;;  %v19975_v50 = vand.u32 4294901760, %v17511_v61  ;;  %v19976_v39 = vand.u32 4294901760, %v17541_v2 }
 0x537   :  { %v17642_v36 = vpack.c.bf16 %v19973_v0, %v19972_v63  ;;  %v19977_v17 = vand.u32 4294901760, %v17529_v56  ;;  %v19978_v52 = vand.u32 4294901760, %v17561_v55  ;;  %v19979_v63 = vand.u32 4294901760, %v17553_v46  ;;  %13234 = vmatprep.subr.bf16.mxu1 %v17543_v60  ;;  %v19982_v46 = vld [vmem:[#allocation41_spill] sm:$0xff] }
 0x538   :  { %v17649_v41 = vpack.c.bf16 %v19975_v50, %v19974_v34  ;;  %v13257_v33 = vpack.c.bf16 %v5249_v22, %v5242_v13  ;;  %v5255_v20 = vsub.f32 %v5253_v23, %v5254_v30  ;;  %v19980_v61 = vand.u32 4294901760, %v17581_v32  ;;  %v19983_v50 = vld [vmem:[#allocation43_spill] sm:$0xff]  ;;  %v19993_v23 = vld [vmem:[#allocation92_spill] sm:$0xff] }
 0x539   :  { %v17655_v27 = vpack.c.bf16 %v19977_v17, %v19976_v39  ;;  %v17661_v16 = vpack.c.bf16 %v19979_v63, %v19978_v52  ;;  %v19981_v51 = vand.u32 4294901760, %v17573_v10  ;;  %v17670_v2 = vpack.c.bf16 %v5233_v12, %v5226_v1  ;;  %11776 = vmatmul.mubr.f32.vlgmr.msra.gmra.mrb[16].mxu1 %v19982_v46  ;;  %v19984_v10 = vld [vmem:[#allocation32_spill] sm:$0xff]  ;;  %v19985_v32 = vld [vmem:[#allocation75_spill] sm:$0xff]  ;;  %v19989_v12 = vld [vmem:[#allocation78_spill] sm:$0xff] }
 0x53a   :  { %v5263_v56 = vand.u32 4294901760, %v5262_v15  ;;  %v17672_v0 = vpack.c.bf16 %v5247_v18, %v5240_v8  ;;  %v17674_v55 = vpack.c.bf16 %v5261_v54, %v5254_v30  ;;  %v5256_v34 = vand.u32 4294901760, %v5255_v20  ;;  %11778 = vmatprep.mubr.f32.mxu1 %v19983_v50  ;;  %13236 = vmatpush3.bf16.msra.mxu1 %v17543_v60  ;;  %v19986_v30 = vld [vmem:[#allocation8_spill] sm:$0xff]  ;;  %v19988_v60 = vld [vmem:[#allocation77_spill] sm:$0xff]  ;;  %v19990_v18 = vld [vmem:[#allocation83_spill] sm:$0xff] }
 0x53b   :  { %v17668_v29 = vpack.c.bf16 %v19981_v51, %v19980_v61  ;;  %13238 = vmatprep.subr.bf16.mxu1 %v17568_v14  ;;  %v19987_v1 = vld [vmem:[#allocation76_spill] sm:$0xff]  ;;  %v19992_v8 = vld [vmem:[#allocation14_spill] sm:$0xff]  ;;  %v20002_v17 = vld [vmem:[#allocation19_spill] sm:$0xff] }
 0x53c   :  { %v13261_v13 = vpack.c.bf16 %v5263_v56, %v5256_v34  ;;  %v19995_v54 = vld [vmem:[#allocation98_spill] sm:$0xff]  ;;  %v19997_v22 = vld [vmem:[#allocation16_spill] sm:$0xff]  ;;  %v20004_v63 = vld [vmem:[#allocation25_spill] sm:$0xff] }
 0x53d   :  { %11779 = vmatmul.mubr.f32.gmra.mrb[18].mxu1 %v19984_v10  ;;  %v19999_v15 = vld [vmem:[#allocation24_spill] sm:$0xff]  ;;  %v20001_v39 = vld [vmem:[#allocation18_spill] sm:$0xff]  ;;  %v20012_v51 = vld [vmem:[#allocation97_spill] sm:$0xff] }
 0x53e   :  { %11781 = vmatprep.mubr.f32.mxu1 %v19985_v32  ;;  %13240 = vmatpush3.bf16.msra.mxu1 %v17568_v14  ;;  %v19991_v14 = vld [vmem:[#allocation89_spill] sm:$0xff]  ;;  %v20003_v52 = vld [vmem:[#allocation48_spill] sm:$0xff]  ;;  %v20008_v20 = vld [vmem:[#allocation82_spill] sm:$0xff] }
 0x53f   :  { %13242 = vmatprep.subr.bf16.mxu1 %v17588_v43  ;;  %v20010_v61 = vld [vmem:[#allocation64_spill] sm:$0xff]  ;;  %v20016_v46 = vld [vmem:[#allocation34_spill] sm:$0xff]  ;;  %v20020_v50 = vld [vmem:[#allocation11_spill] sm:$0xff] }
 0x540   :  { %v20014_v56 = vld [vmem:[#allocation12_spill] sm:$0xff]  ;;  %v20019_v34 = vld [vmem:[#allocation54_spill] sm:$0xff]  ;;  %v20023_v32 = vld [vmem:[#allocation87_spill] sm:$0xff] }
 0x541   :  { %11782 = vmatmul.mubr.f32.gmra.mrb[20].mxu1 %v19986_v30  ;;  %v20022_v10 = vld [vmem:[#allocation80_spill] sm:$0xff] }
 0x542   :  { %11784 = vmatprep.mubr.f32.mxu1 %v19987_v1  ;;  %13244 = vmatpush3.bf16.msra.mxu1 %v17588_v43  ;;  %v19994_v43 = vld [vmem:[#allocation93_spill] sm:$0xff]  ;;  %v20024_v30 = vld [vmem:[#allocation84_spill] sm:$0xff]  ;;  %v20025_v1 = vld [vmem:[#allocation90_spill] sm:$0xff] }
 0x543   :  { %13246 = vmatprep.subr.bf16.mxu1 %v17606_v9 }
 0x545   :  { %11785 = vmatmul.mubr.f32.gmra.mrb[22].mxu1 %v19988_v60  ;;  %v20026_v60 = vld [vmem:[#allocation10_spill] sm:$0xff] }
 0x546   :  { %11787 = vmatprep.mubr.f32.mxu1 %v19989_v12  ;;  %13248 = vmatpush3.bf16.msra.mxu1 %v17606_v9  ;;  %v19996_v9 = vld [vmem:[#allocation101_spill] sm:$0xff]  ;;  %v20027_v12 = vld [vmem:[#allocation95_spill] sm:$0xff] }
 0x547   :  { %13250 = vmatprep.subr.bf16.mxu1 %v13249_v25 }
 0x549   :  { %11788 = vmatmul.mubr.f32.gmra.mrb[24].mxu1 %v19990_v18  ;;  %v20028_v18 = vld [vmem:[#allocation99_spill] sm:$0xff] }
 0x54a   :  { %11790 = vmatprep.mubr.f32.mxu1 %v19991_v14  ;;  %13252 = vmatpush3.bf16.msra.mxu1 %v13249_v25  ;;  %v19998_v25 = vld [vmem:[#allocation22_spill] sm:$0xff]  ;;  %v20029_v14 = vld [vmem:[#allocation17_spill] sm:$0xff] }
 0x54b   :  { %13254 = vmatprep.subr.bf16.mxu1 %v13253_v62 }
 0x54d   :  { %11791 = vmatmul.mubr.f32.gmra.mrb[26].mxu1 %v19992_v8  ;;  %v20030_v8 = vld [vmem:[#allocation15_spill] sm:$0xff] }
 0x54e   :  { %11793 = vmatprep.mubr.f32.mxu1 %v19993_v23  ;;  %13256 = vmatpush3.bf16.msra.mxu1 %v13253_v62  ;;  %v20000_v62 = vld [vmem:[#allocation29_spill] sm:$0xff]  ;;  %v20031_v23 = vld [vmem:[#allocation30_spill] sm:$0xff] }
 0x54f   :  { %13258 = vmatprep.subr.bf16.mxu1 %v13257_v33 }
 0x551   :  { %11794 = vmatmul.mubr.f32.gmra.mrb[28].mxu1 %v19994_v43  ;;  %v20032_v43 = vld [vmem:[#allocation21_spill] sm:$0xff] }
 0x552   :  { %11796 = vmatprep.mubr.f32.mxu1 %v19995_v54  ;;  %13260 = vmatpush3.bf16.msra.mxu1 %v13257_v33  ;;  %v20006_v33 = vld [vmem:[#allocation79_spill] sm:$0xff]  ;;  %v20033_v54 = vld [vmem:[#allocation40_spill] sm:$0xff] }
 0x553   :  { %13262 = vmatprep.subr.bf16.mxu1 %v13261_v13 }
 0x555   :  { %11797 = vmatmul.mubr.f32.gmra.mrb[30].mxu1 %v19996_v9  ;;  %v20034_v9 = vld [vmem:[#allocation31_spill] sm:$0xff] }
 0x556   :  { %13264 = vmatpush3.bf16.msra.mxu1 %v13261_v13  ;;  %11831 = vmatprep.mubr.f32.mxu1 %v19997_v22  ;;  %v20021_v13 = vld [vmem:[#allocation33_spill] sm:$0xff] }
 0x557   :  { %13266 = vmatprep.subr.bf16.mxu1 %v17509_v49 }
 0x559   :  { %11832 = vmatmul.mubr.f32.vlgmr.msra.gmra.mrb[16].mxu1 %v19998_v25 }
 0x55a   :  { %11834 = vmatprep.mubr.f32.mxu1 %v19999_v15  ;;  %13268 = vmatpush3.bf16.msra.mxu1 %v17509_v49  ;;  %v20005_v49 = vld [vmem:[#allocation35_spill] sm:$0xff] }
 0x55b   :  { %13270 = vmatprep.subr.bf16.mxu1 %v17537_v45 }
 0x55d   :  { %11835 = vmatmul.mubr.f32.gmra.mrb[18].mxu1 %v20000_v62 }
 0x55e   :  { %11837 = vmatprep.mubr.f32.mxu1 %v20001_v39  ;;  %13272 = vmatpush3.bf16.msra.mxu1 %v17537_v45  ;;  %v20007_v45 = vld [vmem:[#allocation85_spill] sm:$0xff] }
 0x55f   :  { %13274 = vmatprep.subr.bf16.mxu1 %v17617_v57 }
 0x561   :  { %11838 = vmatmul.mubr.f32.gmra.mrb[20].mxu1 %v20002_v17 }
 0x562   :  { %11840 = vmatprep.mubr.f32.mxu1 %v20003_v52  ;;  %13276 = vmatpush3.bf16.msra.mxu1 %v17617_v57  ;;  %v20009_v57 = vld [vmem:[#allocation70_spill] sm:$0xff] }
 0x563   :  { %13278 = vmatprep.subr.bf16.mxu1 %v17622_v21 }
 0x565   :  { %11841 = vmatmul.mubr.f32.gmra.mrb[22].mxu1 %v20004_v63 }
 0x566   :  { %11843 = vmatprep.mubr.f32.mxu1 %v20005_v49  ;;  %13280 = vmatpush3.bf16.msra.mxu1 %v17622_v21  ;;  %v20011_v21 = vld [vmem:[#allocation94_spill] sm:$0xff] }
 0x567   :  { %13282 = vmatprep.subr.bf16.mxu1 %v17626_v53 }
 0x569   :  { %11844 = vmatmul.mubr.f32.gmra.mrb[24].mxu1 %v20006_v33 }
 0x56a   :  { %11846 = vmatprep.mubr.f32.mxu1 %v20007_v45  ;;  %13284 = vmatpush3.bf16.msra.mxu1 %v17626_v53  ;;  %v20013_v53 = vld [vmem:[#allocation9_spill] sm:$0xff] }
 0x56b   :  { %13286 = vmatprep.subr.bf16.mxu1 %v17631_v44 }
 0x56d   :  { %11847 = vmatmul.mubr.f32.gmra.mrb[26].mxu1 %v20008_v20 }
 0x56e   :  { %11849 = vmatprep.mubr.f32.mxu1 %v20009_v57  ;;  %13288 = vmatpush3.bf16.msra.mxu1 %v17631_v44  ;;  %v20015_v44 = vld [vmem:[#allocation28_spill] sm:$0xff] }
 0x56f   :  { %13290 = vmatprep.subr.bf16.mxu1 %v17633_v47 }
 0x571   :  { %11850 = vmatmul.mubr.f32.gmra.mrb[28].mxu1 %v20010_v61 }
 0x572   :  { %11852 = vmatprep.mubr.f32.mxu1 %v20011_v21  ;;  %13292 = vmatpush3.bf16.msra.mxu1 %v17633_v47  ;;  %v20017_v47 = vld [vmem:[#allocation27_spill] sm:$0xff] }
 0x573   :  { %13294 = vmatprep.subr.bf16.mxu1 %v17636_v3 }
 0x575   :  { %11853 = vmatmul.mubr.f32.gmra.mrb[30].mxu1 %v20012_v51 }
 0x576   :  { %13296 = vmatpush3.bf16.msra.mxu1 %v17636_v3  ;;  %11887 = vmatprep.mubr.f32.mxu1 %v20013_v53  ;;  %v20018_v3 = vld [vmem:[#allocation42_spill] sm:$0xff]  ;;  %v20035_v53 = vld [vmem:[#allocation68_spill] sm:$0xff] }
 0x577   :  { %13298 = vmatprep.subr.bf16.mxu1 %v17498_v38 }
 0x579   :  { %11888 = vmatmul.mubr.f32.vlgmr.msra.gmra.mrb[16].mxu1 %v20014_v56  ;;  %v20036_v56 = vld [vmem:[#allocation53_spill] sm:$0xff] }
 0x57a   :  { %11890 = vmatprep.mubr.f32.mxu1 %v20015_v44  ;;  %13300 = vmatpush3.bf16.msra.mxu1 %v17498_v38  ;;  %v20038_v44 = vld [vmem:[#allocation81_spill] sm:$0xff] }
 0x57b   :  { %13302 = vmatprep.subr.bf16.mxu1 %v17517_v59 }
 0x57d   :  { %11891 = vmatmul.mubr.f32.gmra.mrb[18].mxu1 %v20016_v46  ;;  %v20040_v46 = vld [vmem:[#allocation86_spill] sm:$0xff] }
 0x57e   :  { %11893 = vmatprep.mubr.f32.mxu1 %v20017_v47  ;;  %13304 = vmatpush3.bf16.msra.mxu1 %v17517_v59  ;;  %v20042_v47 = vld [vmem:[#allocation61_spill] sm:$0xff] }
 0x57f   :  { %13306 = vmatprep.subr.bf16.mxu1 %v17539_v28 }
 0x581   :  { %11894 = vmatmul.mubr.f32.gmra.mrb[20].mxu1 %v20018_v3  ;;  %v20044_v3 = vld [vmem:[#allocation100_spill] sm:$0xff] }
 0x582   :  { %11896 = vmatprep.mubr.f32.mxu1 %v20019_v34  ;;  %13308 = vmatpush3.bf16.msra.mxu1 %v17539_v28 }
 0x583   :  { %13310 = vmatprep.subr.bf16.mxu1 %v17559_v26 }
 0x585   :  { %11897 = vmatmul.mubr.f32.gmra.mrb[22].mxu1 %v20020_v50 }
 0x586   :  { %11899 = vmatprep.mubr.f32.mxu1 %v20021_v13  ;;  %13312 = vmatpush3.bf16.msra.mxu1 %v17559_v26 }
 0x587   :  { %13314 = vmatprep.subr.bf16.mxu1 %v17579_v4 }
 0x589   :  { %11900 = vmatmul.mubr.f32.gmra.mrb[24].mxu1 %v20022_v10 }
 0x58a   :  { %11902 = vmatprep.mubr.f32.mxu1 %v20023_v32  ;;  %13316 = vmatpush3.bf16.msra.mxu1 %v17579_v4 }
 0x58b   :  { %13318 = vmatprep.subr.bf16.mxu1 %v17599_v6 }
 0x58d   :  { %11903 = vmatmul.mubr.f32.gmra.mrb[26].mxu1 %v20024_v30 }
 0x58e   :  { %11905 = vmatprep.mubr.f32.mxu1 %v20025_v1  ;;  %13320 = vmatpush3.bf16.msra.mxu1 %v17599_v6 }
 0x58f   :  { %13322 = vmatprep.subr.bf16.mxu1 %v17612_v11 }
 0x591   :  { %11906 = vmatmul.mubr.f32.gmra.mrb[28].mxu1 %v20026_v60 }
 0x592   :  { %11908 = vmatprep.mubr.f32.mxu1 %v20027_v12  ;;  %13324 = vmatpush3.bf16.msra.mxu1 %v17612_v11 }
 0x593   :  { %13326 = vmatprep.subr.bf16.mxu1 %v17628_v48 }
 0x595   :  { %11909 = vmatmul.mubr.f32.gmra.mrb[30].mxu1 %v20028_v18  ;;  %v20045_v18 = vld [vmem:[#allocation71_spill] sm:$0xff] }
 0x596   :  { %13328 = vmatpush3.bf16.msra.mxu1 %v17628_v48  ;;  %11943 = vmatprep.mubr.f32.mxu1 %v20029_v14 }
 0x597   :  { %13330 = vmatprep.subr.bf16.mxu1 %v17642_v36 }
 0x599   :  { %11944 = vmatmul.mubr.f32.vlgmr.msra.gmra.mrb[16].mxu1 %v20030_v8 }
 0x59a   :  { %11946 = vmatprep.mubr.f32.mxu1 %v20031_v23  ;;  %13332 = vmatpush3.bf16.msra.mxu1 %v17642_v36  ;;  %v20037_v36 = vld [vmem:[#allocation26_spill] sm:$0xff] }
 0x59b   :  { %13334 = vmatprep.subr.bf16.mxu1 %v17649_v41 }
 0x59d   :  { %11947 = vmatmul.mubr.f32.gmra.mrb[18].mxu1 %v20032_v43 }
 0x59e   :  { %11949 = vmatprep.mubr.f32.mxu1 %v20033_v54  ;;  %13336 = vmatpush3.bf16.msra.mxu1 %v17649_v41  ;;  %v20039_v41 = vld [vmem:[#allocation88_spill] sm:$0xff] }
 0x59f   :  { %13338 = vmatprep.subr.bf16.mxu1 %v17655_v27 }
 0x5a1   :  { %11950 = vmatmul.mubr.f32.gmra.mrb[20].mxu1 %v20034_v9 }
 0x5a2   :  { %11952 = vmatprep.mubr.f32.mxu1 %v20035_v53  ;;  %13340 = vmatpush3.bf16.msra.mxu1 %v17655_v27  ;;  %v20041_v27 = vld [vmem:[#allocation91_spill] sm:$0xff] }
 0x5a3   :  { %13342 = vmatprep.subr.bf16.mxu1 %v17661_v16 }
 0x5a5   :  { %11953 = vmatmul.mubr.f32.gmra.mrb[22].mxu1 %v20036_v56 }
 0x5a6   :  { %11955 = vmatprep.mubr.f32.mxu1 %v20037_v36  ;;  %13344 = vmatpush3.bf16.msra.mxu1 %v17661_v16  ;;  %v20043_v16 = vld [vmem:[#allocation96_spill] sm:$0xff] }
 0x5a7   :  { %13346 = vmatprep.subr.bf16.mxu1 %v17668_v29 }
 0x5a9   :  { %11956 = vmatmul.mubr.f32.gmra.mrb[24].mxu1 %v20038_v44 }
 0x5aa   :  { %11958 = vmatprep.mubr.f32.mxu1 %v20039_v41  ;;  %13348 = vmatpush3.bf16.msra.mxu1 %v17668_v29 }
 0x5ab   :  { %13350 = vmatprep.subr.bf16.mxu1 %v17670_v2 }
 0x5ad   :  { %11959 = vmatmul.mubr.f32.gmra.mrb[26].mxu1 %v20040_v46  ;;  %v20046_v46 = vld [vmem:[#allocation72_spill] sm:$0xff] }
 0x5ae   :  { %11961 = vmatprep.mubr.f32.mxu1 %v20041_v27  ;;  %13352 = vmatpush3.bf16.msra.mxu1 %v17670_v2 }
 0x5af   :  { %13354 = vmatprep.subr.bf16.mxu1 %v17672_v0 }
 0x5b1   :  { %11962 = vmatmul.mubr.f32.gmra.mrb[28].mxu1 %v20042_v47 }
 0x5b2   :  { %11964 = vmatprep.mubr.f32.mxu1 %v20043_v16  ;;  %13356 = vmatpush3.bf16.msra.mxu1 %v17672_v0 }
 0x5b3   :  { %13358 = vmatprep.subr.bf16.mxu1 %v17674_v55 }
 0x5b5   :  { %11965 = vmatmul.mubr.f32.gmra.mrb[30].mxu1 %v20044_v3 }
 0x5b6   :  { %13360 = vmatpush3.bf16.msra.mxu1 %v17674_v55  ;;  %11999 = vmatprep.mubr.f32.mxu1 %v19997_v22 }
 0x5b7   :  { %13362 = vmatprep.subr.bf16.mxu1 %v17498_v38 }
 0x5b9   :  { %12000 = vmatmul.mubr.f32.vlgmr.msra.gmra.mrb[16].mxu1 %v19998_v25 }
 0x5ba   :  { %12002 = vmatprep.mubr.f32.mxu1 %v19999_v15  ;;  %13364 = vmatpush3.bf16.msra.mxu1 %v17498_v38 }
 0x5bb   :  { %13366 = vmatprep.subr.bf16.mxu1 %v17517_v59 }
 0x5bd   :  { %12003 = vmatmul.mubr.f32.gmra.mrb[18].mxu1 %v20000_v62 }
 0x5be   :  { %12005 = vmatprep.mubr.f32.mxu1 %v20001_v39  ;;  %13368 = vmatpush3.bf16.msra.mxu1 %v17517_v59 }
 0x5bf   :  { %13370 = vmatprep.subr.bf16.mxu1 %v17539_v28 }
 0x5c1   :  { %12006 = vmatmul.mubr.f32.gmra.mrb[20].mxu1 %v20002_v17 }
 0x5c2   :  { %12008 = vmatprep.mubr.f32.mxu1 %v20003_v52  ;;  %13372 = vmatpush3.bf16.msra.mxu1 %v17539_v28 }
 0x5c3   :  { %13374 = vmatprep.subr.bf16.mxu1 %v17559_v26 }
 0x5c5   :  { %12009 = vmatmul.mubr.f32.gmra.mrb[22].mxu1 %v20004_v63 }
 0x5c6   :  { %12011 = vmatprep.mubr.f32.mxu1 %v20005_v49  ;;  %13376 = vmatpush3.bf16.msra.mxu1 %v17559_v26 }
 0x5c7   :  { %13378 = vmatprep.subr.bf16.mxu1 %v17579_v4 }
 0x5c9   :  { %12012 = vmatmul.mubr.f32.gmra.mrb[24].mxu1 %v20006_v33 }
 0x5ca   :  { %12014 = vmatprep.mubr.f32.mxu1 %v20007_v45  ;;  %13380 = vmatpush3.bf16.msra.mxu1 %v17579_v4 }
 0x5cb   :  { %13382 = vmatprep.subr.bf16.mxu1 %v17599_v6 }
 0x5cd   :  { %12015 = vmatmul.mubr.f32.gmra.mrb[26].mxu1 %v20008_v20 }
 0x5ce   :  { %12017 = vmatprep.mubr.f32.mxu1 %v20009_v57  ;;  %13384 = vmatpush3.bf16.msra.mxu1 %v17599_v6 }
 0x5cf   :  { %13386 = vmatprep.subr.bf16.mxu1 %v17612_v11 }
 0x5d1   :  { %12018 = vmatmul.mubr.f32.gmra.mrb[28].mxu1 %v20010_v61 }
 0x5d2   :  { %12020 = vmatprep.mubr.f32.mxu1 %v20011_v21  ;;  %13388 = vmatpush3.bf16.msra.mxu1 %v17612_v11 }
 0x5d3   :  { %13390 = vmatprep.subr.bf16.mxu1 %v17628_v48 }
 0x5d5   :  { %12021 = vmatmul.mubr.f32.gmra.mrb[30].mxu1 %v20012_v51 }
 0x5d6   :  { %13392 = vmatpush3.bf16.msra.mxu1 %v17628_v48  ;;  %12055 = vmatprep.mubr.f32.mxu1 %v19997_v22 }
 0x5d9   :  { %12056 = vmatmul.mubr.f32.vlgmr.msra.gmra.mrb[16].mxu1 %v19998_v25 }
 0x5da   :  { %12058 = vmatprep.mubr.f32.mxu1 %v19999_v15 }
 0x5dd   :  { %12059 = vmatmul.mubr.f32.gmra.mrb[18].mxu1 %v20000_v62 }
 0x5de   :  { %12061 = vmatprep.mubr.f32.mxu1 %v20001_v39 }
 0x5e1   :  { %12062 = vmatmul.mubr.f32.gmra.mrb[20].mxu1 %v20002_v17 }
 0x5e2   :  { %12064 = vmatprep.mubr.f32.mxu1 %v20003_v52 }
 0x5e5   :  { %12065 = vmatmul.mubr.f32.gmra.mrb[22].mxu1 %v20004_v63 }
 0x5e6   :  { %12067 = vmatprep.mubr.f32.mxu1 %v20005_v49 }
 0x5e9   :  { %12068 = vmatmul.mubr.f32.gmra.mrb[24].mxu1 %v20006_v33 }
 0x5ea   :  { %12070 = vmatprep.mubr.f32.mxu1 %v20007_v45 }
 0x5ed   :  { %12071 = vmatmul.mubr.f32.gmra.mrb[26].mxu1 %v20008_v20 }
 0x5ee   :  { %12073 = vmatprep.mubr.f32.mxu1 %v20009_v57 }
 0x5f1   :  { %12074 = vmatmul.mubr.f32.gmra.mrb[28].mxu1 %v20010_v61 }
 0x5f2   :  { %12076 = vmatprep.mubr.f32.mxu1 %v20011_v21 }
 0x5f5   :  { %12077 = vmatmul.mubr.f32.gmra.mrb[30].mxu1 %v20012_v51 }
 0x6ac   :  { %v12057_v11 = vpop.f32.mrb[16].mxu1 }
 0x6ad   :  { %v17842_v38 = vand.u32 4294901760, %v12057_v11  ;;  %v6104_v26 = vpop.f32.mrb[17].mxu1 }
 0x6ae   :  { %v17844_v59 = vand.u32 4294901760, %v6104_v26 }
 0x6af   :  { %v17847_v28 = vsub.f32 %v12057_v11, %v17842_v38 }
 0x6b0   :  { %v17850_v4 = vsub.f32 %v6104_v26, %v17844_v59  ;;  %v12060_v6 = vpop.f32.mrb[18].mxu1 }
 0x6b1   :  { %v6291_v48 = vand.u32 4294901760, %v17847_v28  ;;  %v17853_v29 = vand.u32 4294901760, %v12060_v6  ;;  %v6116_v2 = vpop.f32.mrb[19].mxu1 }
 0x6b2   :  { %v6281_v0 = vand.u32 4294901760, %v17850_v4  ;;  %v17856_v55 = vand.u32 4294901760, %v6116_v2 }
 0x6b3   :  { %v6292_v22 = vsub.f32 %v17847_v28, %v6291_v48  ;;  %v17862_v25 = vsub.f32 %v12060_v6, %v17853_v29 }
 0x6b4   :  { %v17865_v15 = vsub.f32 %v6116_v2, %v17856_v55  ;;  %v12063_v62 = vpop.f32.mrb[20].mxu1  ;;  %v6282_v39 = vsub.f32 %v17850_v4, %v6281_v0 }
 0x6b5   :  { %v6311_v17 = vand.u32 4294901760, %v17862_v25  ;;  %v17871_v52 = vand.u32 4294901760, %v12063_v62  ;;  %v6128_v63 = vpop.f32.mrb[21].mxu1  ;;  %v6293_v20 = vand.u32 4294901760, %v6292_v22 }
 0x6b6   :  { %v6301_v49 = vand.u32 4294901760, %v17865_v15  ;;  %v17874_v33 = vand.u32 4294901760, %v6128_v63  ;;  %v6283_v45 = vand.u32 4294901760, %v6282_v39 }
 0x6b7   :  { %v17877_v57 = vsub.f32 %v12063_v62, %v17871_v52  ;;  %v6312_v61 = vsub.f32 %v17862_v25, %v6311_v17 }
 0x6b8   :  { %v17883_v21 = vsub.f32 %v6128_v63, %v17874_v33  ;;  %v12066_v51 = vpop.f32.mrb[22].mxu1  ;;  %12111 = vmatprep.mubr.f32.mxu0 %v6283_v45  ;;  %v6302_v34 = vsub.f32 %v17865_v15, %v6301_v49  ;;  %v20047_v45 = vld [vmem:[#allocation109_spill] sm:$0xff] }
 0x6b9   :  { %v6331_v50 = vand.u32 4294901760, %v17877_v57  ;;  %v17889_v13 = vand.u32 4294901760, %v12066_v51  ;;  %v6140_v10 = vpop.f32.mrb[23].mxu1  ;;  %12112 = vmatmul.mubr.f32.vlgmr.msra.gmra.mrb[32].mxu0 %v6293_v20  ;;  %v6313_v12 = vand.u32 4294901760, %v6312_v61 }
 0x6ba   :  { %v6321_v32 = vand.u32 4294901760, %v17883_v21  ;;  %v17892_v30 = vand.u32 4294901760, %v6140_v10  ;;  %13428 = vmatpush3.bf16.msra.mxu0 %v19952_v35  ;;  %v6303_v1 = vand.u32 4294901760, %v6302_v34 }
 0x6bb   :  { %v17896_v60 = vsub.f32 %v12066_v51, %v17889_v13  ;;  %13430 = vmatprep.subr.bf16.mxu0 %v20045_v18  ;;  %v6332_v14 = vsub.f32 %v17877_v57, %v6331_v50 }
 0x6bc   :  { %v17903_v8 = vsub.f32 %v6140_v10, %v17892_v30  ;;  %v12069_v23 = vpop.f32.mrb[24].mxu1  ;;  %12114 = vmatprep.mubr.f32.mxu0 %v6303_v1  ;;  %v6322_v35 = vsub.f32 %v17883_v21, %v6321_v32 }
 0x6bd   :  { %v6351_v43 = vand.u32 4294901760, %v17896_v60  ;;  %v17909_v54 = vand.u32 4294901760, %v12069_v23  ;;  %v6152_v9 = vpop.f32.mrb[25].mxu1  ;;  %12115 = vmatmul.mubr.f32.gmra.mrb[34].mxu0 %v6313_v12  ;;  %v6333_v41 = vand.u32 4294901760, %v6332_v14 }
 0x6be   :  { %v6341_v53 = vand.u32 4294901760, %v17903_v8  ;;  %v17912_v56 = vand.u32 4294901760, %v6152_v9  ;;  %13432 = vmatpush3.bf16.msra.mxu0 %v20045_v18  ;;  %v6323_v36 = vand.u32 4294901760, %v6322_v35 }
 0x6bf   :  { %v17916_v44 = vsub.f32 %v12069_v23, %v17909_v54  ;;  %13434 = vmatprep.subr.bf16.mxu0 %v20046_v46  ;;  %v6352_v27 = vsub.f32 %v17896_v60, %v6351_v43 }
 0x6c0   :  { %v17923_v47 = vsub.f32 %v6152_v9, %v17912_v56  ;;  %v12072_v16 = vpop.f32.mrb[26].mxu1  ;;  %12117 = vmatprep.mubr.f32.mxu0 %v6323_v36  ;;  %v6342_v3 = vsub.f32 %v17903_v8, %v6341_v53  ;;  %v20048_v36 = vld [vmem:[#allocation110_spill] sm:$0xff] }
 0x6c1   :  { %v6371_v11 = vand.u32 4294901760, %v17916_v44  ;;  %v17929_v26 = vand.u32 4294901760, %v12072_v16  ;;  %v6164_v6 = vpop.f32.mrb[27].mxu1  ;;  %12118 = vmatmul.mubr.f32.gmra.mrb[36].mxu0 %v6333_v41  ;;  %v6353_v63 = vand.u32 4294901760, %v6352_v27 }
 0x6c2   :  { %v6361_v2 = vand.u32 4294901760, %v17923_v47  ;;  %v17932_v22 = vand.u32 4294901760, %v6164_v6  ;;  %13436 = vmatpush3.bf16.msra.mxu0 %v20046_v46  ;;  %v6343_v62 = vand.u32 4294901760, %v6342_v3 }
 0x6c3   :  { %v17936_v39 = vsub.f32 %v12072_v16, %v17929_v26  ;;  %13438 = vmatprep.subr.bf16.mxu0 %v20047_v45  ;;  %v6372_v20 = vsub.f32 %v17916_v44, %v6371_v11 }
 0x6c4   :  { %v17943_v61 = vsub.f32 %v6164_v6, %v17932_v22  ;;  %v12075_v51 = vpop.f32.mrb[28].mxu1  ;;  %12120 = vmatprep.mubr.f32.mxu0 %v6343_v62  ;;  %v6362_v34 = vsub.f32 %v17923_v47, %v6361_v2 }
 0x6c5   :  { %v6391_v10 = vand.u32 4294901760, %v17936_v39  ;;  %v17949_v1 = vand.u32 4294901760, %v12075_v51  ;;  %v6176_v12 = vpop.f32.mrb[29].mxu1  ;;  %12121 = vmatmul.mubr.f32.gmra.mrb[38].mxu0 %v6353_v63  ;;  %v6373_v9 = vand.u32 4294901760, %v6372_v20 }
 0x6c6   :  { %v6381_v18 = vand.u32 4294901760, %v17943_v61  ;;  %v17952_v14 = vand.u32 4294901760, %v6176_v12  ;;  %13440 = vmatpush3.bf16.msra.mxu0 %v20047_v45  ;;  %v6363_v23 = vand.u32 4294901760, %v6362_v34 }
 0x6c7   :  { %v17956_v35 = vsub.f32 %v12075_v51, %v17949_v1  ;;  %13442 = vmatprep.subr.bf16.mxu0 %v20048_v36  ;;  %v6392_v41 = vsub.f32 %v17936_v39, %v6391_v10 }
 0x6c8   :  { %v17963_v46 = vsub.f32 %v6176_v12, %v17952_v14  ;;  %v12078_v27 = vpop.f32.mrb[30].mxu1  ;;  %12123 = vmatprep.mubr.f32.mxu0 %v6363_v23  ;;  %v6382_v16 = vsub.f32 %v17943_v61, %v6381_v18 }
 0x6c9   :  { %v19487_v3 = vand.u32 4294901760, %v17956_v35  ;;  %v17969_v6 = vand.u32 4294901760, %v12078_v27  ;;  %v6188_v62 = vpop.f32.mrb[31].mxu1  ;;  %12124 = vmatmul.mubr.f32.gmra.mrb[40].mxu0 %v6373_v9  ;;  %v6393_v34 = vand.u32 4294901760, %v6392_v41 }
 0x6ca   :  { %v6401_v63 = vand.u32 4294901760, %v17963_v46  ;;  %v17972_v45 = vand.u32 4294901760, %v6188_v62  ;;  %13444 = vmatpush3.bf16.msra.mxu0 %v20048_v36  ;;  %v6383_v20 = vand.u32 4294901760, %v6382_v16 }
 0x6cb   :  { %v17976_v51 = vsub.f32 %v12078_v27, %v17969_v6  ;;  %13446 = vmatprep.subr.bf16.mxu0 %v16982_v40  ;;  %v6412_v12 = vsub.f32 %v17956_v35, %v19487_v3 }
 0x6cc   :  { %v17983_v23 = vsub.f32 %v6188_v62, %v17972_v45  ;;  %12126 = vmatprep.mubr.f32.mxu0 %v6383_v20  ;;  %v6402_v9 = vsub.f32 %v17963_v46, %v6401_v63 }
 0x6cd   :  { %v6431_v36 = vand.u32 4294901760, %v17976_v51  ;;  %12127 = vmatmul.mubr.f32.gmra.mrb[42].mxu0 %v6393_v34  ;;  %v6413_v16 = vand.u32 4294901760, %v6412_v12  ;;  %v20055_v12 = vld [vmem:[#allocation74_spill] sm:$0xff] }
 0x6ce   :  { %v6421_v27 = vand.u32 4294901760, %v17983_v23  ;;  %13448 = vmatpush3.bf16.msra.mxu0 %v16982_v40  ;;  %v6403_v41 = vand.u32 4294901760, %v6402_v9  ;;  %v20050_v40 = vld [vmem:[#allocation106_spill] sm:$0xff]  ;;  %v20056_v9 = vmov 2  }
 0x6cf   :  { %13450 = vmatprep.subr.bf16.mxu0 %v16986_v19  ;;  %v6432_v62 = vsub.f32 %v17976_v51, %v6431_v36 }
 0x6d0   :  { %12129 = vmatprep.mubr.f32.mxu0 %v6403_v41  ;;  %v6422_v20 = vsub.f32 %v17983_v23, %v6421_v27  ;;  %v20057_v41 = vld [vmem:[#allocation23_spill] sm:$0xff] }
 0x6d1   :  { %12130 = vmatmul.mubr.f32.gmra.mrb[44].mxu0 %v6413_v16  ;;  %v6433_v3 = vand.u32 4294901760, %v6432_v62  ;;  %v20058_v16 = vmov 3   ;;  %v20059_v62 = vld [vmem:[#allocation46_spill] sm:$0xff] }
 0x6d2   :  { %13452 = vmatpush3.bf16.msra.mxu0 %v16986_v19  ;;  %v6423_v34 = vand.u32 4294901760, %v6422_v20  ;;  %v20051_v19 = vld [vmem:[#allocation107_spill] sm:$0xff]  ;;  %v20060_v20 = vmov 4  }
 0x6d3   :  { %13454 = vmatprep.subr.bf16.mxu0 %v16998_v58 }
 0x6d4   :  { %12132 = vmatprep.mubr.f32.mxu0 %v6423_v34  ;;  %v20061_v34 = vld [vmem:[#allocation51_spill] sm:$0xff] }
 0x6d5   :  { %12133 = vmatmul.mubr.f32.gmra.mrb[46].mxu0 %v6433_v3  ;;  %v20054_v3 = vmov 1  }
 0x6d6   :  { %13456 = vmatpush3.bf16.msra.mxu0 %v16998_v58  ;;  %12167 = vmatprep.mubr.f32.mxu0 %v17844_v59  ;;  %v20052_v58 = vld [vmem:[#allocation108_spill] sm:$0xff] }
 0x6d7   :  { %13458 = vmatprep.subr.bf16.mxu0 %v16990_v7 }
 0x6d9   :  { %12168 = vmatmul.mubr.f32.vlgmr.msra.gmra.mrb[32].mxu0 %v17842_v38 }
 0x6da   :  { %12170 = vmatprep.mubr.f32.mxu0 %v17856_v55  ;;  %13460 = vmatpush3.bf16.msra.mxu0 %v16990_v7  ;;  %v20049_v7 = vld [vmem:[#allocation111_spill] sm:$0xff] }
 0x6db   :  { %13462 = vmatprep.subr.bf16.mxu0 %v17255_v24 }
 0x6dd   :  { %12171 = vmatmul.mubr.f32.gmra.mrb[34].mxu0 %v17853_v29 }
 0x6de   :  { %12173 = vmatprep.mubr.f32.mxu0 %v17874_v33  ;;  %13464 = vmatpush3.bf16.msra.mxu0 %v17255_v24  ;;  %v18035_v24 = vld [vmem:[%s19109_s3] sm:$0xff] }
 0x6df   :  { %13466 = vmatprep.subr.bf16.mxu0 %v17263_v5  ;;  %7533 = vperm.xlu1 %14480, %v18035_v24  }
 0x6e0   :  { %7519 = vperm.xlu0 %14479, %v18035_v24  }
 0x6e1   :  { %12174 = vmatmul.mubr.f32.gmra.mrb[36].mxu0 %v17871_v52 }
 0x6e2   :  { %12176 = vmatprep.mubr.f32.mxu0 %v17892_v30  ;;  %13468 = vmatpush3.bf16.msra.mxu0 %v17263_v5  ;;  %v7517_v5 = vld [vmem:[%s19109_s3 + $0x8] sm:$0xff] }
 0x6e3   :  { %13470 = vmatprep.subr.bf16.mxu0 %v17271_v37 }
 0x6e4   :  { %14482 = vset.pattern.permute.xlu0 %v20054_v3  ;;  %v20067_v3 = vmov 7  }
 0x6e5   :  { %12177 = vmatmul.mubr.f32.gmra.mrb[38].mxu0 %v17889_v13  ;;  %7536 = vperm.xlu0 %14482, %v7517_v5  }
 0x6e6   :  { %12179 = vmatprep.mubr.f32.mxu0 %v17912_v56  ;;  %13472 = vmatpush3.bf16.msra.mxu0 %v17271_v37  ;;  %v20053_v37 = vmov 0  }
 0x6e7   :  { %13474 = vmatprep.subr.bf16.mxu0 %v20049_v7  ;;  %14481 = vset.pattern.permute.xlu1 %v20053_v37  ;;  %v20066_v37 = vld [vmem:[#allocation73_spill] sm:$0xff] }
 0x6e8   :  { %7522 = vperm.xlu1 %14481, %v7517_v5  }
 0x6e9   :  { %12180 = vmatmul.mubr.f32.gmra.mrb[40].mxu0 %v17909_v54  ;;  %14484 = vset.pattern.permute.xlu0 %v20058_v16 }
 0x6ea   :  { %12182 = vmatprep.mubr.f32.mxu0 %v17932_v22  ;;  %13476 = vmatpush3.bf16.msra.mxu0 %v20049_v7  ;;  %v20062_v7 = vld [vmem:[#allocation56_spill] sm:$0xff] }
 0x6eb   :  { %13478 = vmatprep.subr.bf16.mxu0 %v20050_v40  ;;  %7561 = vperm.xlu0 %14484, %v18035_v24  }
 0x6ec   :  { %14483 = vset.pattern.permute.xlu1 %v20056_v9  ;;  %v20068_v9 = vld [vmem:[#allocation63_spill] sm:$0xff] }
 0x6ed   :  { %12183 = vmatmul.mubr.f32.gmra.mrb[42].mxu0 %v17929_v26  ;;  %7547 = vperm.xlu1 %14483, %v18035_v24  }
 0x6ee   :  { %12185 = vmatprep.mubr.f32.mxu0 %v17952_v14  ;;  %13480 = vmatpush3.bf16.msra.mxu0 %v20050_v40  ;;  %v20063_v40 = vmov 6  }
 0x6ef   :  { %13482 = vmatprep.subr.bf16.mxu0 %v20051_v19  ;;  %14487 = vset.pattern.permute.xlu0 %v20060_v20 }
 0x6f0   :  { %7578 = vperm.xlu0 %14487, %v7517_v5  }
 0x6f1   :  { %12186 = vmatmul.mubr.f32.gmra.mrb[44].mxu0 %v17949_v1  ;;  %7550 = vperm.xlu1 %14483, %v7517_v5  }
 0x6f2   :  { %12188 = vmatprep.mubr.f32.mxu0 %v17972_v45  ;;  %13484 = vmatpush3.bf16.msra.mxu0 %v20051_v19  ;;  %v20064_v19 = vld [vmem:[#allocation59_spill] sm:$0xff] }
 0x6f3   :  { %13486 = vmatprep.subr.bf16.mxu0 %v20052_v58 }
 0x6f4   :  { %14489 = vset.pattern.permute.xlu0 %v20063_v40 }
 0x6f5   :  { %12189 = vmatmul.mubr.f32.gmra.mrb[46].mxu0 %v17969_v6  ;;  %14485 = vset.pattern.permute.xlu1 %v20058_v16 }
 0x6f6   :  { %13488 = vmatpush3.bf16.msra.mxu0 %v20052_v58  ;;  %12223 = vmatprep.mubr.f32.mxu0 %v17850_v4  ;;  %v20065_v58 = vmov 5   ;;  %v20070_v4 = vld [vmem:[#allocation112_spill] sm:$0xff] }
 0x6f7   :  { %13490 = vmatprep.subr.bf16.mxu0 %v19902_v42  ;;  %7564 = vperm.xlu1 %14485, %v7517_v5  }
 0x6f8   :  { %7603 = vperm.xlu0 %14489, %v18035_v24  }
 0x6f9   :  { %12224 = vmatmul.mubr.f32.vlgmr.msra.gmra.mrb[32].mxu0 %v17847_v28  ;;  %v20069_v28 = vld [vmem:[#allocation67_spill] sm:$0xff] }
 0x6fa   :  { %12226 = vmatprep.mubr.f32.mxu0 %v17865_v15  ;;  %13492 = vmatpush3.bf16.msra.mxu0 %v19902_v42  ;;  %v20074_v15 = vand.u32 4294901760, %v17956_v35 }
 0x6fb   :  { %13494 = vmatprep.subr.bf16.mxu0 %v16771_v31  ;;  %14486 = vset.pattern.permute.xlu1 %v20060_v20 }
 0x6fc   :  { %7575 = vperm.xlu1 %14486, %v18035_v24   ;;  %14492 = vset.pattern.permute.xlu0 %v20067_v3 }
 0x6fd   :  { %12227 = vmatmul.mubr.f32.gmra.mrb[34].mxu0 %v17862_v25  ;;  %7620 = vperm.xlu0 %14492, %v7517_v5   ;;  %v20073_v25 = vld [vmem:[#allocation50_spill] sm:$0xff] }
 0x6fe   :  { %12229 = vmatprep.mubr.f32.mxu0 %v17883_v21  ;;  %13496 = vmatpush3.bf16.msra.mxu0 %v16771_v31 }
 0x6ff   :  { %13498 = vmatprep.subr.bf16.mxu0 %v20055_v12 }
 0x700   :  { %14488 = vset.pattern.permute.xlu1 %v20065_v58 }
 0x701   :  { %12230 = vmatmul.mubr.f32.gmra.mrb[36].mxu0 %v17877_v57  ;;  %7589 = vperm.xlu1 %14488, %v18035_v24  }
 0x702   :  { %12232 = vmatprep.mubr.f32.mxu0 %v17903_v8  ;;  %13500 = vmatpush3.bf16.msra.mxu0 %v20055_v12 }
 0x703   :  { %13502 = vmatprep.subr.bf16.mxu0 %v20057_v41 }
 0x705   :  { %12233 = vmatmul.mubr.f32.gmra.mrb[38].mxu0 %v17896_v60  ;;  %7592 = vperm.xlu1 %14488, %v7517_v5  }
 0x706   :  { %12235 = vmatprep.mubr.f32.mxu0 %v17923_v47  ;;  %13504 = vmatpush3.bf16.msra.mxu0 %v20057_v41 }
 0x707   :  { %13506 = vmatprep.subr.bf16.mxu0 %v20059_v62 }
 0x709   :  { %12236 = vmatmul.mubr.f32.gmra.mrb[40].mxu0 %v17916_v44  ;;  %14490 = vset.pattern.permute.xlu1 %v20063_v40 }
 0x70a   :  { %12238 = vmatprep.mubr.f32.mxu0 %v17943_v61  ;;  %13508 = vmatpush3.bf16.msra.mxu0 %v20059_v62 }
 0x70b   :  { %13510 = vmatprep.subr.bf16.mxu0 %v20061_v34  ;;  %7606 = vperm.xlu1 %14490, %v7517_v5  }
 0x70d   :  { %12239 = vmatmul.mubr.f32.gmra.mrb[42].mxu0 %v17936_v39 }
 0x70e   :  { %12241 = vmatprep.mubr.f32.mxu0 %v17963_v46  ;;  %13512 = vmatpush3.bf16.msra.mxu0 %v20061_v34 }
 0x70f   :  { %13514 = vmatprep.subr.bf16.mxu0 %v20062_v7  ;;  %14491 = vset.pattern.permute.xlu1 %v20067_v3 }
 0x710   :  { %7617 = vperm.xlu1 %14491, %v18035_v24  }
 0x711   :  { %12242 = vmatmul.mubr.f32.gmra.mrb[44].mxu0 %v17956_v35 }
 0x712   :  { %12244 = vmatprep.mubr.f32.mxu0 %v17983_v23  ;;  %13516 = vmatpush3.bf16.msra.mxu0 %v20062_v7 }
 0x713   :  { %13518 = vmatprep.subr.bf16.mxu0 %v20064_v19 }
 0x715   :  { %12245 = vmatmul.mubr.f32.gmra.mrb[46].mxu0 %v17976_v51 }
 0x716   :  { %13520 = vmatpush3.bf16.msra.mxu0 %v20064_v19  ;;  %12279 = vmatprep.mubr.f32.mxu0 %v6281_v0  ;;  %v20072_v0 = vld [vmem:[#allocation20_spill] sm:$0xff] }
 0x717   :  { %13522 = vmatprep.subr.bf16.mxu0 %v20066_v37 }
 0x719   :  { %12280 = vmatmul.mubr.f32.vlgmr.msra.gmra.mrb[32].mxu0 %v6291_v48  ;;  %v20071_v48 = vld [vmem:[#allocation113_spill] sm:$0xff] }
 0x71a   :  { %12282 = vmatprep.mubr.f32.mxu0 %v6301_v49  ;;  %13524 = vmatpush3.bf16.msra.mxu0 %v20066_v37 }
 0x71b   :  { %13526 = vmatprep.subr.bf16.mxu0 %v20068_v9 }
 0x71d   :  { %12283 = vmatmul.mubr.f32.gmra.mrb[34].mxu0 %v6311_v17  ;;  %v20075_v17 = vld [vmem:[#allocation102_spill] sm:$0xff] }
 0x71e   :  { %12285 = vmatprep.mubr.f32.mxu0 %v6321_v32  ;;  %13528 = vmatpush3.bf16.msra.mxu0 %v20068_v9  ;;  %v20078_v9 = vld [vmem:[#allocation38_spill] sm:$0xff] }
 0x71f   :  { %13530 = vmatprep.subr.bf16.mxu0 %v20069_v28 }
 0x721   :  { %12286 = vmatmul.mubr.f32.gmra.mrb[36].mxu0 %v6331_v50 }
 0x722   :  { %12288 = vmatprep.mubr.f32.mxu0 %v6341_v53  ;;  %13532 = vmatpush3.bf16.msra.mxu0 %v20069_v28 }
 0x723   :  { %13534 = vmatprep.subr.bf16.mxu0 %v20070_v4 }
 0x725   :  { %12289 = vmatmul.mubr.f32.gmra.mrb[38].mxu0 %v6351_v43 }
 0x726   :  { %12291 = vmatprep.mubr.f32.mxu0 %v6361_v2  ;;  %13536 = vmatpush3.bf16.msra.mxu0 %v20070_v4 }
 0x727   :  { %13538 = vmatprep.subr.bf16.mxu0 %v20071_v48 }
 0x729   :  { %12292 = vmatmul.mubr.f32.gmra.mrb[40].mxu0 %v6371_v11 }
 0x72a   :  { %12294 = vmatprep.mubr.f32.mxu0 %v6381_v18  ;;  %13540 = vmatpush3.bf16.msra.mxu0 %v20071_v48  ;;  %v20079_v48 = vld [vmem:[#allocation39_spill] sm:$0xff] }
 0x72b   :  { %13542 = vmatprep.subr.bf16.mxu0 %v20072_v0 }
 0x72d   :  { %12295 = vmatmul.mubr.f32.gmra.mrb[42].mxu0 %v6391_v10 }
 0x72e   :  { %12297 = vmatprep.mubr.f32.mxu0 %v6401_v63  ;;  %13544 = vmatpush3.bf16.msra.mxu0 %v20072_v0 }
 0x72f   :  { %13546 = vmatprep.subr.bf16.mxu0 %v20073_v25 }
 0x731   :  { %12298 = vmatmul.mubr.f32.gmra.mrb[44].mxu0 %v20074_v15 }
 0x732   :  { %12300 = vmatprep.mubr.f32.mxu0 %v6421_v27  ;;  %13548 = vmatpush3.bf16.msra.mxu0 %v20073_v25 }
 0x733   :  { %13550 = vmatprep.subr.bf16.mxu0 %v20075_v17 }
 0x735   :  { %12301 = vmatmul.mubr.f32.gmra.mrb[46].mxu0 %v6431_v36 }
 0x736   :  { %13552 = vmatpush3.bf16.msra.mxu0 %v20075_v17  ;;  %12335 = vmatprep.mubr.f32.mxu0 %v17844_v59 }
 0x737   :  { %13554 = vmatprep.subr.bf16.mxu0 %v19902_v42 }
 0x739   :  { %12336 = vmatmul.mubr.f32.vlgmr.msra.gmra.mrb[32].mxu0 %v17842_v38 }
 0x73a   :  { %12338 = vmatprep.mubr.f32.mxu0 %v17856_v55  ;;  %13556 = vmatpush3.bf16.msra.mxu0 %v19902_v42 }
 0x73b   :  { %13558 = vmatprep.subr.bf16.mxu0 %v16771_v31 }
 0x73d   :  { %12339 = vmatmul.mubr.f32.gmra.mrb[34].mxu0 %v17853_v29 }
 0x73e   :  { %12341 = vmatprep.mubr.f32.mxu0 %v17874_v33  ;;  %13560 = vmatpush3.bf16.msra.mxu0 %v16771_v31 }
 0x73f   :  { %13562 = vmatprep.subr.bf16.mxu0 %v20055_v12 }
 0x741   :  { %12342 = vmatmul.mubr.f32.gmra.mrb[36].mxu0 %v17871_v52 }
 0x742   :  { %12344 = vmatprep.mubr.f32.mxu0 %v17892_v30  ;;  %13564 = vmatpush3.bf16.msra.mxu0 %v20055_v12 }
 0x743   :  { %13566 = vmatprep.subr.bf16.mxu0 %v20057_v41 }
 0x745   :  { %12345 = vmatmul.mubr.f32.gmra.mrb[38].mxu0 %v17889_v13 }
 0x746   :  { %12347 = vmatprep.mubr.f32.mxu0 %v17912_v56  ;;  %13568 = vmatpush3.bf16.msra.mxu0 %v20057_v41 }
 0x747   :  { %13570 = vmatprep.subr.bf16.mxu0 %v20059_v62 }
 0x749   :  { %12348 = vmatmul.mubr.f32.gmra.mrb[40].mxu0 %v17909_v54 }
 0x74a   :  { %12350 = vmatprep.mubr.f32.mxu0 %v17932_v22  ;;  %13572 = vmatpush3.bf16.msra.mxu0 %v20059_v62 }
 0x74b   :  { %13574 = vmatprep.subr.bf16.mxu0 %v20061_v34 }
 0x74d   :  { %12351 = vmatmul.mubr.f32.gmra.mrb[42].mxu0 %v17929_v26 }
 0x74e   :  { %12353 = vmatprep.mubr.f32.mxu0 %v17952_v14  ;;  %13576 = vmatpush3.bf16.msra.mxu0 %v20061_v34 }
 0x74f   :  { %13578 = vmatprep.subr.bf16.mxu0 %v20062_v7 }
 0x751   :  { %12354 = vmatmul.mubr.f32.gmra.mrb[44].mxu0 %v17949_v1 }
 0x752   :  { %12356 = vmatprep.mubr.f32.mxu0 %v17972_v45  ;;  %13580 = vmatpush3.bf16.msra.mxu0 %v20062_v7 }
 0x753   :  { %13582 = vmatprep.subr.bf16.mxu0 %v20064_v19 }
 0x755   :  { %12357 = vmatmul.mubr.f32.gmra.mrb[46].mxu0 %v17969_v6 }
 0x756   :  { %13584 = vmatpush3.bf16.msra.mxu0 %v20064_v19  ;;  %12391 = vmatprep.mubr.f32.mxu0 %v17844_v59  ;;  %v20076_v59 = vld [vmem:[#allocation37_spill] sm:$0xff] }
 0x759   :  { %12392 = vmatmul.mubr.f32.vlgmr.msra.gmra.mrb[32].mxu0 %v17842_v38 }
 0x75a   :  { %12394 = vmatprep.mubr.f32.mxu0 %v17856_v55  ;;  %v20077_v55 = vmov 0.0  }
 0x75d   :  { %12395 = vmatmul.mubr.f32.gmra.mrb[34].mxu0 %v17853_v29 }
 0x75e   :  { %12397 = vmatprep.mubr.f32.mxu0 %v17874_v33  ;;  %v7534_v31 = vpop.permute.xlu1 %7533 }
 0x75f   :  { %v7520_v42 = vpop.permute.xlu0 %7519  ;;  %vm7538_vm5 = vcmp.eq.s32.totalorder %v7534_v31, %v20076_v59 }
 0x760   :  { %vm7524_vm6 = vcmp.eq.s32.totalorder %v7520_v42, %v20076_v59  ;;  %v9424_v47 = vsel %vm7538_vm5, 1.0, %v20077_v55 }
 0x761   :  { %12398 = vmatmul.mubr.f32.gmra.mrb[36].mxu0 %v17871_v52  ;;  %v9422_v11 = vsel %vm7524_vm6, 1.0, %v20077_v55 }
 0x762   :  { %12400 = vmatprep.mubr.f32.mxu0 %v17892_v30  ;;  %v7544_v2 = vadd.f32 %v9424_v47, %v9422_v11  ;;  %v20083_v47 = vld [vmem:[#allocation45_spill] sm:$0xff] }
 0x764   :  { %v7537_v29 = vpop.permute.xlu0 %7536 }
 0x765   :  { %12401 = vmatmul.mubr.f32.gmra.mrb[38].mxu0 %v17889_v13  ;;  %vm7539_vm1 = vcmp.eq.s32.totalorder %v7537_v29, %v20076_v59 }
 0x766   :  { %12403 = vmatprep.mubr.f32.mxu0 %v17912_v56  ;;  %v9425_v49 = vsel %vm7539_vm1, 1.0, %v20077_v55 }
 0x767   :  { %v7523_v38 = vpop.permute.xlu1 %7522 }
 0x768   :  { %vm7525_vm0 = vcmp.eq.s32.totalorder %v7523_v38, %v20076_v59  ;;  %v20080_v38 = vld [vmem:[#allocation13_spill] sm:$0xff] }
 0x769   :  { %12404 = vmatmul.mubr.f32.gmra.mrb[40].mxu0 %v17909_v54  ;;  %v9423_v52 = vsel %vm7525_vm0, 1.0, %v20077_v55 }
 0x76a   :  { %12406 = vmatprep.mubr.f32.mxu0 %v17932_v22  ;;  %v7545_v33 = vadd.f32 %v9425_v49, %v9423_v52  ;;  %v7562_v50 = vpop.permute.xlu0 %7561  ;;  %v20081_v52 = vld [vmem:[#allocation36_spill] sm:$0xff] }
 0x76b   :  { %vm7566_vm9 = vcmp.eq.s32.totalorder %v7562_v50, %v20076_v59 }
 0x76c   :  { %v7548_v57 = vpop.permute.xlu1 %7547 }
 0x76d   :  { %12407 = vmatmul.mubr.f32.gmra.mrb[42].mxu0 %v17929_v26  ;;  %vm7552_vm7 = vcmp.eq.s32.totalorder %v7548_v57, %v20076_v59 }
 0x76e   :  { %12409 = vmatprep.mubr.f32.mxu0 %v17952_v14  ;;  %v9426_v22 = vsel %vm7552_vm7, 1.0, %v20077_v55 }
 0x76f   :  { %v7579_v60 = vpop.permute.xlu0 %7578  ;;  %v7558_v10 = vadd.f32 %v9426_v22, %v7544_v2 }
 0x770   :  { %v7551_v21 = vpop.permute.xlu1 %7550  ;;  %vm7581_vm4 = vcmp.eq.s32.totalorder %v7579_v60, %v20076_v59 }
 0x771   :  { %12410 = vmatmul.mubr.f32.gmra.mrb[44].mxu0 %v17949_v1  ;;  %vm7553_vm2 = vcmp.eq.s32.totalorder %v7551_v21, %v20076_v59  ;;  %v9431_v54 = vsel %vm7581_vm4, 1.0, %v20077_v55  ;;  %v9428_v1 = vsel %vm7566_vm9, 1.0, %v20077_v55 }
 0x772   :  { %12412 = vmatprep.mubr.f32.mxu0 %v17972_v45  ;;  %v9427_v13 = vsel %vm7553_vm2, 1.0, %v20077_v55  ;;  %v7572_v35 = vadd.f32 %v9428_v1, %v7558_v10 }
 0x773   :  { %v7559_v32 = vadd.f32 %v9427_v13, %v7545_v33 }
 0x775   :  { %12413 = vmatmul.mubr.f32.gmra.mrb[46].mxu0 %v17969_v6 }
 0x776   :  { %v7565_v30 = vpop.permute.xlu1 %7564 }
 0x777   :  { %vm7567_vm3 = vcmp.eq.s32.totalorder %v7565_v30, %v20076_v59  ;;  %v7604_v63 = vpop.permute.xlu0 %7603 }
 0x778   :  { %v9429_v8 = vsel %vm7567_vm3, 1.0, %v20077_v55  ;;  %vm7608_vm13 = vcmp.eq.s32.totalorder %v7604_v63, %v20076_v59  ;;  %v20084_v63 = vld [vmem:[#allocation47_spill] sm:$0xff] }
 0x779   :  { %v7573_v43 = vadd.f32 %v9429_v8, %v7559_v32  ;;  %v9434_v27 = vsel %vm7608_vm13, 1.0, %v20077_v55 }
 0x77b   :  { %v7576_v53 = vpop.permute.xlu1 %7575  ;;  %v7587_v56 = vadd.f32 %v9431_v54, %v7573_v43  ;;  %v20082_v43 = vld [vmem:[#allocation44_spill] sm:$0xff] }
 0x77c   :  { %vm7580_vm10 = vcmp.eq.s32.totalorder %v7576_v53, %v20076_v59  ;;  %v7621_v7 = vpop.permute.xlu0 %7620 }
 0x77d   :  { %v9430_v6 = vsel %vm7580_vm10, 1.0, %v20077_v55  ;;  %vm7623_vm15 = vcmp.eq.s32.totalorder %v7621_v7, %v20076_v59 }
 0x77e   :  { %v7586_v45 = vadd.f32 %v9430_v6, %v7572_v35  ;;  %v9437_v40 = vsel %vm7623_vm15, 1.0, %v20077_v55 }
 0x780   :  { %v7590_v44 = vpop.permute.xlu1 %7589 }
 0x781   :  { %vm7594_vm12 = vcmp.eq.s32.totalorder %v7590_v44, %v20076_v59 }
 0x782   :  { %v9432_v51 = vsel %vm7594_vm12, 1.0, %v20077_v55 }
 0x783   :  { %v7600_v36 = vadd.f32 %v9432_v51, %v7586_v45 }
 0x784   :  { %v7593_v26 = vpop.permute.xlu1 %7592 }
 0x785   :  { %vm7595_vm8 = vcmp.eq.s32.totalorder %v7593_v26, %v20076_v59  ;;  %v7614_v24 = vadd.f32 %v9434_v27, %v7600_v36 }
 0x786   :  { %v9433_v39 = vsel %vm7595_vm8, 1.0, %v20077_v55 }
 0x787   :  { %v7601_v61 = vadd.f32 %v9433_v39, %v7587_v56 }
 0x78a   :  { %v7607_v18 = vpop.permute.xlu1 %7606 }
 0x78b   :  { %vm7609_vm11 = vcmp.eq.s32.totalorder %v7607_v18, %v20076_v59 }
 0x78c   :  { %v9435_v14 = vsel %vm7609_vm11, 1.0, %v20077_v55 }
 0x78d   :  { %v7615_v46 = vadd.f32 %v9435_v14, %v7601_v61 }
 0x78f   :  { %v7618_v23 = vpop.permute.xlu1 %7617  ;;  %v7629_v19 = vadd.f32 %v9437_v40, %v7615_v46 }
 0x790   :  { %vm7622_vm14 = vcmp.eq.s32.totalorder %v7618_v23, %v20076_v59 }
 0x791   :  { %v9436_v5 = vsel %vm7622_vm14, 1.0, %v20077_v55  ;;  %v18230_v58 = vand.u32 4294901760, %v7629_v19 }
 0x792   :  { %v7628_v12 = vadd.f32 %v9436_v5, %v7614_v24  ;;  %v20085_v24 = vld [vmem:[#allocation49_spill] sm:$0xff] }
 0x793   :  { %v18233_v37 = vsub.f32 %v7629_v19, %v18230_v58 }
 0x794   :  { %v18219_v41 = vand.u32 4294901760, %v7628_v12 }
 0x795   :  { %v19488_v25 = vand.u32 4294901760, %v18233_v37 }
 0x796   :  { %v18222_v16 = vsub.f32 %v7628_v12, %v18219_v41 }
 0x797   :  { %v18243_v33 = vsub.f32 %v18233_v37, %v19488_v25 }
 0x798   :  { %v19489_v62 = vand.u32 4294901760, %v18222_v16 }
 0x79a   :  { %v7714_v20 = vsub.f32 %v18222_v16, %v19489_v62 }
 0x79c   :  { %v7715_v34 = vand.u32 4294901760, %v7714_v20 }
 0x79e   :  { %12447 = vmatprep.mubr.f32.mxu1 %v7715_v34 }
 0x82c   :  { %v12393_v3 = vpop.f32.mrb[32].mxu0 }
 0x82d   :  { %v7485_v28 = vadd.f32 %v12393_v3, %v20078_v9  ;;  %v7390_v4 = vpop.f32.mrb[33].mxu0 }
 0x82e   :  { %v7484_v0 = vadd.f32 %v7390_v4, %v20079_v48 }
 0x82f   :  { %v7501_v15 = vmax.f32 %v7485_v28, 0.0 }
 0x830   :  { %v7500_v17 = vmax.f32 %v7484_v0, 0.0  ;;  %v12396_v31 = vpop.f32.mrb[34].mxu0 }
 0x831   :  { %v7634_v42 = vand.u32 4294901760, %v7501_v15  ;;  %v7487_v59 = vadd.f32 %v12396_v31, %v20080_v38  ;;  %v7402_v29 = vpop.f32.mrb[35].mxu0 }
 0x832   :  { %v7631_v55 = vand.u32 4294901760, %v7500_v17  ;;  %v7486_v49 = vadd.f32 %v7402_v29, %v20081_v52  ;;  %v20087_v29 = vld [vmem:[#allocation55_spill] sm:$0xff] }
 0x833   :  { %v18245_v57 = vsub.f32 %v7501_v15, %v7634_v42  ;;  %v7503_v21 = vmax.f32 %v7487_v59, 0.0  ;;  %v20086_v15 = vld [vmem:[#allocation52_spill] sm:$0xff] }
 0x834   :  { %v18247_v50 = vpack.c.bf16 %v7634_v42, %v7631_v55  ;;  %v18249_v13 = vsub.f32 %v7500_v17, %v7631_v55  ;;  %v7502_v32 = vmax.f32 %v7486_v49, 0.0  ;;  %v12399_v30 = vpop.f32.mrb[36].mxu0 }
 0x835   :  { %v7741_v60 = vand.u32 4294901760, %v18245_v57  ;;  %v7640_v8 = vand.u32 4294901760, %v7503_v21  ;;  %v7489_v54 = vadd.f32 %v12399_v30, %v20082_v43  ;;  %v7414_v53 = vpop.f32.mrb[37].mxu0 }
 0x836   :  { %v7734_v56 = vand.u32 4294901760, %v18249_v13  ;;  %v7637_v44 = vand.u32 4294901760, %v7502_v32  ;;  %v7488_v11 = vadd.f32 %v7414_v53, %v20083_v47  ;;  %13586 = vmatprep.subr.bf16.mxu1 %v18247_v50  ;;  %v18258_v26 = vpack.c.bf16 %v18245_v57, %v18249_v13 }
 0x837   :  { %v18261_v22 = vsub.f32 %v7503_v21, %v7640_v8  ;;  %v7505_v39 = vmax.f32 %v7489_v54, 0.0  ;;  %13588 = vmatpush3.bf16.msra.mxu1 %v18247_v50  ;;  %v7742_v61 = vsub.f32 %v18245_v57, %v7741_v60 }
 0x838   :  { %v18267_v10 = vpack.c.bf16 %v7640_v8, %v7637_v44  ;;  %v18269_v1 = vsub.f32 %v7502_v32, %v7637_v44  ;;  %v7504_v18 = vmax.f32 %v7488_v11, 0.0  ;;  %v12402_v14 = vpop.f32.mrb[38].mxu0  ;;  %v7735_v35 = vsub.f32 %v18249_v13, %v7734_v56 }
 0x839   :  { %v7755_v46 = vand.u32 4294901760, %v18261_v22  ;;  %v7646_v6 = vand.u32 4294901760, %v7505_v39  ;;  %v7491_v45 = vadd.f32 %v12402_v14, %v20084_v63  ;;  %v7426_v51 = vpop.f32.mrb[39].mxu0  ;;  %v7743_v23 = vand.u32 4294901760, %v7742_v61  ;;  %v20089_v63 = vld [vmem:[#allocation58_spill] sm:$0xff] }
 0x83a   :  { %v7748_v36 = vand.u32 4294901760, %v18269_v1  ;;  %v7643_v27 = vand.u32 4294901760, %v7504_v18  ;;  %v7490_v5 = vadd.f32 %v7426_v51, %v20085_v24  ;;  %13590 = vmatprep.subr.bf16.mxu1 %v18267_v10  ;;  %v7736_v12 = vand.u32 4294901760, %v7735_v35 }
 0x83b   :  { %v18279_v20 = vsub.f32 %v7505_v39, %v7646_v6  ;;  %v7507_v34 = vmax.f32 %v7491_v45, 0.0  ;;  %13592 = vmatpush3.bf16.msra.mxu1 %v18267_v10  ;;  %v7756_v7 = vsub.f32 %v18261_v22, %v7755_v46  ;;  %v18287_v40 = vpack.c.bf16 %v18261_v22, %v18269_v1  ;;  %v20088_v39 = vld [vmem:[#allocation57_spill] sm:$0xff] }
 0x83c   :  { %v18289_v19 = vpack.c.bf16 %v7646_v6, %v7643_v27  ;;  %v18291_v3 = vsub.f32 %v7504_v18, %v7643_v27  ;;  %v7506_v9 = vmax.f32 %v7490_v5, 0.0  ;;  %v12405_v28 = vpop.f32.mrb[40].mxu0  ;;  %v18293_v4 = vpack.c.bf16 %v7743_v23, %v7736_v12 }
 0x83d   :  { %v7769_v48 = vand.u32 4294901760, %v18279_v20  ;;  %v7652_v0 = vand.u32 4294901760, %v7507_v34  ;;  %v7493_v17 = vadd.f32 %v12405_v28, %v20086_v15  ;;  %v7438_v31 = vpop.f32.mrb[41].mxu0  ;;  %v7749_v42 = vsub.f32 %v18269_v1, %v7748_v36 }
 0x83e   :  { %v7762_v38 = vand.u32 4294901760, %v18291_v3  ;;  %v7649_v59 = vand.u32 4294901760, %v7506_v9  ;;  %v7492_v55 = vadd.f32 %v7438_v31, %v20087_v29  ;;  %13594 = vmatprep.subr.bf16.mxu1 %v18289_v19  ;;  %v7757_v52 = vand.u32 4294901760, %v7756_v7 }
 0x83f   :  { %v18303_v49 = vsub.f32 %v7507_v34, %v7652_v0  ;;  %v7509_v21 = vmax.f32 %v7493_v17, 0.0  ;;  %13596 = vmatpush3.bf16.msra.mxu1 %v18289_v19  ;;  %v7750_v32 = vand.u32 4294901760, %v7749_v42  ;;  %v7770_v30 = vsub.f32 %v18279_v20, %v7769_v48  ;;  %v20090_v17 = vld [vmem:[#allocation60_spill] sm:$0xff] }
 0x840   :  { %v18309_v8 = vpack.c.bf16 %v7652_v0, %v7649_v59  ;;  %v18311_v43 = vsub.f32 %v7506_v9, %v7649_v59  ;;  %v7508_v54 = vmax.f32 %v7492_v55, 0.0  ;;  %v12408_v53 = vpop.f32.mrb[42].mxu0  ;;  %v7763_v44 = vsub.f32 %v18291_v3, %v7762_v38 }
 0x841   :  { %v19492_v47 = vand.u32 4294901760, %v18303_v49  ;;  %v7658_v11 = vand.u32 4294901760, %v7509_v21  ;;  %v7495_v61 = vadd.f32 %v12408_v53, %v20088_v39  ;;  %v7450_v18 = vpop.f32.mrb[43].mxu0  ;;  %v18318_v14 = vpack.c.bf16 %v7757_v52, %v7750_v32  ;;  %v20091_v52 = vld [vmem:[#allocation62_spill] sm:$0xff] }
 0x842   :  { %v19493_v35 = vand.u32 4294901760, %v18311_v43  ;;  %v7655_v6 = vand.u32 4294901760, %v7508_v54  ;;  %v7494_v45 = vadd.f32 %v7450_v18, %v20089_v63  ;;  %13598 = vmatprep.subr.bf16.mxu1 %v18309_v8  ;;  %v7764_v51 = vand.u32 4294901760, %v7763_v44 }
 0x843   :  { %v18323_v23 = vsub.f32 %v7509_v21, %v7658_v11  ;;  %v7511_v27 = vmax.f32 %v7495_v61, 0.0  ;;  %13600 = vmatpush3.bf16.msra.mxu1 %v18309_v8  ;;  %v7771_v24 = vand.u32 4294901760, %v7770_v30  ;;  %v7784_v5 = vsub.f32 %v18303_v49, %v19492_v47 }
 0x844   :  { %v18329_v12 = vpack.c.bf16 %v7658_v11, %v7655_v6  ;;  %v18331_v34 = vsub.f32 %v7508_v54, %v7655_v6  ;;  %v7510_v7 = vmax.f32 %v7494_v45, 0.0  ;;  %v12411_v9 = vpop.f32.mrb[44].mxu0  ;;  %v7777_v28 = vsub.f32 %v18311_v43, %v19493_v35 }
 0x845   :  { %v19490_v0 = vand.u32 4294901760, %v18323_v23  ;;  %v7664_v15 = vand.u32 4294901760, %v7511_v27  ;;  %v7497_v31 = vadd.f32 %v12411_v9, %v20090_v17  ;;  %v7462_v42 = vpop.f32.mrb[45].mxu0  ;;  %v18338_v59 = vpack.c.bf16 %v7771_v24, %v7764_v51  ;;  %v20092_v51 = vld [vmem:[#allocation65_spill] sm:$0xff]  ;;  %v20093_v17 = vld [vmem:[#allocation66_spill] sm:$0xff] }
 0x846   :  { %v19491_v29 = vand.u32 4294901760, %v18331_v34  ;;  %v7661_v55 = vand.u32 4294901760, %v7510_v7  ;;  %v7496_v21 = vadd.f32 %v7462_v42, %v20091_v52  ;;  %13602 = vmatprep.subr.bf16.mxu1 %v18329_v12  ;;  %v7778_v32 = vand.u32 4294901760, %v7777_v28 }
 0x847   :  { %v18343_v30 = vsub.f32 %v7511_v27, %v7664_v15  ;;  %v7513_v54 = vmax.f32 %v7497_v31, 0.0  ;;  %13604 = vmatpush3.bf16.msra.mxu1 %v18329_v12  ;;  %v7785_v53 = vand.u32 4294901760, %v7784_v5  ;;  %v7798_v44 = vsub.f32 %v18323_v23, %v19490_v0 }
 0x848   :  { %v18349_v11 = vpack.c.bf16 %v7664_v15, %v7661_v55  ;;  %v7803_v39 = vsub.f32 %v7510_v7, %v7661_v55  ;;  %v7512_v61 = vmax.f32 %v7496_v21, 0.0  ;;  %v12414_v18 = vpop.f32.mrb[46].mxu0  ;;  %v7791_v6 = vsub.f32 %v18331_v34, %v19491_v29 }
 0x849   :  { %v7811_v63 = vand.u32 4294901760, %v18343_v30  ;;  %v7670_v45 = vand.u32 4294901760, %v7513_v54  ;;  %v7499_v27 = vadd.f32 %v12414_v18, %v20092_v51  ;;  %v7474_v24 = vpop.f32.mrb[47].mxu0  ;;  %v18356_v5 = vpack.c.bf16 %v7785_v53, %v7778_v32 }
 0x84a   :  { %v7804_v9 = vand.u32 4294901760, %v7803_v39  ;;  %v7667_v28 = vand.u32 4294901760, %v7512_v61  ;;  %v7498_v15 = vadd.f32 %v7474_v24, %v20093_v17  ;;  %13606 = vmatprep.subr.bf16.mxu1 %v18349_v11  ;;  %v7792_v7 = vand.u32 4294901760, %v7791_v6 }
 0x84b   :  { %v7824_v31 = vsub.f32 %v7513_v54, %v7670_v45  ;;  %v7515_v42 = vmax.f32 %v7499_v27, 0.0  ;;  %13608 = vmatpush3.bf16.msra.mxu1 %v18349_v11  ;;  %v7799_v55 = vand.u32 4294901760, %v7798_v44  ;;  %v7812_v52 = vsub.f32 %v18343_v30, %v7811_v63 }
 0x84c   :  { %v18362_v21 = vpack.c.bf16 %v7670_v45, %v7667_v28  ;;  %v7817_v18 = vsub.f32 %v7512_v61, %v7667_v28  ;;  %v7514_v51 = vmax.f32 %v7498_v15, 0.0  ;;  %v7805_v32 = vsub.f32 %v7803_v39, %v7804_v9 }
 0x84d   :  { %v7825_v53 = vand.u32 4294901760, %v7824_v31  ;;  %v7676_v25 = vand.u32 4294901760, %v7515_v42  ;;  %v13633_v62 = vpack.c.bf16 %v7799_v55, %v7792_v7  ;;  %v7813_v2 = vand.u32 4294901760, %v7812_v52 }
 0x84e   :  { %v7818_v24 = vand.u32 4294901760, %v7817_v18  ;;  %v7673_v17 = vand.u32 4294901760, %v7514_v51  ;;  %13610 = vmatprep.subr.bf16.mxu1 %v18362_v21  ;;  %v7806_v54 = vand.u32 4294901760, %v7805_v32  ;;  %v18367_v6 = vpack.c.bf16 %v18279_v20, %v18291_v3 }
 0x84f   :  { %v7838_v44 = vsub.f32 %v7515_v42, %v7676_v25  ;;  %13612 = vmatpush3.bf16.msra.mxu1 %v18362_v21  ;;  %v7826_v45 = vsub.f32 %v7824_v31, %v7825_v53  ;;  %v18372_v61 = vpack.c.bf16 %v18303_v49, %v18311_v43  ;;  %v18376_v27 = vpack.c.bf16 %v18323_v23, %v18331_v34 }
 0x850   :  { %v18378_v28 = vpack.c.bf16 %v7676_v25, %v7673_v17  ;;  %v7831_v15 = vsub.f32 %v7514_v51, %v7673_v17  ;;  %v13637_v7 = vpack.c.bf16 %v7813_v2, %v7806_v54  ;;  %v7819_v55 = vsub.f32 %v7817_v18, %v7818_v24 }
 0x851   :  { %v7839_v52 = vand.u32 4294901760, %v7838_v44  ;;  %v7827_v32 = vand.u32 4294901760, %v7826_v45  ;;  %v18381_v42 = vpack.c.bf16 %v18343_v30, %v7803_v39  ;;  %v18383_v0 = vpack.c.bf16 %v7824_v31, %v7817_v18  ;;  %v8318_v31 = vld [vmem:[%s19112_s6 + $0x10] sm:$0xff]  ;;  %v8319_v18 = vld [vmem:[%s19112_s6 + $0x18] sm:$0xff] }
 0x852   :  { %v7832_v29 = vand.u32 4294901760, %v7831_v15  ;;  %13614 = vmatprep.subr.bf16.mxu1 %v18378_v28  ;;  %v7820_v47 = vand.u32 4294901760, %v7819_v55  ;;  %v18386_v35 = vpack.c.bf16 %v7838_v44, %v7831_v15  ;;  %v18392_v25 = vpack.c.bf16 %v7741_v60, %v7734_v56 }
 0x853   :  { %13616 = vmatpush3.bf16.msra.mxu1 %v18378_v28  ;;  %v7840_v2 = vsub.f32 %v7838_v44, %v7839_v52  ;;  %v18399_v30 = vpack.c.bf16 %v7755_v46, %v7748_v36  ;;  %v18405_v39 = vpack.c.bf16 %v7769_v48, %v7762_v38  ;;  %v20094_v13 = vand.u32 4294901760, %v18311_v43 }
 0x854   :  { %v20095_v57 = vand.u32 4294901760, %v18303_v49  ;;  %13618 = vmatprep.subr.bf16.mxu1 %v18293_v4  ;;  %v13641_v56 = vpack.c.bf16 %v7827_v32, %v7820_v47  ;;  %v7833_v1 = vsub.f32 %v7831_v15, %v7832_v29  ;;  %v20096_v22 = vand.u32 4294901760, %v18331_v34  ;;  %v8317_v34 = vld [vmem:[%s19112_s6 + $0x8] sm:$0xff] }
 0x855   :  { %v20097_v46 = vand.u32 4294901760, %v18323_v23  ;;  %v18420_v3 = vpack.c.bf16 %v7811_v63, %v7804_v9  ;;  %v7841_v20 = vand.u32 4294901760, %v7840_v2  ;;  %v18422_v48 = vpack.c.bf16 %v7825_v53, %v7818_v24  ;;  %v8335_v63 = vld [vmem:[%s19112_s6 + $0x98] sm:$0xff]  ;;  %v8337_v32 = vld [vmem:[%s19112_s6 + $0xa8] sm:$0xff] }
 0x856   :  { %v18411_v60 = vpack.c.bf16 %v20095_v57, %v20094_v13  ;;  %v18424_v38 = vpack.c.bf16 %v7839_v52, %v7832_v29  ;;  %v20098_v49 = vand.u32 4294901760, %v18243_v33  ;;  %v7834_v43 = vand.u32 4294901760, %v7833_v1  ;;  %v8332_v33 = vld [vmem:[%s19112_s6 + $0x80] sm:$0xff]  ;;  %v8334_v29 = vld [vmem:[%s19112_s6 + $0x90] sm:$0xff]  ;;  %v8321_v2 = vld [vmem:[%s19112_s6 + $0x28] sm:$0xff] }
 0x857   :  { %v18418_v36 = vpack.c.bf16 %v20097_v46, %v20096_v22  ;;  %v8413_v9 = vand.u32 4294901760, %v8335_v63  ;;  %v8362_v17 = vand.u32 4294901760, %v8318_v31  ;;  %v8365_v15 = vand.u32 4294901760, %v8319_v18  ;;  %v8336_v52 = vld [vmem:[%s19112_s6 + $0xa0] sm:$0xff]  ;;  %v8339_v1 = vld [vmem:[%s19112_s6 + $0xb8] sm:$0xff] }
 0x858   :  { %12448 = vmatmul.mubr.f32.vlgmr.msra.gmra.mrb[32].mxu1 %v20098_v49  ;;  %v13645_v47 = vpack.c.bf16 %v7841_v20, %v7834_v43  ;;  %v8416_v57 = vand.u32 4294901760, %v8336_v52  ;;  %v8371_v49 = vand.u32 4294901760, %v8321_v2  ;;  %v8322_v43 = vld [vmem:[%s19112_s6 + $0x30] sm:$0xff] }
 0x859   :  { %13620 = vmatpush3.bf16.msra.mxu1 %v18293_v4  ;;  %12482 = vmatprep.mubr.f32.mxu1 %v18219_v41  ;;  %v8333_v4 = vld [vmem:[%s19112_s6 + $0x88] sm:$0xff]  ;;  %v18475_v45 = vsub.f32 %v8335_v63, %v8413_v9  ;;  %v18481_v55 = vsub.f32 %v8319_v18, %v8365_v15 }
 0x85a   :  { %13622 = vmatprep.subr.bf16.mxu1 %v18318_v14  ;;  %v8407_v23 = vand.u32 4294901760, %v8333_v4  ;;  %v18507_v22 = vsub.f32 %v8336_v52, %v8416_v57  ;;  %v8341_v18 = vld [vmem:[%s19112_s6 + $0xc8] sm:$0xff] }
 0x85c   :  { %v18467_v53 = vsub.f32 %v8333_v4, %v8407_v23 }
 0x85d   :  { %13624 = vmatpush3.bf16.msra.mxu1 %v18318_v14  ;;  %v8404_v14 = vand.u32 4294901760, %v8332_v33 }
 0x85e   :  { %13626 = vmatprep.subr.bf16.mxu1 %v18338_v59 }
 0x85f   :  { %v18465_v51 = vsub.f32 %v8332_v33, %v8404_v14  ;;  %v18497_v13 = vpack.c.bf16 %v8407_v23, %v8404_v14  ;;  %v8425_v14 = vand.u32 4294901760, %v8339_v1  ;;  %v8323_v23 = vld [vmem:[%s19112_s6 + $0x38] sm:$0xff] }
 0x861   :  { %13628 = vmatpush3.bf16.msra.mxu1 %v18338_v59  ;;  %13778 = vmatprep.subr.bf16.mxu0 %v18497_v13  ;;  %v18533_v63 = vsub.f32 %v8339_v1, %v8425_v14 }
 0x862   :  { %13630 = vmatprep.subr.bf16.mxu1 %v18356_v5 }
 0x865   :  { %13632 = vmatpush3.bf16.msra.mxu1 %v18356_v5  ;;  %v8410_v5 = vand.u32 4294901760, %v8334_v29 }
 0x866   :  { %13634 = vmatprep.subr.bf16.mxu1 %v13633_v62 }
 0x867   :  { %v18473_v44 = vsub.f32 %v8334_v29, %v8410_v5  ;;  %v18517_v33 = vpack.c.bf16 %v8413_v9, %v8410_v5  ;;  %v8374_v29 = vand.u32 4294901760, %v8322_v43 }
 0x869   :  { %13636 = vmatpush3.bf16.msra.mxu1 %v13633_v62  ;;  %v8316_v62 = vld [vmem:[%s19112_s6] sm:$0xff]  ;;  %v18536_v5 = vsub.f32 %v8322_v43, %v8374_v29 }
 0x86a   :  { %13638 = vmatprep.subr.bf16.mxu1 %v13637_v7  ;;  %v8356_v59 = vand.u32 4294901760, %v8316_v62 }
 0x86c   :  { %v18469_v24 = vsub.f32 %v8316_v62, %v8356_v59  ;;  %v18522_v62 = vsub.f32 %v8321_v2, %v8371_v49 }
 0x86d   :  { %13640 = vmatpush3.bf16.msra.mxu1 %v13637_v7  ;;  %v18478_v7 = vsub.f32 %v8318_v31, %v8362_v17  ;;  %v8340_v31 = vld [vmem:[%s19112_s6 + $0xc0] sm:$0xff] }
 0x86e   :  { %13642 = vmatprep.subr.bf16.mxu1 %v13641_v56  ;;  %v8428_v52 = vand.u32 4294901760, %v8340_v31 }
 0x871   :  { %13644 = vmatpush3.bf16.msra.mxu1 %v13641_v56  ;;  %v8419_v56 = vand.u32 4294901760, %v8337_v32 }
 0x872   :  { %13646 = vmatprep.subr.bf16.mxu1 %v13645_v47 }
 0x875   :  { %13648 = vmatpush3.bf16.msra.mxu1 %v13645_v47  ;;  %v18515_v47 = vsub.f32 %v8337_v32, %v8419_v56  ;;  %v8431_v32 = vand.u32 4294901760, %v8341_v18 }
 0x876   :  { %13650 = vmatprep.subr.bf16.mxu1 %v18258_v26 }
 0x878   :  { %12483 = vmatmul.mubr.f32.vlgmr.msra.gmra.mrb[32].mxu1 %v18230_v58 }
 0x879   :  { %13652 = vmatpush3.bf16.msra.mxu1 %v18258_v26  ;;  %12517 = vmatprep.mubr.f32.mxu1 %v18222_v16  ;;  %v8359_v26 = vand.u32 4294901760, %v8317_v34 }
 0x87a   :  { %13654 = vmatprep.subr.bf16.mxu1 %v18287_v40 }
 0x87b   :  { %v18471_v54 = vsub.f32 %v8317_v34, %v8359_v26  ;;  %v18509_v46 = vpack.c.bf16 %v8359_v26, %v8356_v59  ;;  %v18530_v59 = vpack.c.bf16 %v8365_v15, %v8362_v17  ;;  %v8377_v26 = vand.u32 4294901760, %v8323_v23  ;;  %v8324_v17 = vld [vmem:[%s19112_s6 + $0x40] sm:$0xff]  ;;  %v8325_v15 = vld [vmem:[%s19112_s6 + $0x48] sm:$0xff] }
 0x87c   :  { %v8380_v2 = vand.u32 4294901760, %v8324_v17 }
 0x87d   :  { %13656 = vmatpush3.bf16.msra.mxu1 %v18287_v40  ;;  %v8320_v40 = vld [vmem:[%s19112_s6 + $0x20] sm:$0xff]  ;;  %13780 = vmatpush3.bf16.msra.mxu0 %v18509_v46  ;;  %v18539_v9 = vsub.f32 %v8323_v23, %v8377_v26 }
 0x87e   :  { %13658 = vmatprep.subr.bf16.mxu1 %v18367_v6  ;;  %v8368_v20 = vand.u32 4294901760, %v8320_v40  ;;  %13782 = vmatprep.subr.bf16.mxu0 %v18517_v33 }
 0x881   :  { %13660 = vmatpush3.bf16.msra.mxu1 %v18367_v6  ;;  %v8338_v6 = vld [vmem:[%s19112_s6 + $0xb0] sm:$0xff]  ;;  %13784 = vmatpush3.bf16.msra.mxu0 %v18530_v59 }
 0x882   :  { %13662 = vmatprep.subr.bf16.mxu1 %v18372_v61  ;;  %v8422_v4 = vand.u32 4294901760, %v8338_v6 }
 0x884   :  { %v18528_v34 = vsub.f32 %v8338_v6, %v8422_v4  ;;  %v8383_v6 = vand.u32 4294901760, %v8325_v15  ;;  %v18569_v1 = vpack.c.bf16 %v8425_v14, %v8422_v4 }
 0x885   :  { %13664 = vmatpush3.bf16.msra.mxu1 %v18372_v61  ;;  %v18520_v61 = vsub.f32 %v8320_v40, %v8368_v20  ;;  %v18558_v40 = vpack.c.bf16 %v8371_v49, %v8368_v20  ;;  %v18574_v20 = vpack.c.bf16 %v8377_v26, %v8374_v29  ;;  %v18583_v49 = vpack.c.bf16 %v8431_v32, %v8428_v52 }
 0x886   :  { %13666 = vmatprep.subr.bf16.mxu1 %v18376_v27  ;;  %v18571_v43 = vsub.f32 %v8325_v15, %v8383_v6  ;;  %v18587_v4 = vpack.c.bf16 %v8383_v6, %v8380_v2  ;;  %v19501_v15 = vand.u32 4294901760, %v18522_v62 }
 0x887   :  { %v19498_v26 = vand.u32 4294901760, %v18520_v61 }
 0x888   :  { %20101 = vst [vmem:[#allocation105_spill] sm:$0xff] %v18571_v43 }
 0x889   :  { %13668 = vmatpush3.bf16.msra.mxu1 %v18376_v27  ;;  %v18548_v27 = vpack.c.bf16 %v8419_v56, %v8416_v57  ;;  %v18563_v57 = vsub.f32 %v8341_v18, %v8431_v32  ;;  %v18567_v56 = vsub.f32 %v8324_v17, %v8380_v2 }
 0x88a   :  { %13670 = vmatprep.subr.bf16.mxu1 %v18381_v42 }
 0x88b   :  { %13786 = vmatprep.subr.bf16.mxu0 %v18548_v27  ;;  %20100 = vst [vmem:[#allocation104_spill] sm:$0xff] %v18563_v57 }
 0x88c   :  { %13788 = vmatpush3.bf16.msra.mxu0 %v18558_v40 }
 0x88d   :  { %13672 = vmatpush3.bf16.msra.mxu1 %v18381_v42  ;;  %v18561_v42 = vsub.f32 %v8340_v31, %v8428_v52  ;;  %13790 = vmatprep.subr.bf16.mxu0 %v18569_v1 }
 0x88e   :  { %13674 = vmatprep.subr.bf16.mxu1 %v18383_v0 }
 0x88f   :  { %20099 = vst [vmem:[#allocation103_spill] sm:$0xff] %v18561_v42 }
 0x890   :  { %13792 = vmatpush3.bf16.msra.mxu0 %v18574_v20 }
 0x891   :  { %13676 = vmatpush3.bf16.msra.mxu1 %v18383_v0  ;;  %v20102_v0 = vand.u32 4294901760, %v18222_v16  ;;  %13794 = vmatprep.subr.bf16.mxu0 %v18583_v49  ;;  %v20103_v16 = vand.u32 4294901760, %v18233_v37 }
 0x892   :  { %13678 = vmatprep.subr.bf16.mxu1 %v18386_v35 }
 0x894   :  { %13796 = vmatpush3.bf16.msra.mxu0 %v18587_v4 }
 0x895   :  { %13680 = vmatpush3.bf16.msra.mxu1 %v18386_v35  ;;  %v19506_v35 = vand.u32 4294901760, %v18467_v53 }
 0x896   :  { %13682 = vmatprep.subr.bf16.mxu1 %v18247_v50 }
 0x898   :  { %12518 = vmatmul.mubr.f32.vlgmr.msra.gmra.mrb[32].mxu1 %v18233_v37  ;;  %v19507_v37 = vand.u32 4294901760, %v18465_v51 }
 0x899   :  { %13684 = vmatpush3.bf16.msra.mxu1 %v18247_v50  ;;  %12552 = vmatprep.mubr.f32.mxu1 %v20102_v0  ;;  %v19499_v0 = vand.u32 4294901760, %v18528_v34 }
 0x89a   :  { %13686 = vmatprep.subr.bf16.mxu1 %v18267_v10 }
 0x89d   :  { %13688 = vmatpush3.bf16.msra.mxu1 %v18267_v10 }
 0x89e   :  { %13690 = vmatprep.subr.bf16.mxu1 %v18289_v19 }
 0x8a1   :  { %13692 = vmatpush3.bf16.msra.mxu1 %v18289_v19 }
 0x8a2   :  { %13694 = vmatprep.subr.bf16.mxu1 %v18309_v8 }
 0x8a5   :  { %13696 = vmatpush3.bf16.msra.mxu1 %v18309_v8 }
 0x8a6   :  { %13698 = vmatprep.subr.bf16.mxu1 %v18329_v12 }
 0x8a9   :  { %13700 = vmatpush3.bf16.msra.mxu1 %v18329_v12 }
 0x8aa   :  { %13702 = vmatprep.subr.bf16.mxu1 %v18349_v11 }
 0x8ad   :  { %13704 = vmatpush3.bf16.msra.mxu1 %v18349_v11 }
 0x8ae   :  { %13706 = vmatprep.subr.bf16.mxu1 %v18362_v21 }
 0x8b1   :  { %13708 = vmatpush3.bf16.msra.mxu1 %v18362_v21 }
 0x8b2   :  { %13710 = vmatprep.subr.bf16.mxu1 %v18378_v28 }
 0x8b5   :  { %13712 = vmatpush3.bf16.msra.mxu1 %v18378_v28 }
 0x8b6   :  { %13714 = vmatprep.subr.bf16.mxu1 %v18392_v25 }
 0x8b8   :  { %12553 = vmatmul.mubr.f32.vlgmr.msra.gmra.mrb[32].mxu1 %v20103_v16  ;;  %v18684_v16 = vld [vmem:[%s19112_s6 + $0xd0] sm:$0xff] }
 0x8b9   :  { %13716 = vmatpush3.bf16.msra.mxu1 %v18392_v25  ;;  %12587 = vmatprep.mubr.f32.mxu1 %v18219_v41  ;;  %v19502_v25 = vand.u32 4294901760, %v18475_v45 }
 0x8ba   :  { %13718 = vmatprep.subr.bf16.mxu1 %v18399_v30 }
 0x8bd   :  { %13720 = vmatpush3.bf16.msra.mxu1 %v18399_v30  ;;  %v19497_v30 = vand.u32 4294901760, %v18478_v7 }
 0x8be   :  { %13722 = vmatprep.subr.bf16.mxu1 %v18405_v39 }
 0x8bf   :  { %v8500_v23 = vsub.f32 %v18478_v7, %v19497_v30 }
 0x8c1   :  { %13724 = vmatpush3.bf16.msra.mxu1 %v18405_v39  ;;  %v8605_v39 = vsub.f32 %v18467_v53, %v19506_v35 }
 0x8c2   :  { %13726 = vmatprep.subr.bf16.mxu1 %v18411_v60 }
 0x8c3   :  { %v8606_v31 = vand.u32 4294901760, %v8605_v39  ;;  %v8501_v39 = vand.u32 4294901760, %v8500_v23  ;;  %v19513_v23 = vand.u32 4294901760, %v18684_v16 }
 0x8c5   :  { %13728 = vmatpush3.bf16.msra.mxu1 %v18411_v60  ;;  %v19495_v60 = vand.u32 4294901760, %v18507_v22 }
 0x8c6   :  { %13730 = vmatprep.subr.bf16.mxu1 %v18418_v36 }
 0x8c7   :  { %v8626_v18 = vsub.f32 %v18507_v22, %v19495_v60  ;;  %v8521_v60 = vsub.f32 %v18522_v62, %v19501_v15 }
 0x8c9   :  { %13732 = vmatpush3.bf16.msra.mxu1 %v18418_v36  ;;  %v19494_v36 = vand.u32 4294901760, %v18515_v47 }
 0x8ca   :  { %13734 = vmatprep.subr.bf16.mxu1 %v18420_v3 }
 0x8cb   :  { %v8633_v17 = vsub.f32 %v18515_v47, %v19494_v36 }
 0x8cd   :  { %13736 = vmatpush3.bf16.msra.mxu1 %v18420_v3 }
 0x8ce   :  { %13738 = vmatprep.subr.bf16.mxu1 %v18422_v48 }
 0x8d1   :  { %13740 = vmatpush3.bf16.msra.mxu1 %v18422_v48 }
 0x8d2   :  { %13742 = vmatprep.subr.bf16.mxu1 %v18424_v38 }
 0x8d5   :  { %13744 = vmatpush3.bf16.msra.mxu1 %v18424_v38  ;;  %v8619_v38 = vsub.f32 %v18475_v45, %v19502_v25  ;;  %v8522_v25 = vand.u32 4294901760, %v8521_v60  ;;  %v18749_v60 = vld [vmem:[%s19112_s6 + $0x60] sm:$0xff] }
 0x8d6   :  { %13746 = vmatprep.subr.bf16.mxu1 %v18247_v50 }
 0x8d7   :  { %v8620_v6 = vand.u32 4294901760, %v8619_v38  ;;  %v8634_v38 = vand.u32 4294901760, %v8633_v17  ;;  %v19511_v17 = vand.u32 4294901760, %v18539_v9 }
 0x8d8   :  { %12588 = vmatmul.mubr.f32.vlgmr.msra.gmra.mrb[32].mxu1 %v18230_v58 }
 0x8d9   :  { %13748 = vmatpush3.bf16.msra.mxu1 %v18247_v50  ;;  %12622 = vmatprep.mubr.f32.mxu1 %v18219_v41  ;;  %v19505_v41 = vand.u32 4294901760, %v18469_v24  ;;  %v19504_v50 = vand.u32 4294901760, %v18471_v54  ;;  %v8535_v35 = vsub.f32 %v18539_v9, %v19511_v17 }
 0x8da   :  { %13750 = vmatprep.subr.bf16.mxu1 %v18267_v10 }
 0x8db   :  { %v8486_v3 = vsub.f32 %v18469_v24, %v19505_v41  ;;  %v8493_v48 = vsub.f32 %v18471_v54, %v19504_v50  ;;  %v18737_v41 = vsub.f32 %v18684_v16, %v19513_v23 }
 0x8dd   :  { %13752 = vmatpush3.bf16.msra.mxu1 %v18267_v10  ;;  %v19503_v10 = vand.u32 4294901760, %v18473_v44  ;;  %v8487_v52 = vand.u32 4294901760, %v8486_v3  ;;  %v8494_v32 = vand.u32 4294901760, %v8493_v48  ;;  %v8514_v3 = vsub.f32 %v18520_v61, %v19498_v26  ;;  %v18704_v26 = vld [vmem:[%s19112_s6 + $0x50] sm:$0xff]  ;;  %20104 = vst [vmem:[#allocation69_spill] sm:$0xff] %v18737_v41 }
 0x8de   :  { %13754 = vmatprep.subr.bf16.mxu1 %v18289_v19 }
 0x8e1   :  { %13756 = vmatpush3.bf16.msra.mxu1 %v18289_v19  ;;  %v8598_v19 = vsub.f32 %v18465_v51, %v19507_v37 }
 0x8e2   :  { %13758 = vmatprep.subr.bf16.mxu1 %v18309_v8 }
 0x8e3   :  { %v8599_v14 = vand.u32 4294901760, %v8598_v19  ;;  %v18689_v19 = vld [vmem:[%s19112_s6 + $0xd8] sm:$0xff] }
 0x8e5   :  { %13760 = vmatpush3.bf16.msra.mxu1 %v18309_v8  ;;  %v19496_v8 = vand.u32 4294901760, %v18481_v55  ;;  %v13809_v48 = vpack.c.bf16 %v8606_v31, %v8599_v14  ;;  %v8640_v14 = vsub.f32 %v18528_v34, %v19499_v0  ;;  %v19510_v0 = vand.u32 4294901760, %v18561_v42 }
 0x8e6   :  { %13762 = vmatprep.subr.bf16.mxu1 %v18329_v12 }
 0x8e7   :  { %v8507_v29 = vsub.f32 %v18481_v55, %v19496_v8  ;;  %v13811_v8 = vpack.c.bf16 %v8494_v32, %v8487_v52  ;;  %v18722_v52 = vld [vmem:[%s19112_s6 + $0xe0] sm:$0xff]  ;;  %v18727_v32 = vld [vmem:[%s19112_s6 + $0xe8] sm:$0xff]  ;;  %v8654_v37 = vsub.f32 %v18561_v42, %v19510_v0 }
 0x8e9   :  { %13764 = vmatpush3.bf16.msra.mxu1 %v18329_v12  ;;  %v8612_v12 = vsub.f32 %v18473_v44, %v19503_v10  ;;  %v8508_v36 = vand.u32 4294901760, %v8507_v29  ;;  %v19508_v29 = vand.u32 4294901760, %v18689_v19  ;;  %v19514_v10 = vand.u32 4294901760, %v18704_v26 }
 0x8ea   :  { %13766 = vmatprep.subr.bf16.mxu1 %v18349_v11  ;;  %v8655_v17 = vand.u32 4294901760, %v8654_v37 }
 0x8eb   :  { %v8613_v2 = vand.u32 4294901760, %v8612_v12  ;;  %v8627_v12 = vand.u32 4294901760, %v8626_v18  ;;  %v19509_v18 = vand.u32 4294901760, %v18536_v5 }
 0x8ed   :  { %13768 = vmatpush3.bf16.msra.mxu1 %v18349_v11  ;;  %v19500_v11 = vand.u32 4294901760, %v18533_v63  ;;  %v13813_v30 = vpack.c.bf16 %v8620_v6, %v8613_v2  ;;  %v13815_v2 = vpack.c.bf16 %v8508_v36, %v8501_v39  ;;  %v8515_v6 = vand.u32 4294901760, %v8514_v3  ;;  %v18754_v3 = vld [vmem:[%s19112_s6 + $0x68] sm:$0xff] }
 0x8ee   :  { %13770 = vmatprep.subr.bf16.mxu1 %v18362_v21  ;;  %v13817_v15 = vpack.c.bf16 %v8634_v38, %v8627_v12  ;;  %v18742_v36 = vsub.f32 %v18689_v19, %v19508_v29  ;;  %v19518_v39 = vand.u32 4294901760, %v18722_v52  ;;  %v8528_v38 = vsub.f32 %v18536_v5, %v19509_v18 }
 0x8ef   :  { %v8647_v31 = vsub.f32 %v18533_v63, %v19500_v11  ;;  %v19512_v11 = vand.u32 4294901760, %v18563_v57  ;;  %v18774_v18 = vsub.f32 %v18704_v26, %v19514_v10  ;;  %v20109_v37 = vand.u32 4294901760, %v18754_v3 }
 0x8f0   :  { %v8529_v0 = vand.u32 4294901760, %v8528_v38 }
 0x8f1   :  { %13772 = vmatpush3.bf16.msra.mxu1 %v18362_v21  ;;  %v18709_v21 = vld [vmem:[%s19112_s6 + $0x58] sm:$0xff]  ;;  %v8648_v12 = vand.u32 4294901760, %v8647_v31  ;;  %v8661_v29 = vsub.f32 %v18563_v57, %v19512_v11  ;;  %v20106_v11 = vand.u32 4294901760, %v18567_v56  ;;  %v20107_v57 = vand.u32 4294901760, %v18571_v43 }
 0x8f2   :  { %13774 = vmatprep.subr.bf16.mxu1 %v18378_v28  ;;  %v19515_v50 = vand.u32 4294901760, %v18709_v21 }
 0x8f3   :  { %v8542_v23 = vsub.f32 %v18567_v56, %v20106_v11  ;;  %v20110_v11 = vand.u32 4294901760, %v18737_v41 }
 0x8f5   :  { %13776 = vmatpush3.bf16.msra.mxu1 %v18378_v28  ;;  %v19521_v28 = vand.u32 4294901760, %v18727_v32 }
 0x8f6   :  { %13810 = vmatprep.subr.bf16.mxu1 %v13809_v48  ;;  %v8641_v48 = vand.u32 4294901760, %v8640_v14  ;;  %v8536_v14 = vand.u32 4294901760, %v8535_v35  ;;  %v18811_v35 = vsub.f32 %v18754_v3, %v20109_v37  ;;  %v20112_v37 = vand.u32 4294901760, %v18774_v18 }
 0x8f7   :  { %v18793_v10 = vsub.f32 %v18727_v32, %v19521_v28  ;;  %v8543_v28 = vand.u32 4294901760, %v8542_v23 }
 0x8f8   :  { %12623 = vmatmul.mubr.f32.vlgmr.msra.gmra.mrb[32].mxu1 %v18230_v58  ;;  %v18779_v58 = vsub.f32 %v18709_v21, %v19515_v50  ;;  %v13819_v50 = vpack.c.bf16 %v8522_v25, %v8515_v6  ;;  %v13821_v31 = vpack.c.bf16 %v8648_v12, %v8641_v48  ;;  %v20108_v25 = vand.u32 4294901760, %v18749_v60 }
 0x8f9   :  { %13812 = vmatpush3.bf16.msra.mxu1 %v13811_v8  ;;  %v18788_v8 = vsub.f32 %v18722_v52, %v19518_v39  ;;  %v8549_v39 = vsub.f32 %v18571_v43, %v20107_v57  ;;  %v8668_v57 = vsub.f32 %v18737_v41, %v20110_v11  ;;  %v13823_v38 = vpack.c.bf16 %v8536_v14, %v8529_v0 }
 0x8fa   :  { %13814 = vmatprep.subr.bf16.mxu1 %v13813_v30  ;;  %v8662_v30 = vand.u32 4294901760, %v8661_v29  ;;  %v18806_v6 = vsub.f32 %v18749_v60, %v20108_v25  ;;  %v20111_v29 = vand.u32 4294901760, %v18742_v36  ;;  %v20113_v43 = vand.u32 4294901760, %v18779_v58 }
 0x8fb   :  { %20105 = vst [vmem:[#allocation41_spill] sm:$0xff] %v18788_v8  ;;  %v8550_v42 = vand.u32 4294901760, %v8549_v39  ;;  %v8669_v48 = vand.u32 4294901760, %v8668_v57  ;;  %v20114_v0 = vand.u32 4294901760, %v18788_v8 }
 0x8fc   :  { %v13825_v25 = vpack.c.bf16 %v8662_v30, %v8655_v17  ;;  %v8563_v11 = vsub.f32 %v18779_v58, %v20113_v43  ;;  %v19529_v41 = vand.u32 4294901760, %v18806_v6 }
 0x8fd   :  { %13816 = vmatpush3.bf16.msra.mxu1 %v13815_v2  ;;  %v8675_v2 = vsub.f32 %v18742_v36, %v20111_v29  ;;  %v19528_v29 = vand.u32 4294901760, %v18811_v35  ;;  %v8682_v23 = vsub.f32 %v18788_v8, %v20114_v0  ;;  %v13827_v39 = vpack.c.bf16 %v8550_v42, %v8543_v28 }
 0x8fe   :  { %13818 = vmatprep.subr.bf16.mxu1 %v13817_v15  ;;  %v8556_v15 = vsub.f32 %v18774_v18, %v20112_v37  ;;  %v8564_v30 = vand.u32 4294901760, %v8563_v11  ;;  %v8570_v43 = vsub.f32 %v18806_v6, %v19529_v41 }
 0x8ff   :  { %v8676_v12 = vand.u32 4294901760, %v8675_v2  ;;  %v8683_v2 = vand.u32 4294901760, %v8682_v23 }
 0x900   :  { %v8557_v14 = vand.u32 4294901760, %v8556_v15  ;;  %v8571_v8 = vand.u32 4294901760, %v8570_v43  ;;  %v20117_v15 = vand.u32 4294901760, %v18689_v19  ;;  %v20120_v19 = vand.u32 4294901760, %v18722_v52 }
 0x901   :  { %13820 = vmatpush3.bf16.msra.mxu1 %v13819_v50  ;;  %v20115_v50 = vand.u32 4294901760, %v18793_v10  ;;  %v13829_v57 = vpack.c.bf16 %v8676_v12, %v8669_v48  ;;  %v8346_v48 = vld [vmem:[%s19112_s6 + $0xf0] sm:$0xff]  ;;  %v8347_v12 = vld [vmem:[%s19112_s6 + $0xf8] sm:$0xff] }
 0x902   :  { %13822 = vmatprep.subr.bf16.mxu1 %v13821_v31  ;;  %v8577_v31 = vsub.f32 %v18811_v35, %v19528_v29  ;;  %v13831_v0 = vpack.c.bf16 %v8564_v30, %v8557_v14  ;;  %v8446_v14 = vand.u32 4294901760, %v8346_v48  ;;  %v8449_v30 = vand.u32 4294901760, %v8347_v12 }
 0x903   :  { %v8689_v17 = vsub.f32 %v18793_v10, %v20115_v50 }
 0x904   :  { %v8578_v50 = vand.u32 4294901760, %v8577_v31  ;;  %v18872_v31 = vsub.f32 %v8346_v48, %v8446_v14 }
 0x905   :  { %13824 = vmatpush3.bf16.msra.mxu1 %v13823_v38  ;;  %v8690_v37 = vand.u32 4294901760, %v8689_v17  ;;  %v20116_v38 = vand.u32 4294901760, %v18684_v16  ;;  %v8330_v16 = vld [vmem:[%s19112_s6 + $0x70] sm:$0xff]  ;;  %v20121_v17 = vand.u32 4294901760, %v18727_v32  ;;  %v20122_v32 = vand.u32 4294901760, %v18749_v60 }
 0x906   :  { %13826 = vmatprep.subr.bf16.mxu1 %v13825_v25  ;;  %v13835_v28 = vpack.c.bf16 %v8578_v50, %v8571_v8  ;;  %v20118_v25 = vand.u32 4294901760, %v18704_v26  ;;  %v20119_v8 = vand.u32 4294901760, %v18709_v21  ;;  %v8331_v26 = vld [vmem:[%s19112_s6 + $0x78] sm:$0xff]  ;;  %v8398_v43 = vand.u32 4294901760, %v8330_v16 }
 0x907   :  { %v13833_v42 = vpack.c.bf16 %v8690_v37, %v8683_v2  ;;  %v18845_v11 = vpack.c.bf16 %v20117_v15, %v20116_v38  ;;  %v8401_v21 = vand.u32 4294901760, %v8331_v26  ;;  %v20123_v2 = vand.u32 4294901760, %v18754_v3 }
 0x908   :  { %v18857_v23 = vpack.c.bf16 %v20119_v8, %v20118_v25  ;;  %v18877_v52 = vsub.f32 %v8330_v16, %v8398_v43  ;;  %v18888_v50 = vpack.c.bf16 %v8449_v30, %v8446_v14  ;;  %v13841_v8 = vpack.c.bf16 %v18467_v53, %v18465_v51 }
 0x909   :  { %13828 = vmatpush3.bf16.msra.mxu1 %v13827_v39  ;;  %v18866_v39 = vpack.c.bf16 %v20121_v17, %v20120_v19  ;;  %13798 = vmatprep.subr.bf16.mxu0 %v18845_v11  ;;  %v18883_v37 = vpack.c.bf16 %v20123_v2, %v20122_v32 }
 0x90a   :  { %13830 = vmatprep.subr.bf16.mxu1 %v13829_v57  ;;  %v18874_v57 = vsub.f32 %v8347_v12, %v8449_v30  ;;  %13800 = vmatpush3.bf16.msra.mxu0 %v18857_v23  ;;  %v8583_v38 = vand.u32 4294901760, %v18877_v52  ;;  %v18898_v12 = vpack.c.bf16 %v8401_v21, %v8398_v43  ;;  %v13843_v43 = vpack.c.bf16 %v18471_v54, %v18469_v24 }
 0x90b   :  { %13802 = vmatprep.subr.bf16.mxu0 %v18866_v39 }
 0x90c   :  { %v8584_v48 = vsub.f32 %v18877_v52, %v8583_v38 }
 0x90d   :  { %13832 = vmatpush3.bf16.msra.mxu1 %v13831_v0  ;;  %v18885_v0 = vsub.f32 %v8331_v26, %v8401_v21 }
 0x90e   :  { %13834 = vmatprep.subr.bf16.mxu1 %v13833_v42  ;;  %v8695_v42 = vand.u32 4294901760, %v18872_v31  ;;  %13804 = vmatpush3.bf16.msra.mxu0 %v18883_v37  ;;  %v8585_v17 = vand.u32 4294901760, %v8584_v48  ;;  %v8315_v48 = vld [vmem:[%s19108_s2 + $0x8] sm:$0xff] }
 0x90f   :  { %v8590_v15 = vand.u32 4294901760, %v18885_v0  ;;  %13806 = vmatprep.subr.bf16.mxu0 %v18888_v50 }
 0x910   :  { %v8696_v60 = vsub.f32 %v18872_v31, %v8695_v42 }
 0x911   :  { %13836 = vmatpush3.bf16.msra.mxu1 %v13835_v28  ;;  %v8702_v28 = vand.u32 4294901760, %v18874_v57  ;;  %v8591_v25 = vsub.f32 %v18885_v0, %v8590_v15  ;;  %v18912_v2 = vpack.c.bf16 %v8590_v15, %v8583_v38 }
 0x912   :  { %v8697_v16 = vand.u32 4294901760, %v8696_v60  ;;  %13808 = vmatpush3.bf16.msra.mxu0 %v18898_v12  ;;  %v8314_v60 = vld [vmem:[%s19108_s2] sm:$0xff] }
 0x913   :  { %v8703_v3 = vsub.f32 %v18874_v57, %v8702_v28  ;;  %v8592_v14 = vand.u32 4294901760, %v8591_v25  ;;  %13842 = vmatprep.subr.bf16.mxu0 %v13841_v8  ;;  %v18910_v32 = vpack.c.bf16 %v8702_v28, %v8695_v42  ;;  %v18925_v8 = vand.u32 4294901760, %v8315_v48 }
 0x915   :  { %v8704_v19 = vand.u32 4294901760, %v8703_v3  ;;  %v13839_v26 = vpack.c.bf16 %v8592_v14, %v8585_v17  ;;  %v18917_v3 = vand.u32 4294901760, %v8314_v60  ;;  %20124 = vst [vmem:[#allocation43_spill] sm:$0xff] %v18925_v8  ;;  %v18931_v15 = vsub.f32 %v8315_v48, %v18925_v8 }
 0x917   :  { %v13837_v30 = vpack.c.bf16 %v8704_v19, %v8697_v16  ;;  %v18923_v25 = vsub.f32 %v8314_v60, %v18917_v3  ;;  %v19533_v60 = vand.u32 4294901760, %v18931_v15 }
 0x919   :  { %13838 = vmatprep.subr.bf16.mxu1 %v13837_v30  ;;  %v19530_v38 = vand.u32 4294901760, %v18923_v25  ;;  %v8475_v41 = vsub.f32 %v18931_v15, %v19533_v60  ;;  %v13847_v60 = vpack.c.bf16 %v18481_v55, %v18478_v7 }
 0x91a   :  { %13840 = vmatpush3.bf16.msra.mxu1 %v13839_v26 }
 0x91b   :  { %13874 = vmatprep.subr.bf16.mxu1 %v18497_v13  ;;  %v8460_v26 = vsub.f32 %v18923_v25, %v19530_v38  ;;  %v13845_v38 = vpack.c.bf16 %v18475_v45, %v18473_v44 }
 0x9cb   :  { %v12624_v16 = vpop.f32.mrb[32].mxu1 }
 0x9cc   :  { %v18927_v42 = vand.u32 4294901760, %v12624_v16  ;;  %v8304_v28 = vpop.f32.mrb[33].mxu1 }
 0x9cd   :  { %v18933_v19 = vand.u32 4294901760, %v8304_v28 }
 0x9ce   :  { %v18936_v17 = vsub.f32 %v12624_v16, %v18927_v42 }
 0x9cf   :  { %v8452_v14 = vsub.f32 %v8304_v28, %v18933_v19  ;;  %8707 = vmatprep.mubr.f32.mxu1 %v18933_v19  ;;  %v8461_v28 = vand.u32 4294901760, %v8460_v26 }
 0x9d0   :  { %v8468_v30 = vand.u32 4294901760, %v18936_v17  ;;  %8709 = vmatmul.mubr.f32.vlgmr.msra.gmra.mrb[34].mxu1 %v18917_v3 }
 0x9d1   :  { %13876 = vmatpush3.bf16.msra.mxu1 %v18509_v46  ;;  %8714 = vmatprep.mubr.f32.mxu1 %v18927_v42  ;;  %v8453_v48 = vand.u32 4294901760, %v8452_v14 }
 0x9d2   :  { %13878 = vmatprep.subr.bf16.mxu1 %v18517_v33  ;;  %v8469_v29 = vsub.f32 %v18936_v17, %v8468_v30 }
 0x9d3   :  { %v8454_v16 = vsub.f32 %v8452_v14, %v8453_v48 }
 0x9d4   :  { %8716 = vmatmul.mubr.f32.gmra.mrb[36].mxu1 %v18925_v8  ;;  %v8470_v26 = vand.u32 4294901760, %v8469_v29  ;;  %v8476_v8 = vand.u32 4294901760, %v8475_v41  ;;  %v13851_v41 = vpack.c.bf16 %v18522_v62, %v18520_v61  ;;  %v13853_v29 = vpack.c.bf16 %v18533_v63, %v18528_v34 }
 0x9d5   :  { %13880 = vmatpush3.bf16.msra.mxu1 %v18530_v59  ;;  %8967 = vmatprep.mubr.f32.mxu1 %v8453_v48  ;;  %v8455_v21 = vand.u32 4294901760, %v8454_v16  ;;  %v13849_v48 = vpack.c.bf16 %v18515_v47, %v18507_v22  ;;  %v20128_v16 = vld [vmem:[#allocation69_spill] sm:$0xff] }
 0x9d6   :  { %13882 = vmatprep.subr.bf16.mxu1 %v18548_v27 }
 0x9d7   :  { %8456 = vmatprep.mubr.f32.mxu0 %v8455_v21  ;;  %v20125_v21 = vld [vmem:[#allocation103_spill] sm:$0xff] }
 0x9d8   :  { %8462 = vmatmul.mubr.f32.vlgmr.msra.gmra.mrb[48].mxu0 %v8461_v28  ;;  %v13861_v28 = vpack.c.bf16 %v18742_v36, %v20128_v16 }
 0x9d9   :  { %13844 = vmatpush3.bf16.msra.mxu0 %v13843_v43  ;;  %13884 = vmatpush3.bf16.msra.mxu1 %v18558_v40  ;;  %v13855_v43 = vpack.c.bf16 %v18539_v9, %v18536_v5 }
 0x9da   :  { %8471 = vmatprep.mubr.f32.mxu0 %v8470_v26  ;;  %13846 = vmatprep.subr.bf16.mxu0 %v13845_v38  ;;  %v13863_v26 = vpack.c.bf16 %v18779_v58, %v18774_v18 }
 0x9db   :  { %13886 = vmatprep.subr.bf16.mxu1 %v18569_v1 }
 0x9dc   :  { %8477 = vmatmul.mubr.f32.gmra.mrb[50].mxu0 %v8476_v8  ;;  %v20126_v8 = vld [vmem:[#allocation104_spill] sm:$0xff] }
 0x9dd   :  { %13848 = vmatpush3.bf16.msra.mxu0 %v13847_v60  ;;  %13888 = vmatpush3.bf16.msra.mxu1 %v18574_v20  ;;  %v13857_v38 = vpack.c.bf16 %v20126_v8, %v20125_v21 }
 0x9de   :  { %8851 = vmatprep.mubr.f32.mxu0 %v8452_v14  ;;  %13850 = vmatprep.subr.bf16.mxu0 %v13849_v48  ;;  %v20127_v14 = vld [vmem:[#allocation105_spill] sm:$0xff] }
 0x9df   :  { %13890 = vmatprep.subr.bf16.mxu1 %v18583_v49  ;;  %v13859_v60 = vpack.c.bf16 %v20127_v14, %v18567_v56  ;;  %v20129_v48 = vld [vmem:[#allocation41_spill] sm:$0xff] }
 0x9e1   :  { %13852 = vmatpush3.bf16.msra.mxu0 %v13851_v41  ;;  %13892 = vmatpush3.bf16.msra.mxu1 %v18587_v4  ;;  %v13865_v41 = vpack.c.bf16 %v18793_v10, %v20129_v48 }
 0x9e2   :  { %13854 = vmatprep.subr.bf16.mxu0 %v13853_v29  ;;  %13894 = vmatprep.subr.bf16.mxu1 %v18845_v11  ;;  %v13867_v29 = vpack.c.bf16 %v18811_v35, %v18806_v6 }
 0x9e5   :  { %13856 = vmatpush3.bf16.msra.mxu0 %v13855_v43  ;;  %13896 = vmatpush3.bf16.msra.mxu1 %v18857_v23  ;;  %v20130_v43 = vand.u32 4294901760, %v18923_v25 }
 0x9e6   :  { %13858 = vmatprep.subr.bf16.mxu0 %v13857_v38  ;;  %13898 = vmatprep.subr.bf16.mxu1 %v18866_v39  ;;  %v20131_v38 = vpack.c.bf16 %v18874_v57, %v18872_v31  ;;  %v20137_v31 = vand.u32 4294901760, %v18471_v54  ;;  %v20141_v54 = vand.u32 4294901760, %v18481_v55  ;;  %v20145_v55 = vand.u32 4294901760, %v18522_v62 }
 0x9e7   :  { %v20151_v62 = vand.u32 4294901760, %v20126_v8 }
 0x9e9   :  { %13860 = vmatpush3.bf16.msra.mxu0 %v13859_v60  ;;  %13900 = vmatpush3.bf16.msra.mxu1 %v18883_v37  ;;  %v20132_v60 = vand.u32 4294901760, %v18465_v51  ;;  %v20138_v51 = vand.u32 4294901760, %v18473_v44  ;;  %v20142_v44 = vand.u32 4294901760, %v18507_v22  ;;  %v20146_v22 = vand.u32 4294901760, %v18528_v34 }
 0x9ea   :  { %13862 = vmatprep.subr.bf16.mxu0 %v13861_v28  ;;  %13902 = vmatprep.subr.bf16.mxu1 %v18888_v50  ;;  %v20133_v28 = vand.u32 4294901760, %v18467_v53  ;;  %v20139_v53 = vand.u32 4294901760, %v18475_v45  ;;  %v20143_v45 = vand.u32 4294901760, %v18515_v47  ;;  %v20147_v47 = vand.u32 4294901760, %v18533_v63 }
 0x9eb   :  { %v20152_v34 = vand.u32 4294901760, %v18567_v56  ;;  %v20153_v63 = vand.u32 4294901760, %v20127_v14  ;;  %v20158_v56 = vand.u32 4294901760, %v20129_v48 }
 0x9ed   :  { %13864 = vmatpush3.bf16.msra.mxu0 %v13863_v26  ;;  %13904 = vmatpush3.bf16.msra.mxu1 %v18898_v12  ;;  %v13905_v26 = vpack.c.bf16 %v20133_v28, %v20132_v60 }
 0x9ee   :  { %13866 = vmatprep.subr.bf16.mxu0 %v13865_v41  ;;  %13938 = vmatprep.subr.bf16.mxu1 %v18497_v13  ;;  %v20134_v13 = vand.u32 4294901760, %v18931_v15  ;;  %v20135_v41 = vpack.c.bf16 %v18885_v0, %v18877_v52  ;;  %v20149_v0 = vand.u32 4294901760, %v18539_v9  ;;  %v20155_v9 = vand.u32 4294901760, %v18742_v36 }
 0x9ef   :  { %v20160_v36 = vand.u32 4294901760, %v18806_v6 }
 0x9f0   :  { %8971 = vmatmul.mubr.f32.vlgmr.msra.gmra.mrb[38].mxu1 %v20130_v43 }
 0x9f1   :  { %13868 = vmatpush3.bf16.msra.mxu0 %v13867_v29  ;;  %8978 = vmatprep.mubr.f32.mxu1 %v8468_v30 }
 0x9f2   :  { %13940 = vmatpush3.bf16.msra.mxu1 %v18509_v46  ;;  %13870 = vmatprep.subr.bf16.mxu0 %v20131_v38  ;;  %v20136_v46 = vand.u32 4294901760, %v18469_v24  ;;  %v20140_v24 = vand.u32 4294901760, %v18478_v7  ;;  %v20144_v7 = vand.u32 4294901760, %v18520_v61  ;;  %v20150_v61 = vand.u32 4294901760, %v20125_v21 }
 0x9f3   :  { %13942 = vmatprep.subr.bf16.mxu1 %v18517_v33  ;;  %v13909_v33 = vpack.c.bf16 %v20139_v53, %v20138_v51 }
 0x9f4   :  { %8982 = vmatmul.mubr.f32.gmra.mrb[40].mxu1 %v20134_v13  ;;  %v13907_v57 = vpack.c.bf16 %v20137_v31, %v20136_v46  ;;  %v13911_v52 = vpack.c.bf16 %v20141_v54, %v20140_v24 }
 0x9f5   :  { %13872 = vmatpush3.bf16.msra.mxu0 %v20135_v41  ;;  %9259 = vmatprep.mubr.f32.mxu1 %v18933_v19 }
 0x9f6   :  { %13944 = vmatpush3.bf16.msra.mxu1 %v18530_v59  ;;  %13906 = vmatprep.subr.bf16.mxu0 %v13905_v26  ;;  %v13913_v59 = vpack.c.bf16 %v20143_v45, %v20142_v44 }
 0x9f7   :  { %13946 = vmatprep.subr.bf16.mxu1 %v18548_v27  ;;  %v13915_v27 = vpack.c.bf16 %v20145_v55, %v20144_v7 }
 0x9f8   :  { %8854 = vmatmul.mubr.f32.vlgmr.msra.gmra.mrb[52].mxu0 %v18923_v25 }
 0x9f9   :  { %8860 = vmatprep.mubr.f32.mxu0 %v18936_v17  ;;  %13908 = vmatpush3.bf16.msra.mxu0 %v13907_v57 }
 0x9fa   :  { %13948 = vmatpush3.bf16.msra.mxu1 %v18558_v40  ;;  %13910 = vmatprep.subr.bf16.mxu0 %v13909_v33  ;;  %v13917_v40 = vpack.c.bf16 %v20147_v47, %v20146_v22 }
 0x9fb   :  { %13950 = vmatprep.subr.bf16.mxu1 %v18569_v1  ;;  %v20148_v1 = vand.u32 4294901760, %v18536_v5  ;;  %v20154_v5 = vand.u32 4294901760, %v20128_v16 }
 0x9fc   :  { %8863 = vmatmul.mubr.f32.gmra.mrb[54].mxu0 %v18931_v15  ;;  %v20156_v15 = vand.u32 4294901760, %v18774_v18 }
 0x9fd   :  { %13912 = vmatpush3.bf16.msra.mxu0 %v13911_v52  ;;  %9148 = vmatprep.mubr.f32.mxu0 %v18933_v19  ;;  %v13919_v25 = vpack.c.bf16 %v20149_v0, %v20148_v1 }
 0x9fe   :  { %13952 = vmatpush3.bf16.msra.mxu1 %v18574_v20  ;;  %13914 = vmatprep.subr.bf16.mxu0 %v13913_v59  ;;  %v13921_v20 = vpack.c.bf16 %v20151_v62, %v20150_v61 }
 0x9ff   :  { %13954 = vmatprep.subr.bf16.mxu1 %v18583_v49  ;;  %v13923_v49 = vpack.c.bf16 %v20153_v63, %v20152_v34 }
 0xa01   :  { %13916 = vmatpush3.bf16.msra.mxu0 %v13915_v27 }
 0xa02   :  { %13956 = vmatpush3.bf16.msra.mxu1 %v18587_v4  ;;  %13918 = vmatprep.subr.bf16.mxu0 %v13917_v40  ;;  %v13925_v4 = vpack.c.bf16 %v20155_v9, %v20154_v5 }
 0xa03   :  { %13958 = vmatprep.subr.bf16.mxu1 %v18845_v11  ;;  %v20157_v11 = vand.u32 4294901760, %v18779_v58 }
 0xa05   :  { %13920 = vmatpush3.bf16.msra.mxu0 %v13919_v25  ;;  %v13927_v19 = vpack.c.bf16 %v20157_v11, %v20156_v15 }
 0xa06   :  { %13960 = vmatpush3.bf16.msra.mxu1 %v18857_v23  ;;  %13922 = vmatprep.subr.bf16.mxu0 %v13921_v20  ;;  %v20159_v23 = vand.u32 4294901760, %v18793_v10  ;;  %v20162_v10 = vld [vmem:[#allocation43_spill] sm:$0xff] }
 0xa07   :  { %13962 = vmatprep.subr.bf16.mxu1 %v18866_v39  ;;  %v20161_v39 = vand.u32 4294901760, %v18811_v35 }
 0xa08   :  { %v13929_v17 = vpack.c.bf16 %v20159_v23, %v20158_v56 }
 0xa09   :  { %13924 = vmatpush3.bf16.msra.mxu0 %v13923_v49  ;;  %v13931_v30 = vpack.c.bf16 %v20161_v39, %v20160_v36 }
 0xa0a   :  { %13964 = vmatpush3.bf16.msra.mxu1 %v18883_v37  ;;  %13926 = vmatprep.subr.bf16.mxu0 %v13925_v4 }
 0xa0b   :  { %13966 = vmatprep.subr.bf16.mxu1 %v18888_v50 }
 0xa0d   :  { %13928 = vmatpush3.bf16.msra.mxu0 %v13927_v19 }
 0xa0e   :  { %13968 = vmatpush3.bf16.msra.mxu1 %v18898_v12  ;;  %13930 = vmatprep.subr.bf16.mxu0 %v13929_v17 }
 0xa11   :  { %9261 = vmatmul.mubr.f32.vlgmr.msra.gmra.mrb[42].mxu1 %v18917_v3  ;;  %13932 = vmatpush3.bf16.msra.mxu0 %v13931_v30 }
 0xa12   :  { %9266 = vmatprep.mubr.f32.mxu1 %v18927_v42  ;;  %13934 = vmatprep.subr.bf16.mxu0 %v18910_v32  ;;  %v9438_v32 = vld [vmem:[%s19113_s7] ss:$0 sm:$0xff]  ;;  %s14563_s7 = smov [#allocation5]  }
 0xa13   :  { %s9282_s22 = sshll.u32 %s14563_s7, 4  ;;  %s9283_s22 = int_to_ptr.vmem [resolvable:$true] %s9282_s22 }
 0xa14   :  { %s14525_s5 = scalar_lea.vmem %s9283_s22, 256  ;;  %p14530_p9 = scmp.lt.s32.totalorder %s9283_s22, %s9283_s22 }
 0xa15   :  { %13936 = vmatpush3.bf16.msra.mxu0 %v18912_v2  ;;  %9268 = vmatmul.mubr.f32.gmra.mrb[44].mxu1 %v20162_v10  ;;  %p14526_p8 = scmp.ne.s32.totalorder %s9283_s22, %s14525_s5  ;;  %p14531_p10 = scmp.lt.s32.totalorder %s14525_s5, %s14525_s5 }
 0xa17   :  { %p14532_p11 = por %p14531_p10, %p14530_p9 }
 0xa18   :  { %9150 = vmatmul.mubr.f32.vlgmr.msra.gmra.mrb[56].mxu0 %v18917_v3 }
 0xa19   :  { %9155 = vmatprep.mubr.f32.mxu0 %v18927_v42  ;;  %p14533_p12 = pnand %p14532_p11, %p14526_p8 }
 0xa1c   :  { %9157 = vmatmul.mubr.f32.gmra.mrb[58].mxu0 %v20162_v10 }
 0xaa3   :  { %v10577_v18 = vpop.f32.mrb[34].mxu1 }
 0xaa4   :  { %v10578_v58 = vpop.f32.mrb[35].mxu1 }
 0xaa5   :  { %v10579_v6 = vadd.f32 %v10578_v58, %v10577_v18 }
 0xaa7   :  { %v10580_v35 = vpop.f32.mrb[36].mxu1 }
 0xaa8   :  { %v10581_v37 = vpop.f32.mrb[37].mxu1 }
 0xaa9   :  { %v10582_v50 = vadd.f32 %v10581_v37, %v10580_v35 }
 0xaab   :  { %v10539_v12 = vpop.f32.mrb[48].mxu0 }
 0xaac   :  { %v10540_v2 = vpop.f32.mrb[49].mxu0 }
 0xaad   :  { %v10541_v21 = vadd.f32 %v10540_v2, %v10539_v12 }
 0xaaf   :  { %v8464_v8 = vadd.f32 %v10541_v21, %v9438_v32  ;;  %v10542_v14 = vpop.f32.mrb[50].mxu0 }
 0xab0   :  { %v10543_v3 = vpop.f32.mrb[51].mxu0 }
 0xab1   :  { %v8711_v16 = vadd.f32 %v10579_v6, %v8464_v8  ;;  %v10544_v42 = vadd.f32 %v10543_v3, %v10542_v14 }
 0xab3   :  { %v8479_v48 = vadd.f32 %v10544_v42, %v9438_v32 }
 0xab5   :  { %v8718_v29 = vadd.f32 %v10582_v50, %v8479_v48 }
 0xac3   :  { %v10653_v43 = vpop.f32.mrb[38].mxu1 }
 0xac4   :  { %v10654_v38 = vpop.f32.mrb[39].mxu1 }
 0xac5   :  { %v10655_v60 = vadd.f32 %v10654_v38, %v10653_v43 }
 0xac7   :  { %v10656_v28 = vpop.f32.mrb[40].mxu1 }
 0xac8   :  { %v10657_v26 = vpop.f32.mrb[41].mxu1 }
 0xac9   :  { %v10658_v13 = vadd.f32 %v10657_v26, %v10656_v28 }
 0xacb   :  { %v10615_v41 = vpop.f32.mrb[52].mxu0 }
 0xacc   :  { %v10616_v46 = vpop.f32.mrb[53].mxu0 }
 0xacd   :  { %v10617_v31 = vadd.f32 %v10616_v46, %v10615_v41 }
 0xacf   :  { %v8856_v57 = vadd.f32 %v10617_v31, %v8711_v16  ;;  %v10618_v51 = vpop.f32.mrb[54].mxu0 }
 0xad0   :  { %v10619_v53 = vpop.f32.mrb[55].mxu0 }
 0xad1   :  { %v8973_v33 = vadd.f32 %v10655_v60, %v8856_v57  ;;  %v10620_v24 = vadd.f32 %v10619_v53, %v10618_v51 }
 0xad3   :  { %v8865_v54 = vadd.f32 %v10620_v24, %v8718_v29 }
 0xad5   :  { %v8984_v52 = vadd.f32 %v10658_v13, %v8865_v54 }
 0xae4   :  { %v10729_v44 = vpop.f32.mrb[42].mxu1 }
 0xae5   :  { %v10730_v45 = vpop.f32.mrb[43].mxu1 }
 0xae6   :  { %v10731_v59 = vadd.f32 %v10730_v45, %v10729_v44 }
 0xae8   :  { %v10732_v7 = vpop.f32.mrb[44].mxu1 }
 0xae9   :  { %v10733_v55 = vpop.f32.mrb[45].mxu1 }
 0xaea   :  { %v10734_v27 = vadd.f32 %v10733_v55, %v10732_v7 }
 0xaeb   :  { %v10691_v22 = vpop.f32.mrb[56].mxu0 }
 0xaec   :  { %v10692_v47 = vpop.f32.mrb[57].mxu0 }
 0xaed   :  { %v10693_v40 = vadd.f32 %v10692_v47, %v10691_v22 }
 0xaef   :  { %v9152_v1 = vadd.f32 %v10693_v40, %v8973_v33  ;;  %v10694_v0 = vpop.f32.mrb[58].mxu0 }
 0xaf0   :  { %v10695_v25 = vpop.f32.mrb[59].mxu0 }
 0xaf1   :  { %v9263_v61 = vadd.f32 %v10731_v59, %v9152_v1  ;;  %v10696_v62 = vadd.f32 %v10695_v25, %v10694_v0 }
 0xaf3   :  { %v9273_v20 = vmax.f32 %v9263_v61, 0.0  ;;  %v9159_v34 = vadd.f32 %v10696_v62, %v8984_v52 }
 0xaf5   :  { %9275 = vst [vmem:[#allocation5] sm:$0xff] %v9273_v20  ;;  %v9270_v63 = vadd.f32 %v10734_v27, %v9159_v34 }
 0xaf7   :  { %v9274_v49 = vmax.f32 %v9270_v63, 0.0 }
 0xaf9   :  { %9276 = vst [vmem:[#allocation5 + $0x8] sm:$0xff] %v9274_v49 }
 0xafa   :  { %14536 = shalt.err (!%p14533_p12)
}
 0xafb   :  { %s14537_s24 = scalar_lea.hbm %s19114_s8, 256 }
 0xafc   :  { %p14538_p13 = scmp.ne.s32.totalorder %s19114_s8, %s14537_s24  ;;  %p14541_p0 = scmp.lt.u32.totalorder %s14537_s24, %s19114_s8 }
 0xafe   :  { %p14543_p1 = pnand %p14541_p0, %p14538_p13 }
 0xb00   :  { %14546 = shalt.err (!%p14543_p1)
}
 0xb01   :  { %9288 = dma.vmem_to_hbm [thread:$0]  %s9283_s22, 256, %s19114_s8, [#allocation4], %s14552_s15, %s14552_s15, %s14553_s16  }
 0xb02   :  { %14549 = dma.done.wait [#allocation4], 256  }
 0xb03   :  { %14550 = vsyncadd [#allocation4], 4294967040 }
 0xb04   :  { %9292 = vsyncpa [#allocation3], 1 }
 0xb05   :  { %9293 = vsyncpa [#allocation4], 1 }

</bundles_post_ra>
